<compile_context>
chip_gen: v6e
topology: v6e:2x2x1
jax: 0.10.0
libtpu: 0.0.40
codegen_flags: <defaults>
</compile_context>

<pallas_src>
import functools
import math

import jax
import jax.numpy as jnp
from jax.experimental import pallas as pl
from jax.experimental.pallas import tpu as pltpu

F32 = jnp.float32
_vmem = functools.partial(pl.BlockSpec, memory_space=pltpu.MemorySpace.VMEM)
# Actual per-kernel VMEM usage is well under 2 MiB; 16 MiB leaves headroom and
# stays inside the default scoped limits of v5e/v6e/v7x.
_COMPILER_PARAMS = pltpu.CompilerParams(vmem_limit_bytes=16 * 1024 * 1024)


def _cost(args, out_shapes):
    nbytes = 4 * (sum(int(a.size) for a in args)
                  + sum(math.prod(s.shape) for s in out_shapes))
    # Advisory only: rough flop count for the handful of tiny MXU matmuls.
    return pl.CostEstimate(flops=64 * nbytes, transcendentals=256,
                           bytes_accessed=nbytes)


# --------------------------------------------------------------------------
# In-kernel helpers
# --------------------------------------------------------------------------
def _dot(a, b):
    return jnp.dot(a, b, preferred_element_type=jnp.float32)


def _bn(y, g_ref, b_ref, gm_ref, relu=False):
    """Training-mode BatchNorm2d on a lane-dense (N*H, W*C) slab.

    gm_ref holds kron(ones(W,W), eye(C)) / (N*H*W); multiplying the (1, W*C)
    row of column sums by it yields the per-channel mean broadcast back to
    every (w, c) lane, so the stats stay on the MXU/VPU (no narrow reductions).
    """
    gm = gm_ref[...]
    mean = _dot(jnp.sum(y, axis=0, keepdims=True), gm)
    cen = y - mean
    var = _dot(jnp.sum(cen * cen, axis=0, keepdims=True), gm)
    out = cen * jax.lax.rsqrt(var + 1e-5) * g_ref[...] + b_ref[...]
    return jnp.maximum(out, 0.0) if relu else out


# --------------------------------------------------------------------------
# Fused residual-block kernel (optionally maxpool prologue / upsample epilogue)
# --------------------------------------------------------------------------
def _residual_kernel(*refs, pool, has_skip, upsample):
    o_ref = refs[-1]
    rs = list(refs[:-1])
    x = rs.pop(0)[...]

    if pool:  # fused MaxPool2d(2): exact 0/1 row / lane-group selection matmuls
        ph0, ph1, pw0, pw1 = [rs.pop(0) for _ in range(4)]
        r0, r1 = _dot(ph0[...], x), _dot(ph1[...], x)
        pw0v, pw1v = pw0[...], pw1[...]
        x = jnp.maximum(jnp.maximum(_dot(r0, pw0v), _dot(r0, pw1v)),
                        jnp.maximum(_dot(r1, pw0v), _dot(r1, pw1v)))

    (g1, b1, gm_in, w1, bc1, g2, b2, gm_h, sm, sp,
     bm, b0, bp, bc2, g3, b3, w3, bc3) = [rs.pop(0) for _ in range(18)]

    y = _bn(x, g1, b1, gm_in)
    y = _dot(y, w1[...]) + bc1[...]                       # conv1x1  C -> C/2
    y = _bn(y, g2, b2, gm_h)
    ym, yp = _dot(sm[...], y), _dot(sp[...], y)           # h-1 / h+1 rows (0-pad)
    y = (_dot(ym, bm[...]) + _dot(y, b0[...])             # conv3x3 as 3 banded
         + _dot(yp, bp[...]) + bc2[...])                  # weight matmuls
    y = _bn(y, g3, b3, gm_h)
    y = _dot(y, w3[...]) + bc3[...]                       # conv1x1  C/2 -> C

    if has_skip:                                          # 1x1 projection skip
        ws, bs = [rs.pop(0) for _ in range(2)]
        x = _dot(x, ws[...]) + bs[...]
    res = x + y

    if upsample:  # fused bilinear x2 upsample (align_corners=False) + up1 add
        uh, uw, up1 = [rs.pop(0) for _ in range(3)]
        res = up1[...] + _dot(_dot(uh[...], res), uw[...])

    o_ref[...] = res


# --------------------------------------------------------------------------
# Fused head kernel: convBnrelu -> drop conv -> out conv -> normalize / out_
# --------------------------------------------------------------------------
def _head_kernel(d_ref, x_ref, g_ref, b_ref, gm_ref, wc_ref, bc_ref,
                 wd_ref, bd_ref, wo_ref, bo_ref, k_ref, wb_ref, bb_ref,
                 normed_ref, y_ref):
    d = d_ref[...]
    c = _dot(d, wc_ref[...]) + bc_ref[...]                 # convBnrelu conv
    c = _bn(c, g_ref, b_ref, gm_ref, relu=True)            # BN + ReLU
    drop = _dot(c, wd_ref[...]) + bd_ref[...]              # drop conv1x1
    out = _dot(drop, wo_ref[...]) + bo_ref[...]            # out conv1x1
    # F.normalize(out, p=2, dim=channel):  out / max(||out||, 1e-12)
    n2 = _dot(out * out, k_ref[...])                       # per-pixel channel sum
    normed_ref[...] = out * jax.lax.rsqrt(jnp.maximum(n2, 1e-24))
    back = _dot(out, wb_ref[...]) + bb_ref[...]            # out_ conv1x1
    y_ref[...] = x_ref[...] + drop + back


# --------------------------------------------------------------------------
# Wrapper-side preprocessing of weights into lane-dense operator matrices
# --------------------------------------------------------------------------
def _row(vec, w):
    return jnp.tile(vec, w)[None, :].astype(F32)          # [w*C + c] -> vec[c]


def _group_mean_mat(w, c, count):
    return jnp.kron(jnp.ones((w, w), F32), jnp.eye(c, dtype=F32)) / float(count)


def _conv1_mats(p, w):
    return jnp.kron(jnp.eye(w, dtype=F32), p["w"]), _row(p["b"], w)


def _conv3_mats(p, w):
    wt = p["w"]                                            # (3, 3, Cin, Cout)
    mats = []
    for ky in range(3):
        acc = None
        for kx in range(3):
            m = jnp.kron(jnp.eye(w, k=-(kx - 1), dtype=F32), wt[ky, kx])
            acc = m if acc is None else acc + m
        mats.append(acc)
    return mats[0], mats[1], mats[2], _row(p["b"], w)


def _shift_h_mats(n, h):
    return (jnp.kron(jnp.eye(n, dtype=F32), jnp.eye(h, k=-1, dtype=F32)),
            jnp.kron(jnp.eye(n, dtype=F32), jnp.eye(h, k=1, dtype=F32)))


def _pool_mats(n, h, w, c):
    # MaxPool2d(2): input (n, 2h, 2w, c) -> output (n, h, w, c)
    ph = [jnp.kron(jnp.eye(n, dtype=F32),
                   jax.nn.one_hot(2 * jnp.arange(h) + a, 2 * h, dtype=F32))
          for a in (0, 1)]
    pw = [jnp.kron(jax.nn.one_hot(2 * jnp.arange(w) + b, 2 * w, dtype=F32).T,
                   jnp.eye(c, dtype=F32))
          for b in (0, 1)]
    return ph[0], ph[1], pw[0], pw[1]


def _bilinear_matrix(out_size, in_size):
    # matches F.interpolate(scale_factor=2, mode='bilinear', align_corners=False)
    i = jnp.arange(out_size, dtype=F32)
    s = jnp.maximum((i + 0.5) * (in_size / out_size) - 0.5, 0.0)
    i0 = jnp.minimum(jnp.floor(s).astype(jnp.int32), in_size - 1)
    i1 = jnp.minimum(i0 + 1, in_size - 1)
    w1 = s - i0.astype(F32)
    return ((1.0 - w1)[:, None] * jax.nn.one_hot(i0, in_size, dtype=F32)
            + w1[:, None] * jax.nn.one_hot(i1, in_size, dtype=F32))


def _upsample_mats(n, h, w, c):
    return (jnp.kron(jnp.eye(n, dtype=F32), _bilinear_matrix(2 * h, h)),
            jnp.kron(_bilinear_matrix(2 * w, w).T, jnp.eye(c, dtype=F32)))


# --------------------------------------------------------------------------
# pallas_call wrappers
# --------------------------------------------------------------------------
def _residual_call(p, x, n, h, w, pool=False, up1=None):
    """One fused pallas_call for `residual`.  (h, w) = resolution the block
    computes at; with pool=True the input x is at (2h, 2w); with up1 given the
    output is bilinearly upsampled to (2h, 2w) and added to up1."""
    cin = p["c1"]["w"].shape[0]
    cout = p["c3"]["w"].shape[1]
    ch = cout // 2
    has_skip = "skip" in p
    upsample = up1 is not None

    args = [x]
    if pool:
        args += list(_pool_mats(n, h, w, cin))
    args += [_row(p["bn1"]["gamma"], w), _row(p["bn1"]["beta"], w),
             _group_mean_mat(w, cin, n * h * w)]
    args += list(_conv1_mats(p["c1"], w))
    args += [_row(p["bn2"]["gamma"], w), _row(p["bn2"]["beta"], w),
             _group_mean_mat(w, ch, n * h * w)]
    args += list(_shift_h_mats(n, h))
    args += list(_conv3_mats(p["c2"], w))
    args += [_row(p["bn3"]["gamma"], w), _row(p["bn3"]["beta"], w)]
    args += list(_conv1_mats(p["c3"], w))
    if has_skip:
        args += list(_conv1_mats(p["skip"], w))
    if upsample:
        args += list(_upsample_mats(n, h, w, cout)) + [up1]

    ho, wo = (2 * h, 2 * w) if upsample else (h, w)
    out_shape = jax.ShapeDtypeStruct((n * ho, wo * cout), F32)
    kernel = functools.partial(_residual_kernel, pool=pool, has_skip=has_skip,
                               upsample=upsample)
    return pl.pallas_call(
        kernel,
        out_shape=out_shape,
        in_specs=[_vmem() for _ in args],
        out_specs=_vmem(),
        compiler_params=_COMPILER_PARAMS,
        cost_estimate=_cost(args, [out_shape]),
    )(*args)


def _hourglass_fwd(p, x, n, h, w):
    up1 = _residual_call(p["up1"], x, n, h, w)
    low1 = _residual_call(p["low1"], x, n, h // 2, w // 2, pool=True)
    if "up1" in p["low2"]:                                  # nested hourglass
        low2 = _hourglass_fwd(p["low2"], low1, n, h // 2, w // 2)
    else:                                                   # base residual
        low2 = _residual_call(p["low2"], low1, n, h // 2, w // 2)
    # low3 + bilinear x2 upsample + (up1 + up2), all inside one kernel
    return _residual_call(p["low3"], low2, n, h // 2, w // 2, up1=up1)


def _head_call(p, d, x, n, h, w, c, do):
    args = [d, x,
            _row(p["cbr_bn"]["gamma"], w), _row(p["cbr_bn"]["beta"], w),
            _group_mean_mat(w, c, n * h * w)]
    args += list(_conv1_mats(p["cbr_conv"], w))
    args += list(_conv1_mats(p["drop_conv"], w))
    args += list(_conv1_mats(p["out"], w))
    args.append(jnp.kron(jnp.eye(w, dtype=F32), jnp.ones((do, do), F32)))
    args += list(_conv1_mats(p["out_"], w))
    out_shapes = (jax.ShapeDtypeStruct((n * h, w * do), F32),
                  jax.ShapeDtypeStruct((n * h, w * c), F32))
    return pl.pallas_call(
        _head_kernel,
        out_shape=out_shapes,
        in_specs=[_vmem() for _ in args],
        out_specs=(_vmem(), _vmem()),
        compiler_params=_COMPILER_PARAMS,
        cost_estimate=_cost(args, out_shapes),
    )(*args)


@jax.jit
def wrapped_hourglass_fwd(params, x_nchw):
    n, c, h, w = x_nchw.shape
    do = params["out"]["w"].shape[1]
    # NCHW -> lane-dense (N*H, W*C) slab (pure layout plumbing, done once)
    x = jnp.transpose(x_nchw, (0, 2, 3, 1)).reshape(n * h, w * c)
    d = _hourglass_fwd(params["hg"], x, n, h, w)
    normed, y = _head_call(params, d, x, n, h, w, c, do)
    return normed.reshape(n, h, w, do), y.reshape(n, h, w, c)


# --------------------------------------------------------------------------
# Deterministic parameter init (synthetic, shapes from the module __init__)
# --------------------------------------------------------------------------
class KeyGen:
    def __init__(self, key):
        self.key = key
        self.i = 0

    def __call__(self):
        self.i += 1
        return jax.random.fold_in(self.key, self.i)


def init_conv(kg, cin, cout, k):
    if k == 1:
        w = jax.random.normal(kg(), (cin, cout), F32) * 0.1
    else:
        w = jax.random.normal(kg(), (3, 3, cin, cout), F32) * 0.05
    b = jax.random.normal(kg(), (cout,), F32) * 0.01
    return {"w": w, "b": b}


def init_bn(kg, c):
    return {"gamma": 1.0 + 0.1 * jax.random.normal(kg(), (c,), F32),
            "beta": 0.1 * jax.random.normal(kg(), (c,), F32)}


def init_residual(kg, cin, cout):
    half = cout // 2
    p = {"bn1": init_bn(kg, cin), "c1": init_conv(kg, cin, half, 1),
         "bn2": init_bn(kg, half), "c2": init_conv(kg, half, half, 3),
         "bn3": init_bn(kg, half), "c3": init_conv(kg, half, cout, 1)}
    if cin != cout:
        p["skip"] = init_conv(kg, cin, cout, 1)
    return p


def init_hourglass(kg, cin, cout, n):
    p = {"up1": init_residual(kg, cin, cout),
         "low1": init_residual(kg, cin, cout)}
    p["low2"] = (init_hourglass(kg, cout, cout, n - 1) if n > 0
                 else init_residual(kg, cout, cout))
    p["low3"] = init_residual(kg, cout, cout)
    return p


def init_wrapped(kg, nfeat, outdim, nlow):
    return {"hg": init_hourglass(kg, nfeat, nfeat, nlow),
            "cbr_conv": init_conv(kg, nfeat, nfeat, 1),
            "cbr_bn": init_bn(kg, nfeat),
            "drop_conv": init_conv(kg, nfeat, nfeat, 1),
            "out": init_conv(kg, nfeat, outdim, 1),
            "out_": init_conv(kg, outdim, nfeat, 1)}


# --------------------------------------------------------------------------
if __name__ == "__main__":
    nFeat, outDim, nLow = 8, 4, 2
    N, H, W = 2, 16, 16

    key = jax.random.PRNGKey(0)
    params = init_wrapped(KeyGen(jax.random.fold_in(key, 1)), nFeat, outDim, nLow)
    x_nchw = jax.random.normal(jax.random.fold_in(key, 2), (N, nFeat, H, W), F32)

    normed, y = wrapped_hourglass_fwd(params, x_nchw)
    jax.block_until_ready((normed, y))

    assert normed.shape == (N, H, W, outDim)
    assert y.shape == (N, H, W, nFeat)
    assert bool(jnp.all(jnp.isfinite(normed))) and bool(jnp.all(jnp.isfinite(y)))
    print("KERNEL_OK")
</pallas_src>

<mosaic_0001>
module attributes {stable_mosaic.version = 11 : i64} {
  func.func @_residual_kernel(%arg0: memref<32x128xf32, #tpu.memory_space<vmem>>, %arg1: memref<16x32xf32, #tpu.memory_space<vmem>>, %arg2: memref<16x32xf32, #tpu.memory_space<vmem>>, %arg3: memref<128x64xf32, #tpu.memory_space<vmem>>, %arg4: memref<128x64xf32, #tpu.memory_space<vmem>>, %arg5: memref<1x64xf32, #tpu.memory_space<vmem>>, %arg6: memref<1x64xf32, #tpu.memory_space<vmem>>, %arg7: memref<64x64xf32, #tpu.memory_space<vmem>>, %arg8: memref<64x32xf32, #tpu.memory_space<vmem>>, %arg9: memref<1x32xf32, #tpu.memory_space<vmem>>, %arg10: memref<1x32xf32, #tpu.memory_space<vmem>>, %arg11: memref<1x32xf32, #tpu.memory_space<vmem>>, %arg12: memref<32x32xf32, #tpu.memory_space<vmem>>, %arg13: memref<16x16xf32, #tpu.memory_space<vmem>>, %arg14: memref<16x16xf32, #tpu.memory_space<vmem>>, %arg15: memref<32x32xf32, #tpu.memory_space<vmem>>, %arg16: memref<32x32xf32, #tpu.memory_space<vmem>>, %arg17: memref<32x32xf32, #tpu.memory_space<vmem>>, %arg18: memref<1x32xf32, #tpu.memory_space<vmem>>, %arg19: memref<1x32xf32, #tpu.memory_space<vmem>>, %arg20: memref<1x32xf32, #tpu.memory_space<vmem>>, %arg21: memref<32x64xf32, #tpu.memory_space<vmem>>, %arg22: memref<1x64xf32, #tpu.memory_space<vmem>>, %arg23: memref<16x64xf32, #tpu.memory_space<vmem>>) attributes {dimension_semantics = [], scalar_prefetch = 0 : i64, scratch_operands = 0 : i64, tpu.core_type = #tpu.core_type<tc>} {
    %c0 = arith.constant 0 : index
    %c0_0 = arith.constant 0 : index
    %0 = vector.load %arg0[%c0, %c0_0] : memref<32x128xf32, #tpu.memory_space<vmem>>, vector<32x128xf32>
    %c0_1 = arith.constant 0 : index
    %c0_2 = arith.constant 0 : index
    %1 = vector.load %arg1[%c0_1, %c0_2] : memref<16x32xf32, #tpu.memory_space<vmem>>, vector<16x32xf32>
    %cst = arith.constant dense<0.000000e+00> : vector<16x128xf32>
    %2 = tpu.matmul %1, %0, %cst {dimension_numbers = #tpu.dot_dimension_numbers<[1], [0], [0], [1], [0, 0, 1, 1], [], []>} : vector<16x32xf32>, vector<32x128xf32>, vector<16x128xf32> -> vector<16x128xf32>
    %c0_3 = arith.constant 0 : index
    %c0_4 = arith.constant 0 : index
    %3 = vector.load %arg2[%c0_3, %c0_4] : memref<16x32xf32, #tpu.memory_space<vmem>>, vector<16x32xf32>
    %cst_5 = arith.constant dense<0.000000e+00> : vector<16x128xf32>
    %4 = tpu.matmul %3, %0, %cst_5 {dimension_numbers = #tpu.dot_dimension_numbers<[1], [0], [0], [1], [0, 0, 1, 1], [], []>} : vector<16x32xf32>, vector<32x128xf32>, vector<16x128xf32> -> vector<16x128xf32>
    %c0_6 = arith.constant 0 : index
    %c0_7 = arith.constant 0 : index
    %5 = vector.load %arg3[%c0_6, %c0_7] : memref<128x64xf32, #tpu.memory_space<vmem>>, vector<128x64xf32>
    %c0_8 = arith.constant 0 : index
    %c0_9 = arith.constant 0 : index
    %6 = vector.load %arg4[%c0_8, %c0_9] : memref<128x64xf32, #tpu.memory_space<vmem>>, vector<128x64xf32>
    %cst_10 = arith.constant dense<0.000000e+00> : vector<16x64xf32>
    %7 = tpu.matmul %2, %5, %cst_10 {dimension_numbers = #tpu.dot_dimension_numbers<[1], [0], [0], [1], [0, 0, 1, 1], [], []>} : vector<16x128xf32>, vector<128x64xf32>, vector<16x64xf32> -> vector<16x64xf32>
    %cst_11 = arith.constant dense<0.000000e+00> : vector<16x64xf32>
    %8 = tpu.matmul %2, %6, %cst_11 {dimension_numbers = #tpu.dot_dimension_numbers<[1], [0], [0], [1], [0, 0, 1, 1], [], []>} : vector<16x128xf32>, vector<128x64xf32>, vector<16x64xf32> -> vector<16x64xf32>
    %9 = arith.maximumf %7, %8 : vector<16x64xf32>
    %cst_12 = arith.constant dense<0.000000e+00> : vector<16x64xf32>
    %10 = tpu.matmul %4, %5, %cst_12 {dimension_numbers = #tpu.dot_dimension_numbers<[1], [0], [0], [1], [0, 0, 1, 1], [], []>} : vector<16x128xf32>, vector<128x64xf32>, vector<16x64xf32> -> vector<16x64xf32>
    %cst_13 = arith.constant dense<0.000000e+00> : vector<16x64xf32>
    %11 = tpu.matmul %4, %6, %cst_13 {dimension_numbers = #tpu.dot_dimension_numbers<[1], [0], [0], [1], [0, 0, 1, 1], [], []>} : vector<16x128xf32>, vector<128x64xf32>, vector<16x64xf32> -> vector<16x64xf32>
    %12 = arith.maximumf %10, %11 : vector<16x64xf32>
    %13 = arith.maximumf %9, %12 : vector<16x64xf32>
    %c0_14 = arith.constant 0 : index
    %c0_15 = arith.constant 0 : index
    %14 = vector.load %arg7[%c0_14, %c0_15] : memref<64x64xf32, #tpu.memory_space<vmem>>, vector<64x64xf32>
    %cst_16 = arith.constant dense<0.000000e+00> : vector<64xf32>
    %15 = vector.multi_reduction <add>, %13, %cst_16 [0] : vector<16x64xf32> to vector<64xf32>
    %16 = vector.shape_cast %15 : vector<64xf32> to vector<1x64xf32>
    %cst_17 = arith.constant dense<0.000000e+00> : vector<1x64xf32>
    %17 = tpu.matmul %16, %14, %cst_17 {dimension_numbers = #tpu.dot_dimension_numbers<[1], [0], [0], [1], [0, 0, 1, 1], [], []>} : vector<1x64xf32>, vector<64x64xf32>, vector<1x64xf32> -> vector<1x64xf32>
    %18 = vector.broadcast %17 : vector<1x64xf32> to vector<16x64xf32>
    %19 = arith.subf %13, %18 : vector<16x64xf32>
    %20 = arith.mulf %19, %19 : vector<16x64xf32>
    %cst_18 = arith.constant dense<0.000000e+00> : vector<64xf32>
    %21 = vector.multi_reduction <add>, %20, %cst_18 [0] : vector<16x64xf32> to vector<64xf32>
    %22 = vector.shape_cast %21 : vector<64xf32> to vector<1x64xf32>
    %cst_19 = arith.constant dense<0.000000e+00> : vector<1x64xf32>
    %23 = tpu.matmul %22, %14, %cst_19 {dimension_numbers = #tpu.dot_dimension_numbers<[1], [0], [0], [1], [0, 0, 1, 1], [], []>} : vector<1x64xf32>, vector<64x64xf32>, vector<1x64xf32> -> vector<1x64xf32>
    %cst_20 = arith.constant 9.99999974E-6 : f32
    %24 = vector.broadcast %cst_20 : f32 to vector<1x64xf32>
    %25 = arith.addf %23, %24 : vector<1x64xf32>
    %26 = math.rsqrt %25 : vector<1x64xf32>
    %27 = vector.broadcast %26 : vector<1x64xf32> to vector<16x64xf32>
    %28 = arith.mulf %19, %27 : vector<16x64xf32>
    %c0_21 = arith.constant 0 : index
    %c0_22 = arith.constant 0 : index
    %29 = vector.load %arg5[%c0_21, %c0_22] : memref<1x64xf32, #tpu.memory_space<vmem>>, vector<1x64xf32>
    %30 = vector.broadcast %29 : vector<1x64xf32> to vector<16x64xf32>
    %31 = arith.mulf %28, %30 : vector<16x64xf32>
    %c0_23 = arith.constant 0 : index
    %c0_24 = arith.constant 0 : index
    %32 = vector.load %arg6[%c0_23, %c0_24] : memref<1x64xf32, #tpu.memory_space<vmem>>, vector<1x64xf32>
    %33 = vector.broadcast %32 : vector<1x64xf32> to vector<16x64xf32>
    %34 = arith.addf %31, %33 : vector<16x64xf32>
    %c0_25 = arith.constant 0 : index
    %c0_26 = arith.constant 0 : index
    %35 = vector.load %arg8[%c0_25, %c0_26] : memref<64x32xf32, #tpu.memory_space<vmem>>, vector<64x32xf32>
    %cst_27 = arith.constant dense<0.000000e+00> : vector<16x32xf32>
    %36 = tpu.matmul %34, %35, %cst_27 {dimension_numbers = #tpu.dot_dimension_numbers<[1], [0], [0], [1], [0, 0, 1, 1], [], []>} : vector<16x64xf32>, vector<64x32xf32>, vector<16x32xf32> -> vector<16x32xf32>
    %c0_28 = arith.constant 0 : index
    %c0_29 = arith.constant 0 : index
    %37 = vector.load %arg9[%c0_28, %c0_29] : memref<1x32xf32, #tpu.memory_space<vmem>>, vector<1x32xf32>
    %38 = vector.broadcast %37 : vector<1x32xf32> to vector<16x32xf32>
    %39 = arith.addf %36, %38 : vector<16x32xf32>
    %c0_30 = arith.constant 0 : index
    %c0_31 = arith.constant 0 : index
    %40 = vector.load %arg12[%c0_30, %c0_31] : memref<32x32xf32, #tpu.memory_space<vmem>>, vector<32x32xf32>
    %cst_32 = arith.constant dense<0.000000e+00> : vector<32xf32>
    %41 = vector.multi_reduction <add>, %39, %cst_32 [0] : vector<16x32xf32> to vector<32xf32>
    %42 = vector.shape_cast %41 : vector<32xf32> to vector<1x32xf32>
    %cst_33 = arith.constant dense<0.000000e+00> : vector<1x32xf32>
    %43 = tpu.matmul %42, %40, %cst_33 {dimension_numbers = #tpu.dot_dimension_numbers<[1], [0], [0], [1], [0, 0, 1, 1], [], []>} : vector<1x32xf32>, vector<32x32xf32>, vector<1x32xf32> -> vector<1x32xf32>
    %44 = vector.broadcast %43 : vector<1x32xf32> to vector<16x32xf32>
    %45 = arith.subf %39, %44 : vector<16x32xf32>
    %46 = arith.mulf %45, %45 : vector<16x32xf32>
    %cst_34 = arith.constant dense<0.000000e+00> : vector<32xf32>
    %47 = vector.multi_reduction <add>, %46, %cst_34 [0] : vector<16x32xf32> to vector<32xf32>
    %48 = vector.shape_cast %47 : vector<32xf32> to vector<1x32xf32>
    %cst_35 = arith.constant dense<0.000000e+00> : vector<1x32xf32>
    %49 = tpu.matmul %48, %40, %cst_35 {dimension_numbers = #tpu.dot_dimension_numbers<[1], [0], [0], [1], [0, 0, 1, 1], [], []>} : vector<1x32xf32>, vector<32x32xf32>, vector<1x32xf32> -> vector<1x32xf32>
    %cst_36 = arith.constant 9.99999974E-6 : f32
    %50 = vector.broadcast %cst_36 : f32 to vector<1x32xf32>
    %51 = arith.addf %49, %50 : vector<1x32xf32>
    %52 = math.rsqrt %51 : vector<1x32xf32>
    %53 = vector.broadcast %52 : vector<1x32xf32> to vector<16x32xf32>
    %54 = arith.mulf %45, %53 : vector<16x32xf32>
    %c0_37 = arith.constant 0 : index
    %c0_38 = arith.constant 0 : index
    %55 = vector.load %arg10[%c0_37, %c0_38] : memref<1x32xf32, #tpu.memory_space<vmem>>, vector<1x32xf32>
    %56 = vector.broadcast %55 : vector<1x32xf32> to vector<16x32xf32>
    %57 = arith.mulf %54, %56 : vector<16x32xf32>
    %c0_39 = arith.constant 0 : index
    %c0_40 = arith.constant 0 : index
    %58 = vector.load %arg11[%c0_39, %c0_40] : memref<1x32xf32, #tpu.memory_space<vmem>>, vector<1x32xf32>
    %59 = vector.broadcast %58 : vector<1x32xf32> to vector<16x32xf32>
    %60 = arith.addf %57, %59 : vector<16x32xf32>
    %c0_41 = arith.constant 0 : index
    %c0_42 = arith.constant 0 : index
    %61 = vector.load %arg13[%c0_41, %c0_42] : memref<16x16xf32, #tpu.memory_space<vmem>>, vector<16x16xf32>
    %cst_43 = arith.constant dense<0.000000e+00> : vector<16x32xf32>
    %62 = tpu.matmul %61, %60, %cst_43 {dimension_numbers = #tpu.dot_dimension_numbers<[1], [0], [0], [1], [0, 0, 1, 1], [], []>} : vector<16x16xf32>, vector<16x32xf32>, vector<16x32xf32> -> vector<16x32xf32>
    %c0_44 = arith.constant 0 : index
    %c0_45 = arith.constant 0 : index
    %63 = vector.load %arg14[%c0_44, %c0_45] : memref<16x16xf32, #tpu.memory_space<vmem>>, vector<16x16xf32>
    %cst_46 = arith.constant dense<0.000000e+00> : vector<16x32xf32>
    %64 = tpu.matmul %63, %60, %cst_46 {dimension_numbers = #tpu.dot_dimension_numbers<[1], [0], [0], [1], [0, 0, 1, 1], [], []>} : vector<16x16xf32>, vector<16x32xf32>, vector<16x32xf32> -> vector<16x32xf32>
    %c0_47 = arith.constant 0 : index
    %c0_48 = arith.constant 0 : index
    %65 = vector.load %arg15[%c0_47, %c0_48] : memref<32x32xf32, #tpu.memory_space<vmem>>, vector<32x32xf32>
    %cst_49 = arith.constant dense<0.000000e+00> : vector<16x32xf32>
    %66 = tpu.matmul %62, %65, %cst_49 {dimension_numbers = #tpu.dot_dimension_numbers<[1], [0], [0], [1], [0, 0, 1, 1], [], []>} : vector<16x32xf32>, vector<32x32xf32>, vector<16x32xf32> -> vector<16x32xf32>
    %c0_50 = arith.constant 0 : index
    %c0_51 = arith.constant 0 : index
    %67 = vector.load %arg16[%c0_50, %c0_51] : memref<32x32xf32, #tpu.memory_space<vmem>>, vector<32x32xf32>
    %cst_52 = arith.constant dense<0.000000e+00> : vector<16x32xf32>
    %68 = tpu.matmul %60, %67, %cst_52 {dimension_numbers = #tpu.dot_dimension_numbers<[1], [0], [0], [1], [0, 0, 1, 1], [], []>} : vector<16x32xf32>, vector<32x32xf32>, vector<16x32xf32> -> vector<16x32xf32>
    %69 = arith.addf %66, %68 : vector<16x32xf32>
    %c0_53 = arith.constant 0 : index
    %c0_54 = arith.constant 0 : index
    %70 = vector.load %arg17[%c0_53, %c0_54] : memref<32x32xf32, #tpu.memory_space<vmem>>, vector<32x32xf32>
    %cst_55 = arith.constant dense<0.000000e+00> : vector<16x32xf32>
    %71 = tpu.matmul %64, %70, %cst_55 {dimension_numbers = #tpu.dot_dimension_numbers<[1], [0], [0], [1], [0, 0, 1, 1], [], []>} : vector<16x32xf32>, vector<32x32xf32>, vector<16x32xf32> -> vector<16x32xf32>
    %72 = arith.addf %69, %71 : vector<16x32xf32>
    %c0_56 = arith.constant 0 : index
    %c0_57 = arith.constant 0 : index
    %73 = vector.load %arg18[%c0_56, %c0_57] : memref<1x32xf32, #tpu.memory_space<vmem>>, vector<1x32xf32>
    %74 = vector.broadcast %73 : vector<1x32xf32> to vector<16x32xf32>
    %75 = arith.addf %72, %74 : vector<16x32xf32>
    %c0_58 = arith.constant 0 : index
    %c0_59 = arith.constant 0 : index
    %76 = vector.load %arg12[%c0_58, %c0_59] : memref<32x32xf32, #tpu.memory_space<vmem>>, vector<32x32xf32>
    %cst_60 = arith.constant dense<0.000000e+00> : vector<32xf32>
    %77 = vector.multi_reduction <add>, %75, %cst_60 [0] : vector<16x32xf32> to vector<32xf32>
    %78 = vector.shape_cast %77 : vector<32xf32> to vector<1x32xf32>
    %cst_61 = arith.constant dense<0.000000e+00> : vector<1x32xf32>
    %79 = tpu.matmul %78, %76, %cst_61 {dimension_numbers = #tpu.dot_dimension_numbers<[1], [0], [0], [1], [0, 0, 1, 1], [], []>} : vector<1x32xf32>, vector<32x32xf32>, vector<1x32xf32> -> vector<1x32xf32>
    %80 = vector.broadcast %79 : vector<1x32xf32> to vector<16x32xf32>
    %81 = arith.subf %75, %80 : vector<16x32xf32>
    %82 = arith.mulf %81, %81 : vector<16x32xf32>
    %cst_62 = arith.constant dense<0.000000e+00> : vector<32xf32>
    %83 = vector.multi_reduction <add>, %82, %cst_62 [0] : vector<16x32xf32> to vector<32xf32>
    %84 = vector.shape_cast %83 : vector<32xf32> to vector<1x32xf32>
    %cst_63 = arith.constant dense<0.000000e+00> : vector<1x32xf32>
    %85 = tpu.matmul %84, %76, %cst_63 {dimension_numbers = #tpu.dot_dimension_numbers<[1], [0], [0], [1], [0, 0, 1, 1], [], []>} : vector<1x32xf32>, vector<32x32xf32>, vector<1x32xf32> -> vector<1x32xf32>
    %cst_64 = arith.constant 9.99999974E-6 : f32
    %86 = vector.broadcast %cst_64 : f32 to vector<1x32xf32>
    %87 = arith.addf %85, %86 : vector<1x32xf32>
    %88 = math.rsqrt %87 : vector<1x32xf32>
    %89 = vector.broadcast %88 : vector<1x32xf32> to vector<16x32xf32>
    %90 = arith.mulf %81, %89 : vector<16x32xf32>
    %c0_65 = arith.constant 0 : index
    %c0_66 = arith.constant 0 : index
    %91 = vector.load %arg19[%c0_65, %c0_66] : memref<1x32xf32, #tpu.memory_space<vmem>>, vector<1x32xf32>
    %92 = vector.broadcast %91 : vector<1x32xf32> to vector<16x32xf32>
    %93 = arith.mulf %90, %92 : vector<16x32xf32>
    %c0_67 = arith.constant 0 : index
    %c0_68 = arith.constant 0 : index
    %94 = vector.load %arg20[%c0_67, %c0_68] : memref<1x32xf32, #tpu.memory_space<vmem>>, vector<1x32xf32>
    %95 = vector.broadcast %94 : vector<1x32xf32> to vector<16x32xf32>
    %96 = arith.addf %93, %95 : vector<16x32xf32>
    %c0_69 = arith.constant 0 : index
    %c0_70 = arith.constant 0 : index
    %97 = vector.load %arg21[%c0_69, %c0_70] : memref<32x64xf32, #tpu.memory_space<vmem>>, vector<32x64xf32>
    %cst_71 = arith.constant dense<0.000000e+00> : vector<16x64xf32>
    %98 = tpu.matmul %96, %97, %cst_71 {dimension_numbers = #tpu.dot_dimension_numbers<[1], [0], [0], [1], [0, 0, 1, 1], [], []>} : vector<16x32xf32>, vector<32x64xf32>, vector<16x64xf32> -> vector<16x64xf32>
    %c0_72 = arith.constant 0 : index
    %c0_73 = arith.constant 0 : index
    %99 = vector.load %arg22[%c0_72, %c0_73] : memref<1x64xf32, #tpu.memory_space<vmem>>, vector<1x64xf32>
    %100 = vector.broadcast %99 : vector<1x64xf32> to vector<16x64xf32>
    %101 = arith.addf %98, %100 : vector<16x64xf32>
    %102 = arith.addf %13, %101 : vector<16x64xf32>
    %c0_74 = arith.constant 0 : index
    %c0_75 = arith.constant 0 : index
    %103 = vector.load %arg23[%c0_74, %c0_75] : memref<16x64xf32, #tpu.memory_space<vmem>>, vector<16x64xf32>
    tpu.vector_store %arg23[%c0_74, %c0_75], %102 {strides = array<i32>} : memref<16x64xf32, #tpu.memory_space<vmem>>, vector<16x64xf32>,
    return
  }
}

module attributes {stable_mosaic.version = 11 : i64} {
  func.func @_residual_kernel(%arg0: memref<16x64xf32, #tpu.memory_space<vmem>>, %arg1: memref<8x16xf32, #tpu.memory_space<vmem>>, %arg2: memref<8x16xf32, #tpu.memory_space<vmem>>, %arg3: memref<64x32xf32, #tpu.memory_space<vmem>>, %arg4: memref<64x32xf32, #tpu.memory_space<vmem>>, %arg5: memref<1x32xf32, #tpu.memory_space<vmem>>, %arg6: memref<1x32xf32, #tpu.memory_space<vmem>>, %arg7: memref<32x32xf32, #tpu.memory_space<vmem>>, %arg8: memref<32x16xf32, #tpu.memory_space<vmem>>, %arg9: memref<1x16xf32, #tpu.memory_space<vmem>>, %arg10: memref<1x16xf32, #tpu.memory_space<vmem>>, %arg11: memref<1x16xf32, #tpu.memory_space<vmem>>, %arg12: memref<16x16xf32, #tpu.memory_space<vmem>>, %arg13: memref<8x8xf32, #tpu.memory_space<vmem>>, %arg14: memref<8x8xf32, #tpu.memory_space<vmem>>, %arg15: memref<16x16xf32, #tpu.memory_space<vmem>>, %arg16: memref<16x16xf32, #tpu.memory_space<vmem>>, %arg17: memref<16x16xf32, #tpu.memory_space<vmem>>, %arg18: memref<1x16xf32, #tpu.memory_space<vmem>>, %arg19: memref<1x16xf32, #tpu.memory_space<vmem>>, %arg20: memref<1x16xf32, #tpu.memory_space<vmem>>, %arg21: memref<16x32xf32, #tpu.memory_space<vmem>>, %arg22: memref<1x32xf32, #tpu.memory_space<vmem>>, %arg23: memref<8x32xf32, #tpu.memory_space<vmem>>) attributes {dimension_semantics = [], scalar_prefetch = 0 : i64, scratch_operands = 0 : i64, tpu.core_type = #tpu.core_type<tc>} {
    %c0 = arith.constant 0 : index
    %c0_0 = arith.constant 0 : index
    %0 = vector.load %arg0[%c0, %c0_0] : memref<16x64xf32, #tpu.memory_space<vmem>>, vector<16x64xf32>
    %c0_1 = arith.constant 0 : index
    %c0_2 = arith.constant 0 : index
    %1 = vector.load %arg1[%c0_1, %c0_2] : memref<8x16xf32, #tpu.memory_space<vmem>>, vector<8x16xf32>
    %cst = arith.constant dense<0.000000e+00> : vector<8x64xf32>
    %2 = tpu.matmul %1, %0, %cst {dimension_numbers = #tpu.dot_dimension_numbers<[1], [0], [0], [1], [0, 0, 1, 1], [], []>} : vector<8x16xf32>, vector<16x64xf32>, vector<8x64xf32> -> vector<8x64xf32>
    %c0_3 = arith.constant 0 : index
    %c0_4 = arith.constant 0 : index
    %3 = vector.load %arg2[%c0_3, %c0_4] : memref<8x16xf32, #tpu.memory_space<vmem>>, vector<8x16xf32>
    %cst_5 = arith.constant dense<0.000000e+00> : vector<8x64xf32>
    %4 = tpu.matmul %3, %0, %cst_5 {dimension_numbers = #tpu.dot_dimension_numbers<[1], [0], [0], [1], [0, 0, 1, 1], [], []>} : vector<8x16xf32>, vector<16x64xf32>, vector<8x64xf32> -> vector<8x64xf32>
    %c0_6 = arith.constant 0 : index
    %c0_7 = arith.constant 0 : index
    %5 = vector.load %arg3[%c0_6, %c0_7] : memref<64x32xf32, #tpu.memory_space<vmem>>, vector<64x32xf32>
    %c0_8 = arith.constant 0 : index
    %c0_9 = arith.constant 0 : index
    %6 = vector.load %arg4[%c0_8, %c0_9] : memref<64x32xf32, #tpu.memory_space<vmem>>, vector<64x32xf32>
    %cst_10 = arith.constant dense<0.000000e+00> : vector<8x32xf32>
    %7 = tpu.matmul %2, %5, %cst_10 {dimension_numbers = #tpu.dot_dimension_numbers<[1], [0], [0], [1], [0, 0, 1, 1], [], []>} : vector<8x64xf32>, vector<64x32xf32>, vector<8x32xf32> -> vector<8x32xf32>
    %cst_11 = arith.constant dense<0.000000e+00> : vector<8x32xf32>
    %8 = tpu.matmul %2, %6, %cst_11 {dimension_numbers = #tpu.dot_dimension_numbers<[1], [0], [0], [1], [0, 0, 1, 1], [], []>} : vector<8x64xf32>, vector<64x32xf32>, vector<8x32xf32> -> vector<8x32xf32>
    %9 = arith.maximumf %7, %8 : vector<8x32xf32>
    %cst_12 = arith.constant dense<0.000000e+00> : vector<8x32xf32>
    %10 = tpu.matmul %4, %5, %cst_12 {dimension_numbers = #tpu.dot_dimension_numbers<[1], [0], [0], [1], [0, 0, 1, 1], [], []>} : vector<8x64xf32>, vector<64x32xf32>, vector<8x32xf32> -> vector<8x32xf32>
    %cst_13 = arith.constant dense<0.000000e+00> : vector<8x32xf32>
    %11 = tpu.matmul %4, %6, %cst_13 {dimension_numbers = #tpu.dot_dimension_numbers<[1], [0], [0], [1], [0, 0, 1, 1], [], []>} : vector<8x64xf32>, vector<64x32xf32>, vector<8x32xf32> -> vector<8x32xf32>
    %12 = arith.maximumf %10, %11 : vector<8x32xf32>
    %13 = arith.maximumf %9, %12 : vector<8x32xf32>
    %c0_14 = arith.constant 0 : index
    %c0_15 = arith.constant 0 : index
    %14 = vector.load %arg7[%c0_14, %c0_15] : memref<32x32xf32, #tpu.memory_space<vmem>>, vector<32x32xf32>
    %cst_16 = arith.constant dense<0.000000e+00> : vector<32xf32>
    %15 = vector.multi_reduction <add>, %13, %cst_16 [0] : vector<8x32xf32> to vector<32xf32>
    %16 = vector.shape_cast %15 : vector<32xf32> to vector<1x32xf32>
    %cst_17 = arith.constant dense<0.000000e+00> : vector<1x32xf32>
    %17 = tpu.matmul %16, %14, %cst_17 {dimension_numbers = #tpu.dot_dimension_numbers<[1], [0], [0], [1], [0, 0, 1, 1], [], []>} : vector<1x32xf32>, vector<32x32xf32>, vector<1x32xf32> -> vector<1x32xf32>
    %18 = vector.broadcast %17 : vector<1x32xf32> to vector<8x32xf32>
    %19 = arith.subf %13, %18 : vector<8x32xf32>
    %20 = arith.mulf %19, %19 : vector<8x32xf32>
    %cst_18 = arith.constant dense<0.000000e+00> : vector<32xf32>
    %21 = vector.multi_reduction <add>, %20, %cst_18 [0] : vector<8x32xf32> to vector<32xf32>
    %22 = vector.shape_cast %21 : vector<32xf32> to vector<1x32xf32>
    %cst_19 = arith.constant dense<0.000000e+00> : vector<1x32xf32>
    %23 = tpu.matmul %22, %14, %cst_19 {dimension_numbers = #tpu.dot_dimension_numbers<[1], [0], [0], [1], [0, 0, 1, 1], [], []>} : vector<1x32xf32>, vector<32x32xf32>, vector<1x32xf32> -> vector<1x32xf32>
    %cst_20 = arith.constant 9.99999974E-6 : f32
    %24 = vector.broadcast %cst_20 : f32 to vector<1x32xf32>
    %25 = arith.addf %23, %24 : vector<1x32xf32>
    %26 = math.rsqrt %25 : vector<1x32xf32>
    %27 = vector.broadcast %26 : vector<1x32xf32> to vector<8x32xf32>
    %28 = arith.mulf %19, %27 : vector<8x32xf32>
    %c0_21 = arith.constant 0 : index
    %c0_22 = arith.constant 0 : index
    %29 = vector.load %arg5[%c0_21, %c0_22] : memref<1x32xf32, #tpu.memory_space<vmem>>, vector<1x32xf32>
    %30 = vector.broadcast %29 : vector<1x32xf32> to vector<8x32xf32>
    %31 = arith.mulf %28, %30 : vector<8x32xf32>
    %c0_23 = arith.constant 0 : index
    %c0_24 = arith.constant 0 : index
    %32 = vector.load %arg6[%c0_23, %c0_24] : memref<1x32xf32, #tpu.memory_space<vmem>>, vector<1x32xf32>
    %33 = vector.broadcast %32 : vector<1x32xf32> to vector<8x32xf32>
    %34 = arith.addf %31, %33 : vector<8x32xf32>
    %c0_25 = arith.constant 0 : index
    %c0_26 = arith.constant 0 : index
    %35 = vector.load %arg8[%c0_25, %c0_26] : memref<32x16xf32, #tpu.memory_space<vmem>>, vector<32x16xf32>
    %cst_27 = arith.constant dense<0.000000e+00> : vector<8x16xf32>
    %36 = tpu.matmul %34, %35, %cst_27 {dimension_numbers = #tpu.dot_dimension_numbers<[1], [0], [0], [1], [0, 0, 1, 1], [], []>} : vector<8x32xf32>, vector<32x16xf32>, vector<8x16xf32> -> vector<8x16xf32>
    %c0_28 = arith.constant 0 : index
    %c0_29 = arith.constant 0 : index
    %37 = vector.load %arg9[%c0_28, %c0_29] : memref<1x16xf32, #tpu.memory_space<vmem>>, vector<1x16xf32>
    %38 = vector.broadcast %37 : vector<1x16xf32> to vector<8x16xf32>
    %39 = arith.addf %36, %38 : vector<8x16xf32>
    %c0_30 = arith.constant 0 : index
    %c0_31 = arith.constant 0 : index
    %40 = vector.load %arg12[%c0_30, %c0_31] : memref<16x16xf32, #tpu.memory_space<vmem>>, vector<16x16xf32>
    %cst_32 = arith.constant dense<0.000000e+00> : vector<16xf32>
    %41 = vector.multi_reduction <add>, %39, %cst_32 [0] : vector<8x16xf32> to vector<16xf32>
    %42 = vector.shape_cast %41 : vector<16xf32> to vector<1x16xf32>
    %cst_33 = arith.constant dense<0.000000e+00> : vector<1x16xf32>
    %43 = tpu.matmul %42, %40, %cst_33 {dimension_numbers = #tpu.dot_dimension_numbers<[1], [0], [0], [1], [0, 0, 1, 1], [], []>} : vector<1x16xf32>, vector<16x16xf32>, vector<1x16xf32> -> vector<1x16xf32>
    %44 = vector.broadcast %43 : vector<1x16xf32> to vector<8x16xf32>
    %45 = arith.subf %39, %44 : vector<8x16xf32>
    %46 = arith.mulf %45, %45 : vector<8x16xf32>
    %cst_34 = arith.constant dense<0.000000e+00> : vector<16xf32>
    %47 = vector.multi_reduction <add>, %46, %cst_34 [0] : vector<8x16xf32> to vector<16xf32>
    %48 = vector.shape_cast %47 : vector<16xf32> to vector<1x16xf32>
    %cst_35 = arith.constant dense<0.000000e+00> : vector<1x16xf32>
    %49 = tpu.matmul %48, %40, %cst_35 {dimension_numbers = #tpu.dot_dimension_numbers<[1], [0], [0], [1], [0, 0, 1, 1], [], []>} : vector<1x16xf32>, vector<16x16xf32>, vector<1x16xf32> -> vector<1x16xf32>
    %cst_36 = arith.constant 9.99999974E-6 : f32
    %50 = vector.broadcast %cst_36 : f32 to vector<1x16xf32>
    %51 = arith.addf %49, %50 : vector<1x16xf32>
    %52 = math.rsqrt %51 : vector<1x16xf32>
    %53 = vector.broadcast %52 : vector<1x16xf32> to vector<8x16xf32>
    %54 = arith.mulf %45, %53 : vector<8x16xf32>
    %c0_37 = arith.constant 0 : index
    %c0_38 = arith.constant 0 : index
    %55 = vector.load %arg10[%c0_37, %c0_38] : memref<1x16xf32, #tpu.memory_space<vmem>>, vector<1x16xf32>
    %56 = vector.broadcast %55 : vector<1x16xf32> to vector<8x16xf32>
    %57 = arith.mulf %54, %56 : vector<8x16xf32>
    %c0_39 = arith.constant 0 : index
    %c0_40 = arith.constant 0 : index
    %58 = vector.load %arg11[%c0_39, %c0_40] : memref<1x16xf32, #tpu.memory_space<vmem>>, vector<1x16xf32>
    %59 = vector.broadcast %58 : vector<1x16xf32> to vector<8x16xf32>
    %60 = arith.addf %57, %59 : vector<8x16xf32>
    %c0_41 = arith.constant 0 : index
    %c0_42 = arith.constant 0 : index
    %61 = vector.load %arg13[%c0_41, %c0_42] : memref<8x8xf32, #tpu.memory_space<vmem>>, vector<8x8xf32>
    %cst_43 = arith.constant dense<0.000000e+00> : vector<8x16xf32>
    %62 = tpu.matmul %61, %60, %cst_43 {dimension_numbers = #tpu.dot_dimension_numbers<[1], [0], [0], [1], [0, 0, 1, 1], [], []>} : vector<8x8xf32>, vector<8x16xf32>, vector<8x16xf32> -> vector<8x16xf32>
    %c0_44 = arith.constant 0 : index
    %c0_45 = arith.constant 0 : index
    %63 = vector.load %arg14[%c0_44, %c0_45] : memref<8x8xf32, #tpu.memory_space<vmem>>, vector<8x8xf32>
    %cst_46 = arith.constant dense<0.000000e+00> : vector<8x16xf32>
    %64 = tpu.matmul %63, %60, %cst_46 {dimension_numbers = #tpu.dot_dimension_numbers<[1], [0], [0], [1], [0, 0, 1, 1], [], []>} : vector<8x8xf32>, vector<8x16xf32>, vector<8x16xf32> -> vector<8x16xf32>
    %c0_47 = arith.constant 0 : index
    %c0_48 = arith.constant 0 : index
    %65 = vector.load %arg15[%c0_47, %c0_48] : memref<16x16xf32, #tpu.memory_space<vmem>>, vector<16x16xf32>
    %cst_49 = arith.constant dense<0.000000e+00> : vector<8x16xf32>
    %66 = tpu.matmul %62, %65, %cst_49 {dimension_numbers = #tpu.dot_dimension_numbers<[1], [0], [0], [1], [0, 0, 1, 1], [], []>} : vector<8x16xf32>, vector<16x16xf32>, vector<8x16xf32> -> vector<8x16xf32>
    %c0_50 = arith.constant 0 : index
    %c0_51 = arith.constant 0 : index
    %67 = vector.load %arg16[%c0_50, %c0_51] : memref<16x16xf32, #tpu.memory_space<vmem>>, vector<16x16xf32>
    %cst_52 = arith.constant dense<0.000000e+00> : vector<8x16xf32>
    %68 = tpu.matmul %60, %67, %cst_52 {dimension_numbers = #tpu.dot_dimension_numbers<[1], [0], [0], [1], [0, 0, 1, 1], [], []>} : vector<8x16xf32>, vector<16x16xf32>, vector<8x16xf32> -> vector<8x16xf32>
    %69 = arith.addf %66, %68 : vector<8x16xf32>
    %c0_53 = arith.constant 0 : index
    %c0_54 = arith.constant 0 : index
    %70 = vector.load %arg17[%c0_53, %c0_54] : memref<16x16xf32, #tpu.memory_space<vmem>>, vector<16x16xf32>
    %cst_55 = arith.constant dense<0.000000e+00> : vector<8x16xf32>
    %71 = tpu.matmul %64, %70, %cst_55 {dimension_numbers = #tpu.dot_dimension_numbers<[1], [0], [0], [1], [0, 0, 1, 1], [], []>} : vector<8x16xf32>, vector<16x16xf32>, vector<8x16xf32> -> vector<8x16xf32>
    %72 = arith.addf %69, %71 : vector<8x16xf32>
    %c0_56 = arith.constant 0 : index
    %c0_57 = arith.constant 0 : index
    %73 = vector.load %arg18[%c0_56, %c0_57] : memref<1x16xf32, #tpu.memory_space<vmem>>, vector<1x16xf32>
    %74 = vector.broadcast %73 : vector<1x16xf32> to vector<8x16xf32>
    %75 = arith.addf %72, %74 : vector<8x16xf32>
    %c0_58 = arith.constant 0 : index
    %c0_59 = arith.constant 0 : index
    %76 = vector.load %arg12[%c0_58, %c0_59] : memref<16x16xf32, #tpu.memory_space<vmem>>, vector<16x16xf32>
    %cst_60 = arith.constant dense<0.000000e+00> : vector<16xf32>
    %77 = vector.multi_reduction <add>, %75, %cst_60 [0] : vector<8x16xf32> to vector<16xf32>
    %78 = vector.shape_cast %77 : vector<16xf32> to vector<1x16xf32>
    %cst_61 = arith.constant dense<0.000000e+00> : vector<1x16xf32>
    %79 = tpu.matmul %78, %76, %cst_61 {dimension_numbers = #tpu.dot_dimension_numbers<[1], [0], [0], [1], [0, 0, 1, 1], [], []>} : vector<1x16xf32>, vector<16x16xf32>, vector<1x16xf32> -> vector<1x16xf32>
    %80 = vector.broadcast %79 : vector<1x16xf32> to vector<8x16xf32>
    %81 = arith.subf %75, %80 : vector<8x16xf32>
    %82 = arith.mulf %81, %81 : vector<8x16xf32>
    %cst_62 = arith.constant dense<0.000000e+00> : vector<16xf32>
    %83 = vector.multi_reduction <add>, %82, %cst_62 [0] : vector<8x16xf32> to vector<16xf32>
    %84 = vector.shape_cast %83 : vector<16xf32> to vector<1x16xf32>
    %cst_63 = arith.constant dense<0.000000e+00> : vector<1x16xf32>
    %85 = tpu.matmul %84, %76, %cst_63 {dimension_numbers = #tpu.dot_dimension_numbers<[1], [0], [0], [1], [0, 0, 1, 1], [], []>} : vector<1x16xf32>, vector<16x16xf32>, vector<1x16xf32> -> vector<1x16xf32>
    %cst_64 = arith.constant 9.99999974E-6 : f32
    %86 = vector.broadcast %cst_64 : f32 to vector<1x16xf32>
    %87 = arith.addf %85, %86 : vector<1x16xf32>
    %88 = math.rsqrt %87 : vector<1x16xf32>
    %89 = vector.broadcast %88 : vector<1x16xf32> to vector<8x16xf32>
    %90 = arith.mulf %81, %89 : vector<8x16xf32>
    %c0_65 = arith.constant 0 : index
    %c0_66 = arith.constant 0 : index
    %91 = vector.load %arg19[%c0_65, %c0_66] : memref<1x16xf32, #tpu.memory_space<vmem>>, vector<1x16xf32>
    %92 = vector.broadcast %91 : vector<1x16xf32> to vector<8x16xf32>
    %93 = arith.mulf %90, %92 : vector<8x16xf32>
    %c0_67 = arith.constant 0 : index
    %c0_68 = arith.constant 0 : index
    %94 = vector.load %arg20[%c0_67, %c0_68] : memref<1x16xf32, #tpu.memory_space<vmem>>, vector<1x16xf32>
    %95 = vector.broadcast %94 : vector<1x16xf32> to vector<8x16xf32>
    %96 = arith.addf %93, %95 : vector<8x16xf32>
    %c0_69 = arith.constant 0 : index
    %c0_70 = arith.constant 0 : index
    %97 = vector.load %arg21[%c0_69, %c0_70] : memref<16x32xf32, #tpu.memory_space<vmem>>, vector<16x32xf32>
    %cst_71 = arith.constant dense<0.000000e+00> : vector<8x32xf32>
    %98 = tpu.matmul %96, %97, %cst_71 {dimension_numbers = #tpu.dot_dimension_numbers<[1], [0], [0], [1], [0, 0, 1, 1], [], []>} : vector<8x16xf32>, vector<16x32xf32>, vector<8x32xf32> -> vector<8x32xf32>
    %c0_72 = arith.constant 0 : index
    %c0_73 = arith.constant 0 : index
    %99 = vector.load %arg22[%c0_72, %c0_73] : memref<1x32xf32, #tpu.memory_space<vmem>>, vector<1x32xf32>
    %100 = vector.broadcast %99 : vector<1x32xf32> to vector<8x32xf32>
    %101 = arith.addf %98, %100 : vector<8x32xf32>
    %102 = arith.addf %13, %101 : vector<8x32xf32>
    %c0_74 = arith.constant 0 : index
    %c0_75 = arith.constant 0 : index
    %103 = vector.load %arg23[%c0_74, %c0_75] : memref<8x32xf32, #tpu.memory_space<vmem>>, vector<8x32xf32>
    tpu.vector_store %arg23[%c0_74, %c0_75], %102 {strides = array<i32>} : memref<8x32xf32, #tpu.memory_space<vmem>>, vector<8x32xf32>,
    return
  }
}

module attributes {stable_mosaic.version = 11 : i64} {
  func.func @_residual_kernel(%arg0: memref<16x64xf32, #tpu.memory_space<vmem>>, %arg1: memref<1x64xf32, #tpu.memory_space<vmem>>, %arg2: memref<1x64xf32, #tpu.memory_space<vmem>>, %arg3: memref<64x64xf32, #tpu.memory_space<vmem>>, %arg4: memref<64x32xf32, #tpu.memory_space<vmem>>, %arg5: memref<1x32xf32, #tpu.memory_space<vmem>>, %arg6: memref<1x32xf32, #tpu.memory_space<vmem>>, %arg7: memref<1x32xf32, #tpu.memory_space<vmem>>, %arg8: memref<32x32xf32, #tpu.memory_space<vmem>>, %arg9: memref<16x16xf32, #tpu.memory_space<vmem>>, %arg10: memref<16x16xf32, #tpu.memory_space<vmem>>, %arg11: memref<32x32xf32, #tpu.memory_space<vmem>>, %arg12: memref<32x32xf32, #tpu.memory_space<vmem>>, %arg13: memref<32x32xf32, #tpu.memory_space<vmem>>, %arg14: memref<1x32xf32, #tpu.memory_space<vmem>>, %arg15: memref<1x32xf32, #tpu.memory_space<vmem>>, %arg16: memref<1x32xf32, #tpu.memory_space<vmem>>, %arg17: memref<32x64xf32, #tpu.memory_space<vmem>>, %arg18: memref<1x64xf32, #tpu.memory_space<vmem>>, %arg19: memref<16x64xf32, #tpu.memory_space<vmem>>) attributes {dimension_semantics = [], scalar_prefetch = 0 : i64, scratch_operands = 0 : i64, tpu.core_type = #tpu.core_type<tc>} {
    %c0 = arith.constant 0 : index
    %c0_0 = arith.constant 0 : index
    %0 = vector.load %arg0[%c0, %c0_0] : memref<16x64xf32, #tpu.memory_space<vmem>>, vector<16x64xf32>
    %c0_1 = arith.constant 0 : index
    %c0_2 = arith.constant 0 : index
    %1 = vector.load %arg3[%c0_1, %c0_2] : memref<64x64xf32, #tpu.memory_space<vmem>>, vector<64x64xf32>
    %cst = arith.constant dense<0.000000e+00> : vector<64xf32>
    %2 = vector.multi_reduction <add>, %0, %cst [0] : vector<16x64xf32> to vector<64xf32>
    %3 = vector.shape_cast %2 : vector<64xf32> to vector<1x64xf32>
    %cst_3 = arith.constant dense<0.000000e+00> : vector<1x64xf32>
    %4 = tpu.matmul %3, %1, %cst_3 {dimension_numbers = #tpu.dot_dimension_numbers<[1], [0], [0], [1], [0, 0, 1, 1], [], []>} : vector<1x64xf32>, vector<64x64xf32>, vector<1x64xf32> -> vector<1x64xf32>
    %5 = vector.broadcast %4 : vector<1x64xf32> to vector<16x64xf32>
    %6 = arith.subf %0, %5 : vector<16x64xf32>
    %7 = arith.mulf %6, %6 : vector<16x64xf32>
    %cst_4 = arith.constant dense<0.000000e+00> : vector<64xf32>
    %8 = vector.multi_reduction <add>, %7, %cst_4 [0] : vector<16x64xf32> to vector<64xf32>
    %9 = vector.shape_cast %8 : vector<64xf32> to vector<1x64xf32>
    %cst_5 = arith.constant dense<0.000000e+00> : vector<1x64xf32>
    %10 = tpu.matmul %9, %1, %cst_5 {dimension_numbers = #tpu.dot_dimension_numbers<[1], [0], [0], [1], [0, 0, 1, 1], [], []>} : vector<1x64xf32>, vector<64x64xf32>, vector<1x64xf32> -> vector<1x64xf32>
    %cst_6 = arith.constant 9.99999974E-6 : f32
    %11 = vector.broadcast %cst_6 : f32 to vector<1x64xf32>
    %12 = arith.addf %10, %11 : vector<1x64xf32>
    %13 = math.rsqrt %12 : vector<1x64xf32>
    %14 = vector.broadcast %13 : vector<1x64xf32> to vector<16x64xf32>
    %15 = arith.mulf %6, %14 : vector<16x64xf32>
    %c0_7 = arith.constant 0 : index
    %c0_8 = arith.constant 0 : index
    %16 = vector.load %arg1[%c0_7, %c0_8] : memref<1x64xf32, #tpu.memory_space<vmem>>, vector<1x64xf32>
    %17 = vector.broadcast %16 : vector<1x64xf32> to vector<16x64xf32>
    %18 = arith.mulf %15, %17 : vector<16x64xf32>
    %c0_9 = arith.constant 0 : index
    %c0_10 = arith.constant 0 : index
    %19 = vector.load %arg2[%c0_9, %c0_10] : memref<1x64xf32, #tpu.memory_space<vmem>>, vector<1x64xf32>
    %20 = vector.broadcast %19 : vector<1x64xf32> to vector<16x64xf32>
    %21 = arith.addf %18, %20 : vector<16x64xf32>
    %c0_11 = arith.constant 0 : index
    %c0_12 = arith.constant 0 : index
    %22 = vector.load %arg4[%c0_11, %c0_12] : memref<64x32xf32, #tpu.memory_space<vmem>>, vector<64x32xf32>
    %cst_13 = arith.constant dense<0.000000e+00> : vector<16x32xf32>
    %23 = tpu.matmul %21, %22, %cst_13 {dimension_numbers = #tpu.dot_dimension_numbers<[1], [0], [0], [1], [0, 0, 1, 1], [], []>} : vector<16x64xf32>, vector<64x32xf32>, vector<16x32xf32> -> vector<16x32xf32>
    %c0_14 = arith.constant 0 : index
    %c0_15 = arith.constant 0 : index
    %24 = vector.load %arg5[%c0_14, %c0_15] : memref<1x32xf32, #tpu.memory_space<vmem>>, vector<1x32xf32>
    %25 = vector.broadcast %24 : vector<1x32xf32> to vector<16x32xf32>
    %26 = arith.addf %23, %25 : vector<16x32xf32>
    %c0_16 = arith.constant 0 : index
    %c0_17 = arith.constant 0 : index
    %27 = vector.load %arg8[%c0_16, %c0_17] : memref<32x32xf32, #tpu.memory_space<vmem>>, vector<32x32xf32>
    %cst_18 = arith.constant dense<0.000000e+00> : vector<32xf32>
    %28 = vector.multi_reduction <add>, %26, %cst_18 [0] : vector<16x32xf32> to vector<32xf32>
    %29 = vector.shape_cast %28 : vector<32xf32> to vector<1x32xf32>
    %cst_19 = arith.constant dense<0.000000e+00> : vector<1x32xf32>
    %30 = tpu.matmul %29, %27, %cst_19 {dimension_numbers = #tpu.dot_dimension_numbers<[1], [0], [0], [1], [0, 0, 1, 1], [], []>} : vector<1x32xf32>, vector<32x32xf32>, vector<1x32xf32> -> vector<1x32xf32>
    %31 = vector.broadcast %30 : vector<1x32xf32> to vector<16x32xf32>
    %32 = arith.subf %26, %31 : vector<16x32xf32>
    %33 = arith.mulf %32, %32 : vector<16x32xf32>
    %cst_20 = arith.constant dense<0.000000e+00> : vector<32xf32>
    %34 = vector.multi_reduction <add>, %33, %cst_20 [0] : vector<16x32xf32> to vector<32xf32>
    %35 = vector.shape_cast %34 : vector<32xf32> to vector<1x32xf32>
    %cst_21 = arith.constant dense<0.000000e+00> : vector<1x32xf32>
    %36 = tpu.matmul %35, %27, %cst_21 {dimension_numbers = #tpu.dot_dimension_numbers<[1], [0], [0], [1], [0, 0, 1, 1], [], []>} : vector<1x32xf32>, vector<32x32xf32>, vector<1x32xf32> -> vector<1x32xf32>
    %cst_22 = arith.constant 9.99999974E-6 : f32
    %37 = vector.broadcast %cst_22 : f32 to vector<1x32xf32>
    %38 = arith.addf %36, %37 : vector<1x32xf32>
    %39 = math.rsqrt %38 : vector<1x32xf32>
    %40 = vector.broadcast %39 : vector<1x32xf32> to vector<16x32xf32>
    %41 = arith.mulf %32, %40 : vector<16x32xf32>
    %c0_23 = arith.constant 0 : index
    %c0_24 = arith.constant 0 : index
    %42 = vector.load %arg6[%c0_23, %c0_24] : memref<1x32xf32, #tpu.memory_space<vmem>>, vector<1x32xf32>
    %43 = vector.broadcast %42 : vector<1x32xf32> to vector<16x32xf32>
    %44 = arith.mulf %41, %43 : vector<16x32xf32>
    %c0_25 = arith.constant 0 : index
    %c0_26 = arith.constant 0 : index
    %45 = vector.load %arg7[%c0_25, %c0_26] : memref<1x32xf32, #tpu.memory_space<vmem>>, vector<1x32xf32>
    %46 = vector.broadcast %45 : vector<1x32xf32> to vector<16x32xf32>
    %47 = arith.addf %44, %46 : vector<16x32xf32>
    %c0_27 = arith.constant 0 : index
    %c0_28 = arith.constant 0 : index
    %48 = vector.load %arg9[%c0_27, %c0_28] : memref<16x16xf32, #tpu.memory_space<vmem>>, vector<16x16xf32>
    %cst_29 = arith.constant dense<0.000000e+00> : vector<16x32xf32>
    %49 = tpu.matmul %48, %47, %cst_29 {dimension_numbers = #tpu.dot_dimension_numbers<[1], [0], [0], [1], [0, 0, 1, 1], [], []>} : vector<16x16xf32>, vector<16x32xf32>, vector<16x32xf32> -> vector<16x32xf32>
    %c0_30 = arith.constant 0 : index
    %c0_31 = arith.constant 0 : index
    %50 = vector.load %arg10[%c0_30, %c0_31] : memref<16x16xf32, #tpu.memory_space<vmem>>, vector<16x16xf32>
    %cst_32 = arith.constant dense<0.000000e+00> : vector<16x32xf32>
    %51 = tpu.matmul %50, %47, %cst_32 {dimension_numbers = #tpu.dot_dimension_numbers<[1], [0], [0], [1], [0, 0, 1, 1], [], []>} : vector<16x16xf32>, vector<16x32xf32>, vector<16x32xf32> -> vector<16x32xf32>
    %c0_33 = arith.constant 0 : index
    %c0_34 = arith.constant 0 : index
    %52 = vector.load %arg11[%c0_33, %c0_34] : memref<32x32xf32, #tpu.memory_space<vmem>>, vector<32x32xf32>
    %cst_35 = arith.constant dense<0.000000e+00> : vector<16x32xf32>
    %53 = tpu.matmul %49, %52, %cst_35 {dimension_numbers = #tpu.dot_dimension_numbers<[1], [0], [0], [1], [0, 0, 1, 1], [], []>} : vector<16x32xf32>, vector<32x32xf32>, vector<16x32xf32> -> vector<16x32xf32>
    %c0_36 = arith.constant 0 : index
    %c0_37 = arith.constant 0 : index
    %54 = vector.load %arg12[%c0_36, %c0_37] : memref<32x32xf32, #tpu.memory_space<vmem>>, vector<32x32xf32>
    %cst_38 = arith.constant dense<0.000000e+00> : vector<16x32xf32>
    %55 = tpu.matmul %47, %54, %cst_38 {dimension_numbers = #tpu.dot_dimension_numbers<[1], [0], [0], [1], [0, 0, 1, 1], [], []>} : vector<16x32xf32>, vector<32x32xf32>, vector<16x32xf32> -> vector<16x32xf32>
    %56 = arith.addf %53, %55 : vector<16x32xf32>
    %c0_39 = arith.constant 0 : index
    %c0_40 = arith.constant 0 : index
    %57 = vector.load %arg13[%c0_39, %c0_40] : memref<32x32xf32, #tpu.memory_space<vmem>>, vector<32x32xf32>
    %cst_41 = arith.constant dense<0.000000e+00> : vector<16x32xf32>
    %58 = tpu.matmul %51, %57, %cst_41 {dimension_numbers = #tpu.dot_dimension_numbers<[1], [0], [0], [1], [0, 0, 1, 1], [], []>} : vector<16x32xf32>, vector<32x32xf32>, vector<16x32xf32> -> vector<16x32xf32>
    %59 = arith.addf %56, %58 : vector<16x32xf32>
    %c0_42 = arith.constant 0 : index
    %c0_43 = arith.constant 0 : index
    %60 = vector.load %arg14[%c0_42, %c0_43] : memref<1x32xf32, #tpu.memory_space<vmem>>, vector<1x32xf32>
    %61 = vector.broadcast %60 : vector<1x32xf32> to vector<16x32xf32>
    %62 = arith.addf %59, %61 : vector<16x32xf32>
    %c0_44 = arith.constant 0 : index
    %c0_45 = arith.constant 0 : index
    %63 = vector.load %arg8[%c0_44, %c0_45] : memref<32x32xf32, #tpu.memory_space<vmem>>, vector<32x32xf32>
    %cst_46 = arith.constant dense<0.000000e+00> : vector<32xf32>
    %64 = vector.multi_reduction <add>, %62, %cst_46 [0] : vector<16x32xf32> to vector<32xf32>
    %65 = vector.shape_cast %64 : vector<32xf32> to vector<1x32xf32>
    %cst_47 = arith.constant dense<0.000000e+00> : vector<1x32xf32>
    %66 = tpu.matmul %65, %63, %cst_47 {dimension_numbers = #tpu.dot_dimension_numbers<[1], [0], [0], [1], [0, 0, 1, 1], [], []>} : vector<1x32xf32>, vector<32x32xf32>, vector<1x32xf32> -> vector<1x32xf32>
    %67 = vector.broadcast %66 : vector<1x32xf32> to vector<16x32xf32>
    %68 = arith.subf %62, %67 : vector<16x32xf32>
    %69 = arith.mulf %68, %68 : vector<16x32xf32>
    %cst_48 = arith.constant dense<0.000000e+00> : vector<32xf32>
    %70 = vector.multi_reduction <add>, %69, %cst_48 [0] : vector<16x32xf32> to vector<32xf32>
    %71 = vector.shape_cast %70 : vector<32xf32> to vector<1x32xf32>
    %cst_49 = arith.constant dense<0.000000e+00> : vector<1x32xf32>
    %72 = tpu.matmul %71, %63, %cst_49 {dimension_numbers = #tpu.dot_dimension_numbers<[1], [0], [0], [1], [0, 0, 1, 1], [], []>} : vector<1x32xf32>, vector<32x32xf32>, vector<1x32xf32> -> vector<1x32xf32>
    %cst_50 = arith.constant 9.99999974E-6 : f32
    %73 = vector.broadcast %cst_50 : f32 to vector<1x32xf32>
    %74 = arith.addf %72, %73 : vector<1x32xf32>
    %75 = math.rsqrt %74 : vector<1x32xf32>
    %76 = vector.broadcast %75 : vector<1x32xf32> to vector<16x32xf32>
    %77 = arith.mulf %68, %76 : vector<16x32xf32>
    %c0_51 = arith.constant 0 : index
    %c0_52 = arith.constant 0 : index
    %78 = vector.load %arg15[%c0_51, %c0_52] : memref<1x32xf32, #tpu.memory_space<vmem>>, vector<1x32xf32>
    %79 = vector.broadcast %78 : vector<1x32xf32> to vector<16x32xf32>
    %80 = arith.mulf %77, %79 : vector<16x32xf32>
    %c0_53 = arith.constant 0 : index
    %c0_54 = arith.constant 0 : index
    %81 = vector.load %arg16[%c0_53, %c0_54] : memref<1x32xf32, #tpu.memory_space<vmem>>, vector<1x32xf32>
    %82 = vector.broadcast %81 : vector<1x32xf32> to vector<16x32xf32>
    %83 = arith.addf %80, %82 : vector<16x32xf32>
    %c0_55 = arith.constant 0 : index
    %c0_56 = arith.constant 0 : index
    %84 = vector.load %arg17[%c0_55, %c0_56] : memref<32x64xf32, #tpu.memory_space<vmem>>, vector<32x64xf32>
    %cst_57 = arith.constant dense<0.000000e+00> : vector<16x64xf32>
    %85 = tpu.matmul %83, %84, %cst_57 {dimension_numbers = #tpu.dot_dimension_numbers<[1], [0], [0], [1], [0, 0, 1, 1], [], []>} : vector<16x32xf32>, vector<32x64xf32>, vector<16x64xf32> -> vector<16x64xf32>
    %c0_58 = arith.constant 0 : index
    %c0_59 = arith.constant 0 : index
    %86 = vector.load %arg18[%c0_58, %c0_59] : memref<1x64xf32, #tpu.memory_space<vmem>>, vector<1x64xf32>
    %87 = vector.broadcast %86 : vector<1x64xf32> to vector<16x64xf32>
    %88 = arith.addf %85, %87 : vector<16x64xf32>
    %89 = arith.addf %0, %88 : vector<16x64xf32>
    %c0_60 = arith.constant 0 : index
    %c0_61 = arith.constant 0 : index
    %90 = vector.load %arg19[%c0_60, %c0_61] : memref<16x64xf32, #tpu.memory_space<vmem>>, vector<16x64xf32>
    tpu.vector_store %arg19[%c0_60, %c0_61], %89 {strides = array<i32>} : memref<16x64xf32, #tpu.memory_space<vmem>>, vector<16x64xf32>,
    return
  }
}

module attributes {stable_mosaic.version = 11 : i64} {
  func.func @_residual_kernel(%arg0: memref<8x32xf32, #tpu.memory_space<vmem>>, %arg1: memref<4x8xf32, #tpu.memory_space<vmem>>, %arg2: memref<4x8xf32, #tpu.memory_space<vmem>>, %arg3: memref<32x16xf32, #tpu.memory_space<vmem>>, %arg4: memref<32x16xf32, #tpu.memory_space<vmem>>, %arg5: memref<1x16xf32, #tpu.memory_space<vmem>>, %arg6: memref<1x16xf32, #tpu.memory_space<vmem>>, %arg7: memref<16x16xf32, #tpu.memory_space<vmem>>, %arg8: memref<16x8xf32, #tpu.memory_space<vmem>>, %arg9: memref<1x8xf32, #tpu.memory_space<vmem>>, %arg10: memref<1x8xf32, #tpu.memory_space<vmem>>, %arg11: memref<1x8xf32, #tpu.memory_space<vmem>>, %arg12: memref<8x8xf32, #tpu.memory_space<vmem>>, %arg13: memref<4x4xf32, #tpu.memory_space<vmem>>, %arg14: memref<4x4xf32, #tpu.memory_space<vmem>>, %arg15: memref<8x8xf32, #tpu.memory_space<vmem>>, %arg16: memref<8x8xf32, #tpu.memory_space<vmem>>, %arg17: memref<8x8xf32, #tpu.memory_space<vmem>>, %arg18: memref<1x8xf32, #tpu.memory_space<vmem>>, %arg19: memref<1x8xf32, #tpu.memory_space<vmem>>, %arg20: memref<1x8xf32, #tpu.memory_space<vmem>>, %arg21: memref<8x16xf32, #tpu.memory_space<vmem>>, %arg22: memref<1x16xf32, #tpu.memory_space<vmem>>, %arg23: memref<4x16xf32, #tpu.memory_space<vmem>>) attributes {dimension_semantics = [], scalar_prefetch = 0 : i64, scratch_operands = 0 : i64, tpu.core_type = #tpu.core_type<tc>} {
    %c0 = arith.constant 0 : index
    %c0_0 = arith.constant 0 : index
    %0 = vector.load %arg0[%c0, %c0_0] : memref<8x32xf32, #tpu.memory_space<vmem>>, vector<8x32xf32>
    %c0_1 = arith.constant 0 : index
    %c0_2 = arith.constant 0 : index
    %1 = vector.load %arg1[%c0_1, %c0_2] : memref<4x8xf32, #tpu.memory_space<vmem>>, vector<4x8xf32>
    %cst = arith.constant dense<0.000000e+00> : vector<4x32xf32>
    %2 = tpu.matmul %1, %0, %cst {dimension_numbers = #tpu.dot_dimension_numbers<[1], [0], [0], [1], [0, 0, 1, 1], [], []>} : vector<4x8xf32>, vector<8x32xf32>, vector<4x32xf32> -> vector<4x32xf32>
    %c0_3 = arith.constant 0 : index
    %c0_4 = arith.constant 0 : index
    %3 = vector.load %arg2[%c0_3, %c0_4] : memref<4x8xf32, #tpu.memory_space<vmem>>, vector<4x8xf32>
    %cst_5 = arith.constant dense<0.000000e+00> : vector<4x32xf32>
    %4 = tpu.matmul %3, %0, %cst_5 {dimension_numbers = #tpu.dot_dimension_numbers<[1], [0], [0], [1], [0, 0, 1, 1], [], []>} : vector<4x8xf32>, vector<8x32xf32>, vector<4x32xf32> -> vector<4x32xf32>
    %c0_6 = arith.constant 0 : index
    %c0_7 = arith.constant 0 : index
    %5 = vector.load %arg3[%c0_6, %c0_7] : memref<32x16xf32, #tpu.memory_space<vmem>>, vector<32x16xf32>
    %c0_8 = arith.constant 0 : index
    %c0_9 = arith.constant 0 : index
    %6 = vector.load %arg4[%c0_8, %c0_9] : memref<32x16xf32, #tpu.memory_space<vmem>>, vector<32x16xf32>
    %cst_10 = arith.constant dense<0.000000e+00> : vector<4x16xf32>
    %7 = tpu.matmul %2, %5, %cst_10 {dimension_numbers = #tpu.dot_dimension_numbers<[1], [0], [0], [1], [0, 0, 1, 1], [], []>} : vector<4x32xf32>, vector<32x16xf32>, vector<4x16xf32> -> vector<4x16xf32>
    %cst_11 = arith.constant dense<0.000000e+00> : vector<4x16xf32>
    %8 = tpu.matmul %2, %6, %cst_11 {dimension_numbers = #tpu.dot_dimension_numbers<[1], [0], [0], [1], [0, 0, 1, 1], [], []>} : vector<4x32xf32>, vector<32x16xf32>, vector<4x16xf32> -> vector<4x16xf32>
    %9 = arith.maximumf %7, %8 : vector<4x16xf32>
    %cst_12 = arith.constant dense<0.000000e+00> : vector<4x16xf32>
    %10 = tpu.matmul %4, %5, %cst_12 {dimension_numbers = #tpu.dot_dimension_numbers<[1], [0], [0], [1], [0, 0, 1, 1], [], []>} : vector<4x32xf32>, vector<32x16xf32>, vector<4x16xf32> -> vector<4x16xf32>
    %cst_13 = arith.constant dense<0.000000e+00> : vector<4x16xf32>
    %11 = tpu.matmul %4, %6, %cst_13 {dimension_numbers = #tpu.dot_dimension_numbers<[1], [0], [0], [1], [0, 0, 1, 1], [], []>} : vector<4x32xf32>, vector<32x16xf32>, vector<4x16xf32> -> vector<4x16xf32>
    %12 = arith.maximumf %10, %11 : vector<4x16xf32>
    %13 = arith.maximumf %9, %12 : vector<4x16xf32>
    %c0_14 = arith.constant 0 : index
    %c0_15 = arith.constant 0 : index
    %14 = vector.load %arg7[%c0_14, %c0_15] : memref<16x16xf32, #tpu.memory_space<vmem>>, vector<16x16xf32>
    %cst_16 = arith.constant dense<0.000000e+00> : vector<16xf32>
    %15 = vector.multi_reduction <add>, %13, %cst_16 [0] : vector<4x16xf32> to vector<16xf32>
    %16 = vector.shape_cast %15 : vector<16xf32> to vector<1x16xf32>
    %cst_17 = arith.constant dense<0.000000e+00> : vector<1x16xf32>
    %17 = tpu.matmul %16, %14, %cst_17 {dimension_numbers = #tpu.dot_dimension_numbers<[1], [0], [0], [1], [0, 0, 1, 1], [], []>} : vector<1x16xf32>, vector<16x16xf32>, vector<1x16xf32> -> vector<1x16xf32>
    %18 = vector.broadcast %17 : vector<1x16xf32> to vector<4x16xf32>
    %19 = arith.subf %13, %18 : vector<4x16xf32>
    %20 = arith.mulf %19, %19 : vector<4x16xf32>
    %cst_18 = arith.constant dense<0.000000e+00> : vector<16xf32>
    %21 = vector.multi_reduction <add>, %20, %cst_18 [0] : vector<4x16xf32> to vector<16xf32>
    %22 = vector.shape_cast %21 : vector<16xf32> to vector<1x16xf32>
    %cst_19 = arith.constant dense<0.000000e+00> : vector<1x16xf32>
    %23 = tpu.matmul %22, %14, %cst_19 {dimension_numbers = #tpu.dot_dimension_numbers<[1], [0], [0], [1], [0, 0, 1, 1], [], []>} : vector<1x16xf32>, vector<16x16xf32>, vector<1x16xf32> -> vector<1x16xf32>
    %cst_20 = arith.constant 9.99999974E-6 : f32
    %24 = vector.broadcast %cst_20 : f32 to vector<1x16xf32>
    %25 = arith.addf %23, %24 : vector<1x16xf32>
    %26 = math.rsqrt %25 : vector<1x16xf32>
    %27 = vector.broadcast %26 : vector<1x16xf32> to vector<4x16xf32>
    %28 = arith.mulf %19, %27 : vector<4x16xf32>
    %c0_21 = arith.constant 0 : index
    %c0_22 = arith.constant 0 : index
    %29 = vector.load %arg5[%c0_21, %c0_22] : memref<1x16xf32, #tpu.memory_space<vmem>>, vector<1x16xf32>
    %30 = vector.broadcast %29 : vector<1x16xf32> to vector<4x16xf32>
    %31 = arith.mulf %28, %30 : vector<4x16xf32>
    %c0_23 = arith.constant 0 : index
    %c0_24 = arith.constant 0 : index
    %32 = vector.load %arg6[%c0_23, %c0_24] : memref<1x16xf32, #tpu.memory_space<vmem>>, vector<1x16xf32>
    %33 = vector.broadcast %32 : vector<1x16xf32> to vector<4x16xf32>
    %34 = arith.addf %31, %33 : vector<4x16xf32>
    %c0_25 = arith.constant 0 : index
    %c0_26 = arith.constant 0 : index
    %35 = vector.load %arg8[%c0_25, %c0_26] : memref<16x8xf32, #tpu.memory_space<vmem>>, vector<16x8xf32>
    %cst_27 = arith.constant dense<0.000000e+00> : vector<4x8xf32>
    %36 = tpu.matmul %34, %35, %cst_27 {dimension_numbers = #tpu.dot_dimension_numbers<[1], [0], [0], [1], [0, 0, 1, 1], [], []>} : vector<4x16xf32>, vector<16x8xf32>, vector<4x8xf32> -> vector<4x8xf32>
    %c0_28 = arith.constant 0 : index
    %c0_29 = arith.constant 0 : index
    %37 = vector.load %arg9[%c0_28, %c0_29] : memref<1x8xf32, #tpu.memory_space<vmem>>, vector<1x8xf32>
    %38 = vector.broadcast %37 : vector<1x8xf32> to vector<4x8xf32>
    %39 = arith.addf %36, %38 : vector<4x8xf32>
    %c0_30 = arith.constant 0 : index
    %c0_31 = arith.constant 0 : index
    %40 = vector.load %arg12[%c0_30, %c0_31] : memref<8x8xf32, #tpu.memory_space<vmem>>, vector<8x8xf32>
    %cst_32 = arith.constant dense<0.000000e+00> : vector<8xf32>
    %41 = vector.multi_reduction <add>, %39, %cst_32 [0] : vector<4x8xf32> to vector<8xf32>
    %42 = vector.shape_cast %41 : vector<8xf32> to vector<1x8xf32>
    %cst_33 = arith.constant dense<0.000000e+00> : vector<1x8xf32>
    %43 = tpu.matmul %42, %40, %cst_33 {dimension_numbers = #tpu.dot_dimension_numbers<[1], [0], [0], [1], [0, 0, 1, 1], [], []>} : vector<1x8xf32>, vector<8x8xf32>, vector<1x8xf32> -> vector<1x8xf32>
    %44 = vector.broadcast %43 : vector<1x8xf32> to vector<4x8xf32>
    %45 = arith.subf %39, %44 : vector<4x8xf32>
    %46 = arith.mulf %45, %45 : vector<4x8xf32>
    %cst_34 = arith.constant dense<0.000000e+00> : vector<8xf32>
    %47 = vector.multi_reduction <add>, %46, %cst_34 [0] : vector<4x8xf32> to vector<8xf32>
    %48 = vector.shape_cast %47 : vector<8xf32> to vector<1x8xf32>
    %cst_35 = arith.constant dense<0.000000e+00> : vector<1x8xf32>
    %49 = tpu.matmul %48, %40, %cst_35 {dimension_numbers = #tpu.dot_dimension_numbers<[1], [0], [0], [1], [0, 0, 1, 1], [], []>} : vector<1x8xf32>, vector<8x8xf32>, vector<1x8xf32> -> vector<1x8xf32>
    %cst_36 = arith.constant 9.99999974E-6 : f32
    %50 = vector.broadcast %cst_36 : f32 to vector<1x8xf32>
    %51 = arith.addf %49, %50 : vector<1x8xf32>
    %52 = math.rsqrt %51 : vector<1x8xf32>
    %53 = vector.broadcast %52 : vector<1x8xf32> to vector<4x8xf32>
    %54 = arith.mulf %45, %53 : vector<4x8xf32>
    %c0_37 = arith.constant 0 : index
    %c0_38 = arith.constant 0 : index
    %55 = vector.load %arg10[%c0_37, %c0_38] : memref<1x8xf32, #tpu.memory_space<vmem>>, vector<1x8xf32>
    %56 = vector.broadcast %55 : vector<1x8xf32> to vector<4x8xf32>
    %57 = arith.mulf %54, %56 : vector<4x8xf32>
    %c0_39 = arith.constant 0 : index
    %c0_40 = arith.constant 0 : index
    %58 = vector.load %arg11[%c0_39, %c0_40] : memref<1x8xf32, #tpu.memory_space<vmem>>, vector<1x8xf32>
    %59 = vector.broadcast %58 : vector<1x8xf32> to vector<4x8xf32>
    %60 = arith.addf %57, %59 : vector<4x8xf32>
    %c0_41 = arith.constant 0 : index
    %c0_42 = arith.constant 0 : index
    %61 = vector.load %arg13[%c0_41, %c0_42] : memref<4x4xf32, #tpu.memory_space<vmem>>, vector<4x4xf32>
    %cst_43 = arith.constant dense<0.000000e+00> : vector<4x8xf32>
    %62 = tpu.matmul %61, %60, %cst_43 {dimension_numbers = #tpu.dot_dimension_numbers<[1], [0], [0], [1], [0, 0, 1, 1], [], []>} : vector<4x4xf32>, vector<4x8xf32>, vector<4x8xf32> -> vector<4x8xf32>
    %c0_44 = arith.constant 0 : index
    %c0_45 = arith.constant 0 : index
    %63 = vector.load %arg14[%c0_44, %c0_45] : memref<4x4xf32, #tpu.memory_space<vmem>>, vector<4x4xf32>
    %cst_46 = arith.constant dense<0.000000e+00> : vector<4x8xf32>
    %64 = tpu.matmul %63, %60, %cst_46 {dimension_numbers = #tpu.dot_dimension_numbers<[1], [0], [0], [1], [0, 0, 1, 1], [], []>} : vector<4x4xf32>, vector<4x8xf32>, vector<4x8xf32> -> vector<4x8xf32>
    %c0_47 = arith.constant 0 : index
    %c0_48 = arith.constant 0 : index
    %65 = vector.load %arg15[%c0_47, %c0_48] : memref<8x8xf32, #tpu.memory_space<vmem>>, vector<8x8xf32>
    %cst_49 = arith.constant dense<0.000000e+00> : vector<4x8xf32>
    %66 = tpu.matmul %62, %65, %cst_49 {dimension_numbers = #tpu.dot_dimension_numbers<[1], [0], [0], [1], [0, 0, 1, 1], [], []>} : vector<4x8xf32>, vector<8x8xf32>, vector<4x8xf32> -> vector<4x8xf32>
    %c0_50 = arith.constant 0 : index
    %c0_51 = arith.constant 0 : index
    %67 = vector.load %arg16[%c0_50, %c0_51] : memref<8x8xf32, #tpu.memory_space<vmem>>, vector<8x8xf32>
    %cst_52 = arith.constant dense<0.000000e+00> : vector<4x8xf32>
    %68 = tpu.matmul %60, %67, %cst_52 {dimension_numbers = #tpu.dot_dimension_numbers<[1], [0], [0], [1], [0, 0, 1, 1], [], []>} : vector<4x8xf32>, vector<8x8xf32>, vector<4x8xf32> -> vector<4x8xf32>
    %69 = arith.addf %66, %68 : vector<4x8xf32>
    %c0_53 = arith.constant 0 : index
    %c0_54 = arith.constant 0 : index
    %70 = vector.load %arg17[%c0_53, %c0_54] : memref<8x8xf32, #tpu.memory_space<vmem>>, vector<8x8xf32>
    %cst_55 = arith.constant dense<0.000000e+00> : vector<4x8xf32>
    %71 = tpu.matmul %64, %70, %cst_55 {dimension_numbers = #tpu.dot_dimension_numbers<[1], [0], [0], [1], [0, 0, 1, 1], [], []>} : vector<4x8xf32>, vector<8x8xf32>, vector<4x8xf32> -> vector<4x8xf32>
    %72 = arith.addf %69, %71 : vector<4x8xf32>
    %c0_56 = arith.constant 0 : index
    %c0_57 = arith.constant 0 : index
    %73 = vector.load %arg18[%c0_56, %c0_57] : memref<1x8xf32, #tpu.memory_space<vmem>>, vector<1x8xf32>
    %74 = vector.broadcast %73 : vector<1x8xf32> to vector<4x8xf32>
    %75 = arith.addf %72, %74 : vector<4x8xf32>
    %c0_58 = arith.constant 0 : index
    %c0_59 = arith.constant 0 : index
    %76 = vector.load %arg12[%c0_58, %c0_59] : memref<8x8xf32, #tpu.memory_space<vmem>>, vector<8x8xf32>
    %cst_60 = arith.constant dense<0.000000e+00> : vector<8xf32>
    %77 = vector.multi_reduction <add>, %75, %cst_60 [0] : vector<4x8xf32> to vector<8xf32>
    %78 = vector.shape_cast %77 : vector<8xf32> to vector<1x8xf32>
    %cst_61 = arith.constant dense<0.000000e+00> : vector<1x8xf32>
    %79 = tpu.matmul %78, %76, %cst_61 {dimension_numbers = #tpu.dot_dimension_numbers<[1], [0], [0], [1], [0, 0, 1, 1], [], []>} : vector<1x8xf32>, vector<8x8xf32>, vector<1x8xf32> -> vector<1x8xf32>
    %80 = vector.broadcast %79 : vector<1x8xf32> to vector<4x8xf32>
    %81 = arith.subf %75, %80 : vector<4x8xf32>
    %82 = arith.mulf %81, %81 : vector<4x8xf32>
    %cst_62 = arith.constant dense<0.000000e+00> : vector<8xf32>
    %83 = vector.multi_reduction <add>, %82, %cst_62 [0] : vector<4x8xf32> to vector<8xf32>
    %84 = vector.shape_cast %83 : vector<8xf32> to vector<1x8xf32>
    %cst_63 = arith.constant dense<0.000000e+00> : vector<1x8xf32>
    %85 = tpu.matmul %84, %76, %cst_63 {dimension_numbers = #tpu.dot_dimension_numbers<[1], [0], [0], [1], [0, 0, 1, 1], [], []>} : vector<1x8xf32>, vector<8x8xf32>, vector<1x8xf32> -> vector<1x8xf32>
    %cst_64 = arith.constant 9.99999974E-6 : f32
    %86 = vector.broadcast %cst_64 : f32 to vector<1x8xf32>
    %87 = arith.addf %85, %86 : vector<1x8xf32>
    %88 = math.rsqrt %87 : vector<1x8xf32>
    %89 = vector.broadcast %88 : vector<1x8xf32> to vector<4x8xf32>
    %90 = arith.mulf %81, %89 : vector<4x8xf32>
    %c0_65 = arith.constant 0 : index
    %c0_66 = arith.constant 0 : index
    %91 = vector.load %arg19[%c0_65, %c0_66] : memref<1x8xf32, #tpu.memory_space<vmem>>, vector<1x8xf32>
    %92 = vector.broadcast %91 : vector<1x8xf32> to vector<4x8xf32>
    %93 = arith.mulf %90, %92 : vector<4x8xf32>
    %c0_67 = arith.constant 0 : index
    %c0_68 = arith.constant 0 : index
    %94 = vector.load %arg20[%c0_67, %c0_68] : memref<1x8xf32, #tpu.memory_space<vmem>>, vector<1x8xf32>
    %95 = vector.broadcast %94 : vector<1x8xf32> to vector<4x8xf32>
    %96 = arith.addf %93, %95 : vector<4x8xf32>
    %c0_69 = arith.constant 0 : index
    %c0_70 = arith.constant 0 : index
    %97 = vector.load %arg21[%c0_69, %c0_70] : memref<8x16xf32, #tpu.memory_space<vmem>>, vector<8x16xf32>
    %cst_71 = arith.constant dense<0.000000e+00> : vector<4x16xf32>
    %98 = tpu.matmul %96, %97, %cst_71 {dimension_numbers = #tpu.dot_dimension_numbers<[1], [0], [0], [1], [0, 0, 1, 1], [], []>} : vector<4x8xf32>, vector<8x16xf32>, vector<4x16xf32> -> vector<4x16xf32>
    %c0_72 = arith.constant 0 : index
    %c0_73 = arith.constant 0 : index
    %99 = vector.load %arg22[%c0_72, %c0_73] : memref<1x16xf32, #tpu.memory_space<vmem>>, vector<1x16xf32>
    %100 = vector.broadcast %99 : vector<1x16xf32> to vector<4x16xf32>
    %101 = arith.addf %98, %100 : vector<4x16xf32>
    %102 = arith.addf %13, %101 : vector<4x16xf32>
    %c0_74 = arith.constant 0 : index
    %c0_75 = arith.constant 0 : index
    %103 = vector.load %arg23[%c0_74, %c0_75] : memref<4x16xf32, #tpu.memory_space<vmem>>, vector<4x16xf32>
    tpu.vector_store %arg23[%c0_74, %c0_75], %102 {strides = array<i32>} : memref<4x16xf32, #tpu.memory_space<vmem>>, vector<4x16xf32>,
    return
  }
}

module attributes {stable_mosaic.version = 11 : i64} {
  func.func @_residual_kernel(%arg0: memref<8x32xf32, #tpu.memory_space<vmem>>, %arg1: memref<1x32xf32, #tpu.memory_space<vmem>>, %arg2: memref<1x32xf32, #tpu.memory_space<vmem>>, %arg3: memref<32x32xf32, #tpu.memory_space<vmem>>, %arg4: memref<32x16xf32, #tpu.memory_space<vmem>>, %arg5: memref<1x16xf32, #tpu.memory_space<vmem>>, %arg6: memref<1x16xf32, #tpu.memory_space<vmem>>, %arg7: memref<1x16xf32, #tpu.memory_space<vmem>>, %arg8: memref<16x16xf32, #tpu.memory_space<vmem>>, %arg9: memref<8x8xf32, #tpu.memory_space<vmem>>, %arg10: memref<8x8xf32, #tpu.memory_space<vmem>>, %arg11: memref<16x16xf32, #tpu.memory_space<vmem>>, %arg12: memref<16x16xf32, #tpu.memory_space<vmem>>, %arg13: memref<16x16xf32, #tpu.memory_space<vmem>>, %arg14: memref<1x16xf32, #tpu.memory_space<vmem>>, %arg15: memref<1x16xf32, #tpu.memory_space<vmem>>, %arg16: memref<1x16xf32, #tpu.memory_space<vmem>>, %arg17: memref<16x32xf32, #tpu.memory_space<vmem>>, %arg18: memref<1x32xf32, #tpu.memory_space<vmem>>, %arg19: memref<8x32xf32, #tpu.memory_space<vmem>>) attributes {dimension_semantics = [], scalar_prefetch = 0 : i64, scratch_operands = 0 : i64, tpu.core_type = #tpu.core_type<tc>} {
    %c0 = arith.constant 0 : index
    %c0_0 = arith.constant 0 : index
    %0 = vector.load %arg0[%c0, %c0_0] : memref<8x32xf32, #tpu.memory_space<vmem>>, vector<8x32xf32>
    %c0_1 = arith.constant 0 : index
    %c0_2 = arith.constant 0 : index
    %1 = vector.load %arg3[%c0_1, %c0_2] : memref<32x32xf32, #tpu.memory_space<vmem>>, vector<32x32xf32>
    %cst = arith.constant dense<0.000000e+00> : vector<32xf32>
    %2 = vector.multi_reduction <add>, %0, %cst [0] : vector<8x32xf32> to vector<32xf32>
    %3 = vector.shape_cast %2 : vector<32xf32> to vector<1x32xf32>
    %cst_3 = arith.constant dense<0.000000e+00> : vector<1x32xf32>
    %4 = tpu.matmul %3, %1, %cst_3 {dimension_numbers = #tpu.dot_dimension_numbers<[1], [0], [0], [1], [0, 0, 1, 1], [], []>} : vector<1x32xf32>, vector<32x32xf32>, vector<1x32xf32> -> vector<1x32xf32>
    %5 = vector.broadcast %4 : vector<1x32xf32> to vector<8x32xf32>
    %6 = arith.subf %0, %5 : vector<8x32xf32>
    %7 = arith.mulf %6, %6 : vector<8x32xf32>
    %cst_4 = arith.constant dense<0.000000e+00> : vector<32xf32>
    %8 = vector.multi_reduction <add>, %7, %cst_4 [0] : vector<8x32xf32> to vector<32xf32>
    %9 = vector.shape_cast %8 : vector<32xf32> to vector<1x32xf32>
    %cst_5 = arith.constant dense<0.000000e+00> : vector<1x32xf32>
    %10 = tpu.matmul %9, %1, %cst_5 {dimension_numbers = #tpu.dot_dimension_numbers<[1], [0], [0], [1], [0, 0, 1, 1], [], []>} : vector<1x32xf32>, vector<32x32xf32>, vector<1x32xf32> -> vector<1x32xf32>
    %cst_6 = arith.constant 9.99999974E-6 : f32
    %11 = vector.broadcast %cst_6 : f32 to vector<1x32xf32>
    %12 = arith.addf %10, %11 : vector<1x32xf32>
    %13 = math.rsqrt %12 : vector<1x32xf32>
    %14 = vector.broadcast %13 : vector<1x32xf32> to vector<8x32xf32>
    %15 = arith.mulf %6, %14 : vector<8x32xf32>
    %c0_7 = arith.constant 0 : index
    %c0_8 = arith.constant 0 : index
    %16 = vector.load %arg1[%c0_7, %c0_8] : memref<1x32xf32, #tpu.memory_space<vmem>>, vector<1x32xf32>
    %17 = vector.broadcast %16 : vector<1x32xf32> to vector<8x32xf32>
    %18 = arith.mulf %15, %17 : vector<8x32xf32>
    %c0_9 = arith.constant 0 : index
    %c0_10 = arith.constant 0 : index
    %19 = vector.load %arg2[%c0_9, %c0_10] : memref<1x32xf32, #tpu.memory_space<vmem>>, vector<1x32xf32>
    %20 = vector.broadcast %19 : vector<1x32xf32> to vector<8x32xf32>
    %21 = arith.addf %18, %20 : vector<8x32xf32>
    %c0_11 = arith.constant 0 : index
    %c0_12 = arith.constant 0 : index
    %22 = vector.load %arg4[%c0_11, %c0_12] : memref<32x16xf32, #tpu.memory_space<vmem>>, vector<32x16xf32>
    %cst_13 = arith.constant dense<0.000000e+00> : vector<8x16xf32>
    %23 = tpu.matmul %21, %22, %cst_13 {dimension_numbers = #tpu.dot_dimension_numbers<[1], [0], [0], [1], [0, 0, 1, 1], [], []>} : vector<8x32xf32>, vector<32x16xf32>, vector<8x16xf32> -> vector<8x16xf32>
    %c0_14 = arith.constant 0 : index
    %c0_15 = arith.constant 0 : index
    %24 = vector.load %arg5[%c0_14, %c0_15] : memref<1x16xf32, #tpu.memory_space<vmem>>, vector<1x16xf32>
    %25 = vector.broadcast %24 : vector<1x16xf32> to vector<8x16xf32>
    %26 = arith.addf %23, %25 : vector<8x16xf32>
    %c0_16 = arith.constant 0 : index
    %c0_17 = arith.constant 0 : index
    %27 = vector.load %arg8[%c0_16, %c0_17] : memref<16x16xf32, #tpu.memory_space<vmem>>, vector<16x16xf32>
    %cst_18 = arith.constant dense<0.000000e+00> : vector<16xf32>
    %28 = vector.multi_reduction <add>, %26, %cst_18 [0] : vector<8x16xf32> to vector<16xf32>
    %29 = vector.shape_cast %28 : vector<16xf32> to vector<1x16xf32>
    %cst_19 = arith.constant dense<0.000000e+00> : vector<1x16xf32>
    %30 = tpu.matmul %29, %27, %cst_19 {dimension_numbers = #tpu.dot_dimension_numbers<[1], [0], [0], [1], [0, 0, 1, 1], [], []>} : vector<1x16xf32>, vector<16x16xf32>, vector<1x16xf32> -> vector<1x16xf32>
    %31 = vector.broadcast %30 : vector<1x16xf32> to vector<8x16xf32>
    %32 = arith.subf %26, %31 : vector<8x16xf32>
    %33 = arith.mulf %32, %32 : vector<8x16xf32>
    %cst_20 = arith.constant dense<0.000000e+00> : vector<16xf32>
    %34 = vector.multi_reduction <add>, %33, %cst_20 [0] : vector<8x16xf32> to vector<16xf32>
    %35 = vector.shape_cast %34 : vector<16xf32> to vector<1x16xf32>
    %cst_21 = arith.constant dense<0.000000e+00> : vector<1x16xf32>
    %36 = tpu.matmul %35, %27, %cst_21 {dimension_numbers = #tpu.dot_dimension_numbers<[1], [0], [0], [1], [0, 0, 1, 1], [], []>} : vector<1x16xf32>, vector<16x16xf32>, vector<1x16xf32> -> vector<1x16xf32>
    %cst_22 = arith.constant 9.99999974E-6 : f32
    %37 = vector.broadcast %cst_22 : f32 to vector<1x16xf32>
    %38 = arith.addf %36, %37 : vector<1x16xf32>
    %39 = math.rsqrt %38 : vector<1x16xf32>
    %40 = vector.broadcast %39 : vector<1x16xf32> to vector<8x16xf32>
    %41 = arith.mulf %32, %40 : vector<8x16xf32>
    %c0_23 = arith.constant 0 : index
    %c0_24 = arith.constant 0 : index
    %42 = vector.load %arg6[%c0_23, %c0_24] : memref<1x16xf32, #tpu.memory_space<vmem>>, vector<1x16xf32>
    %43 = vector.broadcast %42 : vector<1x16xf32> to vector<8x16xf32>
    %44 = arith.mulf %41, %43 : vector<8x16xf32>
    %c0_25 = arith.constant 0 : index
    %c0_26 = arith.constant 0 : index
    %45 = vector.load %arg7[%c0_25, %c0_26] : memref<1x16xf32, #tpu.memory_space<vmem>>, vector<1x16xf32>
    %46 = vector.broadcast %45 : vector<1x16xf32> to vector<8x16xf32>
    %47 = arith.addf %44, %46 : vector<8x16xf32>
    %c0_27 = arith.constant 0 : index
    %c0_28 = arith.constant 0 : index
    %48 = vector.load %arg9[%c0_27, %c0_28] : memref<8x8xf32, #tpu.memory_space<vmem>>, vector<8x8xf32>
    %cst_29 = arith.constant dense<0.000000e+00> : vector<8x16xf32>
    %49 = tpu.matmul %48, %47, %cst_29 {dimension_numbers = #tpu.dot_dimension_numbers<[1], [0], [0], [1], [0, 0, 1, 1], [], []>} : vector<8x8xf32>, vector<8x16xf32>, vector<8x16xf32> -> vector<8x16xf32>
    %c0_30 = arith.constant 0 : index
    %c0_31 = arith.constant 0 : index
    %50 = vector.load %arg10[%c0_30, %c0_31] : memref<8x8xf32, #tpu.memory_space<vmem>>, vector<8x8xf32>
    %cst_32 = arith.constant dense<0.000000e+00> : vector<8x16xf32>
    %51 = tpu.matmul %50, %47, %cst_32 {dimension_numbers = #tpu.dot_dimension_numbers<[1], [0], [0], [1], [0, 0, 1, 1], [], []>} : vector<8x8xf32>, vector<8x16xf32>, vector<8x16xf32> -> vector<8x16xf32>
    %c0_33 = arith.constant 0 : index
    %c0_34 = arith.constant 0 : index
    %52 = vector.load %arg11[%c0_33, %c0_34] : memref<16x16xf32, #tpu.memory_space<vmem>>, vector<16x16xf32>
    %cst_35 = arith.constant dense<0.000000e+00> : vector<8x16xf32>
    %53 = tpu.matmul %49, %52, %cst_35 {dimension_numbers = #tpu.dot_dimension_numbers<[1], [0], [0], [1], [0, 0, 1, 1], [], []>} : vector<8x16xf32>, vector<16x16xf32>, vector<8x16xf32> -> vector<8x16xf32>
    %c0_36 = arith.constant 0 : index
    %c0_37 = arith.constant 0 : index
    %54 = vector.load %arg12[%c0_36, %c0_37] : memref<16x16xf32, #tpu.memory_space<vmem>>, vector<16x16xf32>
    %cst_38 = arith.constant dense<0.000000e+00> : vector<8x16xf32>
    %55 = tpu.matmul %47, %54, %cst_38 {dimension_numbers = #tpu.dot_dimension_numbers<[1], [0], [0], [1], [0, 0, 1, 1], [], []>} : vector<8x16xf32>, vector<16x16xf32>, vector<8x16xf32> -> vector<8x16xf32>
    %56 = arith.addf %53, %55 : vector<8x16xf32>
    %c0_39 = arith.constant 0 : index
    %c0_40 = arith.constant 0 : index
    %57 = vector.load %arg13[%c0_39, %c0_40] : memref<16x16xf32, #tpu.memory_space<vmem>>, vector<16x16xf32>
    %cst_41 = arith.constant dense<0.000000e+00> : vector<8x16xf32>
    %58 = tpu.matmul %51, %57, %cst_41 {dimension_numbers = #tpu.dot_dimension_numbers<[1], [0], [0], [1], [0, 0, 1, 1], [], []>} : vector<8x16xf32>, vector<16x16xf32>, vector<8x16xf32> -> vector<8x16xf32>
    %59 = arith.addf %56, %58 : vector<8x16xf32>
    %c0_42 = arith.constant 0 : index
    %c0_43 = arith.constant 0 : index
    %60 = vector.load %arg14[%c0_42, %c0_43] : memref<1x16xf32, #tpu.memory_space<vmem>>, vector<1x16xf32>
    %61 = vector.broadcast %60 : vector<1x16xf32> to vector<8x16xf32>
    %62 = arith.addf %59, %61 : vector<8x16xf32>
    %c0_44 = arith.constant 0 : index
    %c0_45 = arith.constant 0 : index
    %63 = vector.load %arg8[%c0_44, %c0_45] : memref<16x16xf32, #tpu.memory_space<vmem>>, vector<16x16xf32>
    %cst_46 = arith.constant dense<0.000000e+00> : vector<16xf32>
    %64 = vector.multi_reduction <add>, %62, %cst_46 [0] : vector<8x16xf32> to vector<16xf32>
    %65 = vector.shape_cast %64 : vector<16xf32> to vector<1x16xf32>
    %cst_47 = arith.constant dense<0.000000e+00> : vector<1x16xf32>
    %66 = tpu.matmul %65, %63, %cst_47 {dimension_numbers = #tpu.dot_dimension_numbers<[1], [0], [0], [1], [0, 0, 1, 1], [], []>} : vector<1x16xf32>, vector<16x16xf32>, vector<1x16xf32> -> vector<1x16xf32>
    %67 = vector.broadcast %66 : vector<1x16xf32> to vector<8x16xf32>
    %68 = arith.subf %62, %67 : vector<8x16xf32>
    %69 = arith.mulf %68, %68 : vector<8x16xf32>
    %cst_48 = arith.constant dense<0.000000e+00> : vector<16xf32>
    %70 = vector.multi_reduction <add>, %69, %cst_48 [0] : vector<8x16xf32> to vector<16xf32>
    %71 = vector.shape_cast %70 : vector<16xf32> to vector<1x16xf32>
    %cst_49 = arith.constant dense<0.000000e+00> : vector<1x16xf32>
    %72 = tpu.matmul %71, %63, %cst_49 {dimension_numbers = #tpu.dot_dimension_numbers<[1], [0], [0], [1], [0, 0, 1, 1], [], []>} : vector<1x16xf32>, vector<16x16xf32>, vector<1x16xf32> -> vector<1x16xf32>
    %cst_50 = arith.constant 9.99999974E-6 : f32
    %73 = vector.broadcast %cst_50 : f32 to vector<1x16xf32>
    %74 = arith.addf %72, %73 : vector<1x16xf32>
    %75 = math.rsqrt %74 : vector<1x16xf32>
    %76 = vector.broadcast %75 : vector<1x16xf32> to vector<8x16xf32>
    %77 = arith.mulf %68, %76 : vector<8x16xf32>
    %c0_51 = arith.constant 0 : index
    %c0_52 = arith.constant 0 : index
    %78 = vector.load %arg15[%c0_51, %c0_52] : memref<1x16xf32, #tpu.memory_space<vmem>>, vector<1x16xf32>
    %79 = vector.broadcast %78 : vector<1x16xf32> to vector<8x16xf32>
    %80 = arith.mulf %77, %79 : vector<8x16xf32>
    %c0_53 = arith.constant 0 : index
    %c0_54 = arith.constant 0 : index
    %81 = vector.load %arg16[%c0_53, %c0_54] : memref<1x16xf32, #tpu.memory_space<vmem>>, vector<1x16xf32>
    %82 = vector.broadcast %81 : vector<1x16xf32> to vector<8x16xf32>
    %83 = arith.addf %80, %82 : vector<8x16xf32>
    %c0_55 = arith.constant 0 : index
    %c0_56 = arith.constant 0 : index
    %84 = vector.load %arg17[%c0_55, %c0_56] : memref<16x32xf32, #tpu.memory_space<vmem>>, vector<16x32xf32>
    %cst_57 = arith.constant dense<0.000000e+00> : vector<8x32xf32>
    %85 = tpu.matmul %83, %84, %cst_57 {dimension_numbers = #tpu.dot_dimension_numbers<[1], [0], [0], [1], [0, 0, 1, 1], [], []>} : vector<8x16xf32>, vector<16x32xf32>, vector<8x32xf32> -> vector<8x32xf32>
    %c0_58 = arith.constant 0 : index
    %c0_59 = arith.constant 0 : index
    %86 = vector.load %arg18[%c0_58, %c0_59] : memref<1x32xf32, #tpu.memory_space<vmem>>, vector<1x32xf32>
    %87 = vector.broadcast %86 : vector<1x32xf32> to vector<8x32xf32>
    %88 = arith.addf %85, %87 : vector<8x32xf32>
    %89 = arith.addf %0, %88 : vector<8x32xf32>
    %c0_60 = arith.constant 0 : index
    %c0_61 = arith.constant 0 : index
    %90 = vector.load %arg19[%c0_60, %c0_61] : memref<8x32xf32, #tpu.memory_space<vmem>>, vector<8x32xf32>
    tpu.vector_store %arg19[%c0_60, %c0_61], %89 {strides = array<i32>} : memref<8x32xf32, #tpu.memory_space<vmem>>, vector<8x32xf32>,
    return
  }
}

module attributes {stable_mosaic.version = 11 : i64} {
  func.func @_residual_kernel(%arg0: memref<4x16xf32, #tpu.memory_space<vmem>>, %arg1: memref<1x16xf32, #tpu.memory_space<vmem>>, %arg2: memref<1x16xf32, #tpu.memory_space<vmem>>, %arg3: memref<16x16xf32, #tpu.memory_space<vmem>>, %arg4: memref<16x8xf32, #tpu.memory_space<vmem>>, %arg5: memref<1x8xf32, #tpu.memory_space<vmem>>, %arg6: memref<1x8xf32, #tpu.memory_space<vmem>>, %arg7: memref<1x8xf32, #tpu.memory_space<vmem>>, %arg8: memref<8x8xf32, #tpu.memory_space<vmem>>, %arg9: memref<4x4xf32, #tpu.memory_space<vmem>>, %arg10: memref<4x4xf32, #tpu.memory_space<vmem>>, %arg11: memref<8x8xf32, #tpu.memory_space<vmem>>, %arg12: memref<8x8xf32, #tpu.memory_space<vmem>>, %arg13: memref<8x8xf32, #tpu.memory_space<vmem>>, %arg14: memref<1x8xf32, #tpu.memory_space<vmem>>, %arg15: memref<1x8xf32, #tpu.memory_space<vmem>>, %arg16: memref<1x8xf32, #tpu.memory_space<vmem>>, %arg17: memref<8x16xf32, #tpu.memory_space<vmem>>, %arg18: memref<1x16xf32, #tpu.memory_space<vmem>>, %arg19: memref<4x16xf32, #tpu.memory_space<vmem>>) attributes {dimension_semantics = [], scalar_prefetch = 0 : i64, scratch_operands = 0 : i64, tpu.core_type = #tpu.core_type<tc>} {
    %c0 = arith.constant 0 : index
    %c0_0 = arith.constant 0 : index
    %0 = vector.load %arg0[%c0, %c0_0] : memref<4x16xf32, #tpu.memory_space<vmem>>, vector<4x16xf32>
    %c0_1 = arith.constant 0 : index
    %c0_2 = arith.constant 0 : index
    %1 = vector.load %arg3[%c0_1, %c0_2] : memref<16x16xf32, #tpu.memory_space<vmem>>, vector<16x16xf32>
    %cst = arith.constant dense<0.000000e+00> : vector<16xf32>
    %2 = vector.multi_reduction <add>, %0, %cst [0] : vector<4x16xf32> to vector<16xf32>
    %3 = vector.shape_cast %2 : vector<16xf32> to vector<1x16xf32>
    %cst_3 = arith.constant dense<0.000000e+00> : vector<1x16xf32>
    %4 = tpu.matmul %3, %1, %cst_3 {dimension_numbers = #tpu.dot_dimension_numbers<[1], [0], [0], [1], [0, 0, 1, 1], [], []>} : vector<1x16xf32>, vector<16x16xf32>, vector<1x16xf32> -> vector<1x16xf32>
    %5 = vector.broadcast %4 : vector<1x16xf32> to vector<4x16xf32>
    %6 = arith.subf %0, %5 : vector<4x16xf32>
    %7 = arith.mulf %6, %6 : vector<4x16xf32>
    %cst_4 = arith.constant dense<0.000000e+00> : vector<16xf32>
    %8 = vector.multi_reduction <add>, %7, %cst_4 [0] : vector<4x16xf32> to vector<16xf32>
    %9 = vector.shape_cast %8 : vector<16xf32> to vector<1x16xf32>
    %cst_5 = arith.constant dense<0.000000e+00> : vector<1x16xf32>
    %10 = tpu.matmul %9, %1, %cst_5 {dimension_numbers = #tpu.dot_dimension_numbers<[1], [0], [0], [1], [0, 0, 1, 1], [], []>} : vector<1x16xf32>, vector<16x16xf32>, vector<1x16xf32> -> vector<1x16xf32>
    %cst_6 = arith.constant 9.99999974E-6 : f32
    %11 = vector.broadcast %cst_6 : f32 to vector<1x16xf32>
    %12 = arith.addf %10, %11 : vector<1x16xf32>
    %13 = math.rsqrt %12 : vector<1x16xf32>
    %14 = vector.broadcast %13 : vector<1x16xf32> to vector<4x16xf32>
    %15 = arith.mulf %6, %14 : vector<4x16xf32>
    %c0_7 = arith.constant 0 : index
    %c0_8 = arith.constant 0 : index
    %16 = vector.load %arg1[%c0_7, %c0_8] : memref<1x16xf32, #tpu.memory_space<vmem>>, vector<1x16xf32>
    %17 = vector.broadcast %16 : vector<1x16xf32> to vector<4x16xf32>
    %18 = arith.mulf %15, %17 : vector<4x16xf32>
    %c0_9 = arith.constant 0 : index
    %c0_10 = arith.constant 0 : index
    %19 = vector.load %arg2[%c0_9, %c0_10] : memref<1x16xf32, #tpu.memory_space<vmem>>, vector<1x16xf32>
    %20 = vector.broadcast %19 : vector<1x16xf32> to vector<4x16xf32>
    %21 = arith.addf %18, %20 : vector<4x16xf32>
    %c0_11 = arith.constant 0 : index
    %c0_12 = arith.constant 0 : index
    %22 = vector.load %arg4[%c0_11, %c0_12] : memref<16x8xf32, #tpu.memory_space<vmem>>, vector<16x8xf32>
    %cst_13 = arith.constant dense<0.000000e+00> : vector<4x8xf32>
    %23 = tpu.matmul %21, %22, %cst_13 {dimension_numbers = #tpu.dot_dimension_numbers<[1], [0], [0], [1], [0, 0, 1, 1], [], []>} : vector<4x16xf32>, vector<16x8xf32>, vector<4x8xf32> -> vector<4x8xf32>
    %c0_14 = arith.constant 0 : index
    %c0_15 = arith.constant 0 : index
    %24 = vector.load %arg5[%c0_14, %c0_15] : memref<1x8xf32, #tpu.memory_space<vmem>>, vector<1x8xf32>
    %25 = vector.broadcast %24 : vector<1x8xf32> to vector<4x8xf32>
    %26 = arith.addf %23, %25 : vector<4x8xf32>
    %c0_16 = arith.constant 0 : index
    %c0_17 = arith.constant 0 : index
    %27 = vector.load %arg8[%c0_16, %c0_17] : memref<8x8xf32, #tpu.memory_space<vmem>>, vector<8x8xf32>
    %cst_18 = arith.constant dense<0.000000e+00> : vector<8xf32>
    %28 = vector.multi_reduction <add>, %26, %cst_18 [0] : vector<4x8xf32> to vector<8xf32>
    %29 = vector.shape_cast %28 : vector<8xf32> to vector<1x8xf32>
    %cst_19 = arith.constant dense<0.000000e+00> : vector<1x8xf32>
    %30 = tpu.matmul %29, %27, %cst_19 {dimension_numbers = #tpu.dot_dimension_numbers<[1], [0], [0], [1], [0, 0, 1, 1], [], []>} : vector<1x8xf32>, vector<8x8xf32>, vector<1x8xf32> -> vector<1x8xf32>
    %31 = vector.broadcast %30 : vector<1x8xf32> to vector<4x8xf32>
    %32 = arith.subf %26, %31 : vector<4x8xf32>
    %33 = arith.mulf %32, %32 : vector<4x8xf32>
    %cst_20 = arith.constant dense<0.000000e+00> : vector<8xf32>
    %34 = vector.multi_reduction <add>, %33, %cst_20 [0] : vector<4x8xf32> to vector<8xf32>
    %35 = vector.shape_cast %34 : vector<8xf32> to vector<1x8xf32>
    %cst_21 = arith.constant dense<0.000000e+00> : vector<1x8xf32>
    %36 = tpu.matmul %35, %27, %cst_21 {dimension_numbers = #tpu.dot_dimension_numbers<[1], [0], [0], [1], [0, 0, 1, 1], [], []>} : vector<1x8xf32>, vector<8x8xf32>, vector<1x8xf32> -> vector<1x8xf32>
    %cst_22 = arith.constant 9.99999974E-6 : f32
    %37 = vector.broadcast %cst_22 : f32 to vector<1x8xf32>
    %38 = arith.addf %36, %37 : vector<1x8xf32>
    %39 = math.rsqrt %38 : vector<1x8xf32>
    %40 = vector.broadcast %39 : vector<1x8xf32> to vector<4x8xf32>
    %41 = arith.mulf %32, %40 : vector<4x8xf32>
    %c0_23 = arith.constant 0 : index
    %c0_24 = arith.constant 0 : index
    %42 = vector.load %arg6[%c0_23, %c0_24] : memref<1x8xf32, #tpu.memory_space<vmem>>, vector<1x8xf32>
    %43 = vector.broadcast %42 : vector<1x8xf32> to vector<4x8xf32>
    %44 = arith.mulf %41, %43 : vector<4x8xf32>
    %c0_25 = arith.constant 0 : index
    %c0_26 = arith.constant 0 : index
    %45 = vector.load %arg7[%c0_25, %c0_26] : memref<1x8xf32, #tpu.memory_space<vmem>>, vector<1x8xf32>
    %46 = vector.broadcast %45 : vector<1x8xf32> to vector<4x8xf32>
    %47 = arith.addf %44, %46 : vector<4x8xf32>
    %c0_27 = arith.constant 0 : index
    %c0_28 = arith.constant 0 : index
    %48 = vector.load %arg9[%c0_27, %c0_28] : memref<4x4xf32, #tpu.memory_space<vmem>>, vector<4x4xf32>
    %cst_29 = arith.constant dense<0.000000e+00> : vector<4x8xf32>
    %49 = tpu.matmul %48, %47, %cst_29 {dimension_numbers = #tpu.dot_dimension_numbers<[1], [0], [0], [1], [0, 0, 1, 1], [], []>} : vector<4x4xf32>, vector<4x8xf32>, vector<4x8xf32> -> vector<4x8xf32>
    %c0_30 = arith.constant 0 : index
    %c0_31 = arith.constant 0 : index
    %50 = vector.load %arg10[%c0_30, %c0_31] : memref<4x4xf32, #tpu.memory_space<vmem>>, vector<4x4xf32>
    %cst_32 = arith.constant dense<0.000000e+00> : vector<4x8xf32>
    %51 = tpu.matmul %50, %47, %cst_32 {dimension_numbers = #tpu.dot_dimension_numbers<[1], [0], [0], [1], [0, 0, 1, 1], [], []>} : vector<4x4xf32>, vector<4x8xf32>, vector<4x8xf32> -> vector<4x8xf32>
    %c0_33 = arith.constant 0 : index
    %c0_34 = arith.constant 0 : index
    %52 = vector.load %arg11[%c0_33, %c0_34] : memref<8x8xf32, #tpu.memory_space<vmem>>, vector<8x8xf32>
    %cst_35 = arith.constant dense<0.000000e+00> : vector<4x8xf32>
    %53 = tpu.matmul %49, %52, %cst_35 {dimension_numbers = #tpu.dot_dimension_numbers<[1], [0], [0], [1], [0, 0, 1, 1], [], []>} : vector<4x8xf32>, vector<8x8xf32>, vector<4x8xf32> -> vector<4x8xf32>
    %c0_36 = arith.constant 0 : index
    %c0_37 = arith.constant 0 : index
    %54 = vector.load %arg12[%c0_36, %c0_37] : memref<8x8xf32, #tpu.memory_space<vmem>>, vector<8x8xf32>
    %cst_38 = arith.constant dense<0.000000e+00> : vector<4x8xf32>
    %55 = tpu.matmul %47, %54, %cst_38 {dimension_numbers = #tpu.dot_dimension_numbers<[1], [0], [0], [1], [0, 0, 1, 1], [], []>} : vector<4x8xf32>, vector<8x8xf32>, vector<4x8xf32> -> vector<4x8xf32>
    %56 = arith.addf %53, %55 : vector<4x8xf32>
    %c0_39 = arith.constant 0 : index
    %c0_40 = arith.constant 0 : index
    %57 = vector.load %arg13[%c0_39, %c0_40] : memref<8x8xf32, #tpu.memory_space<vmem>>, vector<8x8xf32>
    %cst_41 = arith.constant dense<0.000000e+00> : vector<4x8xf32>
    %58 = tpu.matmul %51, %57, %cst_41 {dimension_numbers = #tpu.dot_dimension_numbers<[1], [0], [0], [1], [0, 0, 1, 1], [], []>} : vector<4x8xf32>, vector<8x8xf32>, vector<4x8xf32> -> vector<4x8xf32>
    %59 = arith.addf %56, %58 : vector<4x8xf32>
    %c0_42 = arith.constant 0 : index
    %c0_43 = arith.constant 0 : index
    %60 = vector.load %arg14[%c0_42, %c0_43] : memref<1x8xf32, #tpu.memory_space<vmem>>, vector<1x8xf32>
    %61 = vector.broadcast %60 : vector<1x8xf32> to vector<4x8xf32>
    %62 = arith.addf %59, %61 : vector<4x8xf32>
    %c0_44 = arith.constant 0 : index
    %c0_45 = arith.constant 0 : index
    %63 = vector.load %arg8[%c0_44, %c0_45] : memref<8x8xf32, #tpu.memory_space<vmem>>, vector<8x8xf32>
    %cst_46 = arith.constant dense<0.000000e+00> : vector<8xf32>
    %64 = vector.multi_reduction <add>, %62, %cst_46 [0] : vector<4x8xf32> to vector<8xf32>
    %65 = vector.shape_cast %64 : vector<8xf32> to vector<1x8xf32>
    %cst_47 = arith.constant dense<0.000000e+00> : vector<1x8xf32>
    %66 = tpu.matmul %65, %63, %cst_47 {dimension_numbers = #tpu.dot_dimension_numbers<[1], [0], [0], [1], [0, 0, 1, 1], [], []>} : vector<1x8xf32>, vector<8x8xf32>, vector<1x8xf32> -> vector<1x8xf32>
    %67 = vector.broadcast %66 : vector<1x8xf32> to vector<4x8xf32>
    %68 = arith.subf %62, %67 : vector<4x8xf32>
    %69 = arith.mulf %68, %68 : vector<4x8xf32>
    %cst_48 = arith.constant dense<0.000000e+00> : vector<8xf32>
    %70 = vector.multi_reduction <add>, %69, %cst_48 [0] : vector<4x8xf32> to vector<8xf32>
    %71 = vector.shape_cast %70 : vector<8xf32> to vector<1x8xf32>
    %cst_49 = arith.constant dense<0.000000e+00> : vector<1x8xf32>
    %72 = tpu.matmul %71, %63, %cst_49 {dimension_numbers = #tpu.dot_dimension_numbers<[1], [0], [0], [1], [0, 0, 1, 1], [], []>} : vector<1x8xf32>, vector<8x8xf32>, vector<1x8xf32> -> vector<1x8xf32>
    %cst_50 = arith.constant 9.99999974E-6 : f32
    %73 = vector.broadcast %cst_50 : f32 to vector<1x8xf32>
    %74 = arith.addf %72, %73 : vector<1x8xf32>
    %75 = math.rsqrt %74 : vector<1x8xf32>
    %76 = vector.broadcast %75 : vector<1x8xf32> to vector<4x8xf32>
    %77 = arith.mulf %68, %76 : vector<4x8xf32>
    %c0_51 = arith.constant 0 : index
    %c0_52 = arith.constant 0 : index
    %78 = vector.load %arg15[%c0_51, %c0_52] : memref<1x8xf32, #tpu.memory_space<vmem>>, vector<1x8xf32>
    %79 = vector.broadcast %78 : vector<1x8xf32> to vector<4x8xf32>
    %80 = arith.mulf %77, %79 : vector<4x8xf32>
    %c0_53 = arith.constant 0 : index
    %c0_54 = arith.constant 0 : index
    %81 = vector.load %arg16[%c0_53, %c0_54] : memref<1x8xf32, #tpu.memory_space<vmem>>, vector<1x8xf32>
    %82 = vector.broadcast %81 : vector<1x8xf32> to vector<4x8xf32>
    %83 = arith.addf %80, %82 : vector<4x8xf32>
    %c0_55 = arith.constant 0 : index
    %c0_56 = arith.constant 0 : index
    %84 = vector.load %arg17[%c0_55, %c0_56] : memref<8x16xf32, #tpu.memory_space<vmem>>, vector<8x16xf32>
    %cst_57 = arith.constant dense<0.000000e+00> : vector<4x16xf32>
    %85 = tpu.matmul %83, %84, %cst_57 {dimension_numbers = #tpu.dot_dimension_numbers<[1], [0], [0], [1], [0, 0, 1, 1], [], []>} : vector<4x8xf32>, vector<8x16xf32>, vector<4x16xf32> -> vector<4x16xf32>
    %c0_58 = arith.constant 0 : index
    %c0_59 = arith.constant 0 : index
    %86 = vector.load %arg18[%c0_58, %c0_59] : memref<1x16xf32, #tpu.memory_space<vmem>>, vector<1x16xf32>
    %87 = vector.broadcast %86 : vector<1x16xf32> to vector<4x16xf32>
    %88 = arith.addf %85, %87 : vector<4x16xf32>
    %89 = arith.addf %0, %88 : vector<4x16xf32>
    %c0_60 = arith.constant 0 : index
    %c0_61 = arith.constant 0 : index
    %90 = vector.load %arg19[%c0_60, %c0_61] : memref<4x16xf32, #tpu.memory_space<vmem>>, vector<4x16xf32>
    tpu.vector_store %arg19[%c0_60, %c0_61], %89 {strides = array<i32>} : memref<4x16xf32, #tpu.memory_space<vmem>>, vector<4x16xf32>,
    return
  }
}

module attributes {stable_mosaic.version = 11 : i64} {
  func.func @_residual_kernel(%arg0: memref<4x16xf32, #tpu.memory_space<vmem>>, %arg1: memref<1x16xf32, #tpu.memory_space<vmem>>, %arg2: memref<1x16xf32, #tpu.memory_space<vmem>>, %arg3: memref<16x16xf32, #tpu.memory_space<vmem>>, %arg4: memref<16x8xf32, #tpu.memory_space<vmem>>, %arg5: memref<1x8xf32, #tpu.memory_space<vmem>>, %arg6: memref<1x8xf32, #tpu.memory_space<vmem>>, %arg7: memref<1x8xf32, #tpu.memory_space<vmem>>, %arg8: memref<8x8xf32, #tpu.memory_space<vmem>>, %arg9: memref<4x4xf32, #tpu.memory_space<vmem>>, %arg10: memref<4x4xf32, #tpu.memory_space<vmem>>, %arg11: memref<8x8xf32, #tpu.memory_space<vmem>>, %arg12: memref<8x8xf32, #tpu.memory_space<vmem>>, %arg13: memref<8x8xf32, #tpu.memory_space<vmem>>, %arg14: memref<1x8xf32, #tpu.memory_space<vmem>>, %arg15: memref<1x8xf32, #tpu.memory_space<vmem>>, %arg16: memref<1x8xf32, #tpu.memory_space<vmem>>, %arg17: memref<8x16xf32, #tpu.memory_space<vmem>>, %arg18: memref<1x16xf32, #tpu.memory_space<vmem>>, %arg19: memref<8x4xf32, #tpu.memory_space<vmem>>, %arg20: memref<16x32xf32, #tpu.memory_space<vmem>>, %arg21: memref<8x32xf32, #tpu.memory_space<vmem>>, %arg22: memref<8x32xf32, #tpu.memory_space<vmem>>) attributes {dimension_semantics = [], scalar_prefetch = 0 : i64, scratch_operands = 0 : i64, tpu.core_type = #tpu.core_type<tc>} {
    %c0 = arith.constant 0 : index
    %c0_0 = arith.constant 0 : index
    %0 = vector.load %arg0[%c0, %c0_0] : memref<4x16xf32, #tpu.memory_space<vmem>>, vector<4x16xf32>
    %c0_1 = arith.constant 0 : index
    %c0_2 = arith.constant 0 : index
    %1 = vector.load %arg3[%c0_1, %c0_2] : memref<16x16xf32, #tpu.memory_space<vmem>>, vector<16x16xf32>
    %cst = arith.constant dense<0.000000e+00> : vector<16xf32>
    %2 = vector.multi_reduction <add>, %0, %cst [0] : vector<4x16xf32> to vector<16xf32>
    %3 = vector.shape_cast %2 : vector<16xf32> to vector<1x16xf32>
    %cst_3 = arith.constant dense<0.000000e+00> : vector<1x16xf32>
    %4 = tpu.matmul %3, %1, %cst_3 {dimension_numbers = #tpu.dot_dimension_numbers<[1], [0], [0], [1], [0, 0, 1, 1], [], []>} : vector<1x16xf32>, vector<16x16xf32>, vector<1x16xf32> -> vector<1x16xf32>
    %5 = vector.broadcast %4 : vector<1x16xf32> to vector<4x16xf32>
    %6 = arith.subf %0, %5 : vector<4x16xf32>
    %7 = arith.mulf %6, %6 : vector<4x16xf32>
    %cst_4 = arith.constant dense<0.000000e+00> : vector<16xf32>
    %8 = vector.multi_reduction <add>, %7, %cst_4 [0] : vector<4x16xf32> to vector<16xf32>
    %9 = vector.shape_cast %8 : vector<16xf32> to vector<1x16xf32>
    %cst_5 = arith.constant dense<0.000000e+00> : vector<1x16xf32>
    %10 = tpu.matmul %9, %1, %cst_5 {dimension_numbers = #tpu.dot_dimension_numbers<[1], [0], [0], [1], [0, 0, 1, 1], [], []>} : vector<1x16xf32>, vector<16x16xf32>, vector<1x16xf32> -> vector<1x16xf32>
    %cst_6 = arith.constant 9.99999974E-6 : f32
    %11 = vector.broadcast %cst_6 : f32 to vector<1x16xf32>
    %12 = arith.addf %10, %11 : vector<1x16xf32>
    %13 = math.rsqrt %12 : vector<1x16xf32>
    %14 = vector.broadcast %13 : vector<1x16xf32> to vector<4x16xf32>
    %15 = arith.mulf %6, %14 : vector<4x16xf32>
    %c0_7 = arith.constant 0 : index
    %c0_8 = arith.constant 0 : index
    %16 = vector.load %arg1[%c0_7, %c0_8] : memref<1x16xf32, #tpu.memory_space<vmem>>, vector<1x16xf32>
    %17 = vector.broadcast %16 : vector<1x16xf32> to vector<4x16xf32>
    %18 = arith.mulf %15, %17 : vector<4x16xf32>
    %c0_9 = arith.constant 0 : index
    %c0_10 = arith.constant 0 : index
    %19 = vector.load %arg2[%c0_9, %c0_10] : memref<1x16xf32, #tpu.memory_space<vmem>>, vector<1x16xf32>
    %20 = vector.broadcast %19 : vector<1x16xf32> to vector<4x16xf32>
    %21 = arith.addf %18, %20 : vector<4x16xf32>
    %c0_11 = arith.constant 0 : index
    %c0_12 = arith.constant 0 : index
    %22 = vector.load %arg4[%c0_11, %c0_12] : memref<16x8xf32, #tpu.memory_space<vmem>>, vector<16x8xf32>
    %cst_13 = arith.constant dense<0.000000e+00> : vector<4x8xf32>
    %23 = tpu.matmul %21, %22, %cst_13 {dimension_numbers = #tpu.dot_dimension_numbers<[1], [0], [0], [1], [0, 0, 1, 1], [], []>} : vector<4x16xf32>, vector<16x8xf32>, vector<4x8xf32> -> vector<4x8xf32>
    %c0_14 = arith.constant 0 : index
    %c0_15 = arith.constant 0 : index
    %24 = vector.load %arg5[%c0_14, %c0_15] : memref<1x8xf32, #tpu.memory_space<vmem>>, vector<1x8xf32>
    %25 = vector.broadcast %24 : vector<1x8xf32> to vector<4x8xf32>
    %26 = arith.addf %23, %25 : vector<4x8xf32>
    %c0_16 = arith.constant 0 : index
    %c0_17 = arith.constant 0 : index
    %27 = vector.load %arg8[%c0_16, %c0_17] : memref<8x8xf32, #tpu.memory_space<vmem>>, vector<8x8xf32>
    %cst_18 = arith.constant dense<0.000000e+00> : vector<8xf32>
    %28 = vector.multi_reduction <add>, %26, %cst_18 [0] : vector<4x8xf32> to vector<8xf32>
    %29 = vector.shape_cast %28 : vector<8xf32> to vector<1x8xf32>
    %cst_19 = arith.constant dense<0.000000e+00> : vector<1x8xf32>
    %30 = tpu.matmul %29, %27, %cst_19 {dimension_numbers = #tpu.dot_dimension_numbers<[1], [0], [0], [1], [0, 0, 1, 1], [], []>} : vector<1x8xf32>, vector<8x8xf32>, vector<1x8xf32> -> vector<1x8xf32>
    %31 = vector.broadcast %30 : vector<1x8xf32> to vector<4x8xf32>
    %32 = arith.subf %26, %31 : vector<4x8xf32>
    %33 = arith.mulf %32, %32 : vector<4x8xf32>
    %cst_20 = arith.constant dense<0.000000e+00> : vector<8xf32>
    %34 = vector.multi_reduction <add>, %33, %cst_20 [0] : vector<4x8xf32> to vector<8xf32>
    %35 = vector.shape_cast %34 : vector<8xf32> to vector<1x8xf32>
    %cst_21 = arith.constant dense<0.000000e+00> : vector<1x8xf32>
    %36 = tpu.matmul %35, %27, %cst_21 {dimension_numbers = #tpu.dot_dimension_numbers<[1], [0], [0], [1], [0, 0, 1, 1], [], []>} : vector<1x8xf32>, vector<8x8xf32>, vector<1x8xf32> -> vector<1x8xf32>
    %cst_22 = arith.constant 9.99999974E-6 : f32
    %37 = vector.broadcast %cst_22 : f32 to vector<1x8xf32>
    %38 = arith.addf %36, %37 : vector<1x8xf32>
    %39 = math.rsqrt %38 : vector<1x8xf32>
    %40 = vector.broadcast %39 : vector<1x8xf32> to vector<4x8xf32>
    %41 = arith.mulf %32, %40 : vector<4x8xf32>
    %c0_23 = arith.constant 0 : index
    %c0_24 = arith.constant 0 : index
    %42 = vector.load %arg6[%c0_23, %c0_24] : memref<1x8xf32, #tpu.memory_space<vmem>>, vector<1x8xf32>
    %43 = vector.broadcast %42 : vector<1x8xf32> to vector<4x8xf32>
    %44 = arith.mulf %41, %43 : vector<4x8xf32>
    %c0_25 = arith.constant 0 : index
    %c0_26 = arith.constant 0 : index
    %45 = vector.load %arg7[%c0_25, %c0_26] : memref<1x8xf32, #tpu.memory_space<vmem>>, vector<1x8xf32>
    %46 = vector.broadcast %45 : vector<1x8xf32> to vector<4x8xf32>
    %47 = arith.addf %44, %46 : vector<4x8xf32>
    %c0_27 = arith.constant 0 : index
    %c0_28 = arith.constant 0 : index
    %48 = vector.load %arg9[%c0_27, %c0_28] : memref<4x4xf32, #tpu.memory_space<vmem>>, vector<4x4xf32>
    %cst_29 = arith.constant dense<0.000000e+00> : vector<4x8xf32>
    %49 = tpu.matmul %48, %47, %cst_29 {dimension_numbers = #tpu.dot_dimension_numbers<[1], [0], [0], [1], [0, 0, 1, 1], [], []>} : vector<4x4xf32>, vector<4x8xf32>, vector<4x8xf32> -> vector<4x8xf32>
    %c0_30 = arith.constant 0 : index
    %c0_31 = arith.constant 0 : index
    %50 = vector.load %arg10[%c0_30, %c0_31] : memref<4x4xf32, #tpu.memory_space<vmem>>, vector<4x4xf32>
    %cst_32 = arith.constant dense<0.000000e+00> : vector<4x8xf32>
    %51 = tpu.matmul %50, %47, %cst_32 {dimension_numbers = #tpu.dot_dimension_numbers<[1], [0], [0], [1], [0, 0, 1, 1], [], []>} : vector<4x4xf32>, vector<4x8xf32>, vector<4x8xf32> -> vector<4x8xf32>
    %c0_33 = arith.constant 0 : index
    %c0_34 = arith.constant 0 : index
    %52 = vector.load %arg11[%c0_33, %c0_34] : memref<8x8xf32, #tpu.memory_space<vmem>>, vector<8x8xf32>
    %cst_35 = arith.constant dense<0.000000e+00> : vector<4x8xf32>
    %53 = tpu.matmul %49, %52, %cst_35 {dimension_numbers = #tpu.dot_dimension_numbers<[1], [0], [0], [1], [0, 0, 1, 1], [], []>} : vector<4x8xf32>, vector<8x8xf32>, vector<4x8xf32> -> vector<4x8xf32>
    %c0_36 = arith.constant 0 : index
    %c0_37 = arith.constant 0 : index
    %54 = vector.load %arg12[%c0_36, %c0_37] : memref<8x8xf32, #tpu.memory_space<vmem>>, vector<8x8xf32>
    %cst_38 = arith.constant dense<0.000000e+00> : vector<4x8xf32>
    %55 = tpu.matmul %47, %54, %cst_38 {dimension_numbers = #tpu.dot_dimension_numbers<[1], [0], [0], [1], [0, 0, 1, 1], [], []>} : vector<4x8xf32>, vector<8x8xf32>, vector<4x8xf32> -> vector<4x8xf32>
    %56 = arith.addf %53, %55 : vector<4x8xf32>
    %c0_39 = arith.constant 0 : index
    %c0_40 = arith.constant 0 : index
    %57 = vector.load %arg13[%c0_39, %c0_40] : memref<8x8xf32, #tpu.memory_space<vmem>>, vector<8x8xf32>
    %cst_41 = arith.constant dense<0.000000e+00> : vector<4x8xf32>
    %58 = tpu.matmul %51, %57, %cst_41 {dimension_numbers = #tpu.dot_dimension_numbers<[1], [0], [0], [1], [0, 0, 1, 1], [], []>} : vector<4x8xf32>, vector<8x8xf32>, vector<4x8xf32> -> vector<4x8xf32>
    %59 = arith.addf %56, %58 : vector<4x8xf32>
    %c0_42 = arith.constant 0 : index
    %c0_43 = arith.constant 0 : index
    %60 = vector.load %arg14[%c0_42, %c0_43] : memref<1x8xf32, #tpu.memory_space<vmem>>, vector<1x8xf32>
    %61 = vector.broadcast %60 : vector<1x8xf32> to vector<4x8xf32>
    %62 = arith.addf %59, %61 : vector<4x8xf32>
    %c0_44 = arith.constant 0 : index
    %c0_45 = arith.constant 0 : index
    %63 = vector.load %arg8[%c0_44, %c0_45] : memref<8x8xf32, #tpu.memory_space<vmem>>, vector<8x8xf32>
    %cst_46 = arith.constant dense<0.000000e+00> : vector<8xf32>
    %64 = vector.multi_reduction <add>, %62, %cst_46 [0] : vector<4x8xf32> to vector<8xf32>
    %65 = vector.shape_cast %64 : vector<8xf32> to vector<1x8xf32>
    %cst_47 = arith.constant dense<0.000000e+00> : vector<1x8xf32>
    %66 = tpu.matmul %65, %63, %cst_47 {dimension_numbers = #tpu.dot_dimension_numbers<[1], [0], [0], [1], [0, 0, 1, 1], [], []>} : vector<1x8xf32>, vector<8x8xf32>, vector<1x8xf32> -> vector<1x8xf32>
    %67 = vector.broadcast %66 : vector<1x8xf32> to vector<4x8xf32>
    %68 = arith.subf %62, %67 : vector<4x8xf32>
    %69 = arith.mulf %68, %68 : vector<4x8xf32>
    %cst_48 = arith.constant dense<0.000000e+00> : vector<8xf32>
    %70 = vector.multi_reduction <add>, %69, %cst_48 [0] : vector<4x8xf32> to vector<8xf32>
    %71 = vector.shape_cast %70 : vector<8xf32> to vector<1x8xf32>
    %cst_49 = arith.constant dense<0.000000e+00> : vector<1x8xf32>
    %72 = tpu.matmul %71, %63, %cst_49 {dimension_numbers = #tpu.dot_dimension_numbers<[1], [0], [0], [1], [0, 0, 1, 1], [], []>} : vector<1x8xf32>, vector<8x8xf32>, vector<1x8xf32> -> vector<1x8xf32>
    %cst_50 = arith.constant 9.99999974E-6 : f32
    %73 = vector.broadcast %cst_50 : f32 to vector<1x8xf32>
    %74 = arith.addf %72, %73 : vector<1x8xf32>
    %75 = math.rsqrt %74 : vector<1x8xf32>
    %76 = vector.broadcast %75 : vector<1x8xf32> to vector<4x8xf32>
    %77 = arith.mulf %68, %76 : vector<4x8xf32>
    %c0_51 = arith.constant 0 : index
    %c0_52 = arith.constant 0 : index
    %78 = vector.load %arg15[%c0_51, %c0_52] : memref<1x8xf32, #tpu.memory_space<vmem>>, vector<1x8xf32>
    %79 = vector.broadcast %78 : vector<1x8xf32> to vector<4x8xf32>
    %80 = arith.mulf %77, %79 : vector<4x8xf32>
    %c0_53 = arith.constant 0 : index
    %c0_54 = arith.constant 0 : index
    %81 = vector.load %arg16[%c0_53, %c0_54] : memref<1x8xf32, #tpu.memory_space<vmem>>, vector<1x8xf32>
    %82 = vector.broadcast %81 : vector<1x8xf32> to vector<4x8xf32>
    %83 = arith.addf %80, %82 : vector<4x8xf32>
    %c0_55 = arith.constant 0 : index
    %c0_56 = arith.constant 0 : index
    %84 = vector.load %arg17[%c0_55, %c0_56] : memref<8x16xf32, #tpu.memory_space<vmem>>, vector<8x16xf32>
    %cst_57 = arith.constant dense<0.000000e+00> : vector<4x16xf32>
    %85 = tpu.matmul %83, %84, %cst_57 {dimension_numbers = #tpu.dot_dimension_numbers<[1], [0], [0], [1], [0, 0, 1, 1], [], []>} : vector<4x8xf32>, vector<8x16xf32>, vector<4x16xf32> -> vector<4x16xf32>
    %c0_58 = arith.constant 0 : index
    %c0_59 = arith.constant 0 : index
    %86 = vector.load %arg18[%c0_58, %c0_59] : memref<1x16xf32, #tpu.memory_space<vmem>>, vector<1x16xf32>
    %87 = vector.broadcast %86 : vector<1x16xf32> to vector<4x16xf32>
    %88 = arith.addf %85, %87 : vector<4x16xf32>
    %89 = arith.addf %0, %88 : vector<4x16xf32>
    %c0_60 = arith.constant 0 : index
    %c0_61 = arith.constant 0 : index
    %90 = vector.load %arg21[%c0_60, %c0_61] : memref<8x32xf32, #tpu.memory_space<vmem>>, vector<8x32xf32>
    %c0_62 = arith.constant 0 : index
    %c0_63 = arith.constant 0 : index
    %91 = vector.load %arg19[%c0_62, %c0_63] : memref<8x4xf32, #tpu.memory_space<vmem>>, vector<8x4xf32>
    %cst_64 = arith.constant dense<0.000000e+00> : vector<8x16xf32>
    %92 = tpu.matmul %91, %89, %cst_64 {dimension_numbers = #tpu.dot_dimension_numbers<[1], [0], [0], [1], [0, 0, 1, 1], [], []>} : vector<8x4xf32>, vector<4x16xf32>, vector<8x16xf32> -> vector<8x16xf32>
    %c0_65 = arith.constant 0 : index
    %c0_66 = arith.constant 0 : index
    %93 = vector.load %arg20[%c0_65, %c0_66] : memref<16x32xf32, #tpu.memory_space<vmem>>, vector<16x32xf32>
    %cst_67 = arith.constant dense<0.000000e+00> : vector<8x32xf32>
    %94 = tpu.matmul %92, %93, %cst_67 {dimension_numbers = #tpu.dot_dimension_numbers<[1], [0], [0], [1], [0, 0, 1, 1], [], []>} : vector<8x16xf32>, vector<16x32xf32>, vector<8x32xf32> -> vector<8x32xf32>
    %95 = arith.addf %90, %94 : vector<8x32xf32>
    %c0_68 = arith.constant 0 : index
    %c0_69 = arith.constant 0 : index
    %96 = vector.load %arg22[%c0_68, %c0_69] : memref<8x32xf32, #tpu.memory_space<vmem>>, vector<8x32xf32>
    tpu.vector_store %arg22[%c0_68, %c0_69], %95 {strides = array<i32>} : memref<8x32xf32, #tpu.memory_space<vmem>>, vector<8x32xf32>,
    return
  }
}

module attributes {stable_mosaic.version = 11 : i64} {
  func.func @_residual_kernel(%arg0: memref<8x32xf32, #tpu.memory_space<vmem>>, %arg1: memref<1x32xf32, #tpu.memory_space<vmem>>, %arg2: memref<1x32xf32, #tpu.memory_space<vmem>>, %arg3: memref<32x32xf32, #tpu.memory_space<vmem>>, %arg4: memref<32x16xf32, #tpu.memory_space<vmem>>, %arg5: memref<1x16xf32, #tpu.memory_space<vmem>>, %arg6: memref<1x16xf32, #tpu.memory_space<vmem>>, %arg7: memref<1x16xf32, #tpu.memory_space<vmem>>, %arg8: memref<16x16xf32, #tpu.memory_space<vmem>>, %arg9: memref<8x8xf32, #tpu.memory_space<vmem>>, %arg10: memref<8x8xf32, #tpu.memory_space<vmem>>, %arg11: memref<16x16xf32, #tpu.memory_space<vmem>>, %arg12: memref<16x16xf32, #tpu.memory_space<vmem>>, %arg13: memref<16x16xf32, #tpu.memory_space<vmem>>, %arg14: memref<1x16xf32, #tpu.memory_space<vmem>>, %arg15: memref<1x16xf32, #tpu.memory_space<vmem>>, %arg16: memref<1x16xf32, #tpu.memory_space<vmem>>, %arg17: memref<16x32xf32, #tpu.memory_space<vmem>>, %arg18: memref<1x32xf32, #tpu.memory_space<vmem>>, %arg19: memref<16x8xf32, #tpu.memory_space<vmem>>, %arg20: memref<32x64xf32, #tpu.memory_space<vmem>>, %arg21: memref<16x64xf32, #tpu.memory_space<vmem>>, %arg22: memref<16x64xf32, #tpu.memory_space<vmem>>) attributes {dimension_semantics = [], scalar_prefetch = 0 : i64, scratch_operands = 0 : i64, tpu.core_type = #tpu.core_type<tc>} {
    %c0 = arith.constant 0 : index
    %c0_0 = arith.constant 0 : index
    %0 = vector.load %arg0[%c0, %c0_0] : memref<8x32xf32, #tpu.memory_space<vmem>>, vector<8x32xf32>
    %c0_1 = arith.constant 0 : index
    %c0_2 = arith.constant 0 : index
    %1 = vector.load %arg3[%c0_1, %c0_2] : memref<32x32xf32, #tpu.memory_space<vmem>>, vector<32x32xf32>
    %cst = arith.constant dense<0.000000e+00> : vector<32xf32>
    %2 = vector.multi_reduction <add>, %0, %cst [0] : vector<8x32xf32> to vector<32xf32>
    %3 = vector.shape_cast %2 : vector<32xf32> to vector<1x32xf32>
    %cst_3 = arith.constant dense<0.000000e+00> : vector<1x32xf32>
    %4 = tpu.matmul %3, %1, %cst_3 {dimension_numbers = #tpu.dot_dimension_numbers<[1], [0], [0], [1], [0, 0, 1, 1], [], []>} : vector<1x32xf32>, vector<32x32xf32>, vector<1x32xf32> -> vector<1x32xf32>
    %5 = vector.broadcast %4 : vector<1x32xf32> to vector<8x32xf32>
    %6 = arith.subf %0, %5 : vector<8x32xf32>
    %7 = arith.mulf %6, %6 : vector<8x32xf32>
    %cst_4 = arith.constant dense<0.000000e+00> : vector<32xf32>
    %8 = vector.multi_reduction <add>, %7, %cst_4 [0] : vector<8x32xf32> to vector<32xf32>
    %9 = vector.shape_cast %8 : vector<32xf32> to vector<1x32xf32>
    %cst_5 = arith.constant dense<0.000000e+00> : vector<1x32xf32>
    %10 = tpu.matmul %9, %1, %cst_5 {dimension_numbers = #tpu.dot_dimension_numbers<[1], [0], [0], [1], [0, 0, 1, 1], [], []>} : vector<1x32xf32>, vector<32x32xf32>, vector<1x32xf32> -> vector<1x32xf32>
    %cst_6 = arith.constant 9.99999974E-6 : f32
    %11 = vector.broadcast %cst_6 : f32 to vector<1x32xf32>
    %12 = arith.addf %10, %11 : vector<1x32xf32>
    %13 = math.rsqrt %12 : vector<1x32xf32>
    %14 = vector.broadcast %13 : vector<1x32xf32> to vector<8x32xf32>
    %15 = arith.mulf %6, %14 : vector<8x32xf32>
    %c0_7 = arith.constant 0 : index
    %c0_8 = arith.constant 0 : index
    %16 = vector.load %arg1[%c0_7, %c0_8] : memref<1x32xf32, #tpu.memory_space<vmem>>, vector<1x32xf32>
    %17 = vector.broadcast %16 : vector<1x32xf32> to vector<8x32xf32>
    %18 = arith.mulf %15, %17 : vector<8x32xf32>
    %c0_9 = arith.constant 0 : index
    %c0_10 = arith.constant 0 : index
    %19 = vector.load %arg2[%c0_9, %c0_10] : memref<1x32xf32, #tpu.memory_space<vmem>>, vector<1x32xf32>
    %20 = vector.broadcast %19 : vector<1x32xf32> to vector<8x32xf32>
    %21 = arith.addf %18, %20 : vector<8x32xf32>
    %c0_11 = arith.constant 0 : index
    %c0_12 = arith.constant 0 : index
    %22 = vector.load %arg4[%c0_11, %c0_12] : memref<32x16xf32, #tpu.memory_space<vmem>>, vector<32x16xf32>
    %cst_13 = arith.constant dense<0.000000e+00> : vector<8x16xf32>
    %23 = tpu.matmul %21, %22, %cst_13 {dimension_numbers = #tpu.dot_dimension_numbers<[1], [0], [0], [1], [0, 0, 1, 1], [], []>} : vector<8x32xf32>, vector<32x16xf32>, vector<8x16xf32> -> vector<8x16xf32>
    %c0_14 = arith.constant 0 : index
    %c0_15 = arith.constant 0 : index
    %24 = vector.load %arg5[%c0_14, %c0_15] : memref<1x16xf32, #tpu.memory_space<vmem>>, vector<1x16xf32>
    %25 = vector.broadcast %24 : vector<1x16xf32> to vector<8x16xf32>
    %26 = arith.addf %23, %25 : vector<8x16xf32>
    %c0_16 = arith.constant 0 : index
    %c0_17 = arith.constant 0 : index
    %27 = vector.load %arg8[%c0_16, %c0_17] : memref<16x16xf32, #tpu.memory_space<vmem>>, vector<16x16xf32>
    %cst_18 = arith.constant dense<0.000000e+00> : vector<16xf32>
    %28 = vector.multi_reduction <add>, %26, %cst_18 [0] : vector<8x16xf32> to vector<16xf32>
    %29 = vector.shape_cast %28 : vector<16xf32> to vector<1x16xf32>
    %cst_19 = arith.constant dense<0.000000e+00> : vector<1x16xf32>
    %30 = tpu.matmul %29, %27, %cst_19 {dimension_numbers = #tpu.dot_dimension_numbers<[1], [0], [0], [1], [0, 0, 1, 1], [], []>} : vector<1x16xf32>, vector<16x16xf32>, vector<1x16xf32> -> vector<1x16xf32>
    %31 = vector.broadcast %30 : vector<1x16xf32> to vector<8x16xf32>
    %32 = arith.subf %26, %31 : vector<8x16xf32>
    %33 = arith.mulf %32, %32 : vector<8x16xf32>
    %cst_20 = arith.constant dense<0.000000e+00> : vector<16xf32>
    %34 = vector.multi_reduction <add>, %33, %cst_20 [0] : vector<8x16xf32> to vector<16xf32>
    %35 = vector.shape_cast %34 : vector<16xf32> to vector<1x16xf32>
    %cst_21 = arith.constant dense<0.000000e+00> : vector<1x16xf32>
    %36 = tpu.matmul %35, %27, %cst_21 {dimension_numbers = #tpu.dot_dimension_numbers<[1], [0], [0], [1], [0, 0, 1, 1], [], []>} : vector<1x16xf32>, vector<16x16xf32>, vector<1x16xf32> -> vector<1x16xf32>
    %cst_22 = arith.constant 9.99999974E-6 : f32
    %37 = vector.broadcast %cst_22 : f32 to vector<1x16xf32>
    %38 = arith.addf %36, %37 : vector<1x16xf32>
    %39 = math.rsqrt %38 : vector<1x16xf32>
    %40 = vector.broadcast %39 : vector<1x16xf32> to vector<8x16xf32>
    %41 = arith.mulf %32, %40 : vector<8x16xf32>
    %c0_23 = arith.constant 0 : index
    %c0_24 = arith.constant 0 : index
    %42 = vector.load %arg6[%c0_23, %c0_24] : memref<1x16xf32, #tpu.memory_space<vmem>>, vector<1x16xf32>
    %43 = vector.broadcast %42 : vector<1x16xf32> to vector<8x16xf32>
    %44 = arith.mulf %41, %43 : vector<8x16xf32>
    %c0_25 = arith.constant 0 : index
    %c0_26 = arith.constant 0 : index
    %45 = vector.load %arg7[%c0_25, %c0_26] : memref<1x16xf32, #tpu.memory_space<vmem>>, vector<1x16xf32>
    %46 = vector.broadcast %45 : vector<1x16xf32> to vector<8x16xf32>
    %47 = arith.addf %44, %46 : vector<8x16xf32>
    %c0_27 = arith.constant 0 : index
    %c0_28 = arith.constant 0 : index
    %48 = vector.load %arg9[%c0_27, %c0_28] : memref<8x8xf32, #tpu.memory_space<vmem>>, vector<8x8xf32>
    %cst_29 = arith.constant dense<0.000000e+00> : vector<8x16xf32>
    %49 = tpu.matmul %48, %47, %cst_29 {dimension_numbers = #tpu.dot_dimension_numbers<[1], [0], [0], [1], [0, 0, 1, 1], [], []>} : vector<8x8xf32>, vector<8x16xf32>, vector<8x16xf32> -> vector<8x16xf32>
    %c0_30 = arith.constant 0 : index
    %c0_31 = arith.constant 0 : index
    %50 = vector.load %arg10[%c0_30, %c0_31] : memref<8x8xf32, #tpu.memory_space<vmem>>, vector<8x8xf32>
    %cst_32 = arith.constant dense<0.000000e+00> : vector<8x16xf32>
    %51 = tpu.matmul %50, %47, %cst_32 {dimension_numbers = #tpu.dot_dimension_numbers<[1], [0], [0], [1], [0, 0, 1, 1], [], []>} : vector<8x8xf32>, vector<8x16xf32>, vector<8x16xf32> -> vector<8x16xf32>
    %c0_33 = arith.constant 0 : index
    %c0_34 = arith.constant 0 : index
    %52 = vector.load %arg11[%c0_33, %c0_34] : memref<16x16xf32, #tpu.memory_space<vmem>>, vector<16x16xf32>
    %cst_35 = arith.constant dense<0.000000e+00> : vector<8x16xf32>
    %53 = tpu.matmul %49, %52, %cst_35 {dimension_numbers = #tpu.dot_dimension_numbers<[1], [0], [0], [1], [0, 0, 1, 1], [], []>} : vector<8x16xf32>, vector<16x16xf32>, vector<8x16xf32> -> vector<8x16xf32>
    %c0_36 = arith.constant 0 : index
    %c0_37 = arith.constant 0 : index
    %54 = vector.load %arg12[%c0_36, %c0_37] : memref<16x16xf32, #tpu.memory_space<vmem>>, vector<16x16xf32>
    %cst_38 = arith.constant dense<0.000000e+00> : vector<8x16xf32>
    %55 = tpu.matmul %47, %54, %cst_38 {dimension_numbers = #tpu.dot_dimension_numbers<[1], [0], [0], [1], [0, 0, 1, 1], [], []>} : vector<8x16xf32>, vector<16x16xf32>, vector<8x16xf32> -> vector<8x16xf32>
    %56 = arith.addf %53, %55 : vector<8x16xf32>
    %c0_39 = arith.constant 0 : index
    %c0_40 = arith.constant 0 : index
    %57 = vector.load %arg13[%c0_39, %c0_40] : memref<16x16xf32, #tpu.memory_space<vmem>>, vector<16x16xf32>
    %cst_41 = arith.constant dense<0.000000e+00> : vector<8x16xf32>
    %58 = tpu.matmul %51, %57, %cst_41 {dimension_numbers = #tpu.dot_dimension_numbers<[1], [0], [0], [1], [0, 0, 1, 1], [], []>} : vector<8x16xf32>, vector<16x16xf32>, vector<8x16xf32> -> vector<8x16xf32>
    %59 = arith.addf %56, %58 : vector<8x16xf32>
    %c0_42 = arith.constant 0 : index
    %c0_43 = arith.constant 0 : index
    %60 = vector.load %arg14[%c0_42, %c0_43] : memref<1x16xf32, #tpu.memory_space<vmem>>, vector<1x16xf32>
    %61 = vector.broadcast %60 : vector<1x16xf32> to vector<8x16xf32>
    %62 = arith.addf %59, %61 : vector<8x16xf32>
    %c0_44 = arith.constant 0 : index
    %c0_45 = arith.constant 0 : index
    %63 = vector.load %arg8[%c0_44, %c0_45] : memref<16x16xf32, #tpu.memory_space<vmem>>, vector<16x16xf32>
    %cst_46 = arith.constant dense<0.000000e+00> : vector<16xf32>
    %64 = vector.multi_reduction <add>, %62, %cst_46 [0] : vector<8x16xf32> to vector<16xf32>
    %65 = vector.shape_cast %64 : vector<16xf32> to vector<1x16xf32>
    %cst_47 = arith.constant dense<0.000000e+00> : vector<1x16xf32>
    %66 = tpu.matmul %65, %63, %cst_47 {dimension_numbers = #tpu.dot_dimension_numbers<[1], [0], [0], [1], [0, 0, 1, 1], [], []>} : vector<1x16xf32>, vector<16x16xf32>, vector<1x16xf32> -> vector<1x16xf32>
    %67 = vector.broadcast %66 : vector<1x16xf32> to vector<8x16xf32>
    %68 = arith.subf %62, %67 : vector<8x16xf32>
    %69 = arith.mulf %68, %68 : vector<8x16xf32>
    %cst_48 = arith.constant dense<0.000000e+00> : vector<16xf32>
    %70 = vector.multi_reduction <add>, %69, %cst_48 [0] : vector<8x16xf32> to vector<16xf32>
    %71 = vector.shape_cast %70 : vector<16xf32> to vector<1x16xf32>
    %cst_49 = arith.constant dense<0.000000e+00> : vector<1x16xf32>
    %72 = tpu.matmul %71, %63, %cst_49 {dimension_numbers = #tpu.dot_dimension_numbers<[1], [0], [0], [1], [0, 0, 1, 1], [], []>} : vector<1x16xf32>, vector<16x16xf32>, vector<1x16xf32> -> vector<1x16xf32>
    %cst_50 = arith.constant 9.99999974E-6 : f32
    %73 = vector.broadcast %cst_50 : f32 to vector<1x16xf32>
    %74 = arith.addf %72, %73 : vector<1x16xf32>
    %75 = math.rsqrt %74 : vector<1x16xf32>
    %76 = vector.broadcast %75 : vector<1x16xf32> to vector<8x16xf32>
    %77 = arith.mulf %68, %76 : vector<8x16xf32>
    %c0_51 = arith.constant 0 : index
    %c0_52 = arith.constant 0 : index
    %78 = vector.load %arg15[%c0_51, %c0_52] : memref<1x16xf32, #tpu.memory_space<vmem>>, vector<1x16xf32>
    %79 = vector.broadcast %78 : vector<1x16xf32> to vector<8x16xf32>
    %80 = arith.mulf %77, %79 : vector<8x16xf32>
    %c0_53 = arith.constant 0 : index
    %c0_54 = arith.constant 0 : index
    %81 = vector.load %arg16[%c0_53, %c0_54] : memref<1x16xf32, #tpu.memory_space<vmem>>, vector<1x16xf32>
    %82 = vector.broadcast %81 : vector<1x16xf32> to vector<8x16xf32>
    %83 = arith.addf %80, %82 : vector<8x16xf32>
    %c0_55 = arith.constant 0 : index
    %c0_56 = arith.constant 0 : index
    %84 = vector.load %arg17[%c0_55, %c0_56] : memref<16x32xf32, #tpu.memory_space<vmem>>, vector<16x32xf32>
    %cst_57 = arith.constant dense<0.000000e+00> : vector<8x32xf32>
    %85 = tpu.matmul %83, %84, %cst_57 {dimension_numbers = #tpu.dot_dimension_numbers<[1], [0], [0], [1], [0, 0, 1, 1], [], []>} : vector<8x16xf32>, vector<16x32xf32>, vector<8x32xf32> -> vector<8x32xf32>
    %c0_58 = arith.constant 0 : index
    %c0_59 = arith.constant 0 : index
    %86 = vector.load %arg18[%c0_58, %c0_59] : memref<1x32xf32, #tpu.memory_space<vmem>>, vector<1x32xf32>
    %87 = vector.broadcast %86 : vector<1x32xf32> to vector<8x32xf32>
    %88 = arith.addf %85, %87 : vector<8x32xf32>
    %89 = arith.addf %0, %88 : vector<8x32xf32>
    %c0_60 = arith.constant 0 : index
    %c0_61 = arith.constant 0 : index
    %90 = vector.load %arg21[%c0_60, %c0_61] : memref<16x64xf32, #tpu.memory_space<vmem>>, vector<16x64xf32>
    %c0_62 = arith.constant 0 : index
    %c0_63 = arith.constant 0 : index
    %91 = vector.load %arg19[%c0_62, %c0_63] : memref<16x8xf32, #tpu.memory_space<vmem>>, vector<16x8xf32>
    %cst_64 = arith.constant dense<0.000000e+00> : vector<16x32xf32>
    %92 = tpu.matmul %91, %89, %cst_64 {dimension_numbers = #tpu.dot_dimension_numbers<[1], [0], [0], [1], [0, 0, 1, 1], [], []>} : vector<16x8xf32>, vector<8x32xf32>, vector<16x32xf32> -> vector<16x32xf32>
    %c0_65 = arith.constant 0 : index
    %c0_66 = arith.constant 0 : index
    %93 = vector.load %arg20[%c0_65, %c0_66] : memref<32x64xf32, #tpu.memory_space<vmem>>, vector<32x64xf32>
    %cst_67 = arith.constant dense<0.000000e+00> : vector<16x64xf32>
    %94 = tpu.matmul %92, %93, %cst_67 {dimension_numbers = #tpu.dot_dimension_numbers<[1], [0], [0], [1], [0, 0, 1, 1], [], []>} : vector<16x32xf32>, vector<32x64xf32>, vector<16x64xf32> -> vector<16x64xf32>
    %95 = arith.addf %90, %94 : vector<16x64xf32>
    %c0_68 = arith.constant 0 : index
    %c0_69 = arith.constant 0 : index
    %96 = vector.load %arg22[%c0_68, %c0_69] : memref<16x64xf32, #tpu.memory_space<vmem>>, vector<16x64xf32>
    tpu.vector_store %arg22[%c0_68, %c0_69], %95 {strides = array<i32>} : memref<16x64xf32, #tpu.memory_space<vmem>>, vector<16x64xf32>,
    return
  }
}

module attributes {stable_mosaic.version = 11 : i64} {
  func.func @_residual_kernel(%arg0: memref<32x128xf32, #tpu.memory_space<vmem>>, %arg1: memref<1x128xf32, #tpu.memory_space<vmem>>, %arg2: memref<1x128xf32, #tpu.memory_space<vmem>>, %arg3: memref<128x128xf32, #tpu.memory_space<vmem>>, %arg4: memref<128x64xf32, #tpu.memory_space<vmem>>, %arg5: memref<1x64xf32, #tpu.memory_space<vmem>>, %arg6: memref<1x64xf32, #tpu.memory_space<vmem>>, %arg7: memref<1x64xf32, #tpu.memory_space<vmem>>, %arg8: memref<64x64xf32, #tpu.memory_space<vmem>>, %arg9: memref<32x32xf32, #tpu.memory_space<vmem>>, %arg10: memref<32x32xf32, #tpu.memory_space<vmem>>, %arg11: memref<64x64xf32, #tpu.memory_space<vmem>>, %arg12: memref<64x64xf32, #tpu.memory_space<vmem>>, %arg13: memref<64x64xf32, #tpu.memory_space<vmem>>, %arg14: memref<1x64xf32, #tpu.memory_space<vmem>>, %arg15: memref<1x64xf32, #tpu.memory_space<vmem>>, %arg16: memref<1x64xf32, #tpu.memory_space<vmem>>, %arg17: memref<64x128xf32, #tpu.memory_space<vmem>>, %arg18: memref<1x128xf32, #tpu.memory_space<vmem>>, %arg19: memref<32x128xf32, #tpu.memory_space<vmem>>) attributes {dimension_semantics = [], scalar_prefetch = 0 : i64, scratch_operands = 0 : i64, tpu.core_type = #tpu.core_type<tc>} {
    %c0 = arith.constant 0 : index
    %c0_0 = arith.constant 0 : index
    %0 = vector.load %arg0[%c0, %c0_0] : memref<32x128xf32, #tpu.memory_space<vmem>>, vector<32x128xf32>
    %c0_1 = arith.constant 0 : index
    %c0_2 = arith.constant 0 : index
    %1 = vector.load %arg3[%c0_1, %c0_2] : memref<128x128xf32, #tpu.memory_space<vmem>>, vector<128x128xf32>
    %cst = arith.constant dense<0.000000e+00> : vector<128xf32>
    %2 = vector.multi_reduction <add>, %0, %cst [0] : vector<32x128xf32> to vector<128xf32>
    %3 = vector.shape_cast %2 : vector<128xf32> to vector<1x128xf32>
    %cst_3 = arith.constant dense<0.000000e+00> : vector<1x128xf32>
    %4 = tpu.matmul %3, %1, %cst_3 {dimension_numbers = #tpu.dot_dimension_numbers<[1], [0], [0], [1], [0, 0, 1, 1], [], []>} : vector<1x128xf32>, vector<128x128xf32>, vector<1x128xf32> -> vector<1x128xf32>
    %5 = vector.broadcast %4 : vector<1x128xf32> to vector<32x128xf32>
    %6 = arith.subf %0, %5 : vector<32x128xf32>
    %7 = arith.mulf %6, %6 : vector<32x128xf32>
    %cst_4 = arith.constant dense<0.000000e+00> : vector<128xf32>
    %8 = vector.multi_reduction <add>, %7, %cst_4 [0] : vector<32x128xf32> to vector<128xf32>
    %9 = vector.shape_cast %8 : vector<128xf32> to vector<1x128xf32>
    %cst_5 = arith.constant dense<0.000000e+00> : vector<1x128xf32>
    %10 = tpu.matmul %9, %1, %cst_5 {dimension_numbers = #tpu.dot_dimension_numbers<[1], [0], [0], [1], [0, 0, 1, 1], [], []>} : vector<1x128xf32>, vector<128x128xf32>, vector<1x128xf32> -> vector<1x128xf32>
    %cst_6 = arith.constant 9.99999974E-6 : f32
    %11 = vector.broadcast %cst_6 : f32 to vector<1x128xf32>
    %12 = arith.addf %10, %11 : vector<1x128xf32>
    %13 = math.rsqrt %12 : vector<1x128xf32>
    %14 = vector.broadcast %13 : vector<1x128xf32> to vector<32x128xf32>
    %15 = arith.mulf %6, %14 : vector<32x128xf32>
    %c0_7 = arith.constant 0 : index
    %c0_8 = arith.constant 0 : index
    %16 = vector.load %arg1[%c0_7, %c0_8] : memref<1x128xf32, #tpu.memory_space<vmem>>, vector<1x128xf32>
    %17 = vector.broadcast %16 : vector<1x128xf32> to vector<32x128xf32>
    %18 = arith.mulf %15, %17 : vector<32x128xf32>
    %c0_9 = arith.constant 0 : index
    %c0_10 = arith.constant 0 : index
    %19 = vector.load %arg2[%c0_9, %c0_10] : memref<1x128xf32, #tpu.memory_space<vmem>>, vector<1x128xf32>
    %20 = vector.broadcast %19 : vector<1x128xf32> to vector<32x128xf32>
    %21 = arith.addf %18, %20 : vector<32x128xf32>
    %c0_11 = arith.constant 0 : index
    %c0_12 = arith.constant 0 : index
    %22 = vector.load %arg4[%c0_11, %c0_12] : memref<128x64xf32, #tpu.memory_space<vmem>>, vector<128x64xf32>
    %cst_13 = arith.constant dense<0.000000e+00> : vector<32x64xf32>
    %23 = tpu.matmul %21, %22, %cst_13 {dimension_numbers = #tpu.dot_dimension_numbers<[1], [0], [0], [1], [0, 0, 1, 1], [], []>} : vector<32x128xf32>, vector<128x64xf32>, vector<32x64xf32> -> vector<32x64xf32>
    %c0_14 = arith.constant 0 : index
    %c0_15 = arith.constant 0 : index
    %24 = vector.load %arg5[%c0_14, %c0_15] : memref<1x64xf32, #tpu.memory_space<vmem>>, vector<1x64xf32>
    %25 = vector.broadcast %24 : vector<1x64xf32> to vector<32x64xf32>
    %26 = arith.addf %23, %25 : vector<32x64xf32>
    %c0_16 = arith.constant 0 : index
    %c0_17 = arith.constant 0 : index
    %27 = vector.load %arg8[%c0_16, %c0_17] : memref<64x64xf32, #tpu.memory_space<vmem>>, vector<64x64xf32>
    %cst_18 = arith.constant dense<0.000000e+00> : vector<64xf32>
    %28 = vector.multi_reduction <add>, %26, %cst_18 [0] : vector<32x64xf32> to vector<64xf32>
    %29 = vector.shape_cast %28 : vector<64xf32> to vector<1x64xf32>
    %cst_19 = arith.constant dense<0.000000e+00> : vector<1x64xf32>
    %30 = tpu.matmul %29, %27, %cst_19 {dimension_numbers = #tpu.dot_dimension_numbers<[1], [0], [0], [1], [0, 0, 1, 1], [], []>} : vector<1x64xf32>, vector<64x64xf32>, vector<1x64xf32> -> vector<1x64xf32>
    %31 = vector.broadcast %30 : vector<1x64xf32> to vector<32x64xf32>
    %32 = arith.subf %26, %31 : vector<32x64xf32>
    %33 = arith.mulf %32, %32 : vector<32x64xf32>
    %cst_20 = arith.constant dense<0.000000e+00> : vector<64xf32>
    %34 = vector.multi_reduction <add>, %33, %cst_20 [0] : vector<32x64xf32> to vector<64xf32>
    %35 = vector.shape_cast %34 : vector<64xf32> to vector<1x64xf32>
    %cst_21 = arith.constant dense<0.000000e+00> : vector<1x64xf32>
    %36 = tpu.matmul %35, %27, %cst_21 {dimension_numbers = #tpu.dot_dimension_numbers<[1], [0], [0], [1], [0, 0, 1, 1], [], []>} : vector<1x64xf32>, vector<64x64xf32>, vector<1x64xf32> -> vector<1x64xf32>
    %cst_22 = arith.constant 9.99999974E-6 : f32
    %37 = vector.broadcast %cst_22 : f32 to vector<1x64xf32>
    %38 = arith.addf %36, %37 : vector<1x64xf32>
    %39 = math.rsqrt %38 : vector<1x64xf32>
    %40 = vector.broadcast %39 : vector<1x64xf32> to vector<32x64xf32>
    %41 = arith.mulf %32, %40 : vector<32x64xf32>
    %c0_23 = arith.constant 0 : index
    %c0_24 = arith.constant 0 : index
    %42 = vector.load %arg6[%c0_23, %c0_24] : memref<1x64xf32, #tpu.memory_space<vmem>>, vector<1x64xf32>
    %43 = vector.broadcast %42 : vector<1x64xf32> to vector<32x64xf32>
    %44 = arith.mulf %41, %43 : vector<32x64xf32>
    %c0_25 = arith.constant 0 : index
    %c0_26 = arith.constant 0 : index
    %45 = vector.load %arg7[%c0_25, %c0_26] : memref<1x64xf32, #tpu.memory_space<vmem>>, vector<1x64xf32>
    %46 = vector.broadcast %45 : vector<1x64xf32> to vector<32x64xf32>
    %47 = arith.addf %44, %46 : vector<32x64xf32>
    %c0_27 = arith.constant 0 : index
    %c0_28 = arith.constant 0 : index
    %48 = vector.load %arg9[%c0_27, %c0_28] : memref<32x32xf32, #tpu.memory_space<vmem>>, vector<32x32xf32>
    %cst_29 = arith.constant dense<0.000000e+00> : vector<32x64xf32>
    %49 = tpu.matmul %48, %47, %cst_29 {dimension_numbers = #tpu.dot_dimension_numbers<[1], [0], [0], [1], [0, 0, 1, 1], [], []>} : vector<32x32xf32>, vector<32x64xf32>, vector<32x64xf32> -> vector<32x64xf32>
    %c0_30 = arith.constant 0 : index
    %c0_31 = arith.constant 0 : index
    %50 = vector.load %arg10[%c0_30, %c0_31] : memref<32x32xf32, #tpu.memory_space<vmem>>, vector<32x32xf32>
    %cst_32 = arith.constant dense<0.000000e+00> : vector<32x64xf32>
    %51 = tpu.matmul %50, %47, %cst_32 {dimension_numbers = #tpu.dot_dimension_numbers<[1], [0], [0], [1], [0, 0, 1, 1], [], []>} : vector<32x32xf32>, vector<32x64xf32>, vector<32x64xf32> -> vector<32x64xf32>
    %c0_33 = arith.constant 0 : index
    %c0_34 = arith.constant 0 : index
    %52 = vector.load %arg11[%c0_33, %c0_34] : memref<64x64xf32, #tpu.memory_space<vmem>>, vector<64x64xf32>
    %cst_35 = arith.constant dense<0.000000e+00> : vector<32x64xf32>
    %53 = tpu.matmul %49, %52, %cst_35 {dimension_numbers = #tpu.dot_dimension_numbers<[1], [0], [0], [1], [0, 0, 1, 1], [], []>} : vector<32x64xf32>, vector<64x64xf32>, vector<32x64xf32> -> vector<32x64xf32>
    %c0_36 = arith.constant 0 : index
    %c0_37 = arith.constant 0 : index
    %54 = vector.load %arg12[%c0_36, %c0_37] : memref<64x64xf32, #tpu.memory_space<vmem>>, vector<64x64xf32>
    %cst_38 = arith.constant dense<0.000000e+00> : vector<32x64xf32>
    %55 = tpu.matmul %47, %54, %cst_38 {dimension_numbers = #tpu.dot_dimension_numbers<[1], [0], [0], [1], [0, 0, 1, 1], [], []>} : vector<32x64xf32>, vector<64x64xf32>, vector<32x64xf32> -> vector<32x64xf32>
    %56 = arith.addf %53, %55 : vector<32x64xf32>
    %c0_39 = arith.constant 0 : index
    %c0_40 = arith.constant 0 : index
    %57 = vector.load %arg13[%c0_39, %c0_40] : memref<64x64xf32, #tpu.memory_space<vmem>>, vector<64x64xf32>
    %cst_41 = arith.constant dense<0.000000e+00> : vector<32x64xf32>
    %58 = tpu.matmul %51, %57, %cst_41 {dimension_numbers = #tpu.dot_dimension_numbers<[1], [0], [0], [1], [0, 0, 1, 1], [], []>} : vector<32x64xf32>, vector<64x64xf32>, vector<32x64xf32> -> vector<32x64xf32>
    %59 = arith.addf %56, %58 : vector<32x64xf32>
    %c0_42 = arith.constant 0 : index
    %c0_43 = arith.constant 0 : index
    %60 = vector.load %arg14[%c0_42, %c0_43] : memref<1x64xf32, #tpu.memory_space<vmem>>, vector<1x64xf32>
    %61 = vector.broadcast %60 : vector<1x64xf32> to vector<32x64xf32>
    %62 = arith.addf %59, %61 : vector<32x64xf32>
    %c0_44 = arith.constant 0 : index
    %c0_45 = arith.constant 0 : index
    %63 = vector.load %arg8[%c0_44, %c0_45] : memref<64x64xf32, #tpu.memory_space<vmem>>, vector<64x64xf32>
    %cst_46 = arith.constant dense<0.000000e+00> : vector<64xf32>
    %64 = vector.multi_reduction <add>, %62, %cst_46 [0] : vector<32x64xf32> to vector<64xf32>
    %65 = vector.shape_cast %64 : vector<64xf32> to vector<1x64xf32>
    %cst_47 = arith.constant dense<0.000000e+00> : vector<1x64xf32>
    %66 = tpu.matmul %65, %63, %cst_47 {dimension_numbers = #tpu.dot_dimension_numbers<[1], [0], [0], [1], [0, 0, 1, 1], [], []>} : vector<1x64xf32>, vector<64x64xf32>, vector<1x64xf32> -> vector<1x64xf32>
    %67 = vector.broadcast %66 : vector<1x64xf32> to vector<32x64xf32>
    %68 = arith.subf %62, %67 : vector<32x64xf32>
    %69 = arith.mulf %68, %68 : vector<32x64xf32>
    %cst_48 = arith.constant dense<0.000000e+00> : vector<64xf32>
    %70 = vector.multi_reduction <add>, %69, %cst_48 [0] : vector<32x64xf32> to vector<64xf32>
    %71 = vector.shape_cast %70 : vector<64xf32> to vector<1x64xf32>
    %cst_49 = arith.constant dense<0.000000e+00> : vector<1x64xf32>
    %72 = tpu.matmul %71, %63, %cst_49 {dimension_numbers = #tpu.dot_dimension_numbers<[1], [0], [0], [1], [0, 0, 1, 1], [], []>} : vector<1x64xf32>, vector<64x64xf32>, vector<1x64xf32> -> vector<1x64xf32>
    %cst_50 = arith.constant 9.99999974E-6 : f32
    %73 = vector.broadcast %cst_50 : f32 to vector<1x64xf32>
    %74 = arith.addf %72, %73 : vector<1x64xf32>
    %75 = math.rsqrt %74 : vector<1x64xf32>
    %76 = vector.broadcast %75 : vector<1x64xf32> to vector<32x64xf32>
    %77 = arith.mulf %68, %76 : vector<32x64xf32>
    %c0_51 = arith.constant 0 : index
    %c0_52 = arith.constant 0 : index
    %78 = vector.load %arg15[%c0_51, %c0_52] : memref<1x64xf32, #tpu.memory_space<vmem>>, vector<1x64xf32>
    %79 = vector.broadcast %78 : vector<1x64xf32> to vector<32x64xf32>
    %80 = arith.mulf %77, %79 : vector<32x64xf32>
    %c0_53 = arith.constant 0 : index
    %c0_54 = arith.constant 0 : index
    %81 = vector.load %arg16[%c0_53, %c0_54] : memref<1x64xf32, #tpu.memory_space<vmem>>, vector<1x64xf32>
    %82 = vector.broadcast %81 : vector<1x64xf32> to vector<32x64xf32>
    %83 = arith.addf %80, %82 : vector<32x64xf32>
    %c0_55 = arith.constant 0 : index
    %c0_56 = arith.constant 0 : index
    %84 = vector.load %arg17[%c0_55, %c0_56] : memref<64x128xf32, #tpu.memory_space<vmem>>, vector<64x128xf32>
    %cst_57 = arith.constant dense<0.000000e+00> : vector<32x128xf32>
    %85 = tpu.matmul %83, %84, %cst_57 {dimension_numbers = #tpu.dot_dimension_numbers<[1], [0], [0], [1], [0, 0, 1, 1], [], []>} : vector<32x64xf32>, vector<64x128xf32>, vector<32x128xf32> -> vector<32x128xf32>
    %c0_58 = arith.constant 0 : index
    %c0_59 = arith.constant 0 : index
    %86 = vector.load %arg18[%c0_58, %c0_59] : memref<1x128xf32, #tpu.memory_space<vmem>>, vector<1x128xf32>
    %87 = vector.broadcast %86 : vector<1x128xf32> to vector<32x128xf32>
    %88 = arith.addf %85, %87 : vector<32x128xf32>
    %89 = arith.addf %0, %88 : vector<32x128xf32>
    %c0_60 = arith.constant 0 : index
    %c0_61 = arith.constant 0 : index
    %90 = vector.load %arg19[%c0_60, %c0_61] : memref<32x128xf32, #tpu.memory_space<vmem>>, vector<32x128xf32>
    tpu.vector_store %arg19[%c0_60, %c0_61], %89 {strides = array<i32>} : memref<32x128xf32, #tpu.memory_space<vmem>>, vector<32x128xf32>,
    return
  }
}

module attributes {stable_mosaic.version = 11 : i64} {
  func.func @_residual_kernel(%arg0: memref<16x64xf32, #tpu.memory_space<vmem>>, %arg1: memref<1x64xf32, #tpu.memory_space<vmem>>, %arg2: memref<1x64xf32, #tpu.memory_space<vmem>>, %arg3: memref<64x64xf32, #tpu.memory_space<vmem>>, %arg4: memref<64x32xf32, #tpu.memory_space<vmem>>, %arg5: memref<1x32xf32, #tpu.memory_space<vmem>>, %arg6: memref<1x32xf32, #tpu.memory_space<vmem>>, %arg7: memref<1x32xf32, #tpu.memory_space<vmem>>, %arg8: memref<32x32xf32, #tpu.memory_space<vmem>>, %arg9: memref<16x16xf32, #tpu.memory_space<vmem>>, %arg10: memref<16x16xf32, #tpu.memory_space<vmem>>, %arg11: memref<32x32xf32, #tpu.memory_space<vmem>>, %arg12: memref<32x32xf32, #tpu.memory_space<vmem>>, %arg13: memref<32x32xf32, #tpu.memory_space<vmem>>, %arg14: memref<1x32xf32, #tpu.memory_space<vmem>>, %arg15: memref<1x32xf32, #tpu.memory_space<vmem>>, %arg16: memref<1x32xf32, #tpu.memory_space<vmem>>, %arg17: memref<32x64xf32, #tpu.memory_space<vmem>>, %arg18: memref<1x64xf32, #tpu.memory_space<vmem>>, %arg19: memref<32x16xf32, #tpu.memory_space<vmem>>, %arg20: memref<64x128xf32, #tpu.memory_space<vmem>>, %arg21: memref<32x128xf32, #tpu.memory_space<vmem>>, %arg22: memref<32x128xf32, #tpu.memory_space<vmem>>) attributes {dimension_semantics = [], scalar_prefetch = 0 : i64, scratch_operands = 0 : i64, tpu.core_type = #tpu.core_type<tc>} {
    %c0 = arith.constant 0 : index
    %c0_0 = arith.constant 0 : index
    %0 = vector.load %arg0[%c0, %c0_0] : memref<16x64xf32, #tpu.memory_space<vmem>>, vector<16x64xf32>
    %c0_1 = arith.constant 0 : index
    %c0_2 = arith.constant 0 : index
    %1 = vector.load %arg3[%c0_1, %c0_2] : memref<64x64xf32, #tpu.memory_space<vmem>>, vector<64x64xf32>
    %cst = arith.constant dense<0.000000e+00> : vector<64xf32>
    %2 = vector.multi_reduction <add>, %0, %cst [0] : vector<16x64xf32> to vector<64xf32>
    %3 = vector.shape_cast %2 : vector<64xf32> to vector<1x64xf32>
    %cst_3 = arith.constant dense<0.000000e+00> : vector<1x64xf32>
    %4 = tpu.matmul %3, %1, %cst_3 {dimension_numbers = #tpu.dot_dimension_numbers<[1], [0], [0], [1], [0, 0, 1, 1], [], []>} : vector<1x64xf32>, vector<64x64xf32>, vector<1x64xf32> -> vector<1x64xf32>
    %5 = vector.broadcast %4 : vector<1x64xf32> to vector<16x64xf32>
    %6 = arith.subf %0, %5 : vector<16x64xf32>
    %7 = arith.mulf %6, %6 : vector<16x64xf32>
    %cst_4 = arith.constant dense<0.000000e+00> : vector<64xf32>
    %8 = vector.multi_reduction <add>, %7, %cst_4 [0] : vector<16x64xf32> to vector<64xf32>
    %9 = vector.shape_cast %8 : vector<64xf32> to vector<1x64xf32>
    %cst_5 = arith.constant dense<0.000000e+00> : vector<1x64xf32>
    %10 = tpu.matmul %9, %1, %cst_5 {dimension_numbers = #tpu.dot_dimension_numbers<[1], [0], [0], [1], [0, 0, 1, 1], [], []>} : vector<1x64xf32>, vector<64x64xf32>, vector<1x64xf32> -> vector<1x64xf32>
    %cst_6 = arith.constant 9.99999974E-6 : f32
    %11 = vector.broadcast %cst_6 : f32 to vector<1x64xf32>
    %12 = arith.addf %10, %11 : vector<1x64xf32>
    %13 = math.rsqrt %12 : vector<1x64xf32>
    %14 = vector.broadcast %13 : vector<1x64xf32> to vector<16x64xf32>
    %15 = arith.mulf %6, %14 : vector<16x64xf32>
    %c0_7 = arith.constant 0 : index
    %c0_8 = arith.constant 0 : index
    %16 = vector.load %arg1[%c0_7, %c0_8] : memref<1x64xf32, #tpu.memory_space<vmem>>, vector<1x64xf32>
    %17 = vector.broadcast %16 : vector<1x64xf32> to vector<16x64xf32>
    %18 = arith.mulf %15, %17 : vector<16x64xf32>
    %c0_9 = arith.constant 0 : index
    %c0_10 = arith.constant 0 : index
    %19 = vector.load %arg2[%c0_9, %c0_10] : memref<1x64xf32, #tpu.memory_space<vmem>>, vector<1x64xf32>
    %20 = vector.broadcast %19 : vector<1x64xf32> to vector<16x64xf32>
    %21 = arith.addf %18, %20 : vector<16x64xf32>
    %c0_11 = arith.constant 0 : index
    %c0_12 = arith.constant 0 : index
    %22 = vector.load %arg4[%c0_11, %c0_12] : memref<64x32xf32, #tpu.memory_space<vmem>>, vector<64x32xf32>
    %cst_13 = arith.constant dense<0.000000e+00> : vector<16x32xf32>
    %23 = tpu.matmul %21, %22, %cst_13 {dimension_numbers = #tpu.dot_dimension_numbers<[1], [0], [0], [1], [0, 0, 1, 1], [], []>} : vector<16x64xf32>, vector<64x32xf32>, vector<16x32xf32> -> vector<16x32xf32>
    %c0_14 = arith.constant 0 : index
    %c0_15 = arith.constant 0 : index
    %24 = vector.load %arg5[%c0_14, %c0_15] : memref<1x32xf32, #tpu.memory_space<vmem>>, vector<1x32xf32>
    %25 = vector.broadcast %24 : vector<1x32xf32> to vector<16x32xf32>
    %26 = arith.addf %23, %25 : vector<16x32xf32>
    %c0_16 = arith.constant 0 : index
    %c0_17 = arith.constant 0 : index
    %27 = vector.load %arg8[%c0_16, %c0_17] : memref<32x32xf32, #tpu.memory_space<vmem>>, vector<32x32xf32>
    %cst_18 = arith.constant dense<0.000000e+00> : vector<32xf32>
    %28 = vector.multi_reduction <add>, %26, %cst_18 [0] : vector<16x32xf32> to vector<32xf32>
    %29 = vector.shape_cast %28 : vector<32xf32> to vector<1x32xf32>
    %cst_19 = arith.constant dense<0.000000e+00> : vector<1x32xf32>
    %30 = tpu.matmul %29, %27, %cst_19 {dimension_numbers = #tpu.dot_dimension_numbers<[1], [0], [0], [1], [0, 0, 1, 1], [], []>} : vector<1x32xf32>, vector<32x32xf32>, vector<1x32xf32> -> vector<1x32xf32>
    %31 = vector.broadcast %30 : vector<1x32xf32> to vector<16x32xf32>
    %32 = arith.subf %26, %31 : vector<16x32xf32>
    %33 = arith.mulf %32, %32 : vector<16x32xf32>
    %cst_20 = arith.constant dense<0.000000e+00> : vector<32xf32>
    %34 = vector.multi_reduction <add>, %33, %cst_20 [0] : vector<16x32xf32> to vector<32xf32>
    %35 = vector.shape_cast %34 : vector<32xf32> to vector<1x32xf32>
    %cst_21 = arith.constant dense<0.000000e+00> : vector<1x32xf32>
    %36 = tpu.matmul %35, %27, %cst_21 {dimension_numbers = #tpu.dot_dimension_numbers<[1], [0], [0], [1], [0, 0, 1, 1], [], []>} : vector<1x32xf32>, vector<32x32xf32>, vector<1x32xf32> -> vector<1x32xf32>
    %cst_22 = arith.constant 9.99999974E-6 : f32
    %37 = vector.broadcast %cst_22 : f32 to vector<1x32xf32>
    %38 = arith.addf %36, %37 : vector<1x32xf32>
    %39 = math.rsqrt %38 : vector<1x32xf32>
    %40 = vector.broadcast %39 : vector<1x32xf32> to vector<16x32xf32>
    %41 = arith.mulf %32, %40 : vector<16x32xf32>
    %c0_23 = arith.constant 0 : index
    %c0_24 = arith.constant 0 : index
    %42 = vector.load %arg6[%c0_23, %c0_24] : memref<1x32xf32, #tpu.memory_space<vmem>>, vector<1x32xf32>
    %43 = vector.broadcast %42 : vector<1x32xf32> to vector<16x32xf32>
    %44 = arith.mulf %41, %43 : vector<16x32xf32>
    %c0_25 = arith.constant 0 : index
    %c0_26 = arith.constant 0 : index
    %45 = vector.load %arg7[%c0_25, %c0_26] : memref<1x32xf32, #tpu.memory_space<vmem>>, vector<1x32xf32>
    %46 = vector.broadcast %45 : vector<1x32xf32> to vector<16x32xf32>
    %47 = arith.addf %44, %46 : vector<16x32xf32>
    %c0_27 = arith.constant 0 : index
    %c0_28 = arith.constant 0 : index
    %48 = vector.load %arg9[%c0_27, %c0_28] : memref<16x16xf32, #tpu.memory_space<vmem>>, vector<16x16xf32>
    %cst_29 = arith.constant dense<0.000000e+00> : vector<16x32xf32>
    %49 = tpu.matmul %48, %47, %cst_29 {dimension_numbers = #tpu.dot_dimension_numbers<[1], [0], [0], [1], [0, 0, 1, 1], [], []>} : vector<16x16xf32>, vector<16x32xf32>, vector<16x32xf32> -> vector<16x32xf32>
    %c0_30 = arith.constant 0 : index
    %c0_31 = arith.constant 0 : index
    %50 = vector.load %arg10[%c0_30, %c0_31] : memref<16x16xf32, #tpu.memory_space<vmem>>, vector<16x16xf32>
    %cst_32 = arith.constant dense<0.000000e+00> : vector<16x32xf32>
    %51 = tpu.matmul %50, %47, %cst_32 {dimension_numbers = #tpu.dot_dimension_numbers<[1], [0], [0], [1], [0, 0, 1, 1], [], []>} : vector<16x16xf32>, vector<16x32xf32>, vector<16x32xf32> -> vector<16x32xf32>
    %c0_33 = arith.constant 0 : index
    %c0_34 = arith.constant 0 : index
    %52 = vector.load %arg11[%c0_33, %c0_34] : memref<32x32xf32, #tpu.memory_space<vmem>>, vector<32x32xf32>
    %cst_35 = arith.constant dense<0.000000e+00> : vector<16x32xf32>
    %53 = tpu.matmul %49, %52, %cst_35 {dimension_numbers = #tpu.dot_dimension_numbers<[1], [0], [0], [1], [0, 0, 1, 1], [], []>} : vector<16x32xf32>, vector<32x32xf32>, vector<16x32xf32> -> vector<16x32xf32>
    %c0_36 = arith.constant 0 : index
    %c0_37 = arith.constant 0 : index
    %54 = vector.load %arg12[%c0_36, %c0_37] : memref<32x32xf32, #tpu.memory_space<vmem>>, vector<32x32xf32>
    %cst_38 = arith.constant dense<0.000000e+00> : vector<16x32xf32>
    %55 = tpu.matmul %47, %54, %cst_38 {dimension_numbers = #tpu.dot_dimension_numbers<[1], [0], [0], [1], [0, 0, 1, 1], [], []>} : vector<16x32xf32>, vector<32x32xf32>, vector<16x32xf32> -> vector<16x32xf32>
    %56 = arith.addf %53, %55 : vector<16x32xf32>
    %c0_39 = arith.constant 0 : index
    %c0_40 = arith.constant 0 : index
    %57 = vector.load %arg13[%c0_39, %c0_40] : memref<32x32xf32, #tpu.memory_space<vmem>>, vector<32x32xf32>
    %cst_41 = arith.constant dense<0.000000e+00> : vector<16x32xf32>
    %58 = tpu.matmul %51, %57, %cst_41 {dimension_numbers = #tpu.dot_dimension_numbers<[1], [0], [0], [1], [0, 0, 1, 1], [], []>} : vector<16x32xf32>, vector<32x32xf32>, vector<16x32xf32> -> vector<16x32xf32>
    %59 = arith.addf %56, %58 : vector<16x32xf32>
    %c0_42 = arith.constant 0 : index
    %c0_43 = arith.constant 0 : index
    %60 = vector.load %arg14[%c0_42, %c0_43] : memref<1x32xf32, #tpu.memory_space<vmem>>, vector<1x32xf32>
    %61 = vector.broadcast %60 : vector<1x32xf32> to vector<16x32xf32>
    %62 = arith.addf %59, %61 : vector<16x32xf32>
    %c0_44 = arith.constant 0 : index
    %c0_45 = arith.constant 0 : index
    %63 = vector.load %arg8[%c0_44, %c0_45] : memref<32x32xf32, #tpu.memory_space<vmem>>, vector<32x32xf32>
    %cst_46 = arith.constant dense<0.000000e+00> : vector<32xf32>
    %64 = vector.multi_reduction <add>, %62, %cst_46 [0] : vector<16x32xf32> to vector<32xf32>
    %65 = vector.shape_cast %64 : vector<32xf32> to vector<1x32xf32>
    %cst_47 = arith.constant dense<0.000000e+00> : vector<1x32xf32>
    %66 = tpu.matmul %65, %63, %cst_47 {dimension_numbers = #tpu.dot_dimension_numbers<[1], [0], [0], [1], [0, 0, 1, 1], [], []>} : vector<1x32xf32>, vector<32x32xf32>, vector<1x32xf32> -> vector<1x32xf32>
    %67 = vector.broadcast %66 : vector<1x32xf32> to vector<16x32xf32>
    %68 = arith.subf %62, %67 : vector<16x32xf32>
    %69 = arith.mulf %68, %68 : vector<16x32xf32>
    %cst_48 = arith.constant dense<0.000000e+00> : vector<32xf32>
    %70 = vector.multi_reduction <add>, %69, %cst_48 [0] : vector<16x32xf32> to vector<32xf32>
    %71 = vector.shape_cast %70 : vector<32xf32> to vector<1x32xf32>
    %cst_49 = arith.constant dense<0.000000e+00> : vector<1x32xf32>
    %72 = tpu.matmul %71, %63, %cst_49 {dimension_numbers = #tpu.dot_dimension_numbers<[1], [0], [0], [1], [0, 0, 1, 1], [], []>} : vector<1x32xf32>, vector<32x32xf32>, vector<1x32xf32> -> vector<1x32xf32>
    %cst_50 = arith.constant 9.99999974E-6 : f32
    %73 = vector.broadcast %cst_50 : f32 to vector<1x32xf32>
    %74 = arith.addf %72, %73 : vector<1x32xf32>
    %75 = math.rsqrt %74 : vector<1x32xf32>
    %76 = vector.broadcast %75 : vector<1x32xf32> to vector<16x32xf32>
    %77 = arith.mulf %68, %76 : vector<16x32xf32>
    %c0_51 = arith.constant 0 : index
    %c0_52 = arith.constant 0 : index
    %78 = vector.load %arg15[%c0_51, %c0_52] : memref<1x32xf32, #tpu.memory_space<vmem>>, vector<1x32xf32>
    %79 = vector.broadcast %78 : vector<1x32xf32> to vector<16x32xf32>
    %80 = arith.mulf %77, %79 : vector<16x32xf32>
    %c0_53 = arith.constant 0 : index
    %c0_54 = arith.constant 0 : index
    %81 = vector.load %arg16[%c0_53, %c0_54] : memref<1x32xf32, #tpu.memory_space<vmem>>, vector<1x32xf32>
    %82 = vector.broadcast %81 : vector<1x32xf32> to vector<16x32xf32>
    %83 = arith.addf %80, %82 : vector<16x32xf32>
    %c0_55 = arith.constant 0 : index
    %c0_56 = arith.constant 0 : index
    %84 = vector.load %arg17[%c0_55, %c0_56] : memref<32x64xf32, #tpu.memory_space<vmem>>, vector<32x64xf32>
    %cst_57 = arith.constant dense<0.000000e+00> : vector<16x64xf32>
    %85 = tpu.matmul %83, %84, %cst_57 {dimension_numbers = #tpu.dot_dimension_numbers<[1], [0], [0], [1], [0, 0, 1, 1], [], []>} : vector<16x32xf32>, vector<32x64xf32>, vector<16x64xf32> -> vector<16x64xf32>
    %c0_58 = arith.constant 0 : index
    %c0_59 = arith.constant 0 : index
    %86 = vector.load %arg18[%c0_58, %c0_59] : memref<1x64xf32, #tpu.memory_space<vmem>>, vector<1x64xf32>
    %87 = vector.broadcast %86 : vector<1x64xf32> to vector<16x64xf32>
    %88 = arith.addf %85, %87 : vector<16x64xf32>
    %89 = arith.addf %0, %88 : vector<16x64xf32>
    %c0_60 = arith.constant 0 : index
    %c0_61 = arith.constant 0 : index
    %90 = vector.load %arg21[%c0_60, %c0_61] : memref<32x128xf32, #tpu.memory_space<vmem>>, vector<32x128xf32>
    %c0_62 = arith.constant 0 : index
    %c0_63 = arith.constant 0 : index
    %91 = vector.load %arg19[%c0_62, %c0_63] : memref<32x16xf32, #tpu.memory_space<vmem>>, vector<32x16xf32>
    %cst_64 = arith.constant dense<0.000000e+00> : vector<32x64xf32>
    %92 = tpu.matmul %91, %89, %cst_64 {dimension_numbers = #tpu.dot_dimension_numbers<[1], [0], [0], [1], [0, 0, 1, 1], [], []>} : vector<32x16xf32>, vector<16x64xf32>, vector<32x64xf32> -> vector<32x64xf32>
    %c0_65 = arith.constant 0 : index
    %c0_66 = arith.constant 0 : index
    %93 = vector.load %arg20[%c0_65, %c0_66] : memref<64x128xf32, #tpu.memory_space<vmem>>, vector<64x128xf32>
    %cst_67 = arith.constant dense<0.000000e+00> : vector<32x128xf32>
    %94 = tpu.matmul %92, %93, %cst_67 {dimension_numbers = #tpu.dot_dimension_numbers<[1], [0], [0], [1], [0, 0, 1, 1], [], []>} : vector<32x64xf32>, vector<64x128xf32>, vector<32x128xf32> -> vector<32x128xf32>
    %95 = arith.addf %90, %94 : vector<32x128xf32>
    %c0_68 = arith.constant 0 : index
    %c0_69 = arith.constant 0 : index
    %96 = vector.load %arg22[%c0_68, %c0_69] : memref<32x128xf32, #tpu.memory_space<vmem>>, vector<32x128xf32>
    tpu.vector_store %arg22[%c0_68, %c0_69], %95 {strides = array<i32>} : memref<32x128xf32, #tpu.memory_space<vmem>>, vector<32x128xf32>,
    return
  }
}

module attributes {stable_mosaic.version = 11 : i64} {
  func.func @_head_kernel(%arg0: memref<32x128xf32, #tpu.memory_space<vmem>>, %arg1: memref<32x128xf32, #tpu.memory_space<vmem>>, %arg2: memref<1x128xf32, #tpu.memory_space<vmem>>, %arg3: memref<1x128xf32, #tpu.memory_space<vmem>>, %arg4: memref<128x128xf32, #tpu.memory_space<vmem>>, %arg5: memref<128x128xf32, #tpu.memory_space<vmem>>, %arg6: memref<1x128xf32, #tpu.memory_space<vmem>>, %arg7: memref<128x128xf32, #tpu.memory_space<vmem>>, %arg8: memref<1x128xf32, #tpu.memory_space<vmem>>, %arg9: memref<128x64xf32, #tpu.memory_space<vmem>>, %arg10: memref<1x64xf32, #tpu.memory_space<vmem>>, %arg11: memref<64x64xf32, #tpu.memory_space<vmem>>, %arg12: memref<64x128xf32, #tpu.memory_space<vmem>>, %arg13: memref<1x128xf32, #tpu.memory_space<vmem>>, %arg14: memref<32x64xf32, #tpu.memory_space<vmem>>, %arg15: memref<32x128xf32, #tpu.memory_space<vmem>>) attributes {dimension_semantics = [], scalar_prefetch = 0 : i64, scratch_operands = 0 : i64, tpu.core_type = #tpu.core_type<tc>} {
    %c0 = arith.constant 0 : index
    %c0_0 = arith.constant 0 : index
    %0 = vector.load %arg0[%c0, %c0_0] : memref<32x128xf32, #tpu.memory_space<vmem>>, vector<32x128xf32>
    %c0_1 = arith.constant 0 : index
    %c0_2 = arith.constant 0 : index
    %1 = vector.load %arg5[%c0_1, %c0_2] : memref<128x128xf32, #tpu.memory_space<vmem>>, vector<128x128xf32>
    %cst = arith.constant dense<0.000000e+00> : vector<32x128xf32>
    %2 = tpu.matmul %0, %1, %cst {dimension_numbers = #tpu.dot_dimension_numbers<[1], [0], [0], [1], [0, 0, 1, 1], [], []>} : vector<32x128xf32>, vector<128x128xf32>, vector<32x128xf32> -> vector<32x128xf32>
    %c0_3 = arith.constant 0 : index
    %c0_4 = arith.constant 0 : index
    %3 = vector.load %arg6[%c0_3, %c0_4] : memref<1x128xf32, #tpu.memory_space<vmem>>, vector<1x128xf32>
    %4 = vector.broadcast %3 : vector<1x128xf32> to vector<32x128xf32>
    %5 = arith.addf %2, %4 : vector<32x128xf32>
    %c0_5 = arith.constant 0 : index
    %c0_6 = arith.constant 0 : index
    %6 = vector.load %arg4[%c0_5, %c0_6] : memref<128x128xf32, #tpu.memory_space<vmem>>, vector<128x128xf32>
    %cst_7 = arith.constant dense<0.000000e+00> : vector<128xf32>
    %7 = vector.multi_reduction <add>, %5, %cst_7 [0] : vector<32x128xf32> to vector<128xf32>
    %8 = vector.shape_cast %7 : vector<128xf32> to vector<1x128xf32>
    %cst_8 = arith.constant dense<0.000000e+00> : vector<1x128xf32>
    %9 = tpu.matmul %8, %6, %cst_8 {dimension_numbers = #tpu.dot_dimension_numbers<[1], [0], [0], [1], [0, 0, 1, 1], [], []>} : vector<1x128xf32>, vector<128x128xf32>, vector<1x128xf32> -> vector<1x128xf32>
    %10 = vector.broadcast %9 : vector<1x128xf32> to vector<32x128xf32>
    %11 = arith.subf %5, %10 : vector<32x128xf32>
    %12 = arith.mulf %11, %11 : vector<32x128xf32>
    %cst_9 = arith.constant dense<0.000000e+00> : vector<128xf32>
    %13 = vector.multi_reduction <add>, %12, %cst_9 [0] : vector<32x128xf32> to vector<128xf32>
    %14 = vector.shape_cast %13 : vector<128xf32> to vector<1x128xf32>
    %cst_10 = arith.constant dense<0.000000e+00> : vector<1x128xf32>
    %15 = tpu.matmul %14, %6, %cst_10 {dimension_numbers = #tpu.dot_dimension_numbers<[1], [0], [0], [1], [0, 0, 1, 1], [], []>} : vector<1x128xf32>, vector<128x128xf32>, vector<1x128xf32> -> vector<1x128xf32>
    %cst_11 = arith.constant 9.99999974E-6 : f32
    %16 = vector.broadcast %cst_11 : f32 to vector<1x128xf32>
    %17 = arith.addf %15, %16 : vector<1x128xf32>
    %18 = math.rsqrt %17 : vector<1x128xf32>
    %19 = vector.broadcast %18 : vector<1x128xf32> to vector<32x128xf32>
    %20 = arith.mulf %11, %19 : vector<32x128xf32>
    %c0_12 = arith.constant 0 : index
    %c0_13 = arith.constant 0 : index
    %21 = vector.load %arg2[%c0_12, %c0_13] : memref<1x128xf32, #tpu.memory_space<vmem>>, vector<1x128xf32>
    %22 = vector.broadcast %21 : vector<1x128xf32> to vector<32x128xf32>
    %23 = arith.mulf %20, %22 : vector<32x128xf32>
    %c0_14 = arith.constant 0 : index
    %c0_15 = arith.constant 0 : index
    %24 = vector.load %arg3[%c0_14, %c0_15] : memref<1x128xf32, #tpu.memory_space<vmem>>, vector<1x128xf32>
    %25 = vector.broadcast %24 : vector<1x128xf32> to vector<32x128xf32>
    %26 = arith.addf %23, %25 : vector<32x128xf32>
    %cst_16 = arith.constant 0.000000e+00 : f32
    %27 = vector.broadcast %cst_16 : f32 to vector<32x128xf32>
    %28 = arith.maximumf %26, %27 : vector<32x128xf32>
    %c0_17 = arith.constant 0 : index
    %c0_18 = arith.constant 0 : index
    %29 = vector.load %arg7[%c0_17, %c0_18] : memref<128x128xf32, #tpu.memory_space<vmem>>, vector<128x128xf32>
    %cst_19 = arith.constant dense<0.000000e+00> : vector<32x128xf32>
    %30 = tpu.matmul %28, %29, %cst_19 {dimension_numbers = #tpu.dot_dimension_numbers<[1], [0], [0], [1], [0, 0, 1, 1], [], []>} : vector<32x128xf32>, vector<128x128xf32>, vector<32x128xf32> -> vector<32x128xf32>
    %c0_20 = arith.constant 0 : index
    %c0_21 = arith.constant 0 : index
    %31 = vector.load %arg8[%c0_20, %c0_21] : memref<1x128xf32, #tpu.memory_space<vmem>>, vector<1x128xf32>
    %32 = vector.broadcast %31 : vector<1x128xf32> to vector<32x128xf32>
    %33 = arith.addf %30, %32 : vector<32x128xf32>
    %c0_22 = arith.constant 0 : index
    %c0_23 = arith.constant 0 : index
    %34 = vector.load %arg9[%c0_22, %c0_23] : memref<128x64xf32, #tpu.memory_space<vmem>>, vector<128x64xf32>
    %cst_24 = arith.constant dense<0.000000e+00> : vector<32x64xf32>
    %35 = tpu.matmul %33, %34, %cst_24 {dimension_numbers = #tpu.dot_dimension_numbers<[1], [0], [0], [1], [0, 0, 1, 1], [], []>} : vector<32x128xf32>, vector<128x64xf32>, vector<32x64xf32> -> vector<32x64xf32>
    %c0_25 = arith.constant 0 : index
    %c0_26 = arith.constant 0 : index
    %36 = vector.load %arg10[%c0_25, %c0_26] : memref<1x64xf32, #tpu.memory_space<vmem>>, vector<1x64xf32>
    %37 = vector.broadcast %36 : vector<1x64xf32> to vector<32x64xf32>
    %38 = arith.addf %35, %37 : vector<32x64xf32>
    %39 = arith.mulf %38, %38 : vector<32x64xf32>
    %c0_27 = arith.constant 0 : index
    %c0_28 = arith.constant 0 : index
    %40 = vector.load %arg11[%c0_27, %c0_28] : memref<64x64xf32, #tpu.memory_space<vmem>>, vector<64x64xf32>
    %cst_29 = arith.constant dense<0.000000e+00> : vector<32x64xf32>
    %41 = tpu.matmul %39, %40, %cst_29 {dimension_numbers = #tpu.dot_dimension_numbers<[1], [0], [0], [1], [0, 0, 1, 1], [], []>} : vector<32x64xf32>, vector<64x64xf32>, vector<32x64xf32> -> vector<32x64xf32>
    %cst_30 = arith.constant 1.000000e-24 : f32
    %42 = vector.broadcast %cst_30 : f32 to vector<32x64xf32>
    %43 = arith.maximumf %41, %42 : vector<32x64xf32>
    %44 = math.rsqrt %43 : vector<32x64xf32>
    %45 = arith.mulf %38, %44 : vector<32x64xf32>
    %c0_31 = arith.constant 0 : index
    %c0_32 = arith.constant 0 : index
    %46 = vector.load %arg14[%c0_31, %c0_32] : memref<32x64xf32, #tpu.memory_space<vmem>>, vector<32x64xf32>
    tpu.vector_store %arg14[%c0_31, %c0_32], %45 {strides = array<i32>} : memref<32x64xf32, #tpu.memory_space<vmem>>, vector<32x64xf32>,
    %c0_33 = arith.constant 0 : index
    %c0_34 = arith.constant 0 : index
    %47 = vector.load %arg12[%c0_33, %c0_34] : memref<64x128xf32, #tpu.memory_space<vmem>>, vector<64x128xf32>
    %cst_35 = arith.constant dense<0.000000e+00> : vector<32x128xf32>
    %48 = tpu.matmul %38, %47, %cst_35 {dimension_numbers = #tpu.dot_dimension_numbers<[1], [0], [0], [1], [0, 0, 1, 1], [], []>} : vector<32x64xf32>, vector<64x128xf32>, vector<32x128xf32> -> vector<32x128xf32>
    %c0_36 = arith.constant 0 : index
    %c0_37 = arith.constant 0 : index
    %49 = vector.load %arg13[%c0_36, %c0_37] : memref<1x128xf32, #tpu.memory_space<vmem>>, vector<1x128xf32>
    %50 = vector.broadcast %49 : vector<1x128xf32> to vector<32x128xf32>
    %51 = arith.addf %48, %50 : vector<32x128xf32>
    %c0_38 = arith.constant 0 : index
    %c0_39 = arith.constant 0 : index
    %52 = vector.load %arg1[%c0_38, %c0_39] : memref<32x128xf32, #tpu.memory_space<vmem>>, vector<32x128xf32>
    %53 = arith.addf %52, %33 : vector<32x128xf32>
    %54 = arith.addf %53, %51 : vector<32x128xf32>
    %c0_40 = arith.constant 0 : index
    %c0_41 = arith.constant 0 : index
    %55 = vector.load %arg15[%c0_40, %c0_41] : memref<32x128xf32, #tpu.memory_space<vmem>>, vector<32x128xf32>
    tpu.vector_store %arg15[%c0_40, %c0_41], %54 {strides = array<i32>} : memref<32x128xf32, #tpu.memory_space<vmem>>, vector<32x128xf32>,
    return
  }
}

</mosaic_0001>

<bundles_post_ra>
// kernel: tile.713
= control target key start
LH: loop header
LB: loop body
LE: loop exit
PB: predicated region body
PF: predicated region fallthrough
CT: control target
= control target key end

     0   :  { %s22_s0 = inlined_call_operand.vmem [shape: f32[8], index: 0, kind: input, shape index: {}]   ;;  %s23_s1 = inlined_call_operand.vmem [shape: f32[2,8], index: 1, kind: output, shape index: {}]  }
   0x1   :  { %v4_v0 = vld [vmem:[%s22_s0] ss:$0 sm:$0xff] }
   0x2   :  { %5 = vst [vmem:[%s23_s1] sm:$0x3] %v4_v0 }

// kernel: tile.714
= control target key start
LH: loop header
LB: loop body
LE: loop exit
PB: predicated region body
PF: predicated region fallthrough
CT: control target
= control target key end

     0   :  { %vm8_vm0 = vcmask 64512   ;;  %vm14_vm1 = vcmask 130112   ;;  %s42_s0 = inlined_call_operand.vmem [shape: f32[2,8], index: 0, kind: input, shape index: {}]   ;;  %s43_s1 = inlined_call_operand.vmem [shape: f32[1,16], index: 1, kind: output, shape index: {}]  }
   0x1   :  { %v5_v0 = vld [vmem:[%s42_s0] sm:$0x3]  ;;  %s25_s0 = smov 8  }
   0x2   :  { %6 = vst [vmem:[#allocation1] sm:$0x3] %v5_v0 }
   0x9   :  { %v11_v1 = vld [vmem:[#allocation1 + $0x1] sm:$0x1]   ;;  %v7_v2 = vld [vmem:[#allocation1] sm:$0x1]  }
   0xa   :  { %12 = vrot.lane.b32.xlu0 %v11_v1, %s25_s0  ;;  %9 = vst.msk [vmem:[#allocation0] sm:$0x1] %vm8_vm0, %v7_v2  }
  0x7c   :  { %v13_v3 = vpop.permute.xlu0 %12  }
  0x7d   :  { %15 = vst.msk [vmem:[#allocation0] sm:$0x1] %vm14_vm1, %v13_v3  }
  0x84   :  { %v20_v4 = vld [vmem:[#allocation0] sm:$0x1] }
  0x85   :  { %23 = vst [vmem:[%s43_s1] sm:$0x1] %v20_v4 }

// kernel: tile.728
= control target key start
LH: loop header
LB: loop body
LE: loop exit
PB: predicated region body
PF: predicated region fallthrough
CT: control target
= control target key end

     0   :  { %s22_s0 = inlined_call_operand.vmem [shape: f32[4], index: 0, kind: input, shape index: {}]   ;;  %s23_s1 = inlined_call_operand.vmem [shape: f32[2,4], index: 1, kind: output, shape index: {}]  }
   0x1   :  { %v4_v0 = vld [vmem:[%s22_s0] ss:$0 sm:$0xff] }
   0x2   :  { %5 = vst [vmem:[%s23_s1] sm:$0x3] %v4_v0 }

// kernel: tile.729
= control target key start
LH: loop header
LB: loop body
LE: loop exit
PB: predicated region body
PF: predicated region fallthrough
CT: control target
= control target key end

     0   :  { %vm8_vm0 = vcmask 31744   ;;  %vm14_vm1 = vcmask 64544   ;;  %s42_s0 = inlined_call_operand.vmem [shape: f32[2,4], index: 0, kind: input, shape index: {}]   ;;  %s43_s1 = inlined_call_operand.vmem [shape: f32[1,8], index: 1, kind: output, shape index: {}]  }
   0x1   :  { %v5_v0 = vld [vmem:[%s42_s0] sm:$0x3]  ;;  %s25_s0 = smov 4  }
   0x2   :  { %6 = vst [vmem:[#allocation1] sm:$0x3] %v5_v0 }
   0x9   :  { %v11_v1 = vld [vmem:[#allocation1 + $0x1] sm:$0x1]   ;;  %v7_v2 = vld [vmem:[#allocation1] sm:$0x1]  }
   0xa   :  { %12 = vrot.lane.b32.xlu0 %v11_v1, %s25_s0  ;;  %9 = vst.msk [vmem:[#allocation0] sm:$0x1] %vm8_vm0, %v7_v2  }
  0x7c   :  { %v13_v3 = vpop.permute.xlu0 %12  }
  0x7d   :  { %15 = vst.msk [vmem:[#allocation0] sm:$0x1] %vm14_vm1, %v13_v3  }
  0x84   :  { %v20_v4 = vld [vmem:[#allocation0] sm:$0x1] }
  0x85   :  { %23 = vst [vmem:[%s43_s1] sm:$0x1] %v20_v4 }

// kernel: tile.623
= control target key start
LH: loop header
LB: loop body
LE: loop exit
PB: predicated region body
PF: predicated region fallthrough
CT: control target
= control target key end

     0   :  { %s22_s0 = inlined_call_operand.vmem [shape: f32[8], index: 0, kind: input, shape index: {}]   ;;  %s23_s1 = inlined_call_operand.vmem [shape: f32[4,8], index: 1, kind: output, shape index: {}]  }
   0x1   :  { %v4_v0 = vld [vmem:[%s22_s0] ss:$0 sm:$0xff] }
   0x2   :  { %5 = vst [vmem:[%s23_s1] sm:$0xf] %v4_v0 }

// kernel: tile.624
= control target key start
LH: loop header
LB: loop body
LE: loop exit
PB: predicated region body
PF: predicated region fallthrough
CT: control target
= control target key end

     0   :  { %vm8_vm0 = vcmask 64512   ;;  %s40_s8 = smov 8   ;;  %s41_s9 = smov 16   ;;  %vm14_vm1 = vcmask 261312   ;;  %vm20_vm2 = vcmask 195712   ;;  %vm26_vm3 = vcmask 130112   ;;  %s58_s0 = inlined_call_operand.vmem [shape: f32[4,8], index: 0, kind: input, shape index: {}]   ;;  %s59_s1 = inlined_call_operand.vmem [shape: f32[1,32], index: 1, kind: output, shape index: {}]  }
   0x1   :  { %v5_v0 = vld [vmem:[%s58_s0] sm:$0xf]  ;;  %s39_s0 = smov 24  }
   0x2   :  { %6 = vst [vmem:[#allocation1] sm:$0xf] %v5_v0 }
   0x9   :  { %v11_v1 = vld [vmem:[#allocation1 + $0x3] sm:$0x1]   ;;  %v23_v2 = vld [vmem:[#allocation1 + $0x1] sm:$0x1]   ;;  %v7_v3 = vld [vmem:[#allocation1] sm:$0x1]  }
   0xa   :  { %12 = vrot.lane.b32.xlu0 %v11_v1, %s39_s0  ;;  %24 = vrot.lane.b32.xlu1 %v23_v2, %s40_s8  ;;  %v17_v4 = vld [vmem:[#allocation1 + $0x2] sm:$0x1]   ;;  %9 = vst.msk [vmem:[#allocation0] sm:$0x1] %vm8_vm0, %v7_v3  }
   0xe   :  { %18 = vrot.lane.b32.xlu0 %v17_v4, %s41_s9 }
  0x7c   :  { %v13_v5 = vpop.permute.xlu0 %12   ;;  %v25_v6 = vpop.permute.xlu1 %24  }
  0x7d   :  { %15 = vst.msk [vmem:[#allocation0] sm:$0x1] %vm14_vm1, %v13_v5  }
  0x80   :  { %v19_v7 = vpop.permute.xlu0 %18  }
  0x81   :  { %21 = vst.msk [vmem:[#allocation0] sm:$0x1] %vm20_vm2, %v19_v7  }
  0x82   :  { %27 = vst.msk [vmem:[#allocation0] sm:$0x1] %vm26_vm3, %v25_v6  }
  0x89   :  { %v32_v8 = vld [vmem:[#allocation0] sm:$0x1] }
  0x8a   :  { %35 = vst [vmem:[%s59_s1] sm:$0x1] %v32_v8 }

// kernel: tile.639
= control target key start
LH: loop header
LB: loop body
LE: loop exit
PB: predicated region body
PF: predicated region fallthrough
CT: control target
= control target key end

     0   :  { %vm8_vm0 = vcmask 31744   ;;  %s40_s8 = smov 4   ;;  %s41_s9 = smov 8   ;;  %vm14_vm1 = vcmask 130144   ;;  %vm20_vm2 = vcmask 97344   ;;  %vm26_vm3 = vcmask 64544   ;;  %s58_s0 = inlined_call_operand.vmem [shape: f32[4,4], index: 0, kind: input, shape index: {}]   ;;  %s59_s1 = inlined_call_operand.vmem [shape: f32[1,16], index: 1, kind: output, shape index: {}]  }
   0x1   :  { %v5_v0 = vld [vmem:[%s58_s0] sm:$0xf]  ;;  %s39_s0 = smov 12  }
   0x2   :  { %6 = vst [vmem:[#allocation1] sm:$0xf] %v5_v0 }
   0x9   :  { %v11_v1 = vld [vmem:[#allocation1 + $0x3] sm:$0x1]   ;;  %v23_v2 = vld [vmem:[#allocation1 + $0x1] sm:$0x1]   ;;  %v7_v3 = vld [vmem:[#allocation1] sm:$0x1]  }
   0xa   :  { %12 = vrot.lane.b32.xlu0 %v11_v1, %s39_s0  ;;  %24 = vrot.lane.b32.xlu1 %v23_v2, %s40_s8  ;;  %v17_v4 = vld [vmem:[#allocation1 + $0x2] sm:$0x1]   ;;  %9 = vst.msk [vmem:[#allocation0] sm:$0x1] %vm8_vm0, %v7_v3  }
   0xe   :  { %18 = vrot.lane.b32.xlu0 %v17_v4, %s41_s9 }
  0x7c   :  { %v13_v5 = vpop.permute.xlu0 %12   ;;  %v25_v6 = vpop.permute.xlu1 %24  }
  0x7d   :  { %15 = vst.msk [vmem:[#allocation0] sm:$0x1] %vm14_vm1, %v13_v5  }
  0x80   :  { %v19_v7 = vpop.permute.xlu0 %18  }
  0x81   :  { %21 = vst.msk [vmem:[#allocation0] sm:$0x1] %vm20_vm2, %v19_v7  }
  0x82   :  { %27 = vst.msk [vmem:[#allocation0] sm:$0x1] %vm26_vm3, %v25_v6  }
  0x89   :  { %v32_v8 = vld [vmem:[#allocation0] sm:$0x1] }
  0x8a   :  { %35 = vst [vmem:[%s59_s1] sm:$0x1] %v32_v8 }

// kernel: tile.638
= control target key start
LH: loop header
LB: loop body
LE: loop exit
PB: predicated region body
PF: predicated region fallthrough
CT: control target
= control target key end

     0   :  { %s22_s0 = inlined_call_operand.vmem [shape: f32[4], index: 0, kind: input, shape index: {}]   ;;  %s23_s1 = inlined_call_operand.vmem [shape: f32[4,4], index: 1, kind: output, shape index: {}]  }
   0x1   :  { %v4_v0 = vld [vmem:[%s22_s0] ss:$0 sm:$0xff] }
   0x2   :  { %5 = vst [vmem:[%s23_s1] sm:$0xf] %v4_v0 }

// kernel: tile.533
= control target key start
LH: loop header
LB: loop body
LE: loop exit
PB: predicated region body
PF: predicated region fallthrough
CT: control target
= control target key end

     0   :  { %s22_s0 = inlined_call_operand.vmem [shape: f32[8], index: 0, kind: input, shape index: {}]   ;;  %s23_s1 = inlined_call_operand.vmem [shape: f32[8,8], index: 1, kind: output, shape index: {}]  }
   0x1   :  { %v4_v0 = vld [vmem:[%s22_s0] ss:$0 sm:$0xff] }
   0x2   :  { %5 = vst [vmem:[%s23_s1] sm:$0xff] %v4_v0 }

// kernel: tile.534
= control target key start
LH: loop header
LB: loop body
LE: loop exit
PB: predicated region body
PF: predicated region fallthrough
CT: control target
= control target key end

     0   :  { %s69_s10 = smov 56   ;;  %s70_s11 = smov 40   ;;  %vm3_vm0 = vcmask 64512   ;;  %vm9_vm1 = vcmask 523712   ;;  %vm15_vm2 = vcmask 458112   ;;  %vm21_vm3 = vcmask 392512   ;;  %s113_s0 = inlined_call_operand.vmem [shape: f32[8,8], index: 0, kind: input, shape index: {}]   ;;  %s114_s1 = inlined_call_operand.vmem [shape: f32[1,64], index: 1, kind: output, shape index: {}]  }
   0x1   :  { %v55_v0 = vld [vmem:[%s113_s0 + $0x7] sm:$0x1]   ;;  %v57_v1 = vld [vmem:[%s113_s0 + $0x5] sm:$0x1]   ;;  %v56_v2 = vld [vmem:[%s113_s0 + $0x6] sm:$0x1]  }
   0x2   :  { %7 = vrot.lane.b32.xlu0 %v55_v0, %s69_s10  ;;  %19 = vrot.lane.b32.xlu1 %v57_v1, %s70_s11  ;;  %v58_v3 = vld [vmem:[%s113_s0 + $0x4] sm:$0x1]   ;;  %v2_v4 = vld [vmem:[%s113_s0] sm:$0x1]   ;;  %s71_s18 = smov 48   ;;  %s72_s19 = smov 32  }
   0x3   :  { %4 = vst.msk [vmem:[#allocation0] sm:$0x1] %vm3_vm0, %v2_v4   ;;  %v59_v5 = vld [vmem:[%s113_s0 + $0x3] sm:$0x1]   ;;  %v60_v6 = vld [vmem:[%s113_s0 + $0x2] sm:$0x1]  }
   0x4   :  { %s73_s24 = smov 24   ;;  %s74_s25 = smov 16   ;;  %v61_v7 = vld [vmem:[%s113_s0 + $0x1] sm:$0x1]   ;;  %vm27_vm4 = vcmask 326912   ;;  %vm33_vm5 = vcmask 261312  }
   0x5   :  { %s75_s0 = smov 8   ;;  %vm39_vm6 = vcmask 195712   ;;  %vm45_vm7 = vcmask 130112  }
   0x6   :  { %13 = vrot.lane.b32.xlu0 %v56_v2, %s71_s18  ;;  %25 = vrot.lane.b32.xlu1 %v58_v3, %s72_s19 }
   0xa   :  { %31 = vrot.lane.b32.xlu0 %v59_v5, %s73_s24  ;;  %37 = vrot.lane.b32.xlu1 %v60_v6, %s74_s25 }
   0xe   :  { %43 = vrot.lane.b32.xlu0 %v61_v7, %s75_s0 }
  0x74   :  { %v8_v8 = vpop.permute.xlu0 %7   ;;  %v20_v9 = vpop.permute.xlu1 %19  }
  0x75   :  { %10 = vst.msk [vmem:[#allocation0] sm:$0x1] %vm9_vm1, %v8_v8  }
  0x78   :  { %v14_v10 = vpop.permute.xlu0 %13   ;;  %v26_v11 = vpop.permute.xlu1 %25  }
  0x79   :  { %16 = vst.msk [vmem:[#allocation0] sm:$0x1] %vm15_vm2, %v14_v10  }
  0x7a   :  { %22 = vst.msk [vmem:[#allocation0] sm:$0x1] %vm21_vm3, %v20_v9  }
  0x7b   :  { %28 = vst.msk [vmem:[#allocation0] sm:$0x1] %vm27_vm4, %v26_v11  }
  0x7c   :  { %v32_v12 = vpop.permute.xlu0 %31   ;;  %v38_v13 = vpop.permute.xlu1 %37  }
  0x7d   :  { %34 = vst.msk [vmem:[#allocation0] sm:$0x1] %vm33_vm5, %v32_v12  }
  0x7e   :  { %40 = vst.msk [vmem:[#allocation0] sm:$0x1] %vm39_vm6, %v38_v13  }
  0x80   :  { %v44_v14 = vpop.permute.xlu0 %43  }
  0x81   :  { %46 = vst.msk [vmem:[#allocation0] sm:$0x1] %vm45_vm7, %v44_v14  }
  0x88   :  { %v51_v15 = vld [vmem:[#allocation0] sm:$0x1] }
  0x89   :  { %54 = vst [vmem:[%s114_s1] sm:$0x1] %v51_v15 }

// kernel: tile.548
= control target key start
LH: loop header
LB: loop body
LE: loop exit
PB: predicated region body
PF: predicated region fallthrough
CT: control target
= control target key end

     0   :  { %s22_s0 = inlined_call_operand.vmem [shape: f32[4], index: 0, kind: input, shape index: {}]   ;;  %s23_s1 = inlined_call_operand.vmem [shape: f32[8,4], index: 1, kind: output, shape index: {}]  }
   0x1   :  { %v4_v0 = vld [vmem:[%s22_s0] ss:$0 sm:$0xff] }
   0x2   :  { %5 = vst [vmem:[%s23_s1] sm:$0xff] %v4_v0 }

// kernel: tile.549
= control target key start
LH: loop header
LB: loop body
LE: loop exit
PB: predicated region body
PF: predicated region fallthrough
CT: control target
= control target key end

     0   :  { %s69_s10 = smov 28   ;;  %s70_s11 = smov 20   ;;  %vm3_vm0 = vcmask 31744   ;;  %vm9_vm1 = vcmask 261344   ;;  %vm15_vm2 = vcmask 228544   ;;  %vm21_vm3 = vcmask 195744   ;;  %s113_s0 = inlined_call_operand.vmem [shape: f32[8,4], index: 0, kind: input, shape index: {}]   ;;  %s114_s1 = inlined_call_operand.vmem [shape: f32[1,32], index: 1, kind: output, shape index: {}]  }
   0x1   :  { %v55_v0 = vld [vmem:[%s113_s0 + $0x7] sm:$0x1]   ;;  %v57_v1 = vld [vmem:[%s113_s0 + $0x5] sm:$0x1]   ;;  %v56_v2 = vld [vmem:[%s113_s0 + $0x6] sm:$0x1]  }
   0x2   :  { %7 = vrot.lane.b32.xlu0 %v55_v0, %s69_s10  ;;  %19 = vrot.lane.b32.xlu1 %v57_v1, %s70_s11  ;;  %v58_v3 = vld [vmem:[%s113_s0 + $0x4] sm:$0x1]   ;;  %v2_v4 = vld [vmem:[%s113_s0] sm:$0x1]   ;;  %s71_s18 = smov 24   ;;  %s72_s19 = smov 16  }
   0x3   :  { %4 = vst.msk [vmem:[#allocation0] sm:$0x1] %vm3_vm0, %v2_v4   ;;  %v59_v5 = vld [vmem:[%s113_s0 + $0x3] sm:$0x1]   ;;  %v60_v6 = vld [vmem:[%s113_s0 + $0x2] sm:$0x1]  }
   0x4   :  { %s73_s24 = smov 12   ;;  %s74_s25 = smov 8   ;;  %v61_v7 = vld [vmem:[%s113_s0 + $0x1] sm:$0x1]   ;;  %vm27_vm4 = vcmask 162944   ;;  %vm33_vm5 = vcmask 130144  }
   0x5   :  { %s75_s0 = smov 4   ;;  %vm39_vm6 = vcmask 97344   ;;  %vm45_vm7 = vcmask 64544  }
   0x6   :  { %13 = vrot.lane.b32.xlu0 %v56_v2, %s71_s18  ;;  %25 = vrot.lane.b32.xlu1 %v58_v3, %s72_s19 }
   0xa   :  { %31 = vrot.lane.b32.xlu0 %v59_v5, %s73_s24  ;;  %37 = vrot.lane.b32.xlu1 %v60_v6, %s74_s25 }
   0xe   :  { %43 = vrot.lane.b32.xlu0 %v61_v7, %s75_s0 }
  0x74   :  { %v8_v8 = vpop.permute.xlu0 %7   ;;  %v20_v9 = vpop.permute.xlu1 %19  }
  0x75   :  { %10 = vst.msk [vmem:[#allocation0] sm:$0x1] %vm9_vm1, %v8_v8  }
  0x78   :  { %v14_v10 = vpop.permute.xlu0 %13   ;;  %v26_v11 = vpop.permute.xlu1 %25  }
  0x79   :  { %16 = vst.msk [vmem:[#allocation0] sm:$0x1] %vm15_vm2, %v14_v10  }
  0x7a   :  { %22 = vst.msk [vmem:[#allocation0] sm:$0x1] %vm21_vm3, %v20_v9  }
  0x7b   :  { %28 = vst.msk [vmem:[#allocation0] sm:$0x1] %vm27_vm4, %v26_v11  }
  0x7c   :  { %v32_v12 = vpop.permute.xlu0 %31   ;;  %v38_v13 = vpop.permute.xlu1 %37  }
  0x7d   :  { %34 = vst.msk [vmem:[#allocation0] sm:$0x1] %vm33_vm5, %v32_v12  }
  0x7e   :  { %40 = vst.msk [vmem:[#allocation0] sm:$0x1] %vm39_vm6, %v38_v13  }
  0x80   :  { %v44_v14 = vpop.permute.xlu0 %43  }
  0x81   :  { %46 = vst.msk [vmem:[#allocation0] sm:$0x1] %vm45_vm7, %v44_v14  }
  0x88   :  { %v51_v15 = vld [vmem:[#allocation0] sm:$0x1] }
  0x89   :  { %54 = vst [vmem:[%s114_s1] sm:$0x1] %v51_v15 }

// kernel: tile.938
= control target key start
LH: loop header
LB: loop body
LE: loop exit
PB: predicated region body
PF: predicated region fallthrough
CT: control target
= control target key end

     0   :  { %s28_s0 = inlined_call_operand.vmem [shape: f32[8], index: 0, kind: input, shape index: {}]   ;;  %s29_s1 = inlined_call_operand.vmem [shape: f32[16,8], index: 1, kind: output, shape index: {}]  }
   0x1   :  { %v4_v0 = vld [vmem:[%s28_s0] ss:$0 sm:$0xff] }
   0x2   :  { %5 = vst [vmem:[%s29_s1] sm:$0xff] %v4_v0  ;;  %8 = vst [vmem:[%s29_s1 + $0x8] sm:$0xff] %v4_v0 }

// kernel: tile.939
= control target key start
LH: loop header
LB: loop body
LE: loop exit
PB: predicated region body
PF: predicated region fallthrough
CT: control target
= control target key end

     0   :  { %s133_s10 = smov 120   ;;  %s134_s11 = smov 104   ;;  %vm3_vm0 = vcmask 64512   ;;  %vm9_vm1 = vcmask 1048512   ;;  %vm15_vm2 = vcmask 982912   ;;  %vm21_vm3 = vcmask 917312   ;;  %s209_s0 = inlined_call_operand.vmem [shape: f32[16,8], index: 0, kind: input, shape index: {}]   ;;  %s210_s1 = inlined_call_operand.vmem [shape: f32[1,128], index: 1, kind: output, shape index: {}]  }
   0x1   :  { %v103_v0 = vld [vmem:[%s209_s0 + $0xf] sm:$0x1]   ;;  %v105_v1 = vld [vmem:[%s209_s0 + $0xd] sm:$0x1]   ;;  %v104_v2 = vld [vmem:[%s209_s0 + $0xe] sm:$0x1]  }
   0x2   :  { %7 = vrot.lane.b32.xlu0 %v103_v0, %s133_s10  ;;  %19 = vrot.lane.b32.xlu1 %v105_v1, %s134_s11  ;;  %v106_v3 = vld [vmem:[%s209_s0 + $0xc] sm:$0x1]   ;;  %s135_s16 = smov 112   ;;  %s136_s17 = smov 96   ;;  %v107_v4 = vld [vmem:[%s209_s0 + $0xb] sm:$0x1]  }
   0x3   :  { %v108_v5 = vld [vmem:[%s209_s0 + $0xa] sm:$0x1]   ;;  %v2_v6 = vld [vmem:[%s209_s0] sm:$0x1]   ;;  %s137_s24 = smov 88   ;;  %s138_s25 = smov 80  }
   0x4   :  { %4 = vst.msk [vmem:[#allocation0] sm:$0x1] %vm3_vm0, %v2_v6   ;;  %v109_v7 = vld [vmem:[%s209_s0 + $0x9] sm:$0x1]   ;;  %v110_v8 = vld [vmem:[%s209_s0 + $0x8] sm:$0x1]  }
   0x5   :  { %s139_s30 = smov 72   ;;  %s140_s2 = smov 64   ;;  %v111_v9 = vld [vmem:[%s209_s0 + $0x7] sm:$0x1]   ;;  %v112_v10 = vld [vmem:[%s209_s0 + $0x6] sm:$0x1]  }
   0x6   :  { %13 = vrot.lane.b32.xlu0 %v104_v2, %s135_s16  ;;  %25 = vrot.lane.b32.xlu1 %v106_v3, %s136_s17  ;;  %s141_s7 = smov 56   ;;  %s142_s8 = smov 48   ;;  %v113_v11 = vld [vmem:[%s209_s0 + $0x5] sm:$0x1]   ;;  %v114_v12 = vld [vmem:[%s209_s0 + $0x4] sm:$0x1]  }
   0x7   :  { %s143_s13 = smov 40   ;;  %s144_s14 = smov 32   ;;  %v115_v13 = vld [vmem:[%s209_s0 + $0x3] sm:$0x1]   ;;  %v116_v14 = vld [vmem:[%s209_s0 + $0x2] sm:$0x1]  }
   0x8   :  { %s145_s19 = smov 24   ;;  %s146_s20 = smov 16   ;;  %v117_v15 = vld [vmem:[%s209_s0 + $0x1] sm:$0x1]   ;;  %vm27_vm4 = vcmask 851712   ;;  %vm33_vm5 = vcmask 786112  }
   0x9   :  { %s147_s0 = smov 8   ;;  %vm39_vm6 = vcmask 720512   ;;  %vm45_vm7 = vcmask 654912   ;;  %vm51_vm8 = vcmask 589312   ;;  %vm57_vm9 = vcmask 523712  }
   0xa   :  { %31 = vrot.lane.b32.xlu0 %v107_v4, %s137_s24  ;;  %37 = vrot.lane.b32.xlu1 %v108_v5, %s138_s25  ;;  %vm63_vm10 = vcmask 458112   ;;  %vm69_vm11 = vcmask 392512   ;;  %vm75_vm12 = vcmask 326912   ;;  %vm81_vm13 = vcmask 261312  }
   0xb   :  { %vm87_vm14 = vcmask 195712   ;;  %vm93_vm15 = vcmask 130112  }
   0xe   :  { %43 = vrot.lane.b32.xlu0 %v109_v7, %s139_s30  ;;  %49 = vrot.lane.b32.xlu1 %v110_v8, %s140_s2 }
  0x12   :  { %55 = vrot.lane.b32.xlu0 %v111_v9, %s141_s7  ;;  %61 = vrot.lane.b32.xlu1 %v112_v10, %s142_s8 }
  0x16   :  { %67 = vrot.lane.b32.xlu0 %v113_v11, %s143_s13  ;;  %73 = vrot.lane.b32.xlu1 %v114_v12, %s144_s14 }
  0x1a   :  { %79 = vrot.lane.b32.xlu0 %v115_v13, %s145_s19  ;;  %85 = vrot.lane.b32.xlu1 %v116_v14, %s146_s20 }
  0x1e   :  { %91 = vrot.lane.b32.xlu0 %v117_v15, %s147_s0 }
  0x74   :  { %v8_v16 = vpop.permute.xlu0 %7   ;;  %v20_v17 = vpop.permute.xlu1 %19  }
  0x75   :  { %10 = vst.msk [vmem:[#allocation0] sm:$0x1] %vm9_vm1, %v8_v16  }
  0x78   :  { %v14_v18 = vpop.permute.xlu0 %13   ;;  %v26_v19 = vpop.permute.xlu1 %25  }
  0x79   :  { %16 = vst.msk [vmem:[#allocation0] sm:$0x1] %vm15_vm2, %v14_v18  }
  0x7a   :  { %22 = vst.msk [vmem:[#allocation0] sm:$0x1] %vm21_vm3, %v20_v17  }
  0x7b   :  { %28 = vst.msk [vmem:[#allocation0] sm:$0x1] %vm27_vm4, %v26_v19  }
  0x7c   :  { %v32_v20 = vpop.permute.xlu0 %31   ;;  %v38_v21 = vpop.permute.xlu1 %37  }
  0x7d   :  { %34 = vst.msk [vmem:[#allocation0] sm:$0x1] %vm33_vm5, %v32_v20  }
  0x7e   :  { %40 = vst.msk [vmem:[#allocation0] sm:$0x1] %vm39_vm6, %v38_v21  }
  0x80   :  { %v44_v22 = vpop.permute.xlu0 %43   ;;  %v50_v23 = vpop.permute.xlu1 %49  }
  0x81   :  { %46 = vst.msk [vmem:[#allocation0] sm:$0x1] %vm45_vm7, %v44_v22  }
  0x82   :  { %52 = vst.msk [vmem:[#allocation0] sm:$0x1] %vm51_vm8, %v50_v23  }
  0x84   :  { %v56_v24 = vpop.permute.xlu0 %55   ;;  %v62_v25 = vpop.permute.xlu1 %61  }
  0x85   :  { %58 = vst.msk [vmem:[#allocation0] sm:$0x1] %vm57_vm9, %v56_v24  }
  0x86   :  { %64 = vst.msk [vmem:[#allocation0] sm:$0x1] %vm63_vm10, %v62_v25  }
  0x88   :  { %v68_v26 = vpop.permute.xlu0 %67   ;;  %v74_v27 = vpop.permute.xlu1 %73  }
  0x89   :  { %70 = vst.msk [vmem:[#allocation0] sm:$0x1] %vm69_vm11, %v68_v26  }
  0x8a   :  { %76 = vst.msk [vmem:[#allocation0] sm:$0x1] %vm75_vm12, %v74_v27  }
  0x8c   :  { %v80_v28 = vpop.permute.xlu0 %79   ;;  %v86_v29 = vpop.permute.xlu1 %85  }
  0x8d   :  { %82 = vst.msk [vmem:[#allocation0] sm:$0x1] %vm81_vm13, %v80_v28  }
  0x8e   :  { %88 = vst.msk [vmem:[#allocation0] sm:$0x1] %vm87_vm14, %v86_v29  }
  0x90   :  { %v92_v30 = vpop.permute.xlu0 %91  }
  0x91   :  { %94 = vst.msk [vmem:[#allocation0] sm:$0x1] %vm93_vm15, %v92_v30  }
  0x98   :  { %v99_v31 = vld [vmem:[#allocation0] sm:$0x1] }
  0x99   :  { %102 = vst [vmem:[%s210_s1] sm:$0x1] %v99_v31 }

// kernel: tile.503
= control target key start
LH: loop header
LB: loop body
LE: loop exit
PB: predicated region body
PF: predicated region fallthrough
CT: control target
= control target key end

     0   :  { %s28_s0 = inlined_call_operand.vmem [shape: f32[4], index: 0, kind: input, shape index: {}]   ;;  %s29_s1 = inlined_call_operand.vmem [shape: f32[16,4], index: 1, kind: output, shape index: {}]  }
   0x1   :  { %v4_v0 = vld [vmem:[%s28_s0] ss:$0 sm:$0xff] }
   0x2   :  { %5 = vst [vmem:[%s29_s1] sm:$0xff] %v4_v0  ;;  %8 = vst [vmem:[%s29_s1 + $0x8] sm:$0xff] %v4_v0 }

// kernel: tile.504
= control target key start
LH: loop header
LB: loop body
LE: loop exit
PB: predicated region body
PF: predicated region fallthrough
CT: control target
= control target key end

     0   :  { %s133_s10 = smov 60   ;;  %s134_s11 = smov 52   ;;  %vm3_vm0 = vcmask 31744   ;;  %vm9_vm1 = vcmask 523744   ;;  %vm15_vm2 = vcmask 490944   ;;  %vm21_vm3 = vcmask 458144   ;;  %s209_s0 = inlined_call_operand.vmem [shape: f32[16,4], index: 0, kind: input, shape index: {}]   ;;  %s210_s1 = inlined_call_operand.vmem [shape: f32[1,64], index: 1, kind: output, shape index: {}]  }
   0x1   :  { %v103_v0 = vld [vmem:[%s209_s0 + $0xf] sm:$0x1]   ;;  %v105_v1 = vld [vmem:[%s209_s0 + $0xd] sm:$0x1]   ;;  %v104_v2 = vld [vmem:[%s209_s0 + $0xe] sm:$0x1]  }
   0x2   :  { %7 = vrot.lane.b32.xlu0 %v103_v0, %s133_s10  ;;  %19 = vrot.lane.b32.xlu1 %v105_v1, %s134_s11  ;;  %v106_v3 = vld [vmem:[%s209_s0 + $0xc] sm:$0x1]   ;;  %s135_s16 = smov 56   ;;  %s136_s17 = smov 48   ;;  %v107_v4 = vld [vmem:[%s209_s0 + $0xb] sm:$0x1]  }
   0x3   :  { %v108_v5 = vld [vmem:[%s209_s0 + $0xa] sm:$0x1]   ;;  %v2_v6 = vld [vmem:[%s209_s0] sm:$0x1]   ;;  %s137_s24 = smov 44   ;;  %s138_s25 = smov 40  }
   0x4   :  { %4 = vst.msk [vmem:[#allocation0] sm:$0x1] %vm3_vm0, %v2_v6   ;;  %v109_v7 = vld [vmem:[%s209_s0 + $0x9] sm:$0x1]   ;;  %v110_v8 = vld [vmem:[%s209_s0 + $0x8] sm:$0x1]  }
   0x5   :  { %s139_s30 = smov 36   ;;  %s140_s2 = smov 32   ;;  %v111_v9 = vld [vmem:[%s209_s0 + $0x7] sm:$0x1]   ;;  %v112_v10 = vld [vmem:[%s209_s0 + $0x6] sm:$0x1]  }
   0x6   :  { %13 = vrot.lane.b32.xlu0 %v104_v2, %s135_s16  ;;  %25 = vrot.lane.b32.xlu1 %v106_v3, %s136_s17  ;;  %s141_s7 = smov 28   ;;  %s142_s8 = smov 24   ;;  %v113_v11 = vld [vmem:[%s209_s0 + $0x5] sm:$0x1]   ;;  %v114_v12 = vld [vmem:[%s209_s0 + $0x4] sm:$0x1]  }
   0x7   :  { %s143_s13 = smov 20   ;;  %s144_s14 = smov 16   ;;  %v115_v13 = vld [vmem:[%s209_s0 + $0x3] sm:$0x1]   ;;  %v116_v14 = vld [vmem:[%s209_s0 + $0x2] sm:$0x1]  }
   0x8   :  { %s145_s19 = smov 12   ;;  %s146_s20 = smov 8   ;;  %v117_v15 = vld [vmem:[%s209_s0 + $0x1] sm:$0x1]   ;;  %vm27_vm4 = vcmask 425344   ;;  %vm33_vm5 = vcmask 392544  }
   0x9   :  { %s147_s0 = smov 4   ;;  %vm39_vm6 = vcmask 359744   ;;  %vm45_vm7 = vcmask 326944   ;;  %vm51_vm8 = vcmask 294144   ;;  %vm57_vm9 = vcmask 261344  }
   0xa   :  { %31 = vrot.lane.b32.xlu0 %v107_v4, %s137_s24  ;;  %37 = vrot.lane.b32.xlu1 %v108_v5, %s138_s25  ;;  %vm63_vm10 = vcmask 228544   ;;  %vm69_vm11 = vcmask 195744   ;;  %vm75_vm12 = vcmask 162944   ;;  %vm81_vm13 = vcmask 130144  }
   0xb   :  { %vm87_vm14 = vcmask 97344   ;;  %vm93_vm15 = vcmask 64544  }
   0xe   :  { %43 = vrot.lane.b32.xlu0 %v109_v7, %s139_s30  ;;  %49 = vrot.lane.b32.xlu1 %v110_v8, %s140_s2 }
  0x12   :  { %55 = vrot.lane.b32.xlu0 %v111_v9, %s141_s7  ;;  %61 = vrot.lane.b32.xlu1 %v112_v10, %s142_s8 }
  0x16   :  { %67 = vrot.lane.b32.xlu0 %v113_v11, %s143_s13  ;;  %73 = vrot.lane.b32.xlu1 %v114_v12, %s144_s14 }
  0x1a   :  { %79 = vrot.lane.b32.xlu0 %v115_v13, %s145_s19  ;;  %85 = vrot.lane.b32.xlu1 %v116_v14, %s146_s20 }
  0x1e   :  { %91 = vrot.lane.b32.xlu0 %v117_v15, %s147_s0 }
  0x74   :  { %v8_v16 = vpop.permute.xlu0 %7   ;;  %v20_v17 = vpop.permute.xlu1 %19  }
  0x75   :  { %10 = vst.msk [vmem:[#allocation0] sm:$0x1] %vm9_vm1, %v8_v16  }
  0x78   :  { %v14_v18 = vpop.permute.xlu0 %13   ;;  %v26_v19 = vpop.permute.xlu1 %25  }
  0x79   :  { %16 = vst.msk [vmem:[#allocation0] sm:$0x1] %vm15_vm2, %v14_v18  }
  0x7a   :  { %22 = vst.msk [vmem:[#allocation0] sm:$0x1] %vm21_vm3, %v20_v17  }
  0x7b   :  { %28 = vst.msk [vmem:[#allocation0] sm:$0x1] %vm27_vm4, %v26_v19  }
  0x7c   :  { %v32_v20 = vpop.permute.xlu0 %31   ;;  %v38_v21 = vpop.permute.xlu1 %37  }
  0x7d   :  { %34 = vst.msk [vmem:[#allocation0] sm:$0x1] %vm33_vm5, %v32_v20  }
  0x7e   :  { %40 = vst.msk [vmem:[#allocation0] sm:$0x1] %vm39_vm6, %v38_v21  }
  0x80   :  { %v44_v22 = vpop.permute.xlu0 %43   ;;  %v50_v23 = vpop.permute.xlu1 %49  }
  0x81   :  { %46 = vst.msk [vmem:[#allocation0] sm:$0x1] %vm45_vm7, %v44_v22  }
  0x82   :  { %52 = vst.msk [vmem:[#allocation0] sm:$0x1] %vm51_vm8, %v50_v23  }
  0x84   :  { %v56_v24 = vpop.permute.xlu0 %55   ;;  %v62_v25 = vpop.permute.xlu1 %61  }
  0x85   :  { %58 = vst.msk [vmem:[#allocation0] sm:$0x1] %vm57_vm9, %v56_v24  }
  0x86   :  { %64 = vst.msk [vmem:[#allocation0] sm:$0x1] %vm63_vm10, %v62_v25  }
  0x88   :  { %v68_v26 = vpop.permute.xlu0 %67   ;;  %v74_v27 = vpop.permute.xlu1 %73  }
  0x89   :  { %70 = vst.msk [vmem:[#allocation0] sm:$0x1] %vm69_vm11, %v68_v26  }
  0x8a   :  { %76 = vst.msk [vmem:[#allocation0] sm:$0x1] %vm75_vm12, %v74_v27  }
  0x8c   :  { %v80_v28 = vpop.permute.xlu0 %79   ;;  %v86_v29 = vpop.permute.xlu1 %85  }
  0x8d   :  { %82 = vst.msk [vmem:[#allocation0] sm:$0x1] %vm81_vm13, %v80_v28  }
  0x8e   :  { %88 = vst.msk [vmem:[#allocation0] sm:$0x1] %vm87_vm14, %v86_v29  }
  0x90   :  { %v92_v30 = vpop.permute.xlu0 %91  }
  0x91   :  { %94 = vst.msk [vmem:[#allocation0] sm:$0x1] %vm93_vm15, %v92_v30  }
  0x98   :  { %v99_v31 = vld [vmem:[#allocation0] sm:$0x1] }
  0x99   :  { %102 = vst [vmem:[%s210_s1] sm:$0x1] %v99_v31 }

// kernel: wrapped_hourglass_fwd.13
= control target key start
LH: loop header
LB: loop body
LE: loop exit
PB: predicated region body
PF: predicated region fallthrough
CT: control target
= control target key end

     0   :  { %v1574_v0 = vmov 0.0   ;;  %vm1575_vm0 = vmmov 0   ;;  %vm72_vm1 = vcmask 523264   ;;  %v155_v20 = vlaneseq  ;;  %s1955_s3 = inlined_call_operand.vmem [shape: f32[64,64], index: 3, kind: input, shape index: {}]   ;;  %s1956_s0 = inlined_call_operand.vmem [shape: f32[16,64], index: 0, kind: input, shape index: {}]   ;;  %s1957_s4 = inlined_call_operand.vmem [shape: f32[64,32], index: 4, kind: input, shape index: {}]   ;;  %s1958_s1 = inlined_call_operand.vmem [shape: f32[1,64], index: 1, kind: input, shape index: {}]   ;;  %s1959_s2 = inlined_call_operand.vmem [shape: f32[1,64], index: 2, kind: input, shape index: {}]   ;;  %s1960_s8 = inlined_call_operand.vmem [shape: f32[32,32], index: 8, kind: input, shape index: {}]   ;;  %s1961_s5 = inlined_call_operand.vmem [shape: f32[1,32], index: 5, kind: input, shape index: {}]   ;;  %s1962_s9 = inlined_call_operand.vmem [shape: f32[16,16], index: 9, kind: input, shape index: {}]   ;;  %s1963_s10 = inlined_call_operand.vmem [shape: f32[16,16], index: 10, kind: input, shape index: {}]   ;;  %s1964_s6 = inlined_call_operand.vmem [shape: f32[1,32], index: 6, kind: input, shape index: {}]   ;;  %s1965_s7 = inlined_call_operand.vmem [shape: f32[1,32], index: 7, kind: input, shape index: {}]   ;;  %s1966_s12 = inlined_call_operand.vmem [shape: f32[32,32], index: 12, kind: input, shape index: {}]   ;;  %s1967_s11 = inlined_call_operand.vmem [shape: f32[32,32], index: 11, kind: input, shape index: {}]   ;;  %s1968_s13 = inlined_call_operand.vmem [shape: f32[32,32], index: 13, kind: input, shape index: {}]   ;;  %s1969_s14 = inlined_call_operand.vmem [shape: f32[1,32], index: 14, kind: input, shape index: {}]   ;;  %s1970_s17 = inlined_call_operand.vmem [shape: f32[32,64], index: 17, kind: input, shape index: {}]   ;;  %s1971_s15 = inlined_call_operand.vmem [shape: f32[1,32], index: 15, kind: input, shape index: {}]   ;;  %s1972_s16 = inlined_call_operand.vmem [shape: f32[1,32], index: 16, kind: input, shape index: {}]   ;;  %s1973_s18 = inlined_call_operand.vmem [shape: f32[1,64], index: 18, kind: input, shape index: {}]   ;;  %s1974_s19 = inlined_call_operand.vmem [shape: f32[16,64], index: 19, kind: output, shape index: {}]  }
   0x1   :  { %1978 = sst [smem:[#allocation2_spill]] %s1955_s3  ;;  %1407 = vmatprep.subr.mxu0 %v1574_v0  ;;  %1423 = vmatprep.mubr.msk.f32.mxu0 %vm1575_vm0, %v1574_v0  ;;  %v1301_v55 = vld [vmem:[%s1959_s2] ss:$0 sm:$0xff]  ;;  %v1782_v60 = vld [vmem:[%s1960_s8 + $0x18] sm:$0xff]  ;;  %v1789_v61 = vld [vmem:[%s1960_s8 + $0x10] sm:$0xff]  ;;  %vm370_vm2 = vcmask 261120  }
   0x2   :  { %1979 = sst [smem:[#allocation3_spill]] %s1956_s0  ;;  %1426 = vmatprep.subr.mxu1 %v1574_v0  ;;  %1442 = vmatprep.mubr.msk.f32.mxu1 %vm1575_vm0, %v1574_v0  ;;  %v156_v21 = vshrl.u32 %v155_v20, 7  ;;  %v1796_v62 = vld [vmem:[%s1960_s8 + $0x8] sm:$0xff]  ;;  %v1803_v63 = vld [vmem:[%s1960_s8] sm:$0xff]  ;;  %vm570_vm3 = vcmask 130048  }
   0x3   :  { %1980 = sst [smem:[#allocation4_spill]] %s1957_s4 }
   0x4   :  { %1981 = sst [smem:[#allocation5_spill]] %s1958_s1  ;;  %v1736_v22 = vsub.s32 0, %v156_v21 }
   0x5   :  { %s1982_s20 = sld [smem:[#allocation2_spill]] }
   0x6   :  { %s1983_s25 = sld [smem:[#allocation3_spill]] }
   0x7   :  { %s1985_s27 = sld [smem:[#allocation5_spill]] }
   0xb   :  { %v71_v1 = vld [vmem:[%s1982_s20 + $0x38] sm:$0xff]  ;;  %v70_v2 = vld [vmem:[%s1982_s20 + $0x30] sm:$0xff]  ;;  %v69_v3 = vld [vmem:[%s1982_s20 + $0x28] sm:$0xff] }
   0xc   :  { %1408 = vmatpush3.msra.mxu0 %v71_v1  ;;  %v1693_v4 = vld [vmem:[%s1983_s25] sm:$0xff]  ;;  %1427 = vmatpush3.msra.mxu1 %v71_v1  ;;  %v1698_v5 = vld [vmem:[%s1983_s25 + $0x8] sm:$0xff]  ;;  %v67_v10 = vld [vmem:[%s1982_s20 + $0x18] sm:$0xff]  ;;  %s1984_s25 = sld [smem:[#allocation4_spill]] }
   0xd   :  { %1409 = vmatprep.subr.mxu0 %v1574_v0  ;;  %v73_v6 = vsel %vm72_vm1, %v1693_v4, 0.0  ;;  %1428 = vmatprep.subr.mxu1 %v1574_v0  ;;  %v68_v7 = vld [vmem:[%s1982_s20 + $0x20] sm:$0xff]  ;;  %v74_v8 = vsel %vm72_vm1, %v1698_v5, 0.0  ;;  %v66_v12 = vld [vmem:[%s1982_s20 + $0x10] sm:$0xff]  ;;  %v65_v14 = vld [vmem:[%s1982_s20 + $0x8] sm:$0xff] }
   0xe   :  { %1410 = vmatpush3.msra.mxu0 %v70_v2  ;;  %1429 = vmatpush3.msra.mxu1 %v70_v2  ;;  %v75_v9 = vadd.f32 %v74_v8, %v73_v6  ;;  %v64_v16 = vld [vmem:[%s1982_s20] sm:$0xff] }
   0xf   :  { %1411 = vmatprep.subr.mxu0 %v1574_v0  ;;  %1430 = vmatprep.subr.mxu1 %v1574_v0  ;;  %v1300_v52 = vld [vmem:[%s1985_s27] ss:$0 sm:$0xff] }
  0x10   :  { %1412 = vmatpush3.msra.mxu0 %v69_v3  ;;  %1431 = vmatpush3.msra.mxu1 %v69_v3  ;;  %v76_v11 = vrot.slane %v75_v9, 4  ;;  %v1302_v1 = vld [vmem:[%s1961_s5] ss:$0 sm:$0xff] }
  0x11   :  { %1413 = vmatprep.subr.mxu0 %v1574_v0  ;;  %1432 = vmatprep.subr.mxu1 %v1574_v0 }
  0x12   :  { %1414 = vmatpush3.msra.mxu0 %v68_v7  ;;  %1433 = vmatpush3.msra.mxu1 %v68_v7  ;;  %v77_v13 = vadd.f32 %v76_v11, %v75_v9  ;;  %v277_v39 = vld [vmem:[%s1984_s25 + $0x38] sm:$0xff]  ;;  %v276_v40 = vld [vmem:[%s1984_s25 + $0x30] sm:$0xff]  ;;  %v275_v41 = vld [vmem:[%s1984_s25 + $0x28] sm:$0xff] }
  0x13   :  { %1415 = vmatprep.subr.mxu0 %v1574_v0  ;;  %1434 = vmatprep.subr.mxu1 %v1574_v0  ;;  %v274_v42 = vld [vmem:[%s1984_s25 + $0x20] sm:$0xff]  ;;  %v273_v43 = vld [vmem:[%s1984_s25 + $0x18] sm:$0xff]  ;;  %v272_v44 = vld [vmem:[%s1984_s25 + $0x10] sm:$0xff] }
  0x14   :  { %1416 = vmatpush3.msra.mxu0 %v67_v10  ;;  %1435 = vmatpush3.msra.mxu1 %v67_v10  ;;  %v78_v15 = vrot.slane %v77_v13, 2  ;;  %v271_v45 = vld [vmem:[%s1984_s25 + $0x8] sm:$0xff]  ;;  %v270_v46 = vld [vmem:[%s1984_s25] sm:$0xff] }
  0x15   :  { %1417 = vmatprep.subr.mxu0 %v1574_v0  ;;  %1436 = vmatprep.subr.mxu1 %v1574_v0 }
  0x16   :  { %1418 = vmatpush3.msra.mxu0 %v66_v12  ;;  %1437 = vmatpush3.msra.mxu1 %v66_v12  ;;  %v79_v17 = vadd.f32 %v78_v15, %v77_v13 }
  0x17   :  { %1419 = vmatprep.subr.mxu0 %v1574_v0  ;;  %1438 = vmatprep.subr.mxu1 %v1574_v0 }
  0x18   :  { %1420 = vmatpush3.msra.mxu0 %v65_v14  ;;  %1439 = vmatpush3.msra.mxu1 %v65_v14  ;;  %v80_v18 = vrot.slane %v79_v17, 1 }
  0x19   :  { %1421 = vmatprep.subr.mxu0 %v1574_v0  ;;  %1440 = vmatprep.subr.mxu1 %v1574_v0 }
  0x1a   :  { %1422 = vmatpush3.msra.mxu0 %v64_v16  ;;  %1441 = vmatpush3.msra.mxu1 %v64_v16  ;;  %v81_v19 = vadd.f32 %v80_v18, %v79_v17 }
  0x1b   :  { %1464 = vmatprep.subr.mxu1 %v1574_v0  ;;  %1445 = vmatprep.subr.mxu0 %v277_v39 }
  0x1c   :  { %1424 = vmatmul.mubr.msk.f32.vlgmr.msra.gmra.mxu0 %vm72_vm1, %v81_v19 }
  0x1d   :  { %1446 = vmatpush3.msra.mxu0 %v277_v39 }
  0x1e   :  { %1447 = vmatprep.subr.mxu0 %v276_v40 }
  0x1f   :  { %1448 = vmatpush3.msra.mxu0 %v276_v40 }
  0x20   :  { %1449 = vmatprep.subr.mxu0 %v275_v41 }
  0x21   :  { %1450 = vmatpush3.msra.mxu0 %v275_v41  ;;  %v1307_v41 = vld [vmem:[%s1964_s6] ss:$0 sm:$0xff] }
  0x22   :  { %1451 = vmatprep.subr.mxu0 %v274_v42 }
  0x23   :  { %1452 = vmatpush3.msra.mxu0 %v274_v42 }
  0x24   :  { %1453 = vmatprep.subr.mxu0 %v273_v43 }
  0x25   :  { %1454 = vmatpush3.msra.mxu0 %v273_v43 }
  0x26   :  { %1455 = vmatprep.subr.mxu0 %v272_v44 }
  0x27   :  { %1456 = vmatpush3.msra.mxu0 %v272_v44  ;;  %v1308_v44 = vld [vmem:[%s1965_s7] ss:$0 sm:$0xff] }
  0x28   :  { %1457 = vmatprep.subr.mxu0 %v271_v45 }
  0x29   :  { %1458 = vmatpush3.msra.mxu0 %v271_v45 }
  0x2a   :  { %1459 = vmatprep.subr.mxu0 %v270_v46 }
  0x2b   :  { %1460 = vmatpush3.msra.mxu0 %v270_v46 }
  0xdc   :  { %v151_v23 = vpop.f32.mrf.mxu0 }
  0xdd   :  { %v158_v24 = vrot.slane %v151_v23, %v1736_v22 }
  0xde   :  { %v1425_v25 = vpop.f32.mrf.mxu0 }
  0xdf   :  { %v159_v26 = vsub.f32 %v1693_v4, %v158_v24  ;;  %v160_v27 = vsub.f32 %v1698_v5, %v158_v24 }
  0xe1   :  { %v161_v28 = vmul.f32 %v159_v26, %v159_v26  ;;  %v162_v29 = vmul.f32 %v160_v27, %v160_v27 }
  0xe3   :  { %v163_v30 = vsel %vm72_vm1, %v161_v28, 0.0  ;;  %v164_v31 = vsel %vm72_vm1, %v162_v29, 0.0 }
  0xe4   :  { %v165_v32 = vadd.f32 %v164_v31, %v163_v30 }
  0xe6   :  { %v166_v33 = vrot.slane %v165_v32, 4 }
  0xe8   :  { %v167_v34 = vadd.f32 %v166_v33, %v165_v32 }
  0xea   :  { %v168_v35 = vrot.slane %v167_v34, 2 }
  0xec   :  { %v169_v36 = vadd.f32 %v168_v35, %v167_v34  ;;  %v568_v34 = vld [vmem:[%s1962_s9] sm:$0xff] }
  0xed   :  { %v652_v35 = vld [vmem:[%s1963_s10] sm:$0xff] }
  0xee   :  { %v170_v37 = vrot.slane %v169_v36, 1 }
  0xf0   :  { %v171_v38 = vadd.f32 %v170_v37, %v169_v36 }
  0xf2   :  { %1443 = vmatmul.mubr.msk.f32.vlgmr.msra.gmra.mxu1 %vm72_vm1, %v171_v38 }
  0xf3   :  { %1472 = vmatprep.mubr.msk.f32.mxu1 %vm1575_vm0, %v1574_v0  ;;  %1465 = vmatpush3.msra.mxu1 %v1782_v60 }
  0xf4   :  { %1466 = vmatprep.subr.mxu1 %v1574_v0 }
  0xf5   :  { %1467 = vmatpush3.msra.mxu1 %v1789_v61 }
  0xf6   :  { %1468 = vmatprep.subr.mxu1 %v1574_v0 }
  0xf7   :  { %1469 = vmatpush3.msra.mxu1 %v1796_v62 }
  0xf8   :  { %1470 = vmatprep.subr.mxu1 %v1574_v0 }
  0xf9   :  { %1471 = vmatpush3.msra.mxu1 %v1803_v63 }
  0xfa   :  { %1475 = vmatprep.subr.mxu1 %v1574_v0 }
 0x1b2   :  { %v241_v47 = vpop.f32.mrf.mxu1 }
 0x1b3   :  { %v242_v48 = vadd.f32 1e-05, %v241_v47 }
 0x1b4   :  { %v1444_v49 = vpop.f32.mrf.mxu1 }
 0x1b5   :  { %1568 = vrsqrt.f32 %v242_v48  ;;  %v569_v49 = vld [vmem:[%s1962_s9 + $0x8] sm:$0xff] }
 0x1c2   :  { %v1569_v50 = vpop.eup %1568 }
 0x1c3   :  { %v249_v51 = vrot.slane %v1569_v50, %v1736_v22  ;;  %v653_v50 = vld [vmem:[%s1963_s10 + $0x8] sm:$0xff] }
 0x1c5   :  { %v250_v53 = vmul.f32 %v249_v51, %v159_v26  ;;  %v251_v54 = vmul.f32 %v249_v51, %v160_v27  ;;  %v742_v51 = vld [vmem:[%s1966_s12 + $0x18] sm:$0xff] }
 0x1c7   :  { %v259_v56 = vmul.f32 %v1300_v52, %v250_v53  ;;  %v260_v57 = vmul.f32 %v1300_v52, %v251_v54  ;;  %v738_v52 = vld [vmem:[%s1967_s11 + $0x18] sm:$0xff]  ;;  %v741_v53 = vld [vmem:[%s1966_s12 + $0x10] sm:$0xff] }
 0x1c8   :  { %v737_v54 = vld [vmem:[%s1967_s11 + $0x10] sm:$0xff] }
 0x1c9   :  { %v268_v58 = vadd.f32 %v1301_v55, %v259_v56  ;;  %v269_v59 = vadd.f32 %v1301_v55, %v260_v57  ;;  %v740_v55 = vld [vmem:[%s1966_s12 + $0x8] sm:$0xff]  ;;  %v739_v56 = vld [vmem:[%s1966_s12] sm:$0xff]  ;;  %v908_v57 = vld [vmem:[%s1968_s13 + $0x18] sm:$0xff] }
 0x1cb   :  { %1461 = vmatprep.mubr.msk.f32.mxu0 %vm72_vm1, %v268_v58  ;;  %v907_v58 = vld [vmem:[%s1968_s13 + $0x10] sm:$0xff] }
 0x1cc   :  { %1462 = vmatmul.mubr.msk.f32.vlgmr.msra.gmra.mxu0 %vm72_vm1, %v269_v59  ;;  %v736_v59 = vld [vmem:[%s1967_s11 + $0x8] sm:$0xff] }
 0x1cd   :  { %1490 = vmatprep.mubr.msk.f32.mxu0 %vm570_vm3, %v568_v34 }
 0x28c   :  { %v1463_v2 = vpop.f32.mrf.mxu0 }
 0x28d   :  { %v363_v3 = vadd.f32 %v1463_v2, %v1302_v1  ;;  %v735_v2 = vld [vmem:[%s1967_s11] sm:$0xff] }
 0x28e   :  { %v357_v6 = vpop.f32.mrf.mxu0 }
 0x28f   :  { %v358_v7 = vadd.f32 %v1302_v1, %v357_v6  ;;  %v372_v8 = vsel %vm370_vm2, %v363_v3, 0.0  ;;  %v906_v1 = vld [vmem:[%s1968_s13 + $0x8] sm:$0xff] }
 0x291   :  { %v371_v9 = vsel %vm370_vm2, %v358_v7, 0.0 }
 0x292   :  { %v373_v10 = vadd.f32 %v372_v8, %v371_v9 }
 0x294   :  { %v374_v11 = vrot.slane %v373_v10, 4 }
 0x296   :  { %v375_v12 = vadd.f32 %v374_v11, %v373_v10 }
 0x298   :  { %v376_v13 = vrot.slane %v375_v12, 2 }
 0x29a   :  { %v377_v14 = vadd.f32 %v376_v13, %v375_v12  ;;  %v1319_v13 = vld [vmem:[%s1969_s14] ss:$0 sm:$0xff] }
 0x29c   :  { %v378_v15 = vrot.slane %v377_v14, 1 }
 0x29e   :  { %v379_v16 = vadd.f32 %v378_v15, %v377_v14 }
 0x2a0   :  { %1473 = vmatmul.mubr.msk.f32.vlgmr.msra.gmra.mxu1 %vm370_vm2, %v379_v16 }
 0x2a1   :  { %1476 = vmatpush3.msra.mxu1 %v1782_v60  ;;  %1483 = vmatprep.mubr.msk.f32.mxu1 %vm1575_vm0, %v1574_v0 }
 0x2a2   :  { %1477 = vmatprep.subr.mxu1 %v1574_v0 }
 0x2a3   :  { %1478 = vmatpush3.msra.mxu1 %v1789_v61 }
 0x2a4   :  { %1479 = vmatprep.subr.mxu1 %v1574_v0 }
 0x2a5   :  { %1480 = vmatpush3.msra.mxu1 %v1796_v62 }
 0x2a6   :  { %1481 = vmatprep.subr.mxu1 %v1574_v0 }
 0x2a7   :  { %1482 = vmatpush3.msra.mxu1 %v1803_v63 }
 0x360   :  { %v449_v17 = vpop.f32.mrf.mxu1 }
 0x361   :  { %v456_v18 = vrot.slane %v449_v17, %v1736_v22 }
 0x362   :  { %v1474_v19 = vpop.f32.mrf.mxu1 }
 0x363   :  { %v457_v20 = vsub.f32 %v358_v7, %v456_v18  ;;  %v458_v21 = vsub.f32 %v363_v3, %v456_v18  ;;  %v905_v3 = vld [vmem:[%s1968_s13] sm:$0xff] }
 0x365   :  { %v459_v23 = vmul.f32 %v457_v20, %v457_v20  ;;  %v460_v24 = vmul.f32 %v458_v21, %v458_v21 }
 0x367   :  { %v461_v25 = vsel %vm370_vm2, %v459_v23, 0.0  ;;  %v462_v26 = vsel %vm370_vm2, %v460_v24, 0.0 }
 0x368   :  { %v463_v27 = vadd.f32 %v462_v26, %v461_v25 }
 0x36a   :  { %v464_v28 = vrot.slane %v463_v27, 4 }
 0x36c   :  { %v465_v29 = vadd.f32 %v464_v28, %v463_v27 }
 0x36e   :  { %v466_v30 = vrot.slane %v465_v29, 2 }
 0x370   :  { %v467_v31 = vadd.f32 %v466_v30, %v465_v29 }
 0x372   :  { %v468_v32 = vrot.slane %v467_v31, 1 }
 0x374   :  { %v469_v33 = vadd.f32 %v468_v32, %v467_v31 }
 0x376   :  { %1484 = vmatmul.mubr.msk.f32.vlgmr.msra.gmra.mxu1 %vm370_vm2, %v469_v33 }
 0x377   :  { %1497 = vmatprep.mubr.msk.f32.mxu1 %vm570_vm3, %v652_v35 }
 0x436   :  { %v539_v36 = vpop.f32.mrf.mxu1 }
 0x437   :  { %v540_v37 = vadd.f32 1e-05, %v539_v36 }
 0x438   :  { %v1485_v38 = vpop.f32.mrf.mxu1 }
 0x439   :  { %1570 = vrsqrt.f32 %v540_v37 }
 0x446   :  { %v1571_v39 = vpop.eup %1570 }
 0x447   :  { %v547_v40 = vrot.slane %v1571_v39, %v1736_v22 }
 0x449   :  { %v549_v42 = vmul.f32 %v547_v40, %v458_v21  ;;  %v548_v43 = vmul.f32 %v547_v40, %v457_v20 }
 0x44b   :  { %v558_v45 = vmul.f32 %v1307_v41, %v549_v42  ;;  %v557_v46 = vmul.f32 %v1307_v41, %v548_v43 }
 0x44d   :  { %v567_v47 = vadd.f32 %v1308_v44, %v558_v45  ;;  %v566_v48 = vadd.f32 %v1308_v44, %v557_v46  ;;  %v1201_v44 = vld [vmem:[%s1970_s17 + $0x18] sm:$0xff]  ;;  %v1200_v45 = vld [vmem:[%s1970_s17 + $0x10] sm:$0xff]  ;;  %v1199_v46 = vld [vmem:[%s1970_s17 + $0x8] sm:$0xff] }
 0x44f   :  { %1486 = vmatprep.subr.mxu0 %v567_v47  ;;  %1493 = vmatprep.subr.mxu1 %v567_v47 }
 0x450   :  { %1487 = vmatpush3.msra.mxu0 %v567_v47  ;;  %1494 = vmatpush3.msra.mxu1 %v567_v47 }
 0x451   :  { %1488 = vmatprep.subr.mxu0 %v566_v48  ;;  %1495 = vmatprep.subr.mxu1 %v566_v48 }
 0x452   :  { %1489 = vmatpush3.msra.mxu0 %v566_v48  ;;  %1496 = vmatpush3.msra.mxu1 %v566_v48 }
 0x453   :  { %1491 = vmatmul.mubr.msk.f32.vlgmr.msra.gmra.mxu0 %vm570_vm3, %v569_v49  ;;  %1498 = vmatmul.mubr.msk.f32.vlgmr.msra.gmra.mxu1 %vm570_vm3, %v653_v50 }
 0x454   :  { %1500 = vmatprep.subr.mxu0 %v742_v51  ;;  %1508 = vmatprep.mubr.msk.f32.mxu0 %vm370_vm2, %v566_v48 }
 0x455   :  { %1501 = vmatpush3.msra.mxu0 %v742_v51  ;;  %1511 = vmatprep.subr.mxu1 %v738_v52 }
 0x456   :  { %1502 = vmatprep.subr.mxu0 %v741_v53  ;;  %1512 = vmatpush3.msra.mxu1 %v738_v52 }
 0x457   :  { %1503 = vmatpush3.msra.mxu0 %v741_v53  ;;  %1513 = vmatprep.subr.mxu1 %v737_v54  ;;  %v1322_v53 = vld [vmem:[%s1971_s15] ss:$0 sm:$0xff] }
 0x458   :  { %1504 = vmatprep.subr.mxu0 %v740_v55  ;;  %1514 = vmatpush3.msra.mxu1 %v737_v54 }
 0x459   :  { %1505 = vmatpush3.msra.mxu0 %v740_v55  ;;  %1515 = vmatprep.subr.mxu1 %v736_v59 }
 0x45a   :  { %1506 = vmatprep.subr.mxu0 %v739_v56  ;;  %1516 = vmatpush3.msra.mxu1 %v736_v59 }
 0x45b   :  { %1507 = vmatpush3.msra.mxu0 %v739_v56  ;;  %1517 = vmatprep.subr.mxu1 %v735_v2  ;;  %v1323_v56 = vld [vmem:[%s1972_s16] ss:$0 sm:$0xff] }
 0x45c   :  { %1509 = vmatmul.mubr.msk.f32.vlgmr.msra.gmra.mxu0 %vm370_vm2, %v567_v47  ;;  %1522 = vmatprep.subr.mxu0 %v908_v57  ;;  %v1198_v47 = vld [vmem:[%s1970_s17] sm:$0xff] }
 0x45d   :  { %1523 = vmatpush3.msra.mxu0 %v908_v57  ;;  %1518 = vmatpush3.msra.mxu1 %v735_v2 }
 0x45e   :  { %1524 = vmatprep.subr.mxu0 %v907_v58  ;;  %1533 = vmatprep.subr.mxu1 %v1574_v0 }
 0x45f   :  { %1525 = vmatpush3.msra.mxu0 %v907_v58 }
 0x460   :  { %1526 = vmatprep.subr.mxu0 %v906_v1 }
 0x461   :  { %1527 = vmatpush3.msra.mxu0 %v906_v1 }
 0x462   :  { %1528 = vmatprep.subr.mxu0 %v905_v3 }
 0x463   :  { %1529 = vmatpush3.msra.mxu0 %v905_v3 }
 0x464   :  { %1544 = vmatprep.subr.mxu0 %v1574_v0 }
 0x513   :  { %v1492_v6 = vpop.f32.mrf.mxu0  ;;  %v1499_v7 = vpop.f32.mrf.mxu1 }
 0x515   :  { %v643_v8 = vpop.f32.mrf.mxu0  ;;  %v726_v9 = vpop.f32.mrf.mxu1 }
 0x516   :  { %1519 = vmatprep.mubr.msk.f32.mxu1 %vm370_vm2, %v643_v8  ;;  %1530 = vmatprep.mubr.msk.f32.mxu0 %vm370_vm2, %v726_v9 }
 0x517   :  { %1520 = vmatmul.mubr.msk.f32.vlgmr.msra.gmra.mxu1 %vm370_vm2, %v1492_v6  ;;  %1531 = vmatmul.mubr.msk.f32.vlgmr.msra.gmra.mxu0 %vm370_vm2, %v1499_v7 }
 0x518   :  { %1534 = vmatpush3.msra.mxu1 %v1782_v60  ;;  %1541 = vmatprep.mubr.msk.f32.mxu1 %vm1575_vm0, %v1574_v0 }
 0x519   :  { %1535 = vmatprep.subr.mxu1 %v1574_v0  ;;  %1545 = vmatpush3.msra.mxu0 %v1782_v60 }
 0x51a   :  { %1536 = vmatpush3.msra.mxu1 %v1789_v61  ;;  %1546 = vmatprep.subr.mxu0 %v1574_v0 }
 0x51b   :  { %1537 = vmatprep.subr.mxu1 %v1574_v0  ;;  %1547 = vmatpush3.msra.mxu0 %v1789_v61 }
 0x51c   :  { %1538 = vmatpush3.msra.mxu1 %v1796_v62  ;;  %1548 = vmatprep.subr.mxu0 %v1574_v0  ;;  %v1510_v60 = vpop.f32.mrf.mxu0 }
 0x51d   :  { %1539 = vmatprep.subr.mxu1 %v1574_v0  ;;  %1549 = vmatpush3.msra.mxu0 %v1796_v62 }
 0x51e   :  { %1540 = vmatpush3.msra.mxu1 %v1803_v63  ;;  %1550 = vmatprep.subr.mxu0 %v1574_v0  ;;  %v815_v10 = vpop.f32.mrf.mxu0 }
 0x51f   :  { %1551 = vmatpush3.msra.mxu0 %v1803_v63  ;;  %1552 = vmatprep.mubr.msk.f32.mxu0 %vm1575_vm0, %v1574_v0 }
 0x520   :  { %1555 = vmatprep.subr.mxu1 %v1201_v44 }
 0x5d7   :  { %v1521_v61 = vpop.f32.mrf.mxu1  ;;  %v1532_v11 = vpop.f32.mrf.mxu0 }
 0x5d8   :  { %v902_v12 = vadd.f32 %v1521_v61, %v1510_v60 }
 0x5d9   :  { %v896_v14 = vpop.f32.mrf.mxu1  ;;  %v981_v16 = vpop.f32.mrf.mxu0 }
 0x5da   :  { %v991_v62 = vadd.f32 %v1532_v11, %v902_v12  ;;  %v897_v15 = vadd.f32 %v896_v14, %v815_v10 }
 0x5dc   :  { %v1000_v17 = vadd.f32 %v1319_v13, %v991_v62  ;;  %v990_v18 = vadd.f32 %v981_v16, %v897_v15 }
 0x5de   :  { %v999_v19 = vadd.f32 %v1319_v13, %v990_v18  ;;  %v1002_v63 = vsel %vm370_vm2, %v1000_v17, 0.0 }
 0x5e0   :  { %v1001_v0 = vsel %vm370_vm2, %v999_v19, 0.0 }
 0x5e1   :  { %v1003_v20 = vadd.f32 %v1002_v63, %v1001_v0 }
 0x5e3   :  { %v1004_v21 = vrot.slane %v1003_v20, 4 }
 0x5e5   :  { %v1005_v23 = vadd.f32 %v1004_v21, %v1003_v20 }
 0x5e7   :  { %v1006_v24 = vrot.slane %v1005_v23, 2 }
 0x5e9   :  { %v1007_v25 = vadd.f32 %v1006_v24, %v1005_v23 }
 0x5eb   :  { %v1008_v26 = vrot.slane %v1007_v25, 1 }
 0x5ed   :  { %v1009_v27 = vadd.f32 %v1008_v26, %v1007_v25 }
 0x5ef   :  { %1542 = vmatmul.mubr.msk.f32.vlgmr.msra.gmra.mxu1 %vm370_vm2, %v1009_v27 }
 0x5f0   :  { %1556 = vmatpush3.msra.mxu1 %v1201_v44 }
 0x5f1   :  { %1557 = vmatprep.subr.mxu1 %v1200_v45 }
 0x5f2   :  { %1558 = vmatpush3.msra.mxu1 %v1200_v45 }
 0x5f3   :  { %1559 = vmatprep.subr.mxu1 %v1199_v46 }
 0x5f4   :  { %1560 = vmatpush3.msra.mxu1 %v1199_v46 }
 0x5f5   :  { %1561 = vmatprep.subr.mxu1 %v1198_v47 }
 0x5f6   :  { %1562 = vmatpush3.msra.mxu1 %v1198_v47 }
 0x6af   :  { %v1079_v28 = vpop.f32.mrf.mxu1 }
 0x6b0   :  { %v1086_v29 = vrot.slane %v1079_v28, %v1736_v22 }
 0x6b1   :  { %v1543_v30 = vpop.f32.mrf.mxu1 }
 0x6b2   :  { %v1087_v31 = vsub.f32 %v999_v19, %v1086_v29  ;;  %v1088_v32 = vsub.f32 %v1000_v17, %v1086_v29 }
 0x6b4   :  { %v1089_v33 = vmul.f32 %v1087_v31, %v1087_v31  ;;  %v1090_v34 = vmul.f32 %v1088_v32, %v1088_v32 }
 0x6b6   :  { %v1091_v35 = vsel %vm370_vm2, %v1089_v33, 0.0  ;;  %v1092_v36 = vsel %vm370_vm2, %v1090_v34, 0.0 }
 0x6b7   :  { %v1093_v37 = vadd.f32 %v1092_v36, %v1091_v35 }
 0x6b9   :  { %v1094_v38 = vrot.slane %v1093_v37, 4 }
 0x6bb   :  { %v1095_v39 = vadd.f32 %v1094_v38, %v1093_v37 }
 0x6bd   :  { %v1096_v40 = vrot.slane %v1095_v39, 2 }
 0x6bf   :  { %v1097_v41 = vadd.f32 %v1096_v40, %v1095_v39 }
 0x6c1   :  { %v1098_v42 = vrot.slane %v1097_v41, 1 }
 0x6c3   :  { %v1099_v43 = vadd.f32 %v1098_v42, %v1097_v41 }
 0x6c5   :  { %1553 = vmatmul.mubr.msk.f32.vlgmr.msra.gmra.mxu0 %vm370_vm2, %v1099_v43 }
 0x785   :  { %v1169_v48 = vpop.f32.mrf.mxu0 }
 0x786   :  { %v1170_v49 = vadd.f32 1e-05, %v1169_v48 }
 0x787   :  { %v1554_v50 = vpop.f32.mrf.mxu0 }
 0x788   :  { %1572 = vrsqrt.f32 %v1170_v49 }
 0x795   :  { %v1573_v51 = vpop.eup %1572 }
 0x796   :  { %v1177_v52 = vrot.slane %v1573_v51, %v1736_v22  ;;  %v1324_v22 = vld [vmem:[%s1973_s18] ss:$0 sm:$0xff] }
 0x798   :  { %v1178_v54 = vmul.f32 %v1177_v52, %v1087_v31  ;;  %v1179_v55 = vmul.f32 %v1177_v52, %v1088_v32 }
 0x79a   :  { %v1187_v57 = vmul.f32 %v1322_v53, %v1178_v54  ;;  %v1188_v58 = vmul.f32 %v1322_v53, %v1179_v55 }
 0x79c   :  { %v1196_v59 = vadd.f32 %v1323_v56, %v1187_v57  ;;  %v1197_v1 = vadd.f32 %v1323_v56, %v1188_v58 }
 0x79e   :  { %1563 = vmatprep.mubr.msk.f32.mxu1 %vm370_vm2, %v1196_v59 }
 0x79f   :  { %1564 = vmatmul.mubr.msk.f32.vlgmr.msra.gmra.mxu1 %vm370_vm2, %v1197_v1 }
 0x85f   :  { %v1565_v2 = vpop.f32.mrf.mxu1 }
 0x860   :  { %v1287_v3 = vadd.f32 %v1565_v2, %v1324_v22 }
 0x861   :  { %v1281_v6 = vpop.f32.mrf.mxu1 }
 0x862   :  { %v1291_v7 = vadd.f32 %v1287_v3, %v1698_v5  ;;  %v1282_v8 = vadd.f32 %v1324_v22, %v1281_v6 }
 0x864   :  { %1293 = vst.msk [vmem:[%s1974_s19 + $0x8] sm:$0xff] %vm72_vm1, %v1291_v7  ;;  %v1290_v9 = vadd.f32 %v1282_v8, %v1693_v4 }
 0x866   :  { %1292 = vst.msk [vmem:[%s1974_s19] sm:$0xff] %vm72_vm1, %v1290_v9 }

// kernel: wrapped_hourglass_fwd.14
= control target key start
LH: loop header
LB: loop body
LE: loop exit
PB: predicated region body
PF: predicated region fallthrough
CT: control target
= control target key end

     0   :  { %v1967_v0 = vmov 0.0   ;;  %vm1968_vm0 = vmmov 0   ;;  %vm77_vm1 = vcmask 130048   ;;  %vm241_vm2 = vcmask 523264   ;;  %s2392_s0 = inlined_call_operand.vmem [shape: f32[16,64], index: 0, kind: input, shape index: {}]   ;;  %s2393_s1 = inlined_call_operand.vmem [shape: f32[8,16], index: 1, kind: input, shape index: {}]   ;;  %s2394_s2 = inlined_call_operand.vmem [shape: f32[8,16], index: 2, kind: input, shape index: {}]   ;;  %s2395_s3 = inlined_call_operand.vmem [shape: f32[64,32], index: 3, kind: input, shape index: {}]   ;;  %s2396_s4 = inlined_call_operand.vmem [shape: f32[64,32], index: 4, kind: input, shape index: {}]   ;;  %s2397_s7 = inlined_call_operand.vmem [shape: f32[32,32], index: 7, kind: input, shape index: {}]   ;;  %s2398_s8 = inlined_call_operand.vmem [shape: f32[32,16], index: 8, kind: input, shape index: {}]   ;;  %s2399_s5 = inlined_call_operand.vmem [shape: f32[1,32], index: 5, kind: input, shape index: {}]   ;;  %s2400_s6 = inlined_call_operand.vmem [shape: f32[1,32], index: 6, kind: input, shape index: {}]   ;;  %s2401_s12 = inlined_call_operand.vmem [shape: f32[16,16], index: 12, kind: input, shape index: {}]   ;;  %s2402_s9 = inlined_call_operand.vmem [shape: f32[1,16], index: 9, kind: input, shape index: {}]   ;;  %s2403_s10 = inlined_call_operand.vmem [shape: f32[1,16], index: 10, kind: input, shape index: {}]   ;;  %s2404_s11 = inlined_call_operand.vmem [shape: f32[1,16], index: 11, kind: input, shape index: {}]   ;;  %s2405_s13 = inlined_call_operand.vmem [shape: f32[8,8], index: 13, kind: input, shape index: {}]   ;;  %s2406_s16 = inlined_call_operand.vmem [shape: f32[16,16], index: 16, kind: input, shape index: {}]   ;;  %s2407_s14 = inlined_call_operand.vmem [shape: f32[8,8], index: 14, kind: input, shape index: {}]   ;;  %s2408_s15 = inlined_call_operand.vmem [shape: f32[16,16], index: 15, kind: input, shape index: {}]   ;;  %s2409_s17 = inlined_call_operand.vmem [shape: f32[16,16], index: 17, kind: input, shape index: {}]   ;;  %s2410_s18 = inlined_call_operand.vmem [shape: f32[1,16], index: 18, kind: input, shape index: {}]   ;;  %s2411_s21 = inlined_call_operand.vmem [shape: f32[16,32], index: 21, kind: input, shape index: {}]   ;;  %s2412_s19 = inlined_call_operand.vmem [shape: f32[1,16], index: 19, kind: input, shape index: {}]   ;;  %s2413_s20 = inlined_call_operand.vmem [shape: f32[1,16], index: 20, kind: input, shape index: {}]   ;;  %s2414_s22 = inlined_call_operand.vmem [shape: f32[1,32], index: 22, kind: input, shape index: {}]   ;;  %s2415_s23 = inlined_call_operand.vmem [shape: f32[8,32], index: 23, kind: output, shape index: {}]  }
   0x1   :  { %2421 = sst [smem:[#allocation2_spill]] %s2392_s0  ;;  %1770 = vmatprep.subr.mxu0 %v1967_v0  ;;  %1774 = vmatprep.mubr.msk.f32.mxu0 %vm1968_vm0, %v1967_v0  ;;  %vm535_vm3 = vcmask 261120   ;;  %v616_v47 = vlaneseq  ;;  %vm999_vm4 = vcmask 64512  }
   0x2   :  { %2422 = sst [smem:[#allocation3_spill]] %s2393_s1  ;;  %1777 = vmatprep.subr.mxu1 %v1967_v0  ;;  %1781 = vmatprep.mubr.msk.f32.mxu1 %vm1968_vm0, %v1967_v0 }
   0x3   :  { %2423 = sst [smem:[#allocation4_spill]] %s2394_s2  ;;  %v617_v48 = vshrl.u32 %v616_v47, 7 }
   0x4   :  { %2424 = sst [smem:[#allocation5_spill]] %s2395_s3 }
   0x5   :  { %2425 = sst [smem:[#allocation6_spill]] %s2396_s4  ;;  %v2236_v49 = vsub.s32 0, %v617_v48 }
   0x6   :  { %2426 = sst [smem:[#allocation7_spill]] %s2397_s7 }
   0x7   :  { %2427 = sst [smem:[#allocation8_spill]] %s2398_s8 }
   0x8   :  { %2428 = sst [smem:[#allocation9_spill]] %s2399_s5 }
   0x9   :  { %s2429_s24 = sld [smem:[#allocation2_spill]] }
   0xa   :  { %s2430_s2 = sld [smem:[#allocation3_spill]] }
   0xb   :  { %s2431_s5 = sld [smem:[#allocation4_spill]] }
   0xc   :  { %s2432_s3 = sld [smem:[#allocation5_spill]] }
   0xd   :  { %s2433_s30 = sld [smem:[#allocation6_spill]] }
   0xe   :  { %s2434_s7 = sld [smem:[#allocation7_spill]] }
   0xf   :  { %v75_v1 = vld [vmem:[%s2429_s24 + $0x8] sm:$0xff]  ;;  %v74_v2 = vld [vmem:[%s2429_s24] sm:$0xff]  ;;  %s2435_s0 = sld [smem:[#allocation8_spill]] }
  0x10   :  { %1771 = vmatpush3.msra.mxu0 %v75_v1  ;;  %v76_v3 = vld [vmem:[%s2430_s2] sm:$0xff]  ;;  %1778 = vmatpush3.msra.mxu1 %v75_v1  ;;  %s2436_s2 = sld [smem:[#allocation9_spill]] }
  0x11   :  { %1772 = vmatprep.subr.mxu0 %v1967_v0  ;;  %1779 = vmatprep.subr.mxu1 %v1967_v0  ;;  %v151_v4 = vld [vmem:[%s2431_s5] sm:$0xff] }
  0x12   :  { %1773 = vmatpush3.msra.mxu0 %v74_v2  ;;  %1780 = vmatpush3.msra.mxu1 %v74_v2  ;;  %v232_v5 = vld [vmem:[%s2432_s3 + $0x38] sm:$0xff]  ;;  %v231_v7 = vld [vmem:[%s2432_s3 + $0x30] sm:$0xff]  ;;  %v230_v9 = vld [vmem:[%s2432_s3 + $0x28] sm:$0xff] }
  0x13   :  { %1775 = vmatmul.mubr.msk.f32.vlgmr.msra.gmra.mxu0 %vm77_vm1, %v76_v3  ;;  %v240_v6 = vld [vmem:[%s2433_s30 + $0x38] sm:$0xff]  ;;  %1784 = vmatprep.subr.mxu0 %v1967_v0  ;;  %v239_v8 = vld [vmem:[%s2433_s30 + $0x30] sm:$0xff]  ;;  %v238_v10 = vld [vmem:[%s2433_s30 + $0x28] sm:$0xff] }
  0x14   :  { %1782 = vmatmul.mubr.msk.f32.vlgmr.msra.gmra.mxu1 %vm77_vm1, %v151_v4  ;;  %1803 = vmatprep.subr.mxu1 %v1967_v0  ;;  %v229_v11 = vld [vmem:[%s2432_s3 + $0x20] sm:$0xff]  ;;  %v228_v13 = vld [vmem:[%s2432_s3 + $0x18] sm:$0xff]  ;;  %v227_v15 = vld [vmem:[%s2432_s3 + $0x10] sm:$0xff] }
  0x15   :  { %1785 = vmatpush3.msra.mxu0 %v232_v5  ;;  %1804 = vmatpush3.msra.mxu1 %v240_v6  ;;  %v237_v12 = vld [vmem:[%s2433_s30 + $0x20] sm:$0xff]  ;;  %v236_v14 = vld [vmem:[%s2433_s30 + $0x18] sm:$0xff]  ;;  %v235_v16 = vld [vmem:[%s2433_s30 + $0x10] sm:$0xff] }
  0x16   :  { %1786 = vmatprep.subr.mxu0 %v1967_v0  ;;  %1805 = vmatprep.subr.mxu1 %v1967_v0  ;;  %v226_v17 = vld [vmem:[%s2432_s3 + $0x8] sm:$0xff]  ;;  %v225_v19 = vld [vmem:[%s2432_s3] sm:$0xff]  ;;  %v534_v25 = vld [vmem:[%s2434_s7 + $0x18] sm:$0xff] }
  0x17   :  { %1787 = vmatpush3.msra.mxu0 %v231_v7  ;;  %1806 = vmatpush3.msra.mxu1 %v239_v8  ;;  %v234_v18 = vld [vmem:[%s2433_s30 + $0x8] sm:$0xff]  ;;  %v233_v20 = vld [vmem:[%s2433_s30] sm:$0xff]  ;;  %v533_v26 = vld [vmem:[%s2434_s7 + $0x10] sm:$0xff] }
  0x18   :  { %1788 = vmatprep.subr.mxu0 %v1967_v0  ;;  %1807 = vmatprep.subr.mxu1 %v1967_v0  ;;  %v532_v27 = vld [vmem:[%s2434_s7 + $0x8] sm:$0xff]  ;;  %v531_v28 = vld [vmem:[%s2434_s7] sm:$0xff]  ;;  %v727_v62 = vld [vmem:[%s2435_s0 + $0x18] sm:$0xff] }
  0x19   :  { %1789 = vmatpush3.msra.mxu0 %v230_v9  ;;  %1808 = vmatpush3.msra.mxu1 %v238_v10  ;;  %v726_v63 = vld [vmem:[%s2435_s0 + $0x10] sm:$0xff]  ;;  %v725_v1 = vld [vmem:[%s2435_s0 + $0x8] sm:$0xff]  ;;  %v724_v2 = vld [vmem:[%s2435_s0] sm:$0xff] }
  0x1a   :  { %1790 = vmatprep.subr.mxu0 %v1967_v0  ;;  %1809 = vmatprep.subr.mxu1 %v1967_v0 }
  0x1b   :  { %1791 = vmatpush3.msra.mxu0 %v229_v11  ;;  %1810 = vmatpush3.msra.mxu1 %v237_v12 }
  0x1c   :  { %1792 = vmatprep.subr.mxu0 %v1967_v0  ;;  %1811 = vmatprep.subr.mxu1 %v1967_v0 }
  0x1d   :  { %1793 = vmatpush3.msra.mxu0 %v228_v13  ;;  %1812 = vmatpush3.msra.mxu1 %v236_v14 }
  0x1e   :  { %1794 = vmatprep.subr.mxu0 %v1967_v0  ;;  %1813 = vmatprep.subr.mxu1 %v1967_v0 }
  0x1f   :  { %1795 = vmatpush3.msra.mxu0 %v227_v15  ;;  %1814 = vmatpush3.msra.mxu1 %v235_v16 }
  0x20   :  { %1796 = vmatprep.subr.mxu0 %v1967_v0  ;;  %1815 = vmatprep.subr.mxu1 %v1967_v0 }
  0x21   :  { %1797 = vmatpush3.msra.mxu0 %v226_v17  ;;  %1816 = vmatpush3.msra.mxu1 %v234_v18 }
  0x22   :  { %1798 = vmatprep.subr.mxu0 %v1967_v0  ;;  %1817 = vmatprep.subr.mxu1 %v1967_v0 }
  0x23   :  { %1799 = vmatpush3.msra.mxu0 %v225_v19  ;;  %1818 = vmatpush3.msra.mxu1 %v233_v20 }
  0x24   :  { %1800 = vmatprep.mubr.msk.f32.mxu0 %vm1968_vm0, %v1967_v0  ;;  %1819 = vmatprep.mubr.msk.f32.mxu1 %vm1968_vm0, %v1967_v0 }
  0x25   :  { %1822 = vmatprep.subr.mxu0 %v1967_v0  ;;  %1841 = vmatprep.subr.mxu1 %v1967_v0 }
  0xd3   :  { %v147_v21 = vpop.f32.mrf.mxu0 }
  0xd4   :  { %1801 = vmatmul.mubr.msk.f32.vlgmr.msra.gmra.mxu0 %vm241_vm2, %v147_v21  ;;  %1820 = vmatmul.mubr.msk.f32.vlgmr.msra.gmra.mxu1 %vm241_vm2, %v147_v21  ;;  %v221_v23 = vpop.f32.mrf.mxu1 }
  0xd5   :  { %1823 = vmatpush3.msra.mxu0 %v232_v5  ;;  %1842 = vmatpush3.msra.mxu1 %v240_v6  ;;  %v1776_v22 = vpop.f32.mrf.mxu0 }
  0xd6   :  { %1824 = vmatprep.subr.mxu0 %v1967_v0  ;;  %1843 = vmatprep.subr.mxu1 %v1967_v0  ;;  %v1783_v24 = vpop.f32.mrf.mxu1 }
  0xd7   :  { %1825 = vmatpush3.msra.mxu0 %v231_v7  ;;  %1844 = vmatpush3.msra.mxu1 %v239_v8  ;;  %v1665_v8 = vld [vmem:[%s2436_s2] ss:$0 sm:$0xff] }
  0xd8   :  { %1826 = vmatprep.subr.mxu0 %v1967_v0  ;;  %1845 = vmatprep.subr.mxu1 %v1967_v0 }
  0xd9   :  { %1827 = vmatpush3.msra.mxu0 %v230_v9  ;;  %1846 = vmatpush3.msra.mxu1 %v238_v10  ;;  %v1666_v10 = vld [vmem:[%s2400_s6] ss:$0 sm:$0xff] }
  0xda   :  { %1828 = vmatprep.subr.mxu0 %v1967_v0  ;;  %1847 = vmatprep.subr.mxu1 %v1967_v0 }
  0xdb   :  { %1829 = vmatpush3.msra.mxu0 %v229_v11  ;;  %1848 = vmatpush3.msra.mxu1 %v237_v12 }
  0xdc   :  { %1830 = vmatprep.subr.mxu0 %v1967_v0  ;;  %1849 = vmatprep.subr.mxu1 %v1967_v0 }
  0xdd   :  { %1831 = vmatpush3.msra.mxu0 %v228_v13  ;;  %1850 = vmatpush3.msra.mxu1 %v236_v14  ;;  %v2273_v13 = vld [vmem:[%s2401_s12 + $0x8] sm:$0xff]  ;;  %v2280_v14 = vld [vmem:[%s2401_s12] sm:$0xff] }
  0xde   :  { %1832 = vmatprep.subr.mxu0 %v1967_v0  ;;  %1851 = vmatprep.subr.mxu1 %v1967_v0 }
  0xdf   :  { %1833 = vmatpush3.msra.mxu0 %v227_v15  ;;  %1852 = vmatpush3.msra.mxu1 %v235_v16  ;;  %v1667_v15 = vld [vmem:[%s2402_s9] ss:$0 sm:$0xff] }
  0xe0   :  { %1834 = vmatprep.subr.mxu0 %v1967_v0  ;;  %1853 = vmatprep.subr.mxu1 %v1967_v0 }
  0xe1   :  { %1835 = vmatpush3.msra.mxu0 %v226_v17  ;;  %1854 = vmatpush3.msra.mxu1 %v234_v18 }
  0xe2   :  { %1836 = vmatprep.subr.mxu0 %v1967_v0  ;;  %1855 = vmatprep.subr.mxu1 %v1967_v0 }
  0xe3   :  { %1837 = vmatpush3.msra.mxu0 %v225_v19  ;;  %1838 = vmatprep.mubr.msk.f32.mxu0 %vm1968_vm0, %v1967_v0 }
  0xe4   :  { %1856 = vmatpush3.msra.mxu1 %v233_v20  ;;  %1857 = vmatprep.mubr.msk.f32.mxu1 %vm1968_vm0, %v1967_v0 }
  0xe5   :  { %1839 = vmatmul.mubr.msk.f32.vlgmr.msra.gmra.mxu0 %vm241_vm2, %v221_v23  ;;  %1858 = vmatmul.mubr.msk.f32.vlgmr.msra.gmra.mxu1 %vm241_vm2, %v221_v23 }
  0xe6   :  { %1860 = vmatprep.subr.mxu0 %v1967_v0  ;;  %1868 = vmatprep.mubr.msk.f32.mxu0 %vm1968_vm0, %v1967_v0 }
  0xe7   :  { %1871 = vmatprep.subr.mxu1 %v1967_v0  ;;  %1879 = vmatprep.mubr.msk.f32.mxu1 %vm1968_vm0, %v1967_v0 }
  0xe8   :  { %1861 = vmatpush3.msra.mxu0 %v534_v25  ;;  %1872 = vmatpush3.msra.mxu1 %v534_v25 }
  0xe9   :  { %1862 = vmatprep.subr.mxu0 %v1967_v0  ;;  %1873 = vmatprep.subr.mxu1 %v1967_v0 }
  0xea   :  { %1863 = vmatpush3.msra.mxu0 %v533_v26  ;;  %1874 = vmatpush3.msra.mxu1 %v533_v26 }
  0xeb   :  { %1864 = vmatprep.subr.mxu0 %v1967_v0  ;;  %1875 = vmatprep.subr.mxu1 %v1967_v0 }
  0xec   :  { %1865 = vmatpush3.msra.mxu0 %v532_v27  ;;  %1876 = vmatpush3.msra.mxu1 %v532_v27 }
  0xed   :  { %1866 = vmatprep.subr.mxu0 %v1967_v0  ;;  %1877 = vmatprep.subr.mxu1 %v1967_v0 }
  0xee   :  { %1867 = vmatpush3.msra.mxu0 %v531_v28  ;;  %1878 = vmatpush3.msra.mxu1 %v531_v28 }
  0xef   :  { %1882 = vmatprep.subr.mxu0 %v1967_v0  ;;  %1893 = vmatprep.subr.mxu1 %v1967_v0 }
 0x194   :  { %v311_v29 = vpop.f32.mrf.mxu0  ;;  %v381_v30 = vpop.f32.mrf.mxu1 }
 0x195   :  { %v385_v35 = vmax.f32 %v311_v29, %v381_v30 }
 0x196   :  { %v1802_v31 = vpop.f32.mrf.mxu0  ;;  %v1821_v32 = vpop.f32.mrf.mxu1 }
 0x1a5   :  { %v455_v33 = vpop.f32.mrf.mxu0  ;;  %v525_v34 = vpop.f32.mrf.mxu1 }
 0x1a6   :  { %v529_v36 = vmax.f32 %v455_v33, %v525_v34 }
 0x1a7   :  { %v1840_v37 = vpop.f32.mrf.mxu0  ;;  %v1859_v38 = vpop.f32.mrf.mxu1 }
 0x1a8   :  { %v2229_v39 = vmax.f32 %v385_v35, %v529_v36 }
 0x1aa   :  { %v536_v40 = vsel %vm535_vm3, %v2229_v39, 0.0 }
 0x1ab   :  { %v537_v41 = vrot.slane %v536_v40, 4 }
 0x1ad   :  { %v538_v42 = vadd.f32 %v537_v41, %v536_v40 }
 0x1af   :  { %v539_v43 = vrot.slane %v538_v42, 2 }
 0x1b1   :  { %v540_v44 = vadd.f32 %v539_v43, %v538_v42 }
 0x1b3   :  { %v541_v45 = vrot.slane %v540_v44, 1 }
 0x1b5   :  { %v542_v46 = vadd.f32 %v541_v45, %v540_v44  ;;  %v1671_v44 = vld [vmem:[%s2403_s10] ss:$0 sm:$0xff] }
 0x1b7   :  { %1869 = vmatmul.mubr.msk.f32.vlgmr.msra.gmra.mxu0 %vm535_vm3, %v542_v46  ;;  %v1672_v46 = vld [vmem:[%s2404_s11] ss:$0 sm:$0xff] }
 0x1b8   :  { %1890 = vmatprep.mubr.msk.f32.mxu0 %vm1968_vm0, %v1967_v0  ;;  %1883 = vmatpush3.msra.mxu0 %v727_v62 }
 0x1b9   :  { %1884 = vmatprep.subr.mxu0 %v1967_v0 }
 0x1ba   :  { %1885 = vmatpush3.msra.mxu0 %v726_v63 }
 0x1bb   :  { %1886 = vmatprep.subr.mxu0 %v1967_v0 }
 0x1bc   :  { %1887 = vmatpush3.msra.mxu0 %v725_v1 }
 0x1bd   :  { %1888 = vmatprep.subr.mxu0 %v1967_v0 }
 0x1be   :  { %1889 = vmatpush3.msra.mxu0 %v724_v2 }
 0x1bf   :  { %1907 = vmatprep.subr.mxu0 %v1967_v0 }
 0x277   :  { %v612_v50 = vpop.f32.mrf.mxu0 }
 0x278   :  { %v619_v51 = vrot.slane %v612_v50, %v2236_v49  ;;  %v998_v50 = vld [vmem:[%s2405_s13] sm:$0xff] }
 0x279   :  { %v1870_v52 = vpop.f32.mrf.mxu0 }
 0x27a   :  { %v620_v53 = vsub.f32 %v2229_v39, %v619_v51  ;;  %v1150_v51 = vld [vmem:[%s2406_s16 + $0x8] sm:$0xff]  ;;  %v1073_v52 = vld [vmem:[%s2407_s14] sm:$0xff] }
 0x27c   :  { %v621_v54 = vmul.f32 %v620_v53, %v620_v53 }
 0x27e   :  { %v622_v55 = vsel %vm535_vm3, %v621_v54, 0.0  ;;  %v1148_v54 = vld [vmem:[%s2408_s15 + $0x8] sm:$0xff] }
 0x27f   :  { %v623_v56 = vrot.slane %v622_v55, 4 }
 0x281   :  { %v624_v57 = vadd.f32 %v623_v56, %v622_v55  ;;  %v1298_v55 = vld [vmem:[%s2409_s17 + $0x8] sm:$0xff]  ;;  %v1147_v56 = vld [vmem:[%s2408_s15] sm:$0xff] }
 0x283   :  { %v625_v58 = vrot.slane %v624_v57, 2 }
 0x285   :  { %v626_v59 = vadd.f32 %v625_v58, %v624_v57  ;;  %v1297_v57 = vld [vmem:[%s2409_s17] sm:$0xff] }
 0x287   :  { %v627_v60 = vrot.slane %v626_v59, 1 }
 0x289   :  { %v628_v61 = vadd.f32 %v627_v60, %v626_v59 }
 0x28b   :  { %1880 = vmatmul.mubr.msk.f32.vlgmr.msra.gmra.mxu1 %vm535_vm3, %v628_v61 }
 0x28c   :  { %1897 = vmatprep.mubr.msk.f32.mxu1 %vm1968_vm0, %v1967_v0  ;;  %1894 = vmatpush3.msra.mxu1 %v2273_v13 }
 0x28d   :  { %1895 = vmatprep.subr.mxu1 %v1967_v0 }
 0x28e   :  { %1896 = vmatpush3.msra.mxu1 %v2280_v14 }
 0x28f   :  { %1900 = vmatprep.subr.mxu1 %v1967_v0 }
 0x34b   :  { %v698_v3 = vpop.f32.mrf.mxu1 }
 0x34c   :  { %v699_v4 = vadd.f32 1e-05, %v698_v3 }
 0x34d   :  { %v1881_v5 = vpop.f32.mrf.mxu1 }
 0x34e   :  { %1961 = vrsqrt.f32 %v699_v4  ;;  %v1678_v4 = vld [vmem:[%s2410_s18] ss:$0 sm:$0xff] }
 0x35b   :  { %v1962_v6 = vpop.eup %1961 }
 0x35c   :  { %v706_v7 = vrot.slane %v1962_v6, %v2236_v49 }
 0x35e   :  { %v707_v9 = vmul.f32 %v706_v7, %v620_v53  ;;  %v1149_v53 = vld [vmem:[%s2406_s16] sm:$0xff] }
 0x360   :  { %v715_v11 = vmul.f32 %v1665_v8, %v707_v9 }
 0x362   :  { %v723_v12 = vadd.f32 %v1666_v10, %v715_v11 }
 0x364   :  { %1891 = vmatmul.mubr.msk.f32.vlgmr.msra.gmra.mxu0 %vm535_vm3, %v723_v12 }
 0x365   :  { %1909 = vmatprep.mubr.msk.f32.mxu0 %vm1968_vm0, %v1967_v0 }
 0x424   :  { %v804_v16 = vpop.f32.mrf.mxu0 }
 0x425   :  { %v805_v17 = vadd.f32 %v1667_v15, %v804_v16 }
 0x426   :  { %v1892_v18 = vpop.f32.mrf.mxu0 }
 0x427   :  { %v810_v19 = vsel %vm77_vm1, %v805_v17, 0.0 }
 0x428   :  { %v811_v20 = vrot.slane %v810_v19, 4 }
 0x42a   :  { %v812_v21 = vadd.f32 %v811_v20, %v810_v19 }
 0x42c   :  { %v813_v22 = vrot.slane %v812_v21, 2 }
 0x42e   :  { %v814_v23 = vadd.f32 %v813_v22, %v812_v21 }
 0x430   :  { %v815_v24 = vrot.slane %v814_v23, 1 }
 0x432   :  { %v816_v25 = vadd.f32 %v815_v24, %v814_v23 }
 0x434   :  { %1898 = vmatmul.mubr.msk.f32.vlgmr.msra.gmra.mxu1 %vm77_vm1, %v816_v25 }
 0x435   :  { %1901 = vmatpush3.msra.mxu1 %v2273_v13  ;;  %1904 = vmatprep.mubr.msk.f32.mxu1 %vm1968_vm0, %v1967_v0 }
 0x436   :  { %1902 = vmatprep.subr.mxu1 %v1967_v0 }
 0x437   :  { %1903 = vmatpush3.msra.mxu1 %v2280_v14 }
 0x438   :  { %1912 = vmatprep.subr.mxu1 %v1967_v0 }
 0x4f4   :  { %v886_v26 = vpop.f32.mrf.mxu1 }
 0x4f5   :  { %v893_v27 = vrot.slane %v886_v26, %v2236_v49 }
 0x4f6   :  { %v1899_v28 = vpop.f32.mrf.mxu1 }
 0x4f7   :  { %v894_v29 = vsub.f32 %v805_v17, %v893_v27  ;;  %v1570_v28 = vld [vmem:[%s2411_s21 + $0x8] sm:$0xff] }
 0x4f9   :  { %v895_v30 = vmul.f32 %v894_v29, %v894_v29 }
 0x4fb   :  { %v896_v31 = vsel %vm77_vm1, %v895_v30, 0.0 }
 0x4fc   :  { %v897_v32 = vrot.slane %v896_v31, 4 }
 0x4fe   :  { %v898_v33 = vadd.f32 %v897_v32, %v896_v31 }
 0x500   :  { %v899_v34 = vrot.slane %v898_v33, 2 }
 0x502   :  { %v900_v35 = vadd.f32 %v899_v34, %v898_v33 }
 0x504   :  { %v901_v36 = vrot.slane %v900_v35, 1 }
 0x506   :  { %v902_v37 = vadd.f32 %v901_v36, %v900_v35  ;;  %v1681_v35 = vld [vmem:[%s2412_s19] ss:$0 sm:$0xff] }
 0x508   :  { %1905 = vmatmul.mubr.msk.f32.vlgmr.msra.gmra.mxu1 %vm77_vm1, %v902_v37  ;;  %v1682_v37 = vld [vmem:[%s2413_s20] ss:$0 sm:$0xff] }
 0x509   :  { %1914 = vmatprep.mubr.msk.f32.mxu1 %vm1968_vm0, %v1967_v0 }
 0x5c8   :  { %v972_v38 = vpop.f32.mrf.mxu1 }
 0x5c9   :  { %v973_v40 = vadd.f32 1e-05, %v972_v38 }
 0x5ca   :  { %v1906_v41 = vpop.f32.mrf.mxu1 }
 0x5cb   :  { %1963 = vrsqrt.f32 %v973_v40 }
 0x5d8   :  { %v1964_v42 = vpop.eup %1963 }
 0x5d9   :  { %v980_v43 = vrot.slane %v1964_v42, %v2236_v49 }
 0x5db   :  { %v981_v45 = vmul.f32 %v980_v43, %v894_v29  ;;  %v1569_v29 = vld [vmem:[%s2411_s21] sm:$0xff] }
 0x5dd   :  { %v989_v47 = vmul.f32 %v1671_v44, %v981_v45 }
 0x5df   :  { %v997_v48 = vadd.f32 %v1672_v46, %v989_v47 }
 0x5e1   :  { %1908 = vmatpush3.msra.mxu0 %v997_v48  ;;  %1913 = vmatpush3.msra.mxu1 %v997_v48 }
 0x5e2   :  { %1910 = vmatmul.mubr.msk.f32.vlgmr.msra.gmra.mxu0 %vm999_vm4, %v998_v50  ;;  %1917 = vmatprep.subr.mxu0 %v1967_v0 }
 0x5e3   :  { %1918 = vmatpush3.msra.mxu0 %v1150_v51  ;;  %1915 = vmatmul.mubr.msk.f32.vlgmr.msra.gmra.mxu1 %vm999_vm4, %v1073_v52 }
 0x5e4   :  { %1919 = vmatprep.subr.mxu0 %v1967_v0  ;;  %1921 = vmatprep.mubr.msk.f32.mxu0 %vm1968_vm0, %v1967_v0 }
 0x5e5   :  { %1920 = vmatpush3.msra.mxu0 %v1149_v53  ;;  %1924 = vmatprep.subr.mxu1 %v1967_v0 }
 0x5e6   :  { %1922 = vmatmul.mubr.msk.f32.vlgmr.msra.gmra.mxu0 %vm77_vm1, %v997_v48  ;;  %1925 = vmatpush3.msra.mxu1 %v1148_v54 }
 0x5e7   :  { %1926 = vmatprep.subr.mxu1 %v1967_v0  ;;  %1931 = vmatprep.subr.mxu0 %v1967_v0 }
 0x5e8   :  { %1928 = vmatprep.mubr.msk.f32.mxu1 %vm1968_vm0, %v1967_v0  ;;  %1935 = vmatprep.mubr.msk.f32.mxu0 %vm1968_vm0, %v1967_v0 }
 0x5e9   :  { %1932 = vmatpush3.msra.mxu0 %v1298_v55  ;;  %1927 = vmatpush3.msra.mxu1 %v1147_v56 }
 0x5ea   :  { %1933 = vmatprep.subr.mxu0 %v1967_v0  ;;  %1938 = vmatprep.subr.mxu1 %v1967_v0 }
 0x5eb   :  { %1934 = vmatpush3.msra.mxu0 %v1297_v57 }
 0x5ec   :  { %1945 = vmatprep.subr.mxu0 %v1967_v0 }
 0x6a2   :  { %v1069_v58 = vpop.f32.mrf.mxu0 }
 0x6a3   :  { %1929 = vmatmul.mubr.msk.f32.vlgmr.msra.gmra.mxu1 %vm77_vm1, %v1069_v58  ;;  %v1143_v59 = vpop.f32.mrf.mxu1 }
 0x6a4   :  { %v1911_v60 = vpop.f32.mrf.mxu0  ;;  %1936 = vmatmul.mubr.msk.f32.vlgmr.msra.gmra.mxu0 %vm77_vm1, %v1143_v59  ;;  %1939 = vmatpush3.msra.mxu1 %v2273_v13 }
 0x6a5   :  { %v1916_v61 = vpop.f32.mrf.mxu1  ;;  %1940 = vmatprep.subr.mxu1 %v1967_v0  ;;  %1942 = vmatprep.mubr.msk.f32.mxu1 %vm1968_vm0, %v1967_v0 }
 0x6a6   :  { %v1220_v62 = vpop.f32.mrf.mxu0  ;;  %1941 = vmatpush3.msra.mxu1 %v2280_v14  ;;  %1946 = vmatpush3.msra.mxu0 %v2273_v13 }
 0x6a7   :  { %1947 = vmatprep.subr.mxu0 %v1967_v0  ;;  %1949 = vmatprep.mubr.msk.f32.mxu0 %vm1968_vm0, %v1967_v0 }
 0x6a8   :  { %v1923_v63 = vpop.f32.mrf.mxu0  ;;  %1948 = vmatpush3.msra.mxu0 %v2280_v14  ;;  %1952 = vmatprep.subr.mxu1 %v1967_v0 }
 0x763   :  { %v1293_v1 = vpop.f32.mrf.mxu1 }
 0x764   :  { %v1294_v2 = vadd.f32 %v1293_v1, %v1220_v62  ;;  %v1368_v3 = vpop.f32.mrf.mxu0 }
 0x765   :  { %v1930_v5 = vpop.f32.mrf.mxu1 }
 0x766   :  { %v1372_v6 = vadd.f32 %v1368_v3, %v1294_v2  ;;  %v1937_v7 = vpop.f32.mrf.mxu0 }
 0x768   :  { %v1380_v8 = vadd.f32 %v1678_v4, %v1372_v6 }
 0x76a   :  { %v1381_v9 = vsel %vm77_vm1, %v1380_v8, 0.0 }
 0x76b   :  { %v1382_v10 = vrot.slane %v1381_v9, 4 }
 0x76d   :  { %v1383_v11 = vadd.f32 %v1382_v10, %v1381_v9 }
 0x76f   :  { %v1384_v12 = vrot.slane %v1383_v11, 2 }
 0x771   :  { %v1385_v13 = vadd.f32 %v1384_v12, %v1383_v11 }
 0x773   :  { %v1386_v14 = vrot.slane %v1385_v13, 1 }
 0x775   :  { %v1387_v15 = vadd.f32 %v1386_v14, %v1385_v13 }
 0x777   :  { %1943 = vmatmul.mubr.msk.f32.vlgmr.msra.gmra.mxu1 %vm77_vm1, %v1387_v15 }
 0x778   :  { %1956 = vmatprep.mubr.msk.f32.mxu1 %vm1968_vm0, %v1967_v0  ;;  %1953 = vmatpush3.msra.mxu1 %v1570_v28 }
 0x779   :  { %1954 = vmatprep.subr.mxu1 %v1967_v0  ;;  %v1683_v0 = vld [vmem:[%s2414_s22] ss:$0 sm:$0xff] }
 0x77a   :  { %1955 = vmatpush3.msra.mxu1 %v1569_v29 }
 0x837   :  { %v1457_v16 = vpop.f32.mrf.mxu1 }
 0x838   :  { %v1464_v17 = vrot.slane %v1457_v16, %v2236_v49 }
 0x839   :  { %v1944_v18 = vpop.f32.mrf.mxu1 }
 0x83a   :  { %v1465_v19 = vsub.f32 %v1380_v8, %v1464_v17 }
 0x83c   :  { %v1466_v20 = vmul.f32 %v1465_v19, %v1465_v19 }
 0x83e   :  { %v1467_v21 = vsel %vm77_vm1, %v1466_v20, 0.0 }
 0x83f   :  { %v1468_v22 = vrot.slane %v1467_v21, 4 }
 0x841   :  { %v1469_v23 = vadd.f32 %v1468_v22, %v1467_v21 }
 0x843   :  { %v1470_v24 = vrot.slane %v1469_v23, 2 }
 0x845   :  { %v1471_v25 = vadd.f32 %v1470_v24, %v1469_v23 }
 0x847   :  { %v1472_v26 = vrot.slane %v1471_v25, 1 }
 0x849   :  { %v1473_v27 = vadd.f32 %v1472_v26, %v1471_v25 }
 0x84b   :  { %1950 = vmatmul.mubr.msk.f32.vlgmr.msra.gmra.mxu0 %vm77_vm1, %v1473_v27 }
 0x90b   :  { %v1543_v30 = vpop.f32.mrf.mxu0 }
 0x90c   :  { %v1544_v31 = vadd.f32 1e-05, %v1543_v30 }
 0x90d   :  { %v1951_v32 = vpop.f32.mrf.mxu0 }
 0x90e   :  { %1965 = vrsqrt.f32 %v1544_v31 }
 0x91b   :  { %v1966_v33 = vpop.eup %1965 }
 0x91c   :  { %v1551_v34 = vrot.slane %v1966_v33, %v2236_v49 }
 0x91e   :  { %v1552_v36 = vmul.f32 %v1551_v34, %v1465_v19 }
 0x920   :  { %v1560_v38 = vmul.f32 %v1681_v35, %v1552_v36 }
 0x922   :  { %v1568_v40 = vadd.f32 %v1682_v37, %v1560_v38 }
 0x924   :  { %1957 = vmatmul.mubr.msk.f32.vlgmr.msra.gmra.mxu1 %vm77_vm1, %v1568_v40 }
 0x9e4   :  { %v1647_v41 = vpop.f32.mrf.mxu1 }
 0x9e5   :  { %v1648_v42 = vadd.f32 %v1683_v0, %v1647_v41 }
 0x9e6   :  { %v1958_v49 = vpop.f32.mrf.mxu1 }
 0x9e7   :  { %v1651_v43 = vadd.f32 %v1648_v42, %v2229_v39 }
 0x9e9   :  { %1652 = vst.msk [vmem:[%s2415_s23] sm:$0xff] %vm535_vm3, %v1651_v43 }

// kernel: wrapped_hourglass_fwd.12
= control target key start
LH: loop header
LB: loop body
LE: loop exit
PB: predicated region body
PF: predicated region fallthrough
CT: control target
= control target key end

     0   :  { %vm80_vm0 = vcmask 261120   ;;  %v2342_v44 = vmov 0.0   ;;  %vm2343_vm1 = vmmov 0   ;;  %vm591_vm2 = vcmask 523264   ;;  %s3053_s0 = inlined_call_operand.vmem [shape: f32[32,128], index: 0, kind: input, shape index: {}]   ;;  %s3054_s1 = inlined_call_operand.vmem [shape: f32[16,32], index: 1, kind: input, shape index: {}]   ;;  %s3055_s2 = inlined_call_operand.vmem [shape: f32[16,32], index: 2, kind: input, shape index: {}]   ;;  %s3056_s3 = inlined_call_operand.vmem [shape: f32[128,64], index: 3, kind: input, shape index: {}]   ;;  %s3057_s4 = inlined_call_operand.vmem [shape: f32[128,64], index: 4, kind: input, shape index: {}]   ;;  %s3058_s7 = inlined_call_operand.vmem [shape: f32[64,64], index: 7, kind: input, shape index: {}]   ;;  %s3059_s8 = inlined_call_operand.vmem [shape: f32[64,32], index: 8, kind: input, shape index: {}]   ;;  %s3060_s5 = inlined_call_operand.vmem [shape: f32[1,64], index: 5, kind: input, shape index: {}]   ;;  %s3061_s6 = inlined_call_operand.vmem [shape: f32[1,64], index: 6, kind: input, shape index: {}]   ;;  %s3062_s12 = inlined_call_operand.vmem [shape: f32[32,32], index: 12, kind: input, shape index: {}]   ;;  %s3063_s9 = inlined_call_operand.vmem [shape: f32[1,32], index: 9, kind: input, shape index: {}]   ;;  %s3064_s13 = inlined_call_operand.vmem [shape: f32[16,16], index: 13, kind: input, shape index: {}]   ;;  %s3065_s14 = inlined_call_operand.vmem [shape: f32[16,16], index: 14, kind: input, shape index: {}]   ;;  %s3066_s10 = inlined_call_operand.vmem [shape: f32[1,32], index: 10, kind: input, shape index: {}]   ;;  %s3067_s11 = inlined_call_operand.vmem [shape: f32[1,32], index: 11, kind: input, shape index: {}]   ;;  %s3068_s16 = inlined_call_operand.vmem [shape: f32[32,32], index: 16, kind: input, shape index: {}]   ;;  %s3069_s15 = inlined_call_operand.vmem [shape: f32[32,32], index: 15, kind: input, shape index: {}]   ;;  %s3070_s17 = inlined_call_operand.vmem [shape: f32[32,32], index: 17, kind: input, shape index: {}]   ;;  %s3071_s18 = inlined_call_operand.vmem [shape: f32[1,32], index: 18, kind: input, shape index: {}]   ;;  %s3072_s21 = inlined_call_operand.vmem [shape: f32[32,64], index: 21, kind: input, shape index: {}]   ;;  %s3073_s19 = inlined_call_operand.vmem [shape: f32[1,32], index: 19, kind: input, shape index: {}]   ;;  %s3074_s20 = inlined_call_operand.vmem [shape: f32[1,32], index: 20, kind: input, shape index: {}]   ;;  %s3075_s22 = inlined_call_operand.vmem [shape: f32[1,64], index: 22, kind: input, shape index: {}]   ;;  %s3076_s23 = inlined_call_operand.vmem [shape: f32[16,64], index: 23, kind: output, shape index: {}]  }
   0x1   :  { %3084 = sst [smem:[#allocation2_spill]] %s3053_s0  ;;  %vm1088_vm3 = vcmask 130048  }
   0x2   :  { %3085 = sst [smem:[#allocation3_spill]] %s3054_s1 }
   0x3   :  { %3086 = sst [smem:[#allocation4_spill]] %s3055_s2 }
   0x4   :  { %3087 = sst [smem:[#allocation5_spill]] %s3056_s3 }
   0x5   :  { %3088 = sst [smem:[#allocation6_spill]] %s3057_s4 }
   0x6   :  { %3089 = sst [smem:[#allocation7_spill]] %s3058_s7 }
   0x7   :  { %3090 = sst [smem:[#allocation8_spill]] %s3059_s8 }
   0x8   :  { %3091 = sst [smem:[#allocation9_spill]] %s3060_s5 }
   0x9   :  { %s3092_s24 = sld [smem:[#allocation2_spill]] }
   0xa   :  { %s3093_s2 = sld [smem:[#allocation3_spill]] }
   0xb   :  { %s3094_s30 = sld [smem:[#allocation4_spill]] }
   0xc   :  { %s3095_s1 = sld [smem:[#allocation5_spill]] }
   0xd   :  { %s3096_s27 = sld [smem:[#allocation6_spill]] }
   0xe   :  { %s3097_s7 = sld [smem:[#allocation7_spill]] }
   0xf   :  { %v77_v0 = vld [vmem:[%s3092_s24 + $0x18] sm:$0xff]  ;;  %v76_v1 = vld [vmem:[%s3092_s24 + $0x10] sm:$0xff]  ;;  %v75_v3 = vld [vmem:[%s3092_s24 + $0x8] sm:$0xff]  ;;  %s3098_s26 = sld [smem:[#allocation8_spill]] }
  0x10   :  { %2013 = vmatprep.subr.mxu0 %v77_v0  ;;  %v78_v2 = vld [vmem:[%s3093_s2] sm:$0xff]  ;;  %2024 = vmatprep.subr.mxu1 %v77_v0  ;;  %v79_v5 = vld [vmem:[%s3093_s2 + $0x8] sm:$0xff]  ;;  %s3099_s5 = sld [smem:[#allocation9_spill]] }
  0x11   :  { %2014 = vmatpush3.msra.mxu0 %v77_v0  ;;  %2021 = vmatprep.mubr.msk.f32.mxu0 %vm80_vm0, %v78_v2  ;;  %v74_v4 = vld [vmem:[%s3092_s24] sm:$0xff]  ;;  %v163_v8 = vld [vmem:[%s3094_s30 + $0x8] sm:$0xff] }
  0x12   :  { %2015 = vmatprep.subr.mxu0 %v76_v1  ;;  %2025 = vmatpush3.msra.mxu1 %v77_v0  ;;  %v162_v6 = vld [vmem:[%s3094_s30] sm:$0xff]  ;;  %v2489_v7 = vld [vmem:[%s3095_s1 + $0x78] sm:$0xff]  ;;  %v2505_v10 = vld [vmem:[%s3095_s1 + $0x70] sm:$0xff] }
  0x13   :  { %2016 = vmatpush3.msra.mxu0 %v76_v1  ;;  %2026 = vmatprep.subr.mxu1 %v76_v1  ;;  %v2497_v9 = vld [vmem:[%s3096_s27 + $0x78] sm:$0xff]  ;;  %v2510_v11 = vld [vmem:[%s3096_s27 + $0x70] sm:$0xff]  ;;  %v2519_v12 = vld [vmem:[%s3095_s1 + $0x68] sm:$0xff] }
  0x14   :  { %2017 = vmatprep.subr.mxu0 %v75_v3  ;;  %2027 = vmatpush3.msra.mxu1 %v76_v1  ;;  %v2524_v13 = vld [vmem:[%s3096_s27 + $0x68] sm:$0xff]  ;;  %v2533_v14 = vld [vmem:[%s3095_s1 + $0x60] sm:$0xff]  ;;  %v2547_v16 = vld [vmem:[%s3095_s1 + $0x58] sm:$0xff] }
  0x15   :  { %2018 = vmatpush3.msra.mxu0 %v75_v3  ;;  %2028 = vmatprep.subr.mxu1 %v75_v3  ;;  %v2538_v15 = vld [vmem:[%s3096_s27 + $0x60] sm:$0xff]  ;;  %v2552_v17 = vld [vmem:[%s3096_s27 + $0x58] sm:$0xff]  ;;  %v2561_v18 = vld [vmem:[%s3095_s1 + $0x50] sm:$0xff] }
  0x16   :  { %2019 = vmatprep.subr.mxu0 %v74_v4  ;;  %2029 = vmatpush3.msra.mxu1 %v75_v3  ;;  %v2566_v19 = vld [vmem:[%s3096_s27 + $0x50] sm:$0xff]  ;;  %v2575_v20 = vld [vmem:[%s3095_s1 + $0x48] sm:$0xff]  ;;  %v2589_v22 = vld [vmem:[%s3095_s1 + $0x40] sm:$0xff] }
  0x17   :  { %2020 = vmatpush3.msra.mxu0 %v74_v4  ;;  %2030 = vmatprep.subr.mxu1 %v74_v4  ;;  %v2580_v21 = vld [vmem:[%s3096_s27 + $0x48] sm:$0xff]  ;;  %v2594_v23 = vld [vmem:[%s3096_s27 + $0x40] sm:$0xff]  ;;  %v2603_v24 = vld [vmem:[%s3095_s1 + $0x38] sm:$0xff] }
  0x18   :  { %2022 = vmatmul.mubr.msk.f32.vlgmr.msra.gmra.mxu0 %vm80_vm0, %v79_v5  ;;  %2031 = vmatpush3.msra.mxu1 %v74_v4  ;;  %v2608_v25 = vld [vmem:[%s3096_s27 + $0x38] sm:$0xff]  ;;  %v2617_v26 = vld [vmem:[%s3095_s1 + $0x30] sm:$0xff]  ;;  %v2631_v28 = vld [vmem:[%s3095_s1 + $0x28] sm:$0xff] }
  0x19   :  { %2032 = vmatprep.mubr.msk.f32.mxu1 %vm80_vm0, %v162_v6  ;;  %2035 = vmatprep.subr.mxu0 %v2489_v7  ;;  %v2622_v27 = vld [vmem:[%s3096_s27 + $0x30] sm:$0xff]  ;;  %v2636_v29 = vld [vmem:[%s3096_s27 + $0x28] sm:$0xff]  ;;  %v2645_v30 = vld [vmem:[%s3095_s1 + $0x20] sm:$0xff] }
  0x1a   :  { %2033 = vmatmul.mubr.msk.f32.vlgmr.msra.gmra.mxu1 %vm80_vm0, %v163_v8  ;;  %2070 = vmatprep.subr.mxu1 %v2497_v9  ;;  %v2650_v31 = vld [vmem:[%s3096_s27 + $0x20] sm:$0xff]  ;;  %v2659_v32 = vld [vmem:[%s3095_s1 + $0x18] sm:$0xff]  ;;  %v2673_v34 = vld [vmem:[%s3095_s1 + $0x10] sm:$0xff] }
  0x1b   :  { %2036 = vmatpush3.msra.mxu0 %v2489_v7  ;;  %2071 = vmatpush3.msra.mxu1 %v2497_v9  ;;  %v2664_v33 = vld [vmem:[%s3096_s27 + $0x18] sm:$0xff]  ;;  %v2678_v35 = vld [vmem:[%s3096_s27 + $0x10] sm:$0xff]  ;;  %v2687_v36 = vld [vmem:[%s3095_s1 + $0x8] sm:$0xff] }
  0x1c   :  { %2037 = vmatprep.subr.mxu0 %v2505_v10  ;;  %2072 = vmatprep.subr.mxu1 %v2510_v11  ;;  %v2692_v37 = vld [vmem:[%s3096_s27 + $0x8] sm:$0xff]  ;;  %v2705_v38 = vld [vmem:[%s3095_s1] sm:$0xff]  ;;  %v590_v45 = vld [vmem:[%s3097_s7 + $0x38] sm:$0xff] }
  0x1d   :  { %2038 = vmatpush3.msra.mxu0 %v2505_v10  ;;  %2073 = vmatpush3.msra.mxu1 %v2510_v11  ;;  %v2710_v39 = vld [vmem:[%s3096_s27] sm:$0xff]  ;;  %v589_v46 = vld [vmem:[%s3097_s7 + $0x30] sm:$0xff]  ;;  %v588_v47 = vld [vmem:[%s3097_s7 + $0x28] sm:$0xff] }
  0x1e   :  { %2039 = vmatprep.subr.mxu0 %v2519_v12  ;;  %2074 = vmatprep.subr.mxu1 %v2524_v13  ;;  %v587_v48 = vld [vmem:[%s3097_s7 + $0x20] sm:$0xff]  ;;  %v586_v49 = vld [vmem:[%s3097_s7 + $0x18] sm:$0xff]  ;;  %v585_v50 = vld [vmem:[%s3097_s7 + $0x10] sm:$0xff] }
  0x1f   :  { %2040 = vmatpush3.msra.mxu0 %v2519_v12  ;;  %2075 = vmatpush3.msra.mxu1 %v2524_v13  ;;  %v584_v51 = vld [vmem:[%s3097_s7 + $0x8] sm:$0xff]  ;;  %v583_v52 = vld [vmem:[%s3097_s7] sm:$0xff] }
  0x20   :  { %2041 = vmatprep.subr.mxu0 %v2533_v14  ;;  %2076 = vmatprep.subr.mxu1 %v2538_v15 }
  0x21   :  { %2042 = vmatpush3.msra.mxu0 %v2533_v14  ;;  %2077 = vmatpush3.msra.mxu1 %v2538_v15 }
  0x22   :  { %2043 = vmatprep.subr.mxu0 %v2547_v16  ;;  %2078 = vmatprep.subr.mxu1 %v2552_v17 }
  0x23   :  { %2044 = vmatpush3.msra.mxu0 %v2547_v16  ;;  %2079 = vmatpush3.msra.mxu1 %v2552_v17 }
  0x24   :  { %2045 = vmatprep.subr.mxu0 %v2561_v18  ;;  %2080 = vmatprep.subr.mxu1 %v2566_v19 }
  0x25   :  { %2046 = vmatpush3.msra.mxu0 %v2561_v18  ;;  %2081 = vmatpush3.msra.mxu1 %v2566_v19 }
  0x26   :  { %2047 = vmatprep.subr.mxu0 %v2575_v20  ;;  %2082 = vmatprep.subr.mxu1 %v2580_v21 }
  0x27   :  { %2048 = vmatpush3.msra.mxu0 %v2575_v20  ;;  %2083 = vmatpush3.msra.mxu1 %v2580_v21 }
  0x28   :  { %2049 = vmatprep.subr.mxu0 %v2589_v22  ;;  %2084 = vmatprep.subr.mxu1 %v2594_v23 }
  0x29   :  { %2050 = vmatpush3.msra.mxu0 %v2589_v22  ;;  %2085 = vmatpush3.msra.mxu1 %v2594_v23 }
  0x2a   :  { %2051 = vmatprep.subr.mxu0 %v2603_v24  ;;  %2086 = vmatprep.subr.mxu1 %v2608_v25 }
  0x2b   :  { %2052 = vmatpush3.msra.mxu0 %v2603_v24  ;;  %2087 = vmatpush3.msra.mxu1 %v2608_v25 }
  0x2c   :  { %2053 = vmatprep.subr.mxu0 %v2617_v26  ;;  %2088 = vmatprep.subr.mxu1 %v2622_v27 }
  0x2d   :  { %2054 = vmatpush3.msra.mxu0 %v2617_v26  ;;  %2089 = vmatpush3.msra.mxu1 %v2622_v27 }
  0x2e   :  { %2055 = vmatprep.subr.mxu0 %v2631_v28  ;;  %2090 = vmatprep.subr.mxu1 %v2636_v29 }
  0x2f   :  { %2056 = vmatpush3.msra.mxu0 %v2631_v28  ;;  %2091 = vmatpush3.msra.mxu1 %v2636_v29 }
  0x30   :  { %2057 = vmatprep.subr.mxu0 %v2645_v30  ;;  %2092 = vmatprep.subr.mxu1 %v2650_v31 }
  0x31   :  { %2058 = vmatpush3.msra.mxu0 %v2645_v30  ;;  %2093 = vmatpush3.msra.mxu1 %v2650_v31 }
  0x32   :  { %2059 = vmatprep.subr.mxu0 %v2659_v32  ;;  %2094 = vmatprep.subr.mxu1 %v2664_v33 }
  0x33   :  { %2060 = vmatpush3.msra.mxu0 %v2659_v32  ;;  %2095 = vmatpush3.msra.mxu1 %v2664_v33 }
  0x34   :  { %2061 = vmatprep.subr.mxu0 %v2673_v34  ;;  %2096 = vmatprep.subr.mxu1 %v2678_v35 }
  0x35   :  { %2062 = vmatpush3.msra.mxu0 %v2673_v34  ;;  %2097 = vmatpush3.msra.mxu1 %v2678_v35 }
  0x36   :  { %2063 = vmatprep.subr.mxu0 %v2687_v36  ;;  %2098 = vmatprep.subr.mxu1 %v2692_v37 }
  0x37   :  { %2064 = vmatpush3.msra.mxu0 %v2687_v36  ;;  %2099 = vmatpush3.msra.mxu1 %v2692_v37 }
  0x38   :  { %2065 = vmatprep.subr.mxu0 %v2705_v38  ;;  %2100 = vmatprep.subr.mxu1 %v2710_v39 }
  0x39   :  { %2066 = vmatpush3.msra.mxu0 %v2705_v38  ;;  %2101 = vmatpush3.msra.mxu1 %v2710_v39 }
  0x3a   :  { %2105 = vmatprep.subr.mxu0 %v2489_v7  ;;  %2140 = vmatprep.subr.mxu1 %v2497_v9 }
  0xd8   :  { %v2023_v40 = vpop.f32.mrf.mxu0 }
  0xda   :  { %v153_v41 = vpop.f32.mrf.mxu0  ;;  %v2034_v42 = vpop.f32.mrf.mxu1 }
  0xdb   :  { %2067 = vmatprep.mubr.f32.mxu0 %v153_v41  ;;  %2102 = vmatprep.mubr.f32.mxu1 %v153_v41 }
  0xdc   :  { %2068 = vmatmul.mubr.f32.vlgmr.msra.gmra.mxu0 %v2023_v40  ;;  %2103 = vmatmul.mubr.f32.vlgmr.msra.gmra.mxu1 %v2023_v40  ;;  %v236_v43 = vpop.f32.mrf.mxu1 }
  0xdd   :  { %2106 = vmatpush3.msra.mxu0 %v2489_v7  ;;  %2141 = vmatpush3.msra.mxu1 %v2497_v9 }
  0xde   :  { %2107 = vmatprep.subr.mxu0 %v2505_v10  ;;  %2142 = vmatprep.subr.mxu1 %v2510_v11 }
  0xdf   :  { %2108 = vmatpush3.msra.mxu0 %v2505_v10  ;;  %2143 = vmatpush3.msra.mxu1 %v2510_v11 }
  0xe0   :  { %2109 = vmatprep.subr.mxu0 %v2519_v12  ;;  %2144 = vmatprep.subr.mxu1 %v2524_v13 }
  0xe1   :  { %2110 = vmatpush3.msra.mxu0 %v2519_v12  ;;  %2145 = vmatpush3.msra.mxu1 %v2524_v13  ;;  %v674_v12 = vlaneseq }
  0xe2   :  { %2111 = vmatprep.subr.mxu0 %v2533_v14  ;;  %2146 = vmatprep.subr.mxu1 %v2538_v15 }
  0xe3   :  { %2112 = vmatpush3.msra.mxu0 %v2533_v14  ;;  %2147 = vmatpush3.msra.mxu1 %v2538_v15  ;;  %v675_v13 = vshrl.u32 %v674_v12, 7 }
  0xe4   :  { %2113 = vmatprep.subr.mxu0 %v2547_v16  ;;  %2148 = vmatprep.subr.mxu1 %v2552_v17 }
  0xe5   :  { %2114 = vmatpush3.msra.mxu0 %v2547_v16  ;;  %2149 = vmatpush3.msra.mxu1 %v2552_v17  ;;  %v2834_v14 = vsub.s32 0, %v675_v13 }
  0xe6   :  { %2115 = vmatprep.subr.mxu0 %v2561_v18  ;;  %2150 = vmatprep.subr.mxu1 %v2566_v19 }
  0xe7   :  { %2116 = vmatpush3.msra.mxu0 %v2561_v18  ;;  %2151 = vmatpush3.msra.mxu1 %v2566_v19 }
  0xe8   :  { %2117 = vmatprep.subr.mxu0 %v2575_v20  ;;  %2152 = vmatprep.subr.mxu1 %v2580_v21 }
  0xe9   :  { %2118 = vmatpush3.msra.mxu0 %v2575_v20  ;;  %2153 = vmatpush3.msra.mxu1 %v2580_v21 }
  0xea   :  { %2119 = vmatprep.subr.mxu0 %v2589_v22  ;;  %2154 = vmatprep.subr.mxu1 %v2594_v23 }
  0xeb   :  { %2120 = vmatpush3.msra.mxu0 %v2589_v22  ;;  %2155 = vmatpush3.msra.mxu1 %v2594_v23 }
  0xec   :  { %2121 = vmatprep.subr.mxu0 %v2603_v24  ;;  %2156 = vmatprep.subr.mxu1 %v2608_v25 }
  0xed   :  { %2122 = vmatpush3.msra.mxu0 %v2603_v24  ;;  %2157 = vmatpush3.msra.mxu1 %v2608_v25 }
  0xee   :  { %2123 = vmatprep.subr.mxu0 %v2617_v26  ;;  %2158 = vmatprep.subr.mxu1 %v2622_v27 }
  0xef   :  { %2124 = vmatpush3.msra.mxu0 %v2617_v26  ;;  %2159 = vmatpush3.msra.mxu1 %v2622_v27 }
  0xf0   :  { %2125 = vmatprep.subr.mxu0 %v2631_v28  ;;  %2160 = vmatprep.subr.mxu1 %v2636_v29 }
  0xf1   :  { %2126 = vmatpush3.msra.mxu0 %v2631_v28  ;;  %2161 = vmatpush3.msra.mxu1 %v2636_v29 }
  0xf2   :  { %2127 = vmatprep.subr.mxu0 %v2645_v30  ;;  %2162 = vmatprep.subr.mxu1 %v2650_v31 }
  0xf3   :  { %2128 = vmatpush3.msra.mxu0 %v2645_v30  ;;  %2163 = vmatpush3.msra.mxu1 %v2650_v31  ;;  %v796_v31 = vld [vmem:[%s3098_s26 + $0x38] sm:$0xff] }
  0xf4   :  { %2129 = vmatprep.subr.mxu0 %v2659_v32  ;;  %2164 = vmatprep.subr.mxu1 %v2664_v33 }
  0xf5   :  { %2130 = vmatpush3.msra.mxu0 %v2659_v32  ;;  %2165 = vmatpush3.msra.mxu1 %v2664_v33  ;;  %v795_v32 = vld [vmem:[%s3098_s26 + $0x30] sm:$0xff]  ;;  %v794_v33 = vld [vmem:[%s3098_s26 + $0x28] sm:$0xff] }
  0xf6   :  { %2131 = vmatprep.subr.mxu0 %v2673_v34  ;;  %2166 = vmatprep.subr.mxu1 %v2678_v35 }
  0xf7   :  { %2132 = vmatpush3.msra.mxu0 %v2673_v34  ;;  %2167 = vmatpush3.msra.mxu1 %v2678_v35  ;;  %v793_v34 = vld [vmem:[%s3098_s26 + $0x20] sm:$0xff]  ;;  %v792_v35 = vld [vmem:[%s3098_s26 + $0x18] sm:$0xff] }
  0xf8   :  { %2133 = vmatprep.subr.mxu0 %v2687_v36  ;;  %2168 = vmatprep.subr.mxu1 %v2692_v37 }
  0xf9   :  { %2134 = vmatpush3.msra.mxu0 %v2687_v36  ;;  %2137 = vmatprep.mubr.f32.mxu0 %v236_v43  ;;  %v791_v36 = vld [vmem:[%s3098_s26 + $0x10] sm:$0xff] }
  0xfa   :  { %2169 = vmatpush3.msra.mxu1 %v2692_v37  ;;  %2172 = vmatprep.mubr.f32.mxu1 %v236_v43  ;;  %v790_v37 = vld [vmem:[%s3098_s26 + $0x8] sm:$0xff] }
  0xfb   :  { %2135 = vmatprep.subr.mxu0 %v2705_v38  ;;  %2170 = vmatprep.subr.mxu1 %v2710_v39 }
  0xfc   :  { %2136 = vmatpush3.msra.mxu0 %v2705_v38  ;;  %2171 = vmatpush3.msra.mxu1 %v2710_v39  ;;  %v789_v38 = vld [vmem:[%s3098_s26] sm:$0xff] }
  0xfd   :  { %2138 = vmatmul.mubr.f32.vlgmr.msra.gmra.mxu0 %v2034_v42  ;;  %2173 = vmatmul.mubr.f32.vlgmr.msra.gmra.mxu1 %v2034_v42 }
  0xfe   :  { %2175 = vmatprep.subr.mxu0 %v2342_v44  ;;  %2194 = vmatprep.subr.mxu1 %v2342_v44 }
  0xff   :  { %2176 = vmatpush3.msra.mxu0 %v590_v45  ;;  %2195 = vmatpush3.msra.mxu1 %v590_v45  ;;  %v1822_v45 = vld [vmem:[%s3099_s5] ss:$0 sm:$0xff] }
 0x100   :  { %2177 = vmatprep.subr.mxu0 %v2342_v44  ;;  %2196 = vmatprep.subr.mxu1 %v2342_v44 }
 0x101   :  { %2178 = vmatpush3.msra.mxu0 %v589_v46  ;;  %2197 = vmatpush3.msra.mxu1 %v589_v46 }
 0x102   :  { %2179 = vmatprep.subr.mxu0 %v2342_v44  ;;  %2198 = vmatprep.subr.mxu1 %v2342_v44 }
 0x103   :  { %2180 = vmatpush3.msra.mxu0 %v588_v47  ;;  %2199 = vmatpush3.msra.mxu1 %v588_v47 }
 0x104   :  { %2181 = vmatprep.subr.mxu0 %v2342_v44  ;;  %2200 = vmatprep.subr.mxu1 %v2342_v44 }
 0x105   :  { %2182 = vmatpush3.msra.mxu0 %v587_v48  ;;  %2201 = vmatpush3.msra.mxu1 %v587_v48  ;;  %v1823_v48 = vld [vmem:[%s3061_s6] ss:$0 sm:$0xff] }
 0x106   :  { %2183 = vmatprep.subr.mxu0 %v2342_v44  ;;  %2202 = vmatprep.subr.mxu1 %v2342_v44 }
 0x107   :  { %2184 = vmatpush3.msra.mxu0 %v586_v49  ;;  %2203 = vmatpush3.msra.mxu1 %v586_v49 }
 0x108   :  { %2185 = vmatprep.subr.mxu0 %v2342_v44  ;;  %2204 = vmatprep.subr.mxu1 %v2342_v44 }
 0x109   :  { %2186 = vmatpush3.msra.mxu0 %v585_v50  ;;  %2191 = vmatprep.mubr.msk.f32.mxu0 %vm2343_vm1, %v2342_v44 }
 0x10a   :  { %2187 = vmatprep.subr.mxu0 %v2342_v44  ;;  %2205 = vmatpush3.msra.mxu1 %v585_v50 }
 0x10b   :  { %2188 = vmatpush3.msra.mxu0 %v584_v51  ;;  %2206 = vmatprep.subr.mxu1 %v2342_v44 }
 0x10c   :  { %2189 = vmatprep.subr.mxu0 %v2342_v44  ;;  %2207 = vmatpush3.msra.mxu1 %v584_v51 }
 0x10d   :  { %2190 = vmatpush3.msra.mxu0 %v583_v52  ;;  %2208 = vmatprep.subr.mxu1 %v2342_v44 }
 0x10e   :  { %2209 = vmatpush3.msra.mxu1 %v583_v52  ;;  %2210 = vmatprep.mubr.msk.f32.mxu1 %vm2343_vm1, %v2342_v44 }
 0x10f   :  { %2232 = vmatprep.subr.mxu1 %v2342_v44  ;;  %2213 = vmatprep.subr.mxu0 %v796_v31 }
 0x19c   :  { %v2069_v53 = vpop.f32.mrf.mxu0  ;;  %v2104_v54 = vpop.f32.mrf.mxu1 }
 0x19d   :  { %v428_v59 = vmax.f32 %v2069_v53, %v2104_v54  ;;  %v2880_v53 = vld [vmem:[%s3062_s12 + $0x18] sm:$0xff]  ;;  %v2887_v54 = vld [vmem:[%s3062_s12 + $0x10] sm:$0xff] }
 0x19e   :  { %v343_v55 = vpop.f32.mrf.mxu0  ;;  %v418_v56 = vpop.f32.mrf.mxu1 }
 0x19f   :  { %v427_v63 = vmax.f32 %v343_v55, %v418_v56  ;;  %v2894_v55 = vld [vmem:[%s3062_s12 + $0x8] sm:$0xff]  ;;  %v2901_v56 = vld [vmem:[%s3062_s12] sm:$0xff] }
 0x1bd   :  { %v2139_v57 = vpop.f32.mrf.mxu0  ;;  %v2174_v58 = vpop.f32.mrf.mxu1 }
 0x1be   :  { %v580_v60 = vmax.f32 %v2139_v57, %v2174_v58  ;;  %v1824_v57 = vld [vmem:[%s3063_s9] ss:$0 sm:$0xff] }
 0x1bf   :  { %v495_v61 = vpop.f32.mrf.mxu0  ;;  %v570_v62 = vpop.f32.mrf.mxu1 }
 0x1c0   :  { %v2825_v0 = vmax.f32 %v428_v59, %v580_v60  ;;  %v579_v1 = vmax.f32 %v495_v61, %v570_v62 }
 0x1c2   :  { %v2827_v2 = vmax.f32 %v427_v63, %v579_v1  ;;  %v593_v3 = vsel %vm591_vm2, %v2825_v0, 0.0 }
 0x1c4   :  { %v592_v4 = vsel %vm591_vm2, %v2827_v2, 0.0 }
 0x1c5   :  { %v594_v5 = vadd.f32 %v593_v3, %v592_v4 }
 0x1c7   :  { %v595_v6 = vrot.slane %v594_v5, 4 }
 0x1c9   :  { %v596_v7 = vadd.f32 %v595_v6, %v594_v5 }
 0x1cb   :  { %v597_v8 = vrot.slane %v596_v7, 2 }
 0x1cd   :  { %v598_v9 = vadd.f32 %v597_v8, %v596_v7 }
 0x1cf   :  { %v599_v10 = vrot.slane %v598_v9, 1 }
 0x1d1   :  { %v600_v11 = vadd.f32 %v599_v10, %v598_v9 }
 0x1d3   :  { %2192 = vmatmul.mubr.msk.f32.vlgmr.msra.gmra.mxu0 %vm591_vm2, %v600_v11 }
 0x1d4   :  { %2214 = vmatpush3.msra.mxu0 %v796_v31 }
 0x1d5   :  { %2215 = vmatprep.subr.mxu0 %v795_v32 }
 0x1d6   :  { %2216 = vmatpush3.msra.mxu0 %v795_v32 }
 0x1d7   :  { %2217 = vmatprep.subr.mxu0 %v794_v33 }
 0x1d8   :  { %2218 = vmatpush3.msra.mxu0 %v794_v33  ;;  %v1829_v33 = vld [vmem:[%s3066_s10] ss:$0 sm:$0xff] }
 0x1d9   :  { %2219 = vmatprep.subr.mxu0 %v793_v34 }
 0x1da   :  { %2220 = vmatpush3.msra.mxu0 %v793_v34 }
 0x1db   :  { %2221 = vmatprep.subr.mxu0 %v792_v35 }
 0x1dc   :  { %2222 = vmatpush3.msra.mxu0 %v792_v35 }
 0x1dd   :  { %2223 = vmatprep.subr.mxu0 %v791_v36 }
 0x1de   :  { %2224 = vmatpush3.msra.mxu0 %v791_v36  ;;  %v1830_v36 = vld [vmem:[%s3067_s11] ss:$0 sm:$0xff] }
 0x1df   :  { %2225 = vmatprep.subr.mxu0 %v790_v37 }
 0x1e0   :  { %2226 = vmatpush3.msra.mxu0 %v790_v37 }
 0x1e1   :  { %2227 = vmatprep.subr.mxu0 %v789_v38 }
 0x1e2   :  { %2228 = vmatpush3.msra.mxu0 %v789_v38 }
 0x293   :  { %v670_v15 = vpop.f32.mrf.mxu0 }
 0x294   :  { %v677_v16 = vrot.slane %v670_v15, %v2834_v14 }
 0x295   :  { %v2193_v17 = vpop.f32.mrf.mxu0 }
 0x296   :  { %v678_v18 = vsub.f32 %v2827_v2, %v677_v16  ;;  %v679_v19 = vsub.f32 %v2825_v0, %v677_v16 }
 0x298   :  { %v680_v20 = vmul.f32 %v678_v18, %v678_v18  ;;  %v681_v21 = vmul.f32 %v679_v19, %v679_v19 }
 0x29a   :  { %v682_v22 = vsel %vm591_vm2, %v680_v20, 0.0  ;;  %v683_v23 = vsel %vm591_vm2, %v681_v21, 0.0 }
 0x29b   :  { %v684_v24 = vadd.f32 %v683_v23, %v682_v22 }
 0x29d   :  { %v685_v25 = vrot.slane %v684_v24, 4 }
 0x29f   :  { %v686_v26 = vadd.f32 %v685_v25, %v684_v24 }
 0x2a1   :  { %v687_v27 = vrot.slane %v686_v26, 2 }
 0x2a3   :  { %v688_v28 = vadd.f32 %v687_v27, %v686_v26  ;;  %v1086_v26 = vld [vmem:[%s3064_s13] sm:$0xff] }
 0x2a4   :  { %v1170_v27 = vld [vmem:[%s3065_s14] sm:$0xff] }
 0x2a5   :  { %v689_v29 = vrot.slane %v688_v28, 1 }
 0x2a7   :  { %v690_v30 = vadd.f32 %v689_v29, %v688_v28 }
 0x2a9   :  { %2211 = vmatmul.mubr.msk.f32.vlgmr.msra.gmra.mxu1 %vm591_vm2, %v690_v30 }
 0x2aa   :  { %2240 = vmatprep.mubr.msk.f32.mxu1 %vm2343_vm1, %v2342_v44  ;;  %2233 = vmatpush3.msra.mxu1 %v2880_v53 }
 0x2ab   :  { %2234 = vmatprep.subr.mxu1 %v2342_v44 }
 0x2ac   :  { %2235 = vmatpush3.msra.mxu1 %v2887_v54 }
 0x2ad   :  { %2236 = vmatprep.subr.mxu1 %v2342_v44 }
 0x2ae   :  { %2237 = vmatpush3.msra.mxu1 %v2894_v55 }
 0x2af   :  { %2238 = vmatprep.subr.mxu1 %v2342_v44 }
 0x2b0   :  { %2239 = vmatpush3.msra.mxu1 %v2901_v56 }
 0x2b1   :  { %2243 = vmatprep.subr.mxu1 %v2342_v44 }
 0x369   :  { %v760_v39 = vpop.f32.mrf.mxu1 }
 0x36a   :  { %v761_v40 = vadd.f32 1e-05, %v760_v39 }
 0x36b   :  { %v2212_v41 = vpop.f32.mrf.mxu1 }
 0x36c   :  { %2336 = vrsqrt.f32 %v761_v40  ;;  %v1087_v41 = vld [vmem:[%s3064_s13 + $0x8] sm:$0xff] }
 0x379   :  { %v2337_v42 = vpop.eup %2336 }
 0x37a   :  { %v768_v43 = vrot.slane %v2337_v42, %v2834_v14  ;;  %v1171_v42 = vld [vmem:[%s3065_s14 + $0x8] sm:$0xff] }
 0x37c   :  { %v769_v46 = vmul.f32 %v768_v43, %v678_v18  ;;  %v770_v47 = vmul.f32 %v768_v43, %v679_v19  ;;  %v1260_v43 = vld [vmem:[%s3068_s16 + $0x18] sm:$0xff] }
 0x37e   :  { %v778_v49 = vmul.f32 %v1822_v45, %v769_v46  ;;  %v779_v50 = vmul.f32 %v1822_v45, %v770_v47  ;;  %v1256_v45 = vld [vmem:[%s3069_s15 + $0x18] sm:$0xff]  ;;  %v1259_v46 = vld [vmem:[%s3068_s16 + $0x10] sm:$0xff] }
 0x37f   :  { %v1255_v47 = vld [vmem:[%s3069_s15 + $0x10] sm:$0xff] }
 0x380   :  { %v787_v51 = vadd.f32 %v1823_v48, %v778_v49  ;;  %v788_v52 = vadd.f32 %v1823_v48, %v779_v50  ;;  %v1258_v48 = vld [vmem:[%s3068_s16 + $0x8] sm:$0xff]  ;;  %v1257_v49 = vld [vmem:[%s3068_s16] sm:$0xff]  ;;  %v1426_v50 = vld [vmem:[%s3070_s17 + $0x18] sm:$0xff] }
 0x382   :  { %2229 = vmatprep.mubr.msk.f32.mxu0 %vm591_vm2, %v787_v51  ;;  %v1425_v51 = vld [vmem:[%s3070_s17 + $0x10] sm:$0xff] }
 0x383   :  { %2230 = vmatmul.mubr.msk.f32.vlgmr.msra.gmra.mxu0 %vm591_vm2, %v788_v52  ;;  %v1254_v52 = vld [vmem:[%s3069_s15 + $0x8] sm:$0xff] }
 0x384   :  { %2258 = vmatprep.mubr.msk.f32.mxu0 %vm1088_vm3, %v1086_v26 }
 0x443   :  { %v2231_v58 = vpop.f32.mrf.mxu0 }
 0x444   :  { %v882_v59 = vadd.f32 %v2231_v58, %v1824_v57  ;;  %v1253_v58 = vld [vmem:[%s3069_s15] sm:$0xff] }
 0x445   :  { %v876_v60 = vpop.f32.mrf.mxu0 }
 0x446   :  { %v877_v61 = vadd.f32 %v1824_v57, %v876_v60  ;;  %v890_v62 = vsel %vm80_vm0, %v882_v59, 0.0  ;;  %v1424_v57 = vld [vmem:[%s3070_s17 + $0x8] sm:$0xff] }
 0x448   :  { %v889_v63 = vsel %vm80_vm0, %v877_v61, 0.0 }
 0x449   :  { %v891_v1 = vadd.f32 %v890_v62, %v889_v63 }
 0x44b   :  { %v892_v3 = vrot.slane %v891_v1, 4 }
 0x44d   :  { %v893_v4 = vadd.f32 %v892_v3, %v891_v1 }
 0x44f   :  { %v894_v5 = vrot.slane %v893_v4, 2 }
 0x451   :  { %v895_v6 = vadd.f32 %v894_v5, %v893_v4  ;;  %v1841_v5 = vld [vmem:[%s3071_s18] ss:$0 sm:$0xff] }
 0x453   :  { %v896_v7 = vrot.slane %v895_v6, 1 }
 0x455   :  { %v897_v8 = vadd.f32 %v896_v7, %v895_v6 }
 0x457   :  { %2241 = vmatmul.mubr.msk.f32.vlgmr.msra.gmra.mxu1 %vm80_vm0, %v897_v8 }
 0x458   :  { %2244 = vmatpush3.msra.mxu1 %v2880_v53  ;;  %2251 = vmatprep.mubr.msk.f32.mxu1 %vm2343_vm1, %v2342_v44 }
 0x459   :  { %2245 = vmatprep.subr.mxu1 %v2342_v44 }
 0x45a   :  { %2246 = vmatpush3.msra.mxu1 %v2887_v54 }
 0x45b   :  { %2247 = vmatprep.subr.mxu1 %v2342_v44 }
 0x45c   :  { %2248 = vmatpush3.msra.mxu1 %v2894_v55 }
 0x45d   :  { %2249 = vmatprep.subr.mxu1 %v2342_v44 }
 0x45e   :  { %2250 = vmatpush3.msra.mxu1 %v2901_v56 }
 0x517   :  { %v967_v9 = vpop.f32.mrf.mxu1 }
 0x518   :  { %v974_v10 = vrot.slane %v967_v9, %v2834_v14 }
 0x519   :  { %v2242_v11 = vpop.f32.mrf.mxu1 }
 0x51a   :  { %v975_v12 = vsub.f32 %v877_v61, %v974_v10  ;;  %v976_v13 = vsub.f32 %v882_v59, %v974_v10  ;;  %v1423_v59 = vld [vmem:[%s3070_s17] sm:$0xff] }
 0x51c   :  { %v977_v15 = vmul.f32 %v975_v12, %v975_v12  ;;  %v978_v16 = vmul.f32 %v976_v13, %v976_v13 }
 0x51e   :  { %v979_v17 = vsel %vm80_vm0, %v977_v15, 0.0  ;;  %v980_v18 = vsel %vm80_vm0, %v978_v16, 0.0 }
 0x51f   :  { %v981_v19 = vadd.f32 %v980_v18, %v979_v17 }
 0x521   :  { %v982_v20 = vrot.slane %v981_v19, 4 }
 0x523   :  { %v983_v21 = vadd.f32 %v982_v20, %v981_v19 }
 0x525   :  { %v984_v22 = vrot.slane %v983_v21, 2 }
 0x527   :  { %v985_v23 = vadd.f32 %v984_v22, %v983_v21 }
 0x529   :  { %v986_v24 = vrot.slane %v985_v23, 1 }
 0x52b   :  { %v987_v25 = vadd.f32 %v986_v24, %v985_v23 }
 0x52d   :  { %2252 = vmatmul.mubr.msk.f32.vlgmr.msra.gmra.mxu1 %vm80_vm0, %v987_v25 }
 0x52e   :  { %2265 = vmatprep.mubr.msk.f32.mxu1 %vm1088_vm3, %v1170_v27 }
 0x5ed   :  { %v1057_v28 = vpop.f32.mrf.mxu1 }
 0x5ee   :  { %v1058_v29 = vadd.f32 1e-05, %v1057_v28 }
 0x5ef   :  { %v2253_v30 = vpop.f32.mrf.mxu1 }
 0x5f0   :  { %2338 = vrsqrt.f32 %v1058_v29 }
 0x5fd   :  { %v2339_v31 = vpop.eup %2338 }
 0x5fe   :  { %v1065_v32 = vrot.slane %v2339_v31, %v2834_v14 }
 0x600   :  { %v1067_v34 = vmul.f32 %v1065_v32, %v976_v13  ;;  %v1066_v35 = vmul.f32 %v1065_v32, %v975_v12 }
 0x602   :  { %v1076_v37 = vmul.f32 %v1829_v33, %v1067_v34  ;;  %v1075_v38 = vmul.f32 %v1829_v33, %v1066_v35 }
 0x604   :  { %v1085_v39 = vadd.f32 %v1830_v36, %v1076_v37  ;;  %v1084_v40 = vadd.f32 %v1830_v36, %v1075_v38  ;;  %v1719_v36 = vld [vmem:[%s3072_s21 + $0x18] sm:$0xff]  ;;  %v1718_v37 = vld [vmem:[%s3072_s21 + $0x10] sm:$0xff]  ;;  %v1717_v38 = vld [vmem:[%s3072_s21 + $0x8] sm:$0xff] }
 0x606   :  { %2254 = vmatprep.subr.mxu0 %v1085_v39  ;;  %2261 = vmatprep.subr.mxu1 %v1085_v39 }
 0x607   :  { %2255 = vmatpush3.msra.mxu0 %v1085_v39  ;;  %2262 = vmatpush3.msra.mxu1 %v1085_v39 }
 0x608   :  { %2256 = vmatprep.subr.mxu0 %v1084_v40  ;;  %2263 = vmatprep.subr.mxu1 %v1084_v40 }
 0x609   :  { %2257 = vmatpush3.msra.mxu0 %v1084_v40  ;;  %2264 = vmatpush3.msra.mxu1 %v1084_v40 }
 0x60a   :  { %2259 = vmatmul.mubr.msk.f32.vlgmr.msra.gmra.mxu0 %vm1088_vm3, %v1087_v41  ;;  %2266 = vmatmul.mubr.msk.f32.vlgmr.msra.gmra.mxu1 %vm1088_vm3, %v1171_v42 }
 0x60b   :  { %2268 = vmatprep.subr.mxu0 %v1260_v43  ;;  %2276 = vmatprep.mubr.msk.f32.mxu0 %vm80_vm0, %v1084_v40 }
 0x60c   :  { %2269 = vmatpush3.msra.mxu0 %v1260_v43  ;;  %2279 = vmatprep.subr.mxu1 %v1256_v45 }
 0x60d   :  { %2270 = vmatprep.subr.mxu0 %v1259_v46  ;;  %2280 = vmatpush3.msra.mxu1 %v1256_v45 }
 0x60e   :  { %2271 = vmatpush3.msra.mxu0 %v1259_v46  ;;  %2281 = vmatprep.subr.mxu1 %v1255_v47  ;;  %v1844_v46 = vld [vmem:[%s3073_s19] ss:$0 sm:$0xff] }
 0x60f   :  { %2272 = vmatprep.subr.mxu0 %v1258_v48  ;;  %2282 = vmatpush3.msra.mxu1 %v1255_v47 }
 0x610   :  { %2273 = vmatpush3.msra.mxu0 %v1258_v48  ;;  %2283 = vmatprep.subr.mxu1 %v1254_v52 }
 0x611   :  { %2274 = vmatprep.subr.mxu0 %v1257_v49  ;;  %2284 = vmatpush3.msra.mxu1 %v1254_v52 }
 0x612   :  { %2275 = vmatpush3.msra.mxu0 %v1257_v49  ;;  %2285 = vmatprep.subr.mxu1 %v1253_v58  ;;  %v1845_v49 = vld [vmem:[%s3074_s20] ss:$0 sm:$0xff] }
 0x613   :  { %2277 = vmatmul.mubr.msk.f32.vlgmr.msra.gmra.mxu0 %vm80_vm0, %v1085_v39  ;;  %2290 = vmatprep.subr.mxu0 %v1426_v50  ;;  %v1716_v39 = vld [vmem:[%s3072_s21] sm:$0xff] }
 0x614   :  { %2291 = vmatpush3.msra.mxu0 %v1426_v50  ;;  %2286 = vmatpush3.msra.mxu1 %v1253_v58 }
 0x615   :  { %2292 = vmatprep.subr.mxu0 %v1425_v51  ;;  %2301 = vmatprep.subr.mxu1 %v2342_v44 }
 0x616   :  { %2293 = vmatpush3.msra.mxu0 %v1425_v51 }
 0x617   :  { %2294 = vmatprep.subr.mxu0 %v1424_v57 }
 0x618   :  { %2295 = vmatpush3.msra.mxu0 %v1424_v57 }
 0x619   :  { %2296 = vmatprep.subr.mxu0 %v1423_v59 }
 0x61a   :  { %2297 = vmatpush3.msra.mxu0 %v1423_v59 }
 0x61b   :  { %2312 = vmatprep.subr.mxu0 %v2342_v44 }
 0x6ca   :  { %v2260_v60 = vpop.f32.mrf.mxu0  ;;  %v2267_v61 = vpop.f32.mrf.mxu1 }
 0x6cc   :  { %v1161_v62 = vpop.f32.mrf.mxu0  ;;  %v1244_v63 = vpop.f32.mrf.mxu1 }
 0x6cd   :  { %2287 = vmatprep.mubr.msk.f32.mxu1 %vm80_vm0, %v1161_v62  ;;  %2298 = vmatprep.mubr.msk.f32.mxu0 %vm80_vm0, %v1244_v63 }
 0x6ce   :  { %2288 = vmatmul.mubr.msk.f32.vlgmr.msra.gmra.mxu1 %vm80_vm0, %v2260_v60  ;;  %2299 = vmatmul.mubr.msk.f32.vlgmr.msra.gmra.mxu0 %vm80_vm0, %v2267_v61 }
 0x6cf   :  { %2302 = vmatpush3.msra.mxu1 %v2880_v53  ;;  %2309 = vmatprep.mubr.msk.f32.mxu1 %vm2343_vm1, %v2342_v44 }
 0x6d0   :  { %2303 = vmatprep.subr.mxu1 %v2342_v44  ;;  %2313 = vmatpush3.msra.mxu0 %v2880_v53 }
 0x6d1   :  { %2304 = vmatpush3.msra.mxu1 %v2887_v54  ;;  %2314 = vmatprep.subr.mxu0 %v2342_v44 }
 0x6d2   :  { %2305 = vmatprep.subr.mxu1 %v2342_v44  ;;  %2315 = vmatpush3.msra.mxu0 %v2887_v54 }
 0x6d3   :  { %2306 = vmatpush3.msra.mxu1 %v2894_v55  ;;  %2316 = vmatprep.subr.mxu0 %v2342_v44  ;;  %v2278_v53 = vpop.f32.mrf.mxu0 }
 0x6d4   :  { %2307 = vmatprep.subr.mxu1 %v2342_v44  ;;  %2317 = vmatpush3.msra.mxu0 %v2894_v55 }
 0x6d5   :  { %2308 = vmatpush3.msra.mxu1 %v2901_v56  ;;  %2318 = vmatprep.subr.mxu0 %v2342_v44  ;;  %v1333_v1 = vpop.f32.mrf.mxu0 }
 0x6d6   :  { %2319 = vmatpush3.msra.mxu0 %v2901_v56  ;;  %2320 = vmatprep.mubr.msk.f32.mxu0 %vm2343_vm1, %v2342_v44 }
 0x6d7   :  { %2323 = vmatprep.subr.mxu1 %v1719_v36 }
 0x78e   :  { %v2289_v54 = vpop.f32.mrf.mxu1  ;;  %v2300_v3 = vpop.f32.mrf.mxu0 }
 0x78f   :  { %v1420_v4 = vadd.f32 %v2289_v54, %v2278_v53 }
 0x790   :  { %v1414_v6 = vpop.f32.mrf.mxu1  ;;  %v1499_v8 = vpop.f32.mrf.mxu0 }
 0x791   :  { %v1509_v55 = vadd.f32 %v2300_v3, %v1420_v4  ;;  %v1415_v7 = vadd.f32 %v1414_v6, %v1333_v1 }
 0x793   :  { %v1518_v9 = vadd.f32 %v1841_v5, %v1509_v55  ;;  %v1508_v10 = vadd.f32 %v1499_v8, %v1415_v7 }
 0x795   :  { %v1517_v11 = vadd.f32 %v1841_v5, %v1508_v10  ;;  %v1520_v56 = vsel %vm80_vm0, %v1518_v9, 0.0 }
 0x797   :  { %v1519_v44 = vsel %vm80_vm0, %v1517_v11, 0.0 }
 0x798   :  { %v1521_v12 = vadd.f32 %v1520_v56, %v1519_v44 }
 0x79a   :  { %v1522_v13 = vrot.slane %v1521_v12, 4 }
 0x79c   :  { %v1523_v15 = vadd.f32 %v1522_v13, %v1521_v12 }
 0x79e   :  { %v1524_v16 = vrot.slane %v1523_v15, 2 }
 0x7a0   :  { %v1525_v17 = vadd.f32 %v1524_v16, %v1523_v15 }
 0x7a2   :  { %v1526_v18 = vrot.slane %v1525_v17, 1 }
 0x7a4   :  { %v1527_v19 = vadd.f32 %v1526_v18, %v1525_v17 }
 0x7a6   :  { %2310 = vmatmul.mubr.msk.f32.vlgmr.msra.gmra.mxu1 %vm80_vm0, %v1527_v19 }
 0x7a7   :  { %2324 = vmatpush3.msra.mxu1 %v1719_v36 }
 0x7a8   :  { %2325 = vmatprep.subr.mxu1 %v1718_v37 }
 0x7a9   :  { %2326 = vmatpush3.msra.mxu1 %v1718_v37 }
 0x7aa   :  { %2327 = vmatprep.subr.mxu1 %v1717_v38 }
 0x7ab   :  { %2328 = vmatpush3.msra.mxu1 %v1717_v38 }
 0x7ac   :  { %2329 = vmatprep.subr.mxu1 %v1716_v39 }
 0x7ad   :  { %2330 = vmatpush3.msra.mxu1 %v1716_v39 }
 0x866   :  { %v1597_v20 = vpop.f32.mrf.mxu1 }
 0x867   :  { %v1604_v21 = vrot.slane %v1597_v20, %v2834_v14 }
 0x868   :  { %v2311_v22 = vpop.f32.mrf.mxu1 }
 0x869   :  { %v1605_v23 = vsub.f32 %v1517_v11, %v1604_v21  ;;  %v1606_v24 = vsub.f32 %v1518_v9, %v1604_v21 }
 0x86b   :  { %v1607_v25 = vmul.f32 %v1605_v23, %v1605_v23  ;;  %v1608_v26 = vmul.f32 %v1606_v24, %v1606_v24 }
 0x86d   :  { %v1609_v27 = vsel %vm80_vm0, %v1607_v25, 0.0  ;;  %v1610_v28 = vsel %vm80_vm0, %v1608_v26, 0.0 }
 0x86e   :  { %v1611_v29 = vadd.f32 %v1610_v28, %v1609_v27 }
 0x870   :  { %v1612_v30 = vrot.slane %v1611_v29, 4 }
 0x872   :  { %v1613_v31 = vadd.f32 %v1612_v30, %v1611_v29 }
 0x874   :  { %v1614_v32 = vrot.slane %v1613_v31, 2 }
 0x876   :  { %v1615_v33 = vadd.f32 %v1614_v32, %v1613_v31 }
 0x878   :  { %v1616_v34 = vrot.slane %v1615_v33, 1 }
 0x87a   :  { %v1617_v35 = vadd.f32 %v1616_v34, %v1615_v33 }
 0x87c   :  { %2321 = vmatmul.mubr.msk.f32.vlgmr.msra.gmra.mxu0 %vm80_vm0, %v1617_v35 }
 0x93c   :  { %v1687_v40 = vpop.f32.mrf.mxu0 }
 0x93d   :  { %v1688_v41 = vadd.f32 1e-05, %v1687_v40 }
 0x93e   :  { %v2322_v42 = vpop.f32.mrf.mxu0 }
 0x93f   :  { %2340 = vrsqrt.f32 %v1688_v41 }
 0x94c   :  { %v2341_v43 = vpop.eup %2340 }
 0x94d   :  { %v1695_v45 = vrot.slane %v2341_v43, %v2834_v14  ;;  %v1846_v14 = vld [vmem:[%s3075_s22] ss:$0 sm:$0xff] }
 0x94f   :  { %v1696_v47 = vmul.f32 %v1695_v45, %v1605_v23  ;;  %v1697_v48 = vmul.f32 %v1695_v45, %v1606_v24 }
 0x951   :  { %v1705_v50 = vmul.f32 %v1844_v46, %v1696_v47  ;;  %v1706_v51 = vmul.f32 %v1844_v46, %v1697_v48 }
 0x953   :  { %v1714_v52 = vadd.f32 %v1845_v49, %v1705_v50  ;;  %v1715_v57 = vadd.f32 %v1845_v49, %v1706_v51 }
 0x955   :  { %2331 = vmatprep.mubr.msk.f32.mxu1 %vm80_vm0, %v1714_v52 }
 0x956   :  { %2332 = vmatmul.mubr.msk.f32.vlgmr.msra.gmra.mxu1 %vm80_vm0, %v1715_v57 }
 0xa16   :  { %v2333_v58 = vpop.f32.mrf.mxu1 }
 0xa17   :  { %v1805_v59 = vadd.f32 %v2333_v58, %v1846_v14 }
 0xa18   :  { %v1799_v60 = vpop.f32.mrf.mxu1 }
 0xa19   :  { %v1809_v61 = vadd.f32 %v1805_v59, %v2825_v0  ;;  %v1800_v62 = vadd.f32 %v1846_v14, %v1799_v60 }
 0xa1b   :  { %1811 = vst.msk [vmem:[%s3076_s23 + $0x8] sm:$0xff] %vm591_vm2, %v1809_v61  ;;  %v1808_v63 = vadd.f32 %v1800_v62, %v2827_v2 }
 0xa1d   :  { %1810 = vst.msk [vmem:[%s3076_s23] sm:$0xff] %vm591_vm2, %v1808_v63 }

// kernel: wrapped_hourglass_fwd.16
= control target key start
LH: loop header
LB: loop body
LE: loop exit
PB: predicated region body
PF: predicated region fallthrough
CT: control target
= control target key end

     0   :  { %vm76_vm0 = vcmask 64512   ;;  %v1860_v0 = vmov 0.0   ;;  %vm1861_vm1 = vmmov 0   ;;  %vm232_vm2 = vcmask 261120   ;;  %s2193_s0 = inlined_call_operand.vmem [shape: f32[8,32], index: 0, kind: input, shape index: {}]   ;;  %s2194_s1 = inlined_call_operand.vmem [shape: f32[4,8], index: 1, kind: input, shape index: {}]   ;;  %s2195_s2 = inlined_call_operand.vmem [shape: f32[4,8], index: 2, kind: input, shape index: {}]   ;;  %s2196_s3 = inlined_call_operand.vmem [shape: f32[32,16], index: 3, kind: input, shape index: {}]   ;;  %s2197_s4 = inlined_call_operand.vmem [shape: f32[32,16], index: 4, kind: input, shape index: {}]   ;;  %s2198_s7 = inlined_call_operand.vmem [shape: f32[16,16], index: 7, kind: input, shape index: {}]   ;;  %s2199_s8 = inlined_call_operand.vmem [shape: f32[16,8], index: 8, kind: input, shape index: {}]   ;;  %s2200_s5 = inlined_call_operand.vmem [shape: f32[1,16], index: 5, kind: input, shape index: {}]   ;;  %s2201_s6 = inlined_call_operand.vmem [shape: f32[1,16], index: 6, kind: input, shape index: {}]   ;;  %s2202_s12 = inlined_call_operand.vmem [shape: f32[8,8], index: 12, kind: input, shape index: {}]   ;;  %s2203_s9 = inlined_call_operand.vmem [shape: f32[1,8], index: 9, kind: input, shape index: {}]   ;;  %s2204_s10 = inlined_call_operand.vmem [shape: f32[1,8], index: 10, kind: input, shape index: {}]   ;;  %s2205_s11 = inlined_call_operand.vmem [shape: f32[1,8], index: 11, kind: input, shape index: {}]   ;;  %s2206_s13 = inlined_call_operand.vmem [shape: f32[4,4], index: 13, kind: input, shape index: {}]   ;;  %s2207_s14 = inlined_call_operand.vmem [shape: f32[4,4], index: 14, kind: input, shape index: {}]   ;;  %s2208_s16 = inlined_call_operand.vmem [shape: f32[8,8], index: 16, kind: input, shape index: {}]   ;;  %s2209_s15 = inlined_call_operand.vmem [shape: f32[8,8], index: 15, kind: input, shape index: {}]   ;;  %s2210_s17 = inlined_call_operand.vmem [shape: f32[8,8], index: 17, kind: input, shape index: {}]   ;;  %s2211_s18 = inlined_call_operand.vmem [shape: f32[1,8], index: 18, kind: input, shape index: {}]   ;;  %s2212_s21 = inlined_call_operand.vmem [shape: f32[8,16], index: 21, kind: input, shape index: {}]   ;;  %s2213_s19 = inlined_call_operand.vmem [shape: f32[1,8], index: 19, kind: input, shape index: {}]   ;;  %s2214_s20 = inlined_call_operand.vmem [shape: f32[1,8], index: 20, kind: input, shape index: {}]   ;;  %s2215_s22 = inlined_call_operand.vmem [shape: f32[1,16], index: 22, kind: input, shape index: {}]   ;;  %s2216_s23 = inlined_call_operand.vmem [shape: f32[4,16], index: 23, kind: output, shape index: {}]  }
   0x1   :  { %2221 = sst [smem:[#allocation2_spill]] %s2193_s0  ;;  %1727 = vmatprep.subr.mxu0 %v1860_v0  ;;  %1729 = vmatprep.mubr.msk.f32.mxu0 %vm1861_vm1, %v1860_v0  ;;  %vm524_vm3 = vcmask 125952   ;;  %vm532_vm4 = vcmask 130048   ;;  %v606_v36 = vlaneseq  ;;  %v1653_v60 = vld [vmem:[%s2201_s6] ss:$0 sm:$0xff]  ;;  %vm797_vm5 = vcmask 60416  }
   0x2   :  { %2222 = sst [smem:[#allocation3_spill]] %s2194_s1  ;;  %1732 = vmatprep.subr.mxu1 %v1860_v0  ;;  %1734 = vmatprep.mubr.msk.f32.mxu1 %vm1861_vm1, %v1860_v0  ;;  %v2103_v63 = vld [vmem:[%s2202_s12] sm:$0xff]  ;;  %vm991_vm6 = vcmask 1043456   ;;  %vm987_vm7 = vcmask 31744  }
   0x3   :  { %2223 = sst [smem:[#allocation4_spill]] %s2195_s2  ;;  %v607_v37 = vshrl.u32 %v606_v36, 7  ;;  %v1065_v36 = vld [vmem:[%s2207_s14] sm:$0xf] }
   0x4   :  { %2224 = sst [smem:[#allocation5_spill]] %s2196_s3 }
   0x5   :  { %2225 = sst [smem:[#allocation6_spill]] %s2197_s4  ;;  %v2074_v38 = vsub.s32 0, %v607_v37  ;;  %v1140_v37 = vld [vmem:[%s2208_s16] sm:$0xff] }
   0x6   :  { %2226 = sst [smem:[#allocation7_spill]] %s2198_s7 }
   0x7   :  { %2227 = sst [smem:[#allocation8_spill]] %s2199_s8 }
   0x8   :  { %2228 = sst [smem:[#allocation9_spill]] %s2200_s5 }
   0x9   :  { %s2229_s24 = sld [smem:[#allocation2_spill]] }
   0xa   :  { %s2230_s1 = sld [smem:[#allocation3_spill]] }
   0xb   :  { %s2231_s8 = sld [smem:[#allocation4_spill]] }
   0xc   :  { %s2232_s28 = sld [smem:[#allocation5_spill]] }
   0xd   :  { %s2233_s0 = sld [smem:[#allocation6_spill]] }
   0xe   :  { %s2235_s7 = sld [smem:[#allocation8_spill]] }
   0xf   :  { %v74_v1 = vld [vmem:[%s2229_s24] sm:$0xff]  ;;  %s2236_s27 = sld [smem:[#allocation9_spill]] }
  0x10   :  { %v75_v2 = vld [vmem:[%s2230_s1] sm:$0xf]  ;;  %1728 = vmatpush3.msra.mxu0 %v74_v1  ;;  %1733 = vmatpush3.msra.mxu1 %v74_v1 }
  0x11   :  { %v150_v3 = vld [vmem:[%s2231_s8] sm:$0xf]  ;;  %1730 = vmatmul.mubr.msk.f32.vlgmr.msra.gmra.mxu0 %vm76_vm0, %v75_v2  ;;  %1737 = vmatprep.subr.mxu0 %v1860_v0 }
  0x12   :  { %v227_v4 = vld [vmem:[%s2232_s28 + $0x18] sm:$0xff]  ;;  %1735 = vmatmul.mubr.msk.f32.vlgmr.msra.gmra.mxu1 %vm76_vm0, %v150_v3  ;;  %1748 = vmatprep.subr.mxu1 %v1860_v0  ;;  %v226_v6 = vld [vmem:[%s2232_s28 + $0x10] sm:$0xff]  ;;  %v225_v8 = vld [vmem:[%s2232_s28 + $0x8] sm:$0xff] }
  0x13   :  { %v231_v5 = vld [vmem:[%s2233_s0 + $0x18] sm:$0xff]  ;;  %v230_v7 = vld [vmem:[%s2233_s0 + $0x10] sm:$0xff]  ;;  %1738 = vmatpush3.msra.mxu0 %v227_v4  ;;  %v229_v9 = vld [vmem:[%s2233_s0 + $0x8] sm:$0xff]  ;;  %1745 = vmatprep.mubr.msk.f32.mxu0 %vm1861_vm1, %v1860_v0 }
  0x14   :  { %1749 = vmatpush3.msra.mxu1 %v231_v5  ;;  %1739 = vmatprep.subr.mxu0 %v1860_v0  ;;  %v224_v10 = vld [vmem:[%s2232_s28] sm:$0xff]  ;;  %v715_v51 = vld [vmem:[%s2235_s7 + $0x8] sm:$0xff] }
  0x15   :  { %1750 = vmatprep.subr.mxu1 %v1860_v0  ;;  %1740 = vmatpush3.msra.mxu0 %v226_v6  ;;  %v228_v11 = vld [vmem:[%s2233_s0] sm:$0xff]  ;;  %s2234_s0 = sld [smem:[#allocation7_spill]] }
  0x16   :  { %1751 = vmatpush3.msra.mxu1 %v230_v7  ;;  %1741 = vmatprep.subr.mxu0 %v1860_v0  ;;  %v714_v52 = vld [vmem:[%s2235_s7] sm:$0xff] }
  0x17   :  { %1752 = vmatprep.subr.mxu1 %v1860_v0  ;;  %1742 = vmatpush3.msra.mxu0 %v225_v8  ;;  %v1652_v58 = vld [vmem:[%s2236_s27] ss:$0 sm:$0xff] }
  0x18   :  { %1753 = vmatpush3.msra.mxu1 %v229_v9  ;;  %1743 = vmatprep.subr.mxu0 %v1860_v0  ;;  %v1654_v1 = vld [vmem:[%s2203_s9] ss:$0 sm:$0xff] }
  0x19   :  { %1754 = vmatprep.subr.mxu1 %v1860_v0  ;;  %1744 = vmatpush3.msra.mxu0 %v224_v10 }
  0x1a   :  { %1755 = vmatpush3.msra.mxu1 %v228_v11  ;;  %1756 = vmatprep.mubr.msk.f32.mxu1 %vm1861_vm1, %v1860_v0 }
  0x1b   :  { %1759 = vmatprep.subr.mxu0 %v1860_v0  ;;  %1770 = vmatprep.subr.mxu1 %v1860_v0  ;;  %v523_v16 = vld [vmem:[%s2234_s0 + $0x8] sm:$0xff]  ;;  %v522_v17 = vld [vmem:[%s2234_s0] sm:$0xff] }
  0xd1   :  { %v146_v12 = vpop.f32.mrf.mxu0 }
  0xd2   :  { %1746 = vmatmul.mubr.msk.f32.vlgmr.msra.gmra.mxu0 %vm232_vm2, %v146_v12  ;;  %1757 = vmatmul.mubr.msk.f32.vlgmr.msra.gmra.mxu1 %vm232_vm2, %v146_v12  ;;  %v220_v14 = vpop.f32.mrf.mxu1 }
  0xd3   :  { %1760 = vmatpush3.msra.mxu0 %v227_v4  ;;  %1771 = vmatpush3.msra.mxu1 %v231_v5  ;;  %v1731_v13 = vpop.f32.mrf.mxu0 }
  0xd4   :  { %1761 = vmatprep.subr.mxu0 %v1860_v0  ;;  %1772 = vmatprep.subr.mxu1 %v1860_v0  ;;  %v1736_v15 = vpop.f32.mrf.mxu1 }
  0xd5   :  { %1762 = vmatpush3.msra.mxu0 %v226_v6  ;;  %1773 = vmatpush3.msra.mxu1 %v230_v7 }
  0xd6   :  { %1763 = vmatprep.subr.mxu0 %v1860_v0  ;;  %1774 = vmatprep.subr.mxu1 %v1860_v0 }
  0xd7   :  { %1764 = vmatpush3.msra.mxu0 %v225_v8  ;;  %1775 = vmatpush3.msra.mxu1 %v229_v9 }
  0xd8   :  { %1765 = vmatprep.subr.mxu0 %v1860_v0  ;;  %1776 = vmatprep.subr.mxu1 %v1860_v0 }
  0xd9   :  { %1766 = vmatpush3.msra.mxu0 %v224_v10  ;;  %1767 = vmatprep.mubr.msk.f32.mxu0 %vm1861_vm1, %v1860_v0 }
  0xda   :  { %1777 = vmatpush3.msra.mxu1 %v228_v11  ;;  %1778 = vmatprep.mubr.msk.f32.mxu1 %vm1861_vm1, %v1860_v0 }
  0xdb   :  { %1768 = vmatmul.mubr.msk.f32.vlgmr.msra.gmra.mxu0 %vm232_vm2, %v220_v14  ;;  %1779 = vmatmul.mubr.msk.f32.vlgmr.msra.gmra.mxu1 %vm232_vm2, %v220_v14 }
  0xdc   :  { %1781 = vmatprep.subr.mxu0 %v1860_v0  ;;  %1785 = vmatprep.mubr.msk.f32.mxu0 %vm1861_vm1, %v1860_v0 }
  0xdd   :  { %1788 = vmatprep.subr.mxu1 %v1860_v0  ;;  %1792 = vmatprep.mubr.msk.f32.mxu1 %vm1861_vm1, %v1860_v0 }
  0xde   :  { %1782 = vmatpush3.msra.mxu0 %v523_v16  ;;  %1789 = vmatpush3.msra.mxu1 %v523_v16 }
  0xdf   :  { %1783 = vmatprep.subr.mxu0 %v1860_v0  ;;  %1790 = vmatprep.subr.mxu1 %v1860_v0 }
  0xe0   :  { %1784 = vmatpush3.msra.mxu0 %v522_v17  ;;  %1791 = vmatpush3.msra.mxu1 %v522_v17 }
  0xe1   :  { %1795 = vmatprep.subr.mxu0 %v1860_v0  ;;  %1802 = vmatprep.subr.mxu1 %v1860_v0 }
 0x192   :  { %v302_v18 = vpop.f32.mrf.mxu0  ;;  %v372_v19 = vpop.f32.mrf.mxu1 }
 0x193   :  { %v376_v24 = vmax.f32 %v302_v18, %v372_v19 }
 0x194   :  { %v1747_v20 = vpop.f32.mrf.mxu0  ;;  %v1758_v21 = vpop.f32.mrf.mxu1 }
 0x19b   :  { %v446_v22 = vpop.f32.mrf.mxu0  ;;  %v516_v23 = vpop.f32.mrf.mxu1 }
 0x19c   :  { %v520_v25 = vmax.f32 %v446_v22, %v516_v23 }
 0x19d   :  { %v1769_v26 = vpop.f32.mrf.mxu0  ;;  %v1780_v27 = vpop.f32.mrf.mxu1 }
 0x19e   :  { %v2067_v28 = vmax.f32 %v376_v24, %v520_v25 }
 0x1a0   :  { %v525_v29 = vsel %vm524_vm3, %v2067_v28, 0.0 }
 0x1a1   :  { %v526_v30 = vrot.slane %v525_v29, 4 }
 0x1a3   :  { %v527_v31 = vadd.f32 %v526_v30, %v525_v29  ;;  %v1658_v30 = vld [vmem:[%s2204_s10] ss:$0 sm:$0xff] }
 0x1a5   :  { %v528_v32 = vrot.slane %v527_v31, 2 }
 0x1a7   :  { %v529_v33 = vadd.f32 %v528_v32, %v527_v31  ;;  %v1659_v32 = vld [vmem:[%s2205_s11] ss:$0 sm:$0xff] }
 0x1a9   :  { %v530_v34 = vrot.slane %v529_v33, 1 }
 0x1ab   :  { %v531_v35 = vadd.f32 %v530_v34, %v529_v33 }
 0x1ad   :  { %1786 = vmatmul.mubr.msk.f32.vlgmr.msra.gmra.mxu0 %vm532_vm4, %v531_v35  ;;  %v986_v35 = vld [vmem:[%s2206_s13] sm:$0xf] }
 0x1ae   :  { %1799 = vmatprep.mubr.msk.f32.mxu0 %vm1861_vm1, %v1860_v0  ;;  %1796 = vmatpush3.msra.mxu0 %v715_v51 }
 0x1af   :  { %1797 = vmatprep.subr.mxu0 %v1860_v0 }
 0x1b0   :  { %1798 = vmatpush3.msra.mxu0 %v714_v52 }
 0x1b1   :  { %1807 = vmatprep.subr.mxu0 %v1860_v0 }
 0x26d   :  { %v602_v39 = vpop.f32.mrf.mxu0 }
 0x26e   :  { %v609_v40 = vrot.slane %v602_v39, %v2074_v38  ;;  %v1139_v39 = vld [vmem:[%s2209_s15] sm:$0xff] }
 0x26f   :  { %v1787_v41 = vpop.f32.mrf.mxu0 }
 0x270   :  { %v610_v42 = vsub.f32 %v2067_v28, %v609_v40  ;;  %v1286_v40 = vld [vmem:[%s2210_s17] sm:$0xff] }
 0x272   :  { %v611_v43 = vmul.f32 %v610_v42, %v610_v42 }
 0x274   :  { %v612_v44 = vsel %vm524_vm3, %v611_v43, 0.0 }
 0x275   :  { %v613_v45 = vrot.slane %v612_v44, 4 }
 0x277   :  { %v614_v46 = vadd.f32 %v613_v45, %v612_v44 }
 0x279   :  { %v615_v47 = vrot.slane %v614_v46, 2 }
 0x27b   :  { %v616_v48 = vadd.f32 %v615_v47, %v614_v46 }
 0x27d   :  { %v617_v49 = vrot.slane %v616_v48, 1 }
 0x27f   :  { %v618_v50 = vadd.f32 %v617_v49, %v616_v48 }
 0x281   :  { %1793 = vmatmul.mubr.msk.f32.vlgmr.msra.gmra.mxu1 %vm532_vm4, %v618_v50  ;;  %v1667_v50 = vld [vmem:[%s2211_s18] ss:$0 sm:$0xff] }
 0x282   :  { %1804 = vmatprep.mubr.msk.f32.mxu1 %vm1861_vm1, %v1860_v0  ;;  %1803 = vmatpush3.msra.mxu1 %v2103_v63 }
 0x283   :  { %1812 = vmatprep.subr.mxu1 %v1860_v0 }
 0x341   :  { %v688_v53 = vpop.f32.mrf.mxu1 }
 0x342   :  { %v689_v54 = vadd.f32 1e-05, %v688_v53 }
 0x343   :  { %v1794_v55 = vpop.f32.mrf.mxu1 }
 0x344   :  { %1854 = vrsqrt.f32 %v689_v54 }
 0x351   :  { %v1855_v56 = vpop.eup %1854 }
 0x352   :  { %v696_v57 = vrot.slane %v1855_v56, %v2074_v38 }
 0x354   :  { %v697_v59 = vmul.f32 %v696_v57, %v610_v42 }
 0x356   :  { %v705_v61 = vmul.f32 %v1652_v58, %v697_v59 }
 0x358   :  { %v713_v62 = vadd.f32 %v1653_v60, %v705_v61 }
 0x35a   :  { %1800 = vmatmul.mubr.msk.f32.vlgmr.msra.gmra.mxu0 %vm532_vm4, %v713_v62 }
 0x35b   :  { %1809 = vmatprep.mubr.msk.f32.mxu0 %vm1861_vm1, %v1860_v0  ;;  %1808 = vmatpush3.msra.mxu0 %v2103_v63 }
 0x35c   :  { %1817 = vmatprep.subr.mxu0 %v1860_v0 }
 0x41a   :  { %v792_v2 = vpop.f32.mrf.mxu0 }
 0x41b   :  { %v793_v3 = vadd.f32 %v1654_v1, %v792_v2 }
 0x41c   :  { %v1801_v4 = vpop.f32.mrf.mxu0 }
 0x41d   :  { %v798_v5 = vsel %vm797_vm5, %v793_v3, 0.0 }
 0x41e   :  { %v799_v6 = vrot.slane %v798_v5, 4 }
 0x420   :  { %v800_v7 = vadd.f32 %v799_v6, %v798_v5 }
 0x422   :  { %v801_v8 = vrot.slane %v800_v7, 2 }
 0x424   :  { %v802_v9 = vadd.f32 %v801_v8, %v800_v7 }
 0x426   :  { %v803_v10 = vrot.slane %v802_v9, 1 }
 0x428   :  { %v804_v11 = vadd.f32 %v803_v10, %v802_v9 }
 0x42a   :  { %1805 = vmatmul.mubr.msk.f32.vlgmr.msra.gmra.mxu1 %vm76_vm0, %v804_v11 }
 0x42b   :  { %1814 = vmatprep.mubr.msk.f32.mxu1 %vm1861_vm1, %v1860_v0 }
 0x4ea   :  { %v874_v12 = vpop.f32.mrf.mxu1 }
 0x4eb   :  { %v881_v13 = vrot.slane %v874_v12, %v2074_v38 }
 0x4ec   :  { %v1806_v14 = vpop.f32.mrf.mxu1 }
 0x4ed   :  { %v882_v15 = vsub.f32 %v793_v3, %v881_v13 }
 0x4ef   :  { %v883_v16 = vmul.f32 %v882_v15, %v882_v15 }
 0x4f1   :  { %v884_v17 = vsel %vm797_vm5, %v883_v16, 0.0  ;;  %v1670_v16 = vld [vmem:[%s2213_s19] ss:$0 sm:$0xff] }
 0x4f2   :  { %v885_v18 = vrot.slane %v884_v17, 4 }
 0x4f4   :  { %v886_v19 = vadd.f32 %v885_v18, %v884_v17  ;;  %v1671_v18 = vld [vmem:[%s2214_s20] ss:$0 sm:$0xff] }
 0x4f6   :  { %v887_v20 = vrot.slane %v886_v19, 2 }
 0x4f8   :  { %v888_v21 = vadd.f32 %v887_v20, %v886_v19 }
 0x4fa   :  { %v889_v22 = vrot.slane %v888_v21, 1 }
 0x4fc   :  { %v890_v23 = vadd.f32 %v889_v22, %v888_v21  ;;  %v1672_v21 = vld [vmem:[%s2215_s22] ss:$0 sm:$0xff] }
 0x4fe   :  { %1810 = vmatmul.mubr.msk.f32.vlgmr.msra.gmra.mxu0 %vm76_vm0, %v890_v23 }
 0x4ff   :  { %1819 = vmatprep.mubr.msk.f32.mxu0 %vm1861_vm1, %v1860_v0 }
 0x5be   :  { %v960_v24 = vpop.f32.mrf.mxu0 }
 0x5bf   :  { %v961_v25 = vadd.f32 1e-05, %v960_v24 }
 0x5c0   :  { %v1811_v26 = vpop.f32.mrf.mxu0 }
 0x5c1   :  { %1856 = vrsqrt.f32 %v961_v25 }
 0x5ce   :  { %v1857_v27 = vpop.eup %1856 }
 0x5cf   :  { %v968_v29 = vrot.slane %v1857_v27, %v2074_v38 }
 0x5d1   :  { %v969_v31 = vmul.f32 %v968_v29, %v882_v15 }
 0x5d3   :  { %v977_v33 = vmul.f32 %v1658_v30, %v969_v31 }
 0x5d5   :  { %v985_v34 = vadd.f32 %v1659_v32, %v977_v33 }
 0x5d7   :  { %1813 = vmatpush3.msk.msra.mxu1 %vm991_vm6, %v985_v34  ;;  %1818 = vmatpush3.msk.msra.mxu0 %vm991_vm6, %v985_v34 }
 0x5d8   :  { %1815 = vmatmul.mubr.msk.f32.vlgmr.msra.gmra.mxu1 %vm987_vm7, %v986_v35  ;;  %1820 = vmatmul.mubr.msk.f32.vlgmr.msra.gmra.mxu0 %vm987_vm7, %v1065_v36 }
 0x5d9   :  { %1822 = vmatprep.subr.mxu1 %v1860_v0  ;;  %1824 = vmatprep.mubr.msk.f32.mxu1 %vm1861_vm1, %v1860_v0 }
 0x5da   :  { %1823 = vmatpush3.msra.mxu1 %v1140_v37  ;;  %1827 = vmatprep.subr.mxu0 %v1860_v0 }
 0x5db   :  { %1829 = vmatprep.mubr.msk.f32.mxu0 %vm1861_vm1, %v1860_v0  ;;  %1832 = vmatprep.subr.mxu1 %v1860_v0 }
 0x5dc   :  { %1825 = vmatmul.mubr.msk.f32.vlgmr.msra.gmra.mxu1 %vm76_vm0, %v985_v34  ;;  %1828 = vmatpush3.msra.mxu0 %v1139_v39 }
 0x5dd   :  { %1834 = vmatprep.mubr.msk.f32.mxu1 %vm1861_vm1, %v1860_v0  ;;  %1833 = vmatpush3.msra.mxu1 %v1286_v40 }
 0x5de   :  { %1837 = vmatprep.subr.mxu0 %v1860_v0  ;;  %1842 = vmatprep.subr.mxu1 %v1860_v0 }
 0x698   :  { %v1061_v41 = vpop.f32.mrf.mxu1  ;;  %v1135_v42 = vpop.f32.mrf.mxu0 }
 0x699   :  { %1830 = vmatmul.mubr.msk.f32.vlgmr.msra.gmra.mxu0 %vm76_vm0, %v1061_v41  ;;  %1835 = vmatmul.mubr.msk.f32.vlgmr.msra.gmra.mxu1 %vm76_vm0, %v1135_v42 }
 0x69a   :  { %v1816_v43 = vpop.f32.mrf.mxu1  ;;  %v1821_v44 = vpop.f32.mrf.mxu0  ;;  %1838 = vmatpush3.msra.mxu0 %v2103_v63  ;;  %1839 = vmatprep.mubr.msk.f32.mxu0 %vm1861_vm1, %v1860_v0 }
 0x69b   :  { %1843 = vmatpush3.msra.mxu1 %v2103_v63  ;;  %1844 = vmatprep.mubr.msk.f32.mxu1 %vm1861_vm1, %v1860_v0 }
 0x69c   :  { %v1209_v45 = vpop.f32.mrf.mxu1  ;;  %1847 = vmatprep.subr.mxu0 %v1860_v0 }
 0x69e   :  { %v1826_v46 = vpop.f32.mrf.mxu1 }
 0x759   :  { %v1282_v47 = vpop.f32.mrf.mxu0  ;;  %v1356_v48 = vpop.f32.mrf.mxu1 }
 0x75a   :  { %v1283_v49 = vadd.f32 %v1282_v47, %v1209_v45 }
 0x75b   :  { %v1831_v51 = vpop.f32.mrf.mxu0  ;;  %v1836_v52 = vpop.f32.mrf.mxu1 }
 0x75c   :  { %v1360_v53 = vadd.f32 %v1356_v48, %v1283_v49 }
 0x75e   :  { %v1368_v54 = vadd.f32 %v1667_v50, %v1360_v53 }
 0x760   :  { %v1369_v55 = vsel %vm797_vm5, %v1368_v54, 0.0 }
 0x761   :  { %v1370_v56 = vrot.slane %v1369_v55, 4 }
 0x763   :  { %v1371_v57 = vadd.f32 %v1370_v56, %v1369_v55 }
 0x765   :  { %v1372_v58 = vrot.slane %v1371_v57, 2 }
 0x767   :  { %v1373_v59 = vadd.f32 %v1372_v58, %v1371_v57 }
 0x769   :  { %v1374_v60 = vrot.slane %v1373_v59, 1 }
 0x76b   :  { %v1375_v61 = vadd.f32 %v1374_v60, %v1373_v59 }
 0x76d   :  { %1840 = vmatmul.mubr.msk.f32.vlgmr.msra.gmra.mxu0 %vm76_vm0, %v1375_v61 }
 0x76e   :  { %1849 = vmatprep.mubr.msk.f32.mxu0 %vm1861_vm1, %v1860_v0  ;;  %v1557_v0 = vld [vmem:[%s2212_s21] sm:$0xff] }
 0x76f   :  { %1848 = vmatpush3.msra.mxu0 %v1557_v0 }
 0x82d   :  { %v1445_v62 = vpop.f32.mrf.mxu0 }
 0x82e   :  { %v1452_v63 = vrot.slane %v1445_v62, %v2074_v38 }
 0x82f   :  { %v1841_v1 = vpop.f32.mrf.mxu0 }
 0x830   :  { %v1453_v2 = vsub.f32 %v1368_v54, %v1452_v63 }
 0x832   :  { %v1454_v3 = vmul.f32 %v1453_v2, %v1453_v2 }
 0x834   :  { %v1455_v4 = vsel %vm797_vm5, %v1454_v3, 0.0 }
 0x835   :  { %v1456_v5 = vrot.slane %v1455_v4, 4 }
 0x837   :  { %v1457_v6 = vadd.f32 %v1456_v5, %v1455_v4 }
 0x839   :  { %v1458_v7 = vrot.slane %v1457_v6, 2 }
 0x83b   :  { %v1459_v8 = vadd.f32 %v1458_v7, %v1457_v6 }
 0x83d   :  { %v1460_v9 = vrot.slane %v1459_v8, 1 }
 0x83f   :  { %v1461_v10 = vadd.f32 %v1460_v9, %v1459_v8 }
 0x841   :  { %1845 = vmatmul.mubr.msk.f32.vlgmr.msra.gmra.mxu1 %vm76_vm0, %v1461_v10 }
 0x901   :  { %v1531_v11 = vpop.f32.mrf.mxu1 }
 0x902   :  { %v1532_v12 = vadd.f32 1e-05, %v1531_v11 }
 0x903   :  { %v1846_v13 = vpop.f32.mrf.mxu1 }
 0x904   :  { %1858 = vrsqrt.f32 %v1532_v12 }
 0x911   :  { %v1859_v14 = vpop.eup %1858 }
 0x912   :  { %v1539_v15 = vrot.slane %v1859_v14, %v2074_v38 }
 0x914   :  { %v1540_v17 = vmul.f32 %v1539_v15, %v1453_v2 }
 0x916   :  { %v1548_v19 = vmul.f32 %v1670_v16, %v1540_v17 }
 0x918   :  { %v1556_v20 = vadd.f32 %v1671_v18, %v1548_v19 }
 0x91a   :  { %1850 = vmatmul.mubr.msk.f32.vlgmr.msra.gmra.mxu0 %vm76_vm0, %v1556_v20 }
 0x9da   :  { %v1634_v22 = vpop.f32.mrf.mxu0 }
 0x9db   :  { %v1635_v23 = vadd.f32 %v1672_v21, %v1634_v22 }
 0x9dc   :  { %v1851_v38 = vpop.f32.mrf.mxu0 }
 0x9dd   :  { %v1638_v24 = vadd.f32 %v1635_v23, %v2067_v28 }
 0x9df   :  { %1639 = vst.msk [vmem:[%s2216_s23] sm:$0xf] %vm524_vm3, %v1638_v24 }

// kernel: wrapped_hourglass_fwd.15
= control target key start
LH: loop header
LB: loop body
LE: loop exit
PB: predicated region body
PF: predicated region fallthrough
CT: control target
= control target key end

     0   :  { %vm67_vm0 = vcmask 261120   ;;  %v1362_v0 = vmov 0.0   ;;  %vm1363_vm1 = vmmov 0   ;;  %v148_v13 = vlaneseq  ;;  %s1656_s3 = inlined_call_operand.vmem [shape: f32[32,32], index: 3, kind: input, shape index: {}]   ;;  %s1657_s0 = inlined_call_operand.vmem [shape: f32[8,32], index: 0, kind: input, shape index: {}]   ;;  %s1658_s4 = inlined_call_operand.vmem [shape: f32[32,16], index: 4, kind: input, shape index: {}]   ;;  %s1659_s1 = inlined_call_operand.vmem [shape: f32[1,32], index: 1, kind: input, shape index: {}]   ;;  %s1660_s2 = inlined_call_operand.vmem [shape: f32[1,32], index: 2, kind: input, shape index: {}]   ;;  %s1661_s8 = inlined_call_operand.vmem [shape: f32[16,16], index: 8, kind: input, shape index: {}]   ;;  %s1662_s5 = inlined_call_operand.vmem [shape: f32[1,16], index: 5, kind: input, shape index: {}]   ;;  %s1663_s6 = inlined_call_operand.vmem [shape: f32[1,16], index: 6, kind: input, shape index: {}]   ;;  %s1664_s7 = inlined_call_operand.vmem [shape: f32[1,16], index: 7, kind: input, shape index: {}]   ;;  %s1665_s9 = inlined_call_operand.vmem [shape: f32[8,8], index: 9, kind: input, shape index: {}]   ;;  %s1666_s12 = inlined_call_operand.vmem [shape: f32[16,16], index: 12, kind: input, shape index: {}]   ;;  %s1667_s10 = inlined_call_operand.vmem [shape: f32[8,8], index: 10, kind: input, shape index: {}]   ;;  %s1668_s11 = inlined_call_operand.vmem [shape: f32[16,16], index: 11, kind: input, shape index: {}]   ;;  %s1669_s13 = inlined_call_operand.vmem [shape: f32[16,16], index: 13, kind: input, shape index: {}]   ;;  %s1670_s14 = inlined_call_operand.vmem [shape: f32[1,16], index: 14, kind: input, shape index: {}]   ;;  %s1671_s17 = inlined_call_operand.vmem [shape: f32[16,32], index: 17, kind: input, shape index: {}]   ;;  %s1672_s15 = inlined_call_operand.vmem [shape: f32[1,16], index: 15, kind: input, shape index: {}]   ;;  %s1673_s16 = inlined_call_operand.vmem [shape: f32[1,16], index: 16, kind: input, shape index: {}]   ;;  %s1674_s18 = inlined_call_operand.vmem [shape: f32[1,32], index: 18, kind: input, shape index: {}]   ;;  %s1675_s19 = inlined_call_operand.vmem [shape: f32[8,32], index: 19, kind: output, shape index: {}]  }
   0x1   :  { %1678 = sst [smem:[#allocation2_spill]] %s1656_s3  ;;  %1255 = vmatprep.subr.mxu0 %v1362_v0  ;;  %1263 = vmatprep.mubr.msk.f32.mxu0 %vm1363_vm1, %v1362_v0  ;;  %v1193_v39 = vld [vmem:[%s1660_s2] ss:$0 sm:$0xff]  ;;  %v1537_v42 = vld [vmem:[%s1661_s8 + $0x8] sm:$0xff]  ;;  %vm342_vm2 = vcmask 130048   ;;  %vm532_vm3 = vcmask 64512  }
   0x2   :  { %1679 = sst [smem:[#allocation3_spill]] %s1657_s0  ;;  %1266 = vmatprep.subr.mxu1 %v1362_v0  ;;  %1274 = vmatprep.mubr.msk.f32.mxu1 %vm1363_vm1, %v1362_v0  ;;  %v149_v14 = vshrl.u32 %v148_v13, 7  ;;  %v1544_v43 = vld [vmem:[%s1661_s8] sm:$0xff] }
   0x3   :  { %1680 = sst [smem:[#allocation4_spill]] %s1658_s4  ;;  %v1194_v44 = vld [vmem:[%s1662_s5] ss:$0 sm:$0xff] }
   0x4   :  { %1681 = sst [smem:[#allocation5_spill]] %s1659_s1  ;;  %v1500_v15 = vsub.s32 0, %v149_v14 }
   0x5   :  { %s1682_s20 = sld [smem:[#allocation2_spill]] }
   0x6   :  { %s1683_s23 = sld [smem:[#allocation3_spill]] }
   0x7   :  { %s1684_s29 = sld [smem:[#allocation4_spill]] }
   0x8   :  { %s1685_s24 = sld [smem:[#allocation5_spill]] }
   0xb   :  { %v66_v1 = vld [vmem:[%s1682_s20 + $0x18] sm:$0xff]  ;;  %v65_v2 = vld [vmem:[%s1682_s20 + $0x10] sm:$0xff]  ;;  %v64_v4 = vld [vmem:[%s1682_s20 + $0x8] sm:$0xff] }
   0xc   :  { %1256 = vmatpush3.msra.mxu0 %v66_v1  ;;  %v1476_v3 = vld [vmem:[%s1683_s23] sm:$0xff]  ;;  %1267 = vmatpush3.msra.mxu1 %v66_v1 }
   0xd   :  { %1257 = vmatprep.subr.mxu0 %v1362_v0  ;;  %v68_v5 = vsel %vm67_vm0, %v1476_v3, 0.0  ;;  %1268 = vmatprep.subr.mxu1 %v1362_v0  ;;  %v63_v7 = vld [vmem:[%s1682_s20] sm:$0xff]  ;;  %v259_v28 = vld [vmem:[%s1684_s29 + $0x18] sm:$0xff]  ;;  %v258_v29 = vld [vmem:[%s1684_s29 + $0x10] sm:$0xff] }
   0xe   :  { %1258 = vmatpush3.msra.mxu0 %v65_v2  ;;  %v69_v6 = vrot.slane %v68_v5, 4  ;;  %1269 = vmatpush3.msra.mxu1 %v65_v2  ;;  %v257_v30 = vld [vmem:[%s1684_s29 + $0x8] sm:$0xff]  ;;  %v256_v31 = vld [vmem:[%s1684_s29] sm:$0xff] }
   0xf   :  { %1259 = vmatprep.subr.mxu0 %v1362_v0  ;;  %1270 = vmatprep.subr.mxu1 %v1362_v0  ;;  %v1192_v37 = vld [vmem:[%s1685_s24] ss:$0 sm:$0xff] }
  0x10   :  { %1260 = vmatpush3.msra.mxu0 %v64_v4  ;;  %v70_v8 = vadd.f32 %v69_v6, %v68_v5  ;;  %1271 = vmatpush3.msra.mxu1 %v64_v4 }
  0x11   :  { %1261 = vmatprep.subr.mxu0 %v1362_v0  ;;  %1272 = vmatprep.subr.mxu1 %v1362_v0 }
  0x12   :  { %1262 = vmatpush3.msra.mxu0 %v63_v7  ;;  %v71_v9 = vrot.slane %v70_v8, 2  ;;  %1273 = vmatpush3.msra.mxu1 %v63_v7 }
  0x13   :  { %1277 = vmatprep.subr.mxu0 %v1362_v0  ;;  %1288 = vmatprep.subr.mxu1 %v1362_v0 }
  0x14   :  { %v72_v10 = vadd.f32 %v71_v9, %v70_v8 }
  0x16   :  { %v73_v11 = vrot.slane %v72_v10, 1 }
  0x18   :  { %v74_v12 = vadd.f32 %v73_v11, %v72_v10  ;;  %v1198_v10 = vld [vmem:[%s1663_s6] ss:$0 sm:$0xff] }
  0x1a   :  { %1264 = vmatmul.mubr.msk.f32.vlgmr.msra.gmra.mxu0 %vm67_vm0, %v74_v12  ;;  %v1199_v12 = vld [vmem:[%s1664_s7] ss:$0 sm:$0xff] }
  0x1b   :  { %1285 = vmatprep.mubr.msk.f32.mxu0 %vm1363_vm1, %v1362_v0  ;;  %1278 = vmatpush3.msra.mxu0 %v259_v28 }
  0x1c   :  { %1279 = vmatprep.subr.mxu0 %v1362_v0 }
  0x1d   :  { %1280 = vmatpush3.msra.mxu0 %v258_v29 }
  0x1e   :  { %1281 = vmatprep.subr.mxu0 %v1362_v0 }
  0x1f   :  { %1282 = vmatpush3.msra.mxu0 %v257_v30 }
  0x20   :  { %1283 = vmatprep.subr.mxu0 %v1362_v0 }
  0x21   :  { %1284 = vmatpush3.msra.mxu0 %v256_v31 }
  0x22   :  { %1302 = vmatprep.subr.mxu0 %v1362_v0 }
  0xda   :  { %v144_v16 = vpop.f32.mrf.mxu0 }
  0xdb   :  { %v151_v17 = vrot.slane %v144_v16, %v1500_v15  ;;  %v531_v16 = vld [vmem:[%s1665_s9] sm:$0xff] }
  0xdc   :  { %v1265_v18 = vpop.f32.mrf.mxu0 }
  0xdd   :  { %v152_v19 = vsub.f32 %v1476_v3, %v151_v17  ;;  %v683_v17 = vld [vmem:[%s1666_s12 + $0x8] sm:$0xff]  ;;  %v606_v18 = vld [vmem:[%s1667_s10] sm:$0xff] }
  0xdf   :  { %v153_v20 = vmul.f32 %v152_v19, %v152_v19 }
  0xe1   :  { %v154_v21 = vsel %vm67_vm0, %v153_v20, 0.0  ;;  %v681_v20 = vld [vmem:[%s1668_s11 + $0x8] sm:$0xff] }
  0xe2   :  { %v155_v22 = vrot.slane %v154_v21, 4 }
  0xe4   :  { %v156_v23 = vadd.f32 %v155_v22, %v154_v21  ;;  %v831_v21 = vld [vmem:[%s1669_s13 + $0x8] sm:$0xff]  ;;  %v680_v22 = vld [vmem:[%s1668_s11] sm:$0xff] }
  0xe6   :  { %v157_v24 = vrot.slane %v156_v23, 2 }
  0xe8   :  { %v158_v25 = vadd.f32 %v157_v24, %v156_v23  ;;  %v830_v23 = vld [vmem:[%s1669_s13] sm:$0xff] }
  0xea   :  { %v159_v26 = vrot.slane %v158_v25, 1 }
  0xec   :  { %v160_v27 = vadd.f32 %v159_v26, %v158_v25 }
  0xee   :  { %1275 = vmatmul.mubr.msk.f32.vlgmr.msra.gmra.mxu1 %vm67_vm0, %v160_v27 }
  0xef   :  { %1292 = vmatprep.mubr.msk.f32.mxu1 %vm1363_vm1, %v1362_v0  ;;  %1289 = vmatpush3.msra.mxu1 %v1537_v42 }
  0xf0   :  { %1290 = vmatprep.subr.mxu1 %v1362_v0 }
  0xf1   :  { %1291 = vmatpush3.msra.mxu1 %v1544_v43 }
  0xf2   :  { %1295 = vmatprep.subr.mxu1 %v1362_v0 }
 0x1ae   :  { %v230_v32 = vpop.f32.mrf.mxu1 }
 0x1af   :  { %v231_v33 = vadd.f32 1e-05, %v230_v32 }
 0x1b0   :  { %v1276_v34 = vpop.f32.mrf.mxu1 }
 0x1b1   :  { %1356 = vrsqrt.f32 %v231_v33  ;;  %v1205_v33 = vld [vmem:[%s1670_s14] ss:$0 sm:$0xff] }
 0x1be   :  { %v1357_v35 = vpop.eup %1356 }
 0x1bf   :  { %v238_v36 = vrot.slane %v1357_v35, %v1500_v15 }
 0x1c1   :  { %v239_v38 = vmul.f32 %v238_v36, %v152_v19  ;;  %v682_v19 = vld [vmem:[%s1666_s12] sm:$0xff] }
 0x1c3   :  { %v247_v40 = vmul.f32 %v1192_v37, %v239_v38 }
 0x1c5   :  { %v255_v41 = vadd.f32 %v1193_v39, %v247_v40 }
 0x1c7   :  { %1286 = vmatmul.mubr.msk.f32.vlgmr.msra.gmra.mxu0 %vm67_vm0, %v255_v41 }
 0x1c8   :  { %1304 = vmatprep.mubr.msk.f32.mxu0 %vm1363_vm1, %v1362_v0 }
 0x287   :  { %v336_v45 = vpop.f32.mrf.mxu0 }
 0x288   :  { %v337_v46 = vadd.f32 %v1194_v44, %v336_v45 }
 0x289   :  { %v1287_v47 = vpop.f32.mrf.mxu0 }
 0x28a   :  { %v343_v48 = vsel %vm342_vm2, %v337_v46, 0.0 }
 0x28b   :  { %v344_v49 = vrot.slane %v343_v48, 4 }
 0x28d   :  { %v345_v50 = vadd.f32 %v344_v49, %v343_v48 }
 0x28f   :  { %v346_v51 = vrot.slane %v345_v50, 2 }
 0x291   :  { %v347_v52 = vadd.f32 %v346_v51, %v345_v50 }
 0x293   :  { %v348_v53 = vrot.slane %v347_v52, 1 }
 0x295   :  { %v349_v54 = vadd.f32 %v348_v53, %v347_v52 }
 0x297   :  { %1293 = vmatmul.mubr.msk.f32.vlgmr.msra.gmra.mxu1 %vm342_vm2, %v349_v54 }
 0x298   :  { %1296 = vmatpush3.msra.mxu1 %v1537_v42  ;;  %1299 = vmatprep.mubr.msk.f32.mxu1 %vm1363_vm1, %v1362_v0 }
 0x299   :  { %1297 = vmatprep.subr.mxu1 %v1362_v0 }
 0x29a   :  { %1298 = vmatpush3.msra.mxu1 %v1544_v43 }
 0x29b   :  { %1307 = vmatprep.subr.mxu1 %v1362_v0 }
 0x357   :  { %v419_v55 = vpop.f32.mrf.mxu1 }
 0x358   :  { %v426_v56 = vrot.slane %v419_v55, %v1500_v15 }
 0x359   :  { %v1294_v57 = vpop.f32.mrf.mxu1 }
 0x35a   :  { %v427_v58 = vsub.f32 %v337_v46, %v426_v56  ;;  %v1103_v57 = vld [vmem:[%s1671_s17 + $0x8] sm:$0xff] }
 0x35c   :  { %v428_v59 = vmul.f32 %v427_v58, %v427_v58 }
 0x35e   :  { %v429_v60 = vsel %vm342_vm2, %v428_v59, 0.0 }
 0x35f   :  { %v430_v61 = vrot.slane %v429_v60, 4 }
 0x361   :  { %v431_v62 = vadd.f32 %v430_v61, %v429_v60 }
 0x363   :  { %v432_v63 = vrot.slane %v431_v62, 2 }
 0x365   :  { %v433_v1 = vadd.f32 %v432_v63, %v431_v62 }
 0x367   :  { %v434_v2 = vrot.slane %v433_v1, 1 }
 0x369   :  { %v435_v4 = vadd.f32 %v434_v2, %v433_v1  ;;  %v1208_v1 = vld [vmem:[%s1672_s15] ss:$0 sm:$0xff] }
 0x36b   :  { %1300 = vmatmul.mubr.msk.f32.vlgmr.msra.gmra.mxu1 %vm342_vm2, %v435_v4  ;;  %v1209_v4 = vld [vmem:[%s1673_s16] ss:$0 sm:$0xff] }
 0x36c   :  { %1309 = vmatprep.mubr.msk.f32.mxu1 %vm1363_vm1, %v1362_v0 }
 0x42b   :  { %v505_v5 = vpop.f32.mrf.mxu1 }
 0x42c   :  { %v506_v6 = vadd.f32 1e-05, %v505_v5 }
 0x42d   :  { %v1301_v7 = vpop.f32.mrf.mxu1 }
 0x42e   :  { %1358 = vrsqrt.f32 %v506_v6 }
 0x43b   :  { %v1359_v8 = vpop.eup %1358 }
 0x43c   :  { %v513_v9 = vrot.slane %v1359_v8, %v1500_v15 }
 0x43e   :  { %v514_v11 = vmul.f32 %v513_v9, %v427_v58  ;;  %v1102_v58 = vld [vmem:[%s1671_s17] sm:$0xff] }
 0x440   :  { %v522_v13 = vmul.f32 %v1198_v10, %v514_v11 }
 0x442   :  { %v530_v14 = vadd.f32 %v1199_v12, %v522_v13 }
 0x444   :  { %1303 = vmatpush3.msra.mxu0 %v530_v14  ;;  %1308 = vmatpush3.msra.mxu1 %v530_v14 }
 0x445   :  { %1305 = vmatmul.mubr.msk.f32.vlgmr.msra.gmra.mxu0 %vm532_vm3, %v531_v16  ;;  %1312 = vmatprep.subr.mxu0 %v1362_v0 }
 0x446   :  { %1313 = vmatpush3.msra.mxu0 %v683_v17  ;;  %1310 = vmatmul.mubr.msk.f32.vlgmr.msra.gmra.mxu1 %vm532_vm3, %v606_v18 }
 0x447   :  { %1314 = vmatprep.subr.mxu0 %v1362_v0  ;;  %1316 = vmatprep.mubr.msk.f32.mxu0 %vm1363_vm1, %v1362_v0 }
 0x448   :  { %1315 = vmatpush3.msra.mxu0 %v682_v19  ;;  %1319 = vmatprep.subr.mxu1 %v1362_v0 }
 0x449   :  { %1317 = vmatmul.mubr.msk.f32.vlgmr.msra.gmra.mxu0 %vm342_vm2, %v530_v14  ;;  %1320 = vmatpush3.msra.mxu1 %v681_v20 }
 0x44a   :  { %1321 = vmatprep.subr.mxu1 %v1362_v0  ;;  %1326 = vmatprep.subr.mxu0 %v1362_v0 }
 0x44b   :  { %1323 = vmatprep.mubr.msk.f32.mxu1 %vm1363_vm1, %v1362_v0  ;;  %1330 = vmatprep.mubr.msk.f32.mxu0 %vm1363_vm1, %v1362_v0 }
 0x44c   :  { %1327 = vmatpush3.msra.mxu0 %v831_v21  ;;  %1322 = vmatpush3.msra.mxu1 %v680_v22 }
 0x44d   :  { %1328 = vmatprep.subr.mxu0 %v1362_v0  ;;  %1333 = vmatprep.subr.mxu1 %v1362_v0 }
 0x44e   :  { %1329 = vmatpush3.msra.mxu0 %v830_v23 }
 0x44f   :  { %1340 = vmatprep.subr.mxu0 %v1362_v0 }
 0x505   :  { %v602_v24 = vpop.f32.mrf.mxu0 }
 0x506   :  { %1324 = vmatmul.mubr.msk.f32.vlgmr.msra.gmra.mxu1 %vm342_vm2, %v602_v24  ;;  %v676_v25 = vpop.f32.mrf.mxu1 }
 0x507   :  { %v1306_v26 = vpop.f32.mrf.mxu0  ;;  %1331 = vmatmul.mubr.msk.f32.vlgmr.msra.gmra.mxu0 %vm342_vm2, %v676_v25  ;;  %1334 = vmatpush3.msra.mxu1 %v1537_v42 }
 0x508   :  { %v1311_v27 = vpop.f32.mrf.mxu1  ;;  %1335 = vmatprep.subr.mxu1 %v1362_v0  ;;  %1337 = vmatprep.mubr.msk.f32.mxu1 %vm1363_vm1, %v1362_v0 }
 0x509   :  { %v753_v28 = vpop.f32.mrf.mxu0  ;;  %1336 = vmatpush3.msra.mxu1 %v1544_v43  ;;  %1341 = vmatpush3.msra.mxu0 %v1537_v42 }
 0x50a   :  { %1342 = vmatprep.subr.mxu0 %v1362_v0  ;;  %1344 = vmatprep.mubr.msk.f32.mxu0 %vm1363_vm1, %v1362_v0 }
 0x50b   :  { %v1318_v29 = vpop.f32.mrf.mxu0  ;;  %1343 = vmatpush3.msra.mxu0 %v1544_v43  ;;  %1347 = vmatprep.subr.mxu1 %v1362_v0 }
 0x5c6   :  { %v826_v30 = vpop.f32.mrf.mxu1 }
 0x5c7   :  { %v827_v31 = vadd.f32 %v826_v30, %v753_v28  ;;  %v901_v32 = vpop.f32.mrf.mxu0 }
 0x5c8   :  { %v1325_v34 = vpop.f32.mrf.mxu1 }
 0x5c9   :  { %v905_v35 = vadd.f32 %v901_v32, %v827_v31  ;;  %v1332_v36 = vpop.f32.mrf.mxu0 }
 0x5cb   :  { %v913_v37 = vadd.f32 %v1205_v33, %v905_v35 }
 0x5cd   :  { %v914_v38 = vsel %vm342_vm2, %v913_v37, 0.0 }
 0x5ce   :  { %v915_v39 = vrot.slane %v914_v38, 4 }
 0x5d0   :  { %v916_v40 = vadd.f32 %v915_v39, %v914_v38 }
 0x5d2   :  { %v917_v41 = vrot.slane %v916_v40, 2 }
 0x5d4   :  { %v918_v42 = vadd.f32 %v917_v41, %v916_v40 }
 0x5d6   :  { %v919_v43 = vrot.slane %v918_v42, 1 }
 0x5d8   :  { %v920_v44 = vadd.f32 %v919_v43, %v918_v42 }
 0x5da   :  { %1338 = vmatmul.mubr.msk.f32.vlgmr.msra.gmra.mxu1 %vm342_vm2, %v920_v44 }
 0x5db   :  { %1351 = vmatprep.mubr.msk.f32.mxu1 %vm1363_vm1, %v1362_v0  ;;  %1348 = vmatpush3.msra.mxu1 %v1103_v57 }
 0x5dc   :  { %1349 = vmatprep.subr.mxu1 %v1362_v0  ;;  %v1210_v0 = vld [vmem:[%s1674_s18] ss:$0 sm:$0xff] }
 0x5dd   :  { %1350 = vmatpush3.msra.mxu1 %v1102_v58 }
 0x69a   :  { %v990_v45 = vpop.f32.mrf.mxu1 }
 0x69b   :  { %v997_v46 = vrot.slane %v990_v45, %v1500_v15 }
 0x69c   :  { %v1339_v47 = vpop.f32.mrf.mxu1 }
 0x69d   :  { %v998_v48 = vsub.f32 %v913_v37, %v997_v46 }
 0x69f   :  { %v999_v49 = vmul.f32 %v998_v48, %v998_v48 }
 0x6a1   :  { %v1000_v50 = vsel %vm342_vm2, %v999_v49, 0.0 }
 0x6a2   :  { %v1001_v51 = vrot.slane %v1000_v50, 4 }
 0x6a4   :  { %v1002_v52 = vadd.f32 %v1001_v51, %v1000_v50 }
 0x6a6   :  { %v1003_v53 = vrot.slane %v1002_v52, 2 }
 0x6a8   :  { %v1004_v54 = vadd.f32 %v1003_v53, %v1002_v52 }
 0x6aa   :  { %v1005_v55 = vrot.slane %v1004_v54, 1 }
 0x6ac   :  { %v1006_v56 = vadd.f32 %v1005_v55, %v1004_v54 }
 0x6ae   :  { %1345 = vmatmul.mubr.msk.f32.vlgmr.msra.gmra.mxu0 %vm342_vm2, %v1006_v56 }
 0x76e   :  { %v1076_v59 = vpop.f32.mrf.mxu0 }
 0x76f   :  { %v1077_v60 = vadd.f32 1e-05, %v1076_v59 }
 0x770   :  { %v1346_v61 = vpop.f32.mrf.mxu0 }
 0x771   :  { %1360 = vrsqrt.f32 %v1077_v60 }
 0x77e   :  { %v1361_v62 = vpop.eup %1360 }
 0x77f   :  { %v1084_v63 = vrot.slane %v1361_v62, %v1500_v15 }
 0x781   :  { %v1085_v2 = vmul.f32 %v1084_v63, %v998_v48 }
 0x783   :  { %v1093_v5 = vmul.f32 %v1208_v1, %v1085_v2 }
 0x785   :  { %v1101_v6 = vadd.f32 %v1209_v4, %v1093_v5 }
 0x787   :  { %1352 = vmatmul.mubr.msk.f32.vlgmr.msra.gmra.mxu1 %vm342_vm2, %v1101_v6 }
 0x847   :  { %v1180_v7 = vpop.f32.mrf.mxu1 }
 0x848   :  { %v1181_v8 = vadd.f32 %v1210_v0, %v1180_v7 }
 0x849   :  { %v1353_v15 = vpop.f32.mrf.mxu1 }
 0x84a   :  { %v1184_v9 = vadd.f32 %v1181_v8, %v1476_v3 }
 0x84c   :  { %1185 = vst.msk [vmem:[%s1675_s19] sm:$0xff] %vm67_vm0, %v1184_v9 }

// kernel: wrapped_hourglass_fwd.17
= control target key start
LH: loop header
LB: loop body
LE: loop exit
PB: predicated region body
PF: predicated region fallthrough
CT: control target
= control target key end

     0   :  { %vm65_vm0 = vcmask 125952   ;;  %v1318_v0 = vmov 0.0   ;;  %vm1319_vm1 = vmmov 0   ;;  %vm73_vm2 = vcmask 130048   ;;  %s1565_s3 = inlined_call_operand.vmem [shape: f32[16,16], index: 3, kind: input, shape index: {}]   ;;  %s1566_s0 = inlined_call_operand.vmem [shape: f32[4,16], index: 0, kind: input, shape index: {}]   ;;  %s1567_s4 = inlined_call_operand.vmem [shape: f32[16,8], index: 4, kind: input, shape index: {}]   ;;  %s1568_s1 = inlined_call_operand.vmem [shape: f32[1,16], index: 1, kind: input, shape index: {}]   ;;  %s1569_s2 = inlined_call_operand.vmem [shape: f32[1,16], index: 2, kind: input, shape index: {}]   ;;  %s1570_s8 = inlined_call_operand.vmem [shape: f32[8,8], index: 8, kind: input, shape index: {}]   ;;  %s1571_s5 = inlined_call_operand.vmem [shape: f32[1,8], index: 5, kind: input, shape index: {}]   ;;  %s1572_s6 = inlined_call_operand.vmem [shape: f32[1,8], index: 6, kind: input, shape index: {}]   ;;  %s1573_s7 = inlined_call_operand.vmem [shape: f32[1,8], index: 7, kind: input, shape index: {}]   ;;  %s1574_s9 = inlined_call_operand.vmem [shape: f32[4,4], index: 9, kind: input, shape index: {}]   ;;  %s1575_s10 = inlined_call_operand.vmem [shape: f32[4,4], index: 10, kind: input, shape index: {}]   ;;  %s1576_s12 = inlined_call_operand.vmem [shape: f32[8,8], index: 12, kind: input, shape index: {}]   ;;  %s1577_s11 = inlined_call_operand.vmem [shape: f32[8,8], index: 11, kind: input, shape index: {}]   ;;  %s1578_s13 = inlined_call_operand.vmem [shape: f32[8,8], index: 13, kind: input, shape index: {}]   ;;  %s1579_s14 = inlined_call_operand.vmem [shape: f32[1,8], index: 14, kind: input, shape index: {}]   ;;  %s1580_s17 = inlined_call_operand.vmem [shape: f32[8,16], index: 17, kind: input, shape index: {}]   ;;  %s1581_s15 = inlined_call_operand.vmem [shape: f32[1,8], index: 15, kind: input, shape index: {}]   ;;  %s1582_s16 = inlined_call_operand.vmem [shape: f32[1,8], index: 16, kind: input, shape index: {}]   ;;  %s1583_s18 = inlined_call_operand.vmem [shape: f32[1,16], index: 18, kind: input, shape index: {}]   ;;  %s1584_s19 = inlined_call_operand.vmem [shape: f32[4,16], index: 19, kind: output, shape index: {}]  }
   0x1   :  { %1587 = sst [smem:[#allocation2_spill]] %s1565_s3  ;;  %1239 = vmatprep.subr.mxu0 %v1318_v0  ;;  %1243 = vmatprep.mubr.msk.f32.mxu0 %vm1319_vm1, %v1318_v0  ;;  %v147_v11 = vlaneseq  ;;  %v1189_v35 = vld [vmem:[%s1569_s2] ss:$0 sm:$0xff]  ;;  %vm338_vm3 = vcmask 60416   ;;  %vm346_vm4 = vcmask 64512   ;;  %vm533_vm5 = vcmask 1043456  }
   0x2   :  { %1588 = sst [smem:[#allocation3_spill]] %s1566_s0  ;;  %1246 = vmatprep.subr.mxu1 %v1318_v0  ;;  %1250 = vmatprep.mubr.msk.f32.mxu1 %vm1319_vm1, %v1318_v0  ;;  %v1475_v38 = vld [vmem:[%s1570_s8] sm:$0xff]  ;;  %vm529_vm6 = vcmask 31744  }
   0x3   :  { %1589 = sst [smem:[#allocation4_spill]] %s1567_s4  ;;  %v148_v12 = vshrl.u32 %v147_v11, 7  ;;  %v1190_v39 = vld [vmem:[%s1571_s5] ss:$0 sm:$0xff] }
   0x4   :  { %1590 = sst [smem:[#allocation5_spill]] %s1568_s1  ;;  %v607_v11 = vld [vmem:[%s1575_s10] sm:$0xf] }
   0x5   :  { %s1591_s20 = sld [smem:[#allocation2_spill]]  ;;  %v1446_v13 = vsub.s32 0, %v148_v12  ;;  %v682_v12 = vld [vmem:[%s1576_s12] sm:$0xff] }
   0x6   :  { %s1592_s23 = sld [smem:[#allocation3_spill]] }
   0x7   :  { %s1593_s1 = sld [smem:[#allocation4_spill]] }
   0x8   :  { %s1594_s3 = sld [smem:[#allocation5_spill]] }
   0xb   :  { %v64_v1 = vld [vmem:[%s1591_s20 + $0x8] sm:$0xff]  ;;  %v63_v2 = vld [vmem:[%s1591_s20] sm:$0xff] }
   0xc   :  { %v1432_v3 = vld [vmem:[%s1592_s23] sm:$0xf]  ;;  %1240 = vmatpush3.msra.mxu0 %v64_v1  ;;  %1247 = vmatpush3.msra.mxu1 %v64_v1 }
   0xd   :  { %v66_v4 = vsel %vm65_vm0, %v1432_v3, 0.0  ;;  %1241 = vmatprep.subr.mxu0 %v1318_v0  ;;  %1248 = vmatprep.subr.mxu1 %v1318_v0  ;;  %v256_v26 = vld [vmem:[%s1593_s1 + $0x8] sm:$0xff]  ;;  %v255_v27 = vld [vmem:[%s1593_s1] sm:$0xff] }
   0xe   :  { %v67_v5 = vrot.slane %v66_v4, 4  ;;  %1242 = vmatpush3.msra.mxu0 %v63_v2  ;;  %1249 = vmatpush3.msra.mxu1 %v63_v2  ;;  %v1188_v33 = vld [vmem:[%s1594_s3] ss:$0 sm:$0xff] }
   0xf   :  { %1253 = vmatprep.subr.mxu0 %v1318_v0  ;;  %1260 = vmatprep.subr.mxu1 %v1318_v0 }
  0x10   :  { %v68_v6 = vadd.f32 %v67_v5, %v66_v4  ;;  %v1194_v5 = vld [vmem:[%s1572_s6] ss:$0 sm:$0xff] }
  0x12   :  { %v69_v7 = vrot.slane %v68_v6, 2 }
  0x14   :  { %v70_v8 = vadd.f32 %v69_v7, %v68_v6  ;;  %v1195_v7 = vld [vmem:[%s1573_s7] ss:$0 sm:$0xff] }
  0x16   :  { %v71_v9 = vrot.slane %v70_v8, 1 }
  0x18   :  { %v72_v10 = vadd.f32 %v71_v9, %v70_v8 }
  0x1a   :  { %1244 = vmatmul.mubr.msk.f32.vlgmr.msra.gmra.mxu0 %vm73_vm2, %v72_v10  ;;  %v528_v10 = vld [vmem:[%s1574_s9] sm:$0xf] }
  0x1b   :  { %1257 = vmatprep.mubr.msk.f32.mxu0 %vm1319_vm1, %v1318_v0  ;;  %1254 = vmatpush3.msra.mxu0 %v256_v26 }
  0x1c   :  { %1255 = vmatprep.subr.mxu0 %v1318_v0 }
  0x1d   :  { %1256 = vmatpush3.msra.mxu0 %v255_v27 }
  0x1e   :  { %1265 = vmatprep.subr.mxu0 %v1318_v0 }
  0xda   :  { %v143_v14 = vpop.f32.mrf.mxu0 }
  0xdb   :  { %v150_v15 = vrot.slane %v143_v14, %v1446_v13  ;;  %v681_v14 = vld [vmem:[%s1577_s11] sm:$0xff] }
  0xdc   :  { %v1245_v16 = vpop.f32.mrf.mxu0 }
  0xdd   :  { %v151_v17 = vsub.f32 %v1432_v3, %v150_v15  ;;  %v828_v15 = vld [vmem:[%s1578_s13] sm:$0xff] }
  0xdf   :  { %v152_v18 = vmul.f32 %v151_v17, %v151_v17 }
  0xe1   :  { %v153_v19 = vsel %vm65_vm0, %v152_v18, 0.0 }
  0xe2   :  { %v154_v20 = vrot.slane %v153_v19, 4 }
  0xe4   :  { %v155_v21 = vadd.f32 %v154_v20, %v153_v19 }
  0xe6   :  { %v156_v22 = vrot.slane %v155_v21, 2 }
  0xe8   :  { %v157_v23 = vadd.f32 %v156_v22, %v155_v21 }
  0xea   :  { %v158_v24 = vrot.slane %v157_v23, 1 }
  0xec   :  { %v159_v25 = vadd.f32 %v158_v24, %v157_v23 }
  0xee   :  { %1251 = vmatmul.mubr.msk.f32.vlgmr.msra.gmra.mxu1 %vm73_vm2, %v159_v25  ;;  %v1203_v25 = vld [vmem:[%s1579_s14] ss:$0 sm:$0xff] }
  0xef   :  { %1262 = vmatprep.mubr.msk.f32.mxu1 %vm1319_vm1, %v1318_v0  ;;  %1261 = vmatpush3.msra.mxu1 %v1475_v38 }
  0xf0   :  { %1270 = vmatprep.subr.mxu1 %v1318_v0 }
 0x1ae   :  { %v229_v28 = vpop.f32.mrf.mxu1 }
 0x1af   :  { %v230_v29 = vadd.f32 1e-05, %v229_v28 }
 0x1b0   :  { %v1252_v30 = vpop.f32.mrf.mxu1 }
 0x1b1   :  { %1312 = vrsqrt.f32 %v230_v29 }
 0x1be   :  { %v1313_v31 = vpop.eup %1312 }
 0x1bf   :  { %v237_v32 = vrot.slane %v1313_v31, %v1446_v13 }
 0x1c1   :  { %v238_v34 = vmul.f32 %v237_v32, %v151_v17 }
 0x1c3   :  { %v246_v36 = vmul.f32 %v1188_v33, %v238_v34 }
 0x1c5   :  { %v254_v37 = vadd.f32 %v1189_v35, %v246_v36 }
 0x1c7   :  { %1258 = vmatmul.mubr.msk.f32.vlgmr.msra.gmra.mxu0 %vm73_vm2, %v254_v37 }
 0x1c8   :  { %1267 = vmatprep.mubr.msk.f32.mxu0 %vm1319_vm1, %v1318_v0  ;;  %1266 = vmatpush3.msra.mxu0 %v1475_v38 }
 0x1c9   :  { %1275 = vmatprep.subr.mxu0 %v1318_v0 }
 0x287   :  { %v333_v40 = vpop.f32.mrf.mxu0 }
 0x288   :  { %v334_v41 = vadd.f32 %v1190_v39, %v333_v40 }
 0x289   :  { %v1259_v42 = vpop.f32.mrf.mxu0 }
 0x28a   :  { %v339_v43 = vsel %vm338_vm3, %v334_v41, 0.0 }
 0x28b   :  { %v340_v44 = vrot.slane %v339_v43, 4 }
 0x28d   :  { %v341_v45 = vadd.f32 %v340_v44, %v339_v43 }
 0x28f   :  { %v342_v46 = vrot.slane %v341_v45, 2 }
 0x291   :  { %v343_v47 = vadd.f32 %v342_v46, %v341_v45 }
 0x293   :  { %v344_v48 = vrot.slane %v343_v47, 1 }
 0x295   :  { %v345_v49 = vadd.f32 %v344_v48, %v343_v47 }
 0x297   :  { %1263 = vmatmul.mubr.msk.f32.vlgmr.msra.gmra.mxu1 %vm346_vm4, %v345_v49 }
 0x298   :  { %1272 = vmatprep.mubr.msk.f32.mxu1 %vm1319_vm1, %v1318_v0 }
 0x357   :  { %v416_v50 = vpop.f32.mrf.mxu1 }
 0x358   :  { %v423_v51 = vrot.slane %v416_v50, %v1446_v13 }
 0x359   :  { %v1264_v52 = vpop.f32.mrf.mxu1 }
 0x35a   :  { %v424_v53 = vsub.f32 %v334_v41, %v423_v51 }
 0x35c   :  { %v425_v54 = vmul.f32 %v424_v53, %v424_v53 }
 0x35e   :  { %v426_v55 = vsel %vm338_vm3, %v425_v54, 0.0  ;;  %v1206_v54 = vld [vmem:[%s1581_s15] ss:$0 sm:$0xff] }
 0x35f   :  { %v427_v56 = vrot.slane %v426_v55, 4 }
 0x361   :  { %v428_v57 = vadd.f32 %v427_v56, %v426_v55  ;;  %v1207_v56 = vld [vmem:[%s1582_s16] ss:$0 sm:$0xff] }
 0x363   :  { %v429_v58 = vrot.slane %v428_v57, 2 }
 0x365   :  { %v430_v59 = vadd.f32 %v429_v58, %v428_v57 }
 0x367   :  { %v431_v60 = vrot.slane %v430_v59, 1 }
 0x369   :  { %v432_v61 = vadd.f32 %v431_v60, %v430_v59  ;;  %v1208_v59 = vld [vmem:[%s1583_s18] ss:$0 sm:$0xff] }
 0x36b   :  { %1268 = vmatmul.mubr.msk.f32.vlgmr.msra.gmra.mxu0 %vm346_vm4, %v432_v61 }
 0x36c   :  { %1277 = vmatprep.mubr.msk.f32.mxu0 %vm1319_vm1, %v1318_v0 }
 0x42b   :  { %v502_v62 = vpop.f32.mrf.mxu0 }
 0x42c   :  { %v503_v63 = vadd.f32 1e-05, %v502_v62 }
 0x42d   :  { %v1269_v1 = vpop.f32.mrf.mxu0 }
 0x42e   :  { %1314 = vrsqrt.f32 %v503_v63 }
 0x43b   :  { %v1315_v2 = vpop.eup %1314 }
 0x43c   :  { %v510_v4 = vrot.slane %v1315_v2, %v1446_v13 }
 0x43e   :  { %v511_v6 = vmul.f32 %v510_v4, %v424_v53 }
 0x440   :  { %v519_v8 = vmul.f32 %v1194_v5, %v511_v6 }
 0x442   :  { %v527_v9 = vadd.f32 %v1195_v7, %v519_v8 }
 0x444   :  { %1271 = vmatpush3.msk.msra.mxu1 %vm533_vm5, %v527_v9  ;;  %1276 = vmatpush3.msk.msra.mxu0 %vm533_vm5, %v527_v9 }
 0x445   :  { %1273 = vmatmul.mubr.msk.f32.vlgmr.msra.gmra.mxu1 %vm529_vm6, %v528_v10  ;;  %1278 = vmatmul.mubr.msk.f32.vlgmr.msra.gmra.mxu0 %vm529_vm6, %v607_v11 }
 0x446   :  { %1280 = vmatprep.subr.mxu1 %v1318_v0  ;;  %1282 = vmatprep.mubr.msk.f32.mxu1 %vm1319_vm1, %v1318_v0 }
 0x447   :  { %1281 = vmatpush3.msra.mxu1 %v682_v12  ;;  %1285 = vmatprep.subr.mxu0 %v1318_v0 }
 0x448   :  { %1287 = vmatprep.mubr.msk.f32.mxu0 %vm1319_vm1, %v1318_v0  ;;  %1290 = vmatprep.subr.mxu1 %v1318_v0 }
 0x449   :  { %1283 = vmatmul.mubr.msk.f32.vlgmr.msra.gmra.mxu1 %vm346_vm4, %v527_v9  ;;  %1286 = vmatpush3.msra.mxu0 %v681_v14 }
 0x44a   :  { %1292 = vmatprep.mubr.msk.f32.mxu1 %vm1319_vm1, %v1318_v0  ;;  %1291 = vmatpush3.msra.mxu1 %v828_v15 }
 0x44b   :  { %1295 = vmatprep.subr.mxu0 %v1318_v0  ;;  %1300 = vmatprep.subr.mxu1 %v1318_v0 }
 0x505   :  { %v603_v16 = vpop.f32.mrf.mxu1  ;;  %v677_v17 = vpop.f32.mrf.mxu0 }
 0x506   :  { %1288 = vmatmul.mubr.msk.f32.vlgmr.msra.gmra.mxu0 %vm346_vm4, %v603_v16  ;;  %1293 = vmatmul.mubr.msk.f32.vlgmr.msra.gmra.mxu1 %vm346_vm4, %v677_v17 }
 0x507   :  { %v1274_v18 = vpop.f32.mrf.mxu1  ;;  %v1279_v19 = vpop.f32.mrf.mxu0  ;;  %1296 = vmatpush3.msra.mxu0 %v1475_v38  ;;  %1297 = vmatprep.mubr.msk.f32.mxu0 %vm1319_vm1, %v1318_v0 }
 0x508   :  { %1301 = vmatpush3.msra.mxu1 %v1475_v38  ;;  %1302 = vmatprep.mubr.msk.f32.mxu1 %vm1319_vm1, %v1318_v0 }
 0x509   :  { %v751_v20 = vpop.f32.mrf.mxu1  ;;  %1305 = vmatprep.subr.mxu0 %v1318_v0 }
 0x50b   :  { %v1284_v21 = vpop.f32.mrf.mxu1 }
 0x5c6   :  { %v824_v22 = vpop.f32.mrf.mxu0  ;;  %v898_v23 = vpop.f32.mrf.mxu1 }
 0x5c7   :  { %v825_v24 = vadd.f32 %v824_v22, %v751_v20 }
 0x5c8   :  { %v1289_v26 = vpop.f32.mrf.mxu0  ;;  %v1294_v27 = vpop.f32.mrf.mxu1 }
 0x5c9   :  { %v902_v28 = vadd.f32 %v898_v23, %v825_v24 }
 0x5cb   :  { %v910_v29 = vadd.f32 %v1203_v25, %v902_v28 }
 0x5cd   :  { %v911_v30 = vsel %vm338_vm3, %v910_v29, 0.0 }
 0x5ce   :  { %v912_v31 = vrot.slane %v911_v30, 4 }
 0x5d0   :  { %v913_v32 = vadd.f32 %v912_v31, %v911_v30 }
 0x5d2   :  { %v914_v33 = vrot.slane %v913_v32, 2 }
 0x5d4   :  { %v915_v34 = vadd.f32 %v914_v33, %v913_v32 }
 0x5d6   :  { %v916_v35 = vrot.slane %v915_v34, 1 }
 0x5d8   :  { %v917_v36 = vadd.f32 %v916_v35, %v915_v34 }
 0x5da   :  { %1298 = vmatmul.mubr.msk.f32.vlgmr.msra.gmra.mxu0 %vm346_vm4, %v917_v36 }
 0x5db   :  { %1307 = vmatprep.mubr.msk.f32.mxu0 %vm1319_vm1, %v1318_v0  ;;  %v1099_v0 = vld [vmem:[%s1580_s17] sm:$0xff] }
 0x5dc   :  { %1306 = vmatpush3.msra.mxu0 %v1099_v0 }
 0x69a   :  { %v987_v37 = vpop.f32.mrf.mxu0 }
 0x69b   :  { %v994_v38 = vrot.slane %v987_v37, %v1446_v13 }
 0x69c   :  { %v1299_v39 = vpop.f32.mrf.mxu0 }
 0x69d   :  { %v995_v40 = vsub.f32 %v910_v29, %v994_v38 }
 0x69f   :  { %v996_v41 = vmul.f32 %v995_v40, %v995_v40 }
 0x6a1   :  { %v997_v42 = vsel %vm338_vm3, %v996_v41, 0.0 }
 0x6a2   :  { %v998_v43 = vrot.slane %v997_v42, 4 }
 0x6a4   :  { %v999_v44 = vadd.f32 %v998_v43, %v997_v42 }
 0x6a6   :  { %v1000_v45 = vrot.slane %v999_v44, 2 }
 0x6a8   :  { %v1001_v46 = vadd.f32 %v1000_v45, %v999_v44 }
 0x6aa   :  { %v1002_v47 = vrot.slane %v1001_v46, 1 }
 0x6ac   :  { %v1003_v48 = vadd.f32 %v1002_v47, %v1001_v46 }
 0x6ae   :  { %1303 = vmatmul.mubr.msk.f32.vlgmr.msra.gmra.mxu1 %vm346_vm4, %v1003_v48 }
 0x76e   :  { %v1073_v49 = vpop.f32.mrf.mxu1 }
 0x76f   :  { %v1074_v50 = vadd.f32 1e-05, %v1073_v49 }
 0x770   :  { %v1304_v51 = vpop.f32.mrf.mxu1 }
 0x771   :  { %1316 = vrsqrt.f32 %v1074_v50 }
 0x77e   :  { %v1317_v52 = vpop.eup %1316 }
 0x77f   :  { %v1081_v53 = vrot.slane %v1317_v52, %v1446_v13 }
 0x781   :  { %v1082_v55 = vmul.f32 %v1081_v53, %v995_v40 }
 0x783   :  { %v1090_v57 = vmul.f32 %v1206_v54, %v1082_v55 }
 0x785   :  { %v1098_v58 = vadd.f32 %v1207_v56, %v1090_v57 }
 0x787   :  { %1308 = vmatmul.mubr.msk.f32.vlgmr.msra.gmra.mxu0 %vm346_vm4, %v1098_v58 }
 0x847   :  { %v1176_v60 = vpop.f32.mrf.mxu0 }
 0x848   :  { %v1177_v61 = vadd.f32 %v1208_v59, %v1176_v60 }
 0x849   :  { %v1309_v13 = vpop.f32.mrf.mxu0 }
 0x84a   :  { %v1180_v62 = vadd.f32 %v1177_v61, %v1432_v3 }
 0x84c   :  { %1181 = vst.msk [vmem:[%s1584_s19] sm:$0xf] %vm65_vm0, %v1180_v62 }

// kernel: wrapped_hourglass_fwd.18
= control target key start
LH: loop header
LB: loop body
LE: loop exit
PB: predicated region body
PF: predicated region fallthrough
CT: control target
= control target key end

     0   :  { %vm74_vm0 = vcmask 125952   ;;  %v1502_v0 = vmov 0.0   ;;  %vm1503_vm1 = vmmov 0   ;;  %vm82_vm2 = vcmask 130048   ;;  %s1789_s3 = inlined_call_operand.vmem [shape: f32[16,16], index: 3, kind: input, shape index: {}]   ;;  %s1790_s0 = inlined_call_operand.vmem [shape: f32[4,16], index: 0, kind: input, shape index: {}]   ;;  %s1791_s4 = inlined_call_operand.vmem [shape: f32[16,8], index: 4, kind: input, shape index: {}]   ;;  %s1792_s1 = inlined_call_operand.vmem [shape: f32[1,16], index: 1, kind: input, shape index: {}]   ;;  %s1793_s2 = inlined_call_operand.vmem [shape: f32[1,16], index: 2, kind: input, shape index: {}]   ;;  %s1794_s8 = inlined_call_operand.vmem [shape: f32[8,8], index: 8, kind: input, shape index: {}]   ;;  %s1795_s5 = inlined_call_operand.vmem [shape: f32[1,8], index: 5, kind: input, shape index: {}]   ;;  %s1796_s6 = inlined_call_operand.vmem [shape: f32[1,8], index: 6, kind: input, shape index: {}]   ;;  %s1797_s7 = inlined_call_operand.vmem [shape: f32[1,8], index: 7, kind: input, shape index: {}]   ;;  %s1798_s9 = inlined_call_operand.vmem [shape: f32[4,4], index: 9, kind: input, shape index: {}]   ;;  %s1799_s10 = inlined_call_operand.vmem [shape: f32[4,4], index: 10, kind: input, shape index: {}]   ;;  %s1800_s12 = inlined_call_operand.vmem [shape: f32[8,8], index: 12, kind: input, shape index: {}]   ;;  %s1801_s11 = inlined_call_operand.vmem [shape: f32[8,8], index: 11, kind: input, shape index: {}]   ;;  %s1802_s13 = inlined_call_operand.vmem [shape: f32[8,8], index: 13, kind: input, shape index: {}]   ;;  %s1803_s14 = inlined_call_operand.vmem [shape: f32[1,8], index: 14, kind: input, shape index: {}]   ;;  %s1804_s17 = inlined_call_operand.vmem [shape: f32[8,16], index: 17, kind: input, shape index: {}]   ;;  %s1805_s15 = inlined_call_operand.vmem [shape: f32[1,8], index: 15, kind: input, shape index: {}]   ;;  %s1806_s16 = inlined_call_operand.vmem [shape: f32[1,8], index: 16, kind: input, shape index: {}]   ;;  %s1807_s20 = inlined_call_operand.vmem [shape: f32[16,32], index: 20, kind: input, shape index: {}]   ;;  %s1808_s18 = inlined_call_operand.vmem [shape: f32[1,16], index: 18, kind: input, shape index: {}]   ;;  %s1809_s19 = inlined_call_operand.vmem [shape: f32[8,4], index: 19, kind: input, shape index: {}]   ;;  %s1810_s21 = inlined_call_operand.vmem [shape: f32[8,32], index: 21, kind: input, shape index: {}]   ;;  %s1811_s22 = inlined_call_operand.vmem [shape: f32[8,32], index: 22, kind: output, shape index: {}]  }
   0x1   :  { %1814 = sst [smem:[#allocation2_spill]] %s1789_s3  ;;  %1411 = vmatprep.subr.mxu0 %v1502_v0  ;;  %1415 = vmatprep.mubr.msk.f32.mxu0 %vm1503_vm1, %v1502_v0  ;;  %v156_v11 = vlaneseq  ;;  %vm347_vm3 = vcmask 60416   ;;  %vm355_vm4 = vcmask 64512   ;;  %vm542_vm5 = vcmask 1043456  }
   0x2   :  { %1815 = sst [smem:[#allocation3_spill]] %s1790_s0  ;;  %1418 = vmatprep.subr.mxu1 %v1502_v0  ;;  %1422 = vmatprep.mubr.msk.f32.mxu1 %vm1503_vm1, %v1502_v0  ;;  %vm538_vm6 = vcmask 31744   ;;  %vm1344_vm7 = vcmask 261120  }
   0x3   :  { %1816 = sst [smem:[#allocation4_spill]] %s1791_s4  ;;  %v157_v12 = vshrl.u32 %v156_v11, 7  ;;  %v616_v11 = vld [vmem:[%s1799_s10] sm:$0xf] }
   0x4   :  { %1817 = sst [smem:[#allocation5_spill]] %s1792_s1 }
   0x5   :  { %1818 = sst [smem:[#allocation6_spill]] %s1793_s2  ;;  %v1645_v13 = vsub.s32 0, %v157_v12  ;;  %v691_v12 = vld [vmem:[%s1800_s12] sm:$0xff] }
   0x6   :  { %1819 = sst [smem:[#allocation7_spill]] %s1794_s8 }
   0x7   :  { %1820 = sst [smem:[#allocation8_spill]] %s1795_s5 }
   0x8   :  { %s1821_s29 = sld [smem:[#allocation2_spill]] }
   0x9   :  { %s1822_s0 = sld [smem:[#allocation3_spill]] }
   0xa   :  { %s1823_s5 = sld [smem:[#allocation4_spill]] }
   0xb   :  { %s1824_s1 = sld [smem:[#allocation5_spill]] }
   0xc   :  { %s1825_s30 = sld [smem:[#allocation6_spill]] }
   0xd   :  { %s1826_s23 = sld [smem:[#allocation7_spill]] }
   0xe   :  { %v73_v1 = vld [vmem:[%s1821_s29 + $0x8] sm:$0xff]  ;;  %v72_v2 = vld [vmem:[%s1821_s29] sm:$0xff]  ;;  %s1827_s24 = sld [smem:[#allocation8_spill]] }
   0xf   :  { %v1631_v3 = vld [vmem:[%s1822_s0] sm:$0xf]  ;;  %1412 = vmatpush3.msra.mxu0 %v73_v1  ;;  %1419 = vmatpush3.msra.mxu1 %v73_v1 }
  0x10   :  { %v75_v4 = vsel %vm74_vm0, %v1631_v3, 0.0  ;;  %1413 = vmatprep.subr.mxu0 %v1502_v0  ;;  %1420 = vmatprep.subr.mxu1 %v1502_v0  ;;  %v265_v26 = vld [vmem:[%s1823_s5 + $0x8] sm:$0xff]  ;;  %v264_v27 = vld [vmem:[%s1823_s5] sm:$0xff] }
  0x11   :  { %v76_v5 = vrot.slane %v75_v4, 4  ;;  %1414 = vmatpush3.msra.mxu0 %v72_v2  ;;  %1421 = vmatpush3.msra.mxu1 %v72_v2  ;;  %v1352_v33 = vld [vmem:[%s1824_s1] ss:$0 sm:$0xff] }
  0x12   :  { %1425 = vmatprep.subr.mxu0 %v1502_v0  ;;  %1432 = vmatprep.subr.mxu1 %v1502_v0  ;;  %v1353_v35 = vld [vmem:[%s1825_s30] ss:$0 sm:$0xff] }
  0x13   :  { %v77_v6 = vadd.f32 %v76_v5, %v75_v4  ;;  %v1674_v38 = vld [vmem:[%s1826_s23] sm:$0xff] }
  0x14   :  { %v1354_v39 = vld [vmem:[%s1827_s24] ss:$0 sm:$0xff] }
  0x15   :  { %v78_v7 = vrot.slane %v77_v6, 2  ;;  %v1358_v5 = vld [vmem:[%s1796_s6] ss:$0 sm:$0xff] }
  0x17   :  { %v79_v8 = vadd.f32 %v78_v7, %v77_v6  ;;  %v1359_v7 = vld [vmem:[%s1797_s7] ss:$0 sm:$0xff] }
  0x19   :  { %v80_v9 = vrot.slane %v79_v8, 1 }
  0x1b   :  { %v81_v10 = vadd.f32 %v80_v9, %v79_v8 }
  0x1d   :  { %1416 = vmatmul.mubr.msk.f32.vlgmr.msra.gmra.mxu0 %vm82_vm2, %v81_v10  ;;  %v537_v10 = vld [vmem:[%s1798_s9] sm:$0xf] }
  0x1e   :  { %1429 = vmatprep.mubr.msk.f32.mxu0 %vm1503_vm1, %v1502_v0  ;;  %1426 = vmatpush3.msra.mxu0 %v265_v26 }
  0x1f   :  { %1427 = vmatprep.subr.mxu0 %v1502_v0 }
  0x20   :  { %1428 = vmatpush3.msra.mxu0 %v264_v27 }
  0x21   :  { %1437 = vmatprep.subr.mxu0 %v1502_v0 }
  0xdd   :  { %v152_v14 = vpop.f32.mrf.mxu0 }
  0xde   :  { %v159_v15 = vrot.slane %v152_v14, %v1645_v13  ;;  %v690_v14 = vld [vmem:[%s1801_s11] sm:$0xff] }
  0xdf   :  { %v1417_v16 = vpop.f32.mrf.mxu0 }
  0xe0   :  { %v160_v17 = vsub.f32 %v1631_v3, %v159_v15  ;;  %v837_v15 = vld [vmem:[%s1802_s13] sm:$0xff] }
  0xe2   :  { %v161_v18 = vmul.f32 %v160_v17, %v160_v17 }
  0xe4   :  { %v162_v19 = vsel %vm74_vm0, %v161_v18, 0.0 }
  0xe5   :  { %v163_v20 = vrot.slane %v162_v19, 4 }
  0xe7   :  { %v164_v21 = vadd.f32 %v163_v20, %v162_v19 }
  0xe9   :  { %v165_v22 = vrot.slane %v164_v21, 2 }
  0xeb   :  { %v166_v23 = vadd.f32 %v165_v22, %v164_v21 }
  0xed   :  { %v167_v24 = vrot.slane %v166_v23, 1 }
  0xef   :  { %v168_v25 = vadd.f32 %v167_v24, %v166_v23 }
  0xf1   :  { %1423 = vmatmul.mubr.msk.f32.vlgmr.msra.gmra.mxu1 %vm82_vm2, %v168_v25  ;;  %v1367_v25 = vld [vmem:[%s1803_s14] ss:$0 sm:$0xff] }
  0xf2   :  { %1434 = vmatprep.mubr.msk.f32.mxu1 %vm1503_vm1, %v1502_v0  ;;  %1433 = vmatpush3.msra.mxu1 %v1674_v38 }
  0xf3   :  { %1442 = vmatprep.subr.mxu1 %v1502_v0 }
 0x1b1   :  { %v238_v28 = vpop.f32.mrf.mxu1 }
 0x1b2   :  { %v239_v29 = vadd.f32 1e-05, %v238_v28 }
 0x1b3   :  { %v1424_v30 = vpop.f32.mrf.mxu1 }
 0x1b4   :  { %1496 = vrsqrt.f32 %v239_v29 }
 0x1c1   :  { %v1497_v31 = vpop.eup %1496 }
 0x1c2   :  { %v246_v32 = vrot.slane %v1497_v31, %v1645_v13 }
 0x1c4   :  { %v247_v34 = vmul.f32 %v246_v32, %v160_v17 }
 0x1c6   :  { %v255_v36 = vmul.f32 %v1352_v33, %v247_v34 }
 0x1c8   :  { %v263_v37 = vadd.f32 %v1353_v35, %v255_v36 }
 0x1ca   :  { %1430 = vmatmul.mubr.msk.f32.vlgmr.msra.gmra.mxu0 %vm82_vm2, %v263_v37 }
 0x1cb   :  { %1439 = vmatprep.mubr.msk.f32.mxu0 %vm1503_vm1, %v1502_v0  ;;  %1438 = vmatpush3.msra.mxu0 %v1674_v38 }
 0x1cc   :  { %1447 = vmatprep.subr.mxu0 %v1502_v0 }
 0x28a   :  { %v342_v40 = vpop.f32.mrf.mxu0 }
 0x28b   :  { %v343_v41 = vadd.f32 %v1354_v39, %v342_v40 }
 0x28c   :  { %v1431_v42 = vpop.f32.mrf.mxu0 }
 0x28d   :  { %v348_v43 = vsel %vm347_vm3, %v343_v41, 0.0 }
 0x28e   :  { %v349_v44 = vrot.slane %v348_v43, 4 }
 0x290   :  { %v350_v45 = vadd.f32 %v349_v44, %v348_v43 }
 0x292   :  { %v351_v46 = vrot.slane %v350_v45, 2 }
 0x294   :  { %v352_v47 = vadd.f32 %v351_v46, %v350_v45 }
 0x296   :  { %v353_v48 = vrot.slane %v352_v47, 1 }
 0x298   :  { %v354_v49 = vadd.f32 %v353_v48, %v352_v47 }
 0x29a   :  { %1435 = vmatmul.mubr.msk.f32.vlgmr.msra.gmra.mxu1 %vm355_vm4, %v354_v49  ;;  %v1108_v49 = vld [vmem:[%s1804_s17] sm:$0xff] }
 0x29b   :  { %1444 = vmatprep.mubr.msk.f32.mxu1 %vm1503_vm1, %v1502_v0 }
 0x35a   :  { %v425_v50 = vpop.f32.mrf.mxu1 }
 0x35b   :  { %v432_v51 = vrot.slane %v425_v50, %v1645_v13 }
 0x35c   :  { %v1436_v52 = vpop.f32.mrf.mxu1 }
 0x35d   :  { %v433_v53 = vsub.f32 %v343_v41, %v432_v51 }
 0x35f   :  { %v434_v54 = vmul.f32 %v433_v53, %v433_v53 }
 0x361   :  { %v435_v55 = vsel %vm347_vm3, %v434_v54, 0.0 }
 0x362   :  { %v436_v56 = vrot.slane %v435_v55, 4 }
 0x364   :  { %v437_v57 = vadd.f32 %v436_v56, %v435_v55  ;;  %v1370_v55 = vld [vmem:[%s1805_s15] ss:$0 sm:$0xff] }
 0x366   :  { %v438_v58 = vrot.slane %v437_v57, 2 }
 0x368   :  { %v439_v59 = vadd.f32 %v438_v58, %v437_v57  ;;  %v1371_v57 = vld [vmem:[%s1806_s16] ss:$0 sm:$0xff] }
 0x36a   :  { %v440_v60 = vrot.slane %v439_v59, 1 }
 0x36c   :  { %v441_v61 = vadd.f32 %v440_v60, %v439_v59  ;;  %v1372_v60 = vld [vmem:[%s1808_s18] ss:$0 sm:$0xff] }
 0x36e   :  { %1440 = vmatmul.mubr.msk.f32.vlgmr.msra.gmra.mxu0 %vm355_vm4, %v441_v61 }
 0x36f   :  { %1449 = vmatprep.mubr.msk.f32.mxu0 %vm1503_vm1, %v1502_v0 }
 0x42e   :  { %v511_v62 = vpop.f32.mrf.mxu0 }
 0x42f   :  { %v512_v63 = vadd.f32 1e-05, %v511_v62 }
 0x430   :  { %v1441_v1 = vpop.f32.mrf.mxu0 }
 0x431   :  { %1498 = vrsqrt.f32 %v512_v63 }
 0x43e   :  { %v1499_v2 = vpop.eup %1498 }
 0x43f   :  { %v519_v4 = vrot.slane %v1499_v2, %v1645_v13  ;;  %v1191_v2 = vld [vmem:[%s1809_s19] sm:$0xff] }
 0x441   :  { %v520_v6 = vmul.f32 %v519_v4, %v433_v53 }
 0x443   :  { %v528_v8 = vmul.f32 %v1358_v5, %v520_v6 }
 0x445   :  { %v536_v9 = vadd.f32 %v1359_v7, %v528_v8 }
 0x447   :  { %1443 = vmatpush3.msk.msra.mxu1 %vm542_vm5, %v536_v9  ;;  %1448 = vmatpush3.msk.msra.mxu0 %vm542_vm5, %v536_v9 }
 0x448   :  { %1445 = vmatmul.mubr.msk.f32.vlgmr.msra.gmra.mxu1 %vm538_vm6, %v537_v10  ;;  %1450 = vmatmul.mubr.msk.f32.vlgmr.msra.gmra.mxu0 %vm538_vm6, %v616_v11 }
 0x449   :  { %1452 = vmatprep.subr.mxu1 %v1502_v0  ;;  %1454 = vmatprep.mubr.msk.f32.mxu1 %vm1503_vm1, %v1502_v0 }
 0x44a   :  { %1453 = vmatpush3.msra.mxu1 %v691_v12  ;;  %1457 = vmatprep.subr.mxu0 %v1502_v0 }
 0x44b   :  { %1462 = vmatprep.subr.mxu1 %v1502_v0  ;;  %1459 = vmatprep.mubr.msk.f32.mxu0 %vm1503_vm1, %v1502_v0 }
 0x44c   :  { %1455 = vmatmul.mubr.msk.f32.vlgmr.msra.gmra.mxu1 %vm355_vm4, %v536_v9  ;;  %1458 = vmatpush3.msra.mxu0 %v690_v14 }
 0x44d   :  { %1464 = vmatprep.mubr.msk.f32.mxu1 %vm1503_vm1, %v1502_v0  ;;  %1463 = vmatpush3.msra.mxu1 %v837_v15 }
 0x44e   :  { %1467 = vmatprep.subr.mxu0 %v1502_v0  ;;  %1472 = vmatprep.subr.mxu1 %v1502_v0 }
 0x508   :  { %v612_v16 = vpop.f32.mrf.mxu1  ;;  %v686_v17 = vpop.f32.mrf.mxu0 }
 0x509   :  { %1460 = vmatmul.mubr.msk.f32.vlgmr.msra.gmra.mxu0 %vm355_vm4, %v612_v16  ;;  %1465 = vmatmul.mubr.msk.f32.vlgmr.msra.gmra.mxu1 %vm355_vm4, %v686_v17 }
 0x50a   :  { %v1446_v18 = vpop.f32.mrf.mxu1  ;;  %v1451_v19 = vpop.f32.mrf.mxu0  ;;  %1468 = vmatpush3.msra.mxu0 %v1674_v38  ;;  %1469 = vmatprep.mubr.msk.f32.mxu0 %vm1503_vm1, %v1502_v0 }
 0x50b   :  { %1473 = vmatpush3.msra.mxu1 %v1674_v38  ;;  %1474 = vmatprep.mubr.msk.f32.mxu1 %vm1503_vm1, %v1502_v0 }
 0x50c   :  { %v760_v20 = vpop.f32.mrf.mxu1  ;;  %1477 = vmatprep.subr.mxu0 %v1502_v0  ;;  %1482 = vmatprep.subr.mxu1 %v1502_v0 }
 0x50e   :  { %v1456_v21 = vpop.f32.mrf.mxu1 }
 0x5c9   :  { %v833_v22 = vpop.f32.mrf.mxu0  ;;  %v907_v23 = vpop.f32.mrf.mxu1 }
 0x5ca   :  { %v834_v24 = vadd.f32 %v833_v22, %v760_v20 }
 0x5cb   :  { %v1461_v26 = vpop.f32.mrf.mxu0  ;;  %v1466_v27 = vpop.f32.mrf.mxu1 }
 0x5cc   :  { %v911_v28 = vadd.f32 %v907_v23, %v834_v24 }
 0x5ce   :  { %v919_v29 = vadd.f32 %v1367_v25, %v911_v28 }
 0x5d0   :  { %v920_v30 = vsel %vm347_vm3, %v919_v29, 0.0 }
 0x5d1   :  { %v921_v31 = vrot.slane %v920_v30, 4 }
 0x5d3   :  { %v922_v32 = vadd.f32 %v921_v31, %v920_v30 }
 0x5d5   :  { %v923_v33 = vrot.slane %v922_v32, 2 }
 0x5d7   :  { %v924_v34 = vadd.f32 %v923_v33, %v922_v32 }
 0x5d9   :  { %v925_v35 = vrot.slane %v924_v34, 1 }
 0x5db   :  { %v926_v36 = vadd.f32 %v925_v35, %v924_v34 }
 0x5dd   :  { %1470 = vmatmul.mubr.msk.f32.vlgmr.msra.gmra.mxu0 %vm355_vm4, %v926_v36 }
 0x5de   :  { %1479 = vmatprep.mubr.msk.f32.mxu0 %vm1503_vm1, %v1502_v0  ;;  %1478 = vmatpush3.msra.mxu0 %v1108_v49 }
 0x5df   :  { %1487 = vmatprep.subr.mxu0 %v1502_v0 }
 0x69d   :  { %v996_v37 = vpop.f32.mrf.mxu0 }
 0x69e   :  { %v1003_v38 = vrot.slane %v996_v37, %v1645_v13 }
 0x69f   :  { %v1471_v39 = vpop.f32.mrf.mxu0 }
 0x6a0   :  { %v1004_v40 = vsub.f32 %v919_v29, %v1003_v38 }
 0x6a2   :  { %v1005_v41 = vmul.f32 %v1004_v40, %v1004_v40 }
 0x6a4   :  { %v1006_v42 = vsel %vm347_vm3, %v1005_v41, 0.0 }
 0x6a5   :  { %v1007_v43 = vrot.slane %v1006_v42, 4 }
 0x6a7   :  { %v1008_v44 = vadd.f32 %v1007_v43, %v1006_v42 }
 0x6a9   :  { %v1009_v45 = vrot.slane %v1008_v44, 2 }
 0x6ab   :  { %v1010_v46 = vadd.f32 %v1009_v45, %v1008_v44 }
 0x6ad   :  { %v1011_v47 = vrot.slane %v1010_v46, 1 }
 0x6af   :  { %v1012_v48 = vadd.f32 %v1011_v47, %v1010_v46 }
 0x6b1   :  { %1475 = vmatmul.mubr.msk.f32.vlgmr.msra.gmra.mxu1 %vm355_vm4, %v1012_v48 }
 0x6b2   :  { %1484 = vmatprep.mubr.msk.f32.mxu1 %vm1503_vm1, %v1502_v0 }
 0x771   :  { %v1082_v50 = vpop.f32.mrf.mxu1 }
 0x772   :  { %v1083_v51 = vadd.f32 1e-05, %v1082_v50 }
 0x773   :  { %v1476_v52 = vpop.f32.mrf.mxu1 }
 0x774   :  { %1500 = vrsqrt.f32 %v1083_v51 }
 0x781   :  { %v1501_v53 = vpop.eup %1500 }
 0x782   :  { %v1090_v54 = vrot.slane %v1501_v53, %v1645_v13  ;;  %v1269_v13 = vld [vmem:[%s1807_s20 + $0x8] sm:$0xff] }
 0x784   :  { %v1091_v56 = vmul.f32 %v1090_v54, %v1004_v40 }
 0x786   :  { %v1099_v58 = vmul.f32 %v1370_v55, %v1091_v56 }
 0x788   :  { %v1107_v59 = vadd.f32 %v1371_v57, %v1099_v58 }
 0x78a   :  { %1480 = vmatmul.mubr.msk.f32.vlgmr.msra.gmra.mxu0 %vm355_vm4, %v1107_v59 }
 0x78b   :  { %1491 = vmatprep.mubr.msk.f32.mxu0 %vm1503_vm1, %v1502_v0  ;;  %1488 = vmatpush3.msra.mxu0 %v1269_v13 }
 0x78c   :  { %1489 = vmatprep.subr.mxu0 %v1502_v0  ;;  %v1268_v0 = vld [vmem:[%s1807_s20] sm:$0xff] }
 0x78d   :  { %1490 = vmatpush3.msra.mxu0 %v1268_v0 }
 0x84a   :  { %v1185_v61 = vpop.f32.mrf.mxu0 }
 0x84b   :  { %v1186_v62 = vadd.f32 %v1372_v60, %v1185_v61 }
 0x84c   :  { %v1481_v63 = vpop.f32.mrf.mxu0 }
 0x84d   :  { %v1189_v1 = vadd.f32 %v1186_v62, %v1631_v3  ;;  %v1190_v3 = vld [vmem:[%s1810_s21] sm:$0xff] }
 0x84f   :  { %1483 = vmatpush3.msk.msra.mxu1 %vm542_vm5, %v1189_v1 }
 0x850   :  { %1485 = vmatmul.mubr.msk.f32.vlgmr.msra.gmra.mxu1 %vm538_vm6, %v1191_v2 }
 0x910   :  { %v1264_v4 = vpop.f32.mrf.mxu1 }
 0x911   :  { %1492 = vmatmul.mubr.msk.f32.vlgmr.msra.gmra.mxu0 %vm82_vm2, %v1264_v4 }
 0x912   :  { %v1486_v5 = vpop.f32.mrf.mxu1 }
 0x9d1   :  { %v1339_v6 = vpop.f32.mrf.mxu0 }
 0x9d2   :  { %v1343_v7 = vadd.f32 %v1339_v6, %v1190_v3 }
 0x9d3   :  { %v1493_v8 = vpop.f32.mrf.mxu0 }
 0x9d4   :  { %1345 = vst.msk [vmem:[%s1811_s22] sm:$0xff] %vm1344_vm7, %v1343_v7 }

// kernel: wrapped_hourglass_fwd.19
= control target key start
LH: loop header
LB: loop body
LE: loop exit
PB: predicated region body
PF: predicated region fallthrough
CT: control target
= control target key end

     0   :  { %vm76_vm0 = vcmask 261120   ;;  %v1574_v0 = vmov 0.0   ;;  %vm1575_vm1 = vmmov 0   ;;  %v157_v13 = vlaneseq  ;;  %s1915_s3 = inlined_call_operand.vmem [shape: f32[32,32], index: 3, kind: input, shape index: {}]   ;;  %s1916_s0 = inlined_call_operand.vmem [shape: f32[8,32], index: 0, kind: input, shape index: {}]   ;;  %s1917_s4 = inlined_call_operand.vmem [shape: f32[32,16], index: 4, kind: input, shape index: {}]   ;;  %s1918_s1 = inlined_call_operand.vmem [shape: f32[1,32], index: 1, kind: input, shape index: {}]   ;;  %s1919_s2 = inlined_call_operand.vmem [shape: f32[1,32], index: 2, kind: input, shape index: {}]   ;;  %s1920_s8 = inlined_call_operand.vmem [shape: f32[16,16], index: 8, kind: input, shape index: {}]   ;;  %s1921_s5 = inlined_call_operand.vmem [shape: f32[1,16], index: 5, kind: input, shape index: {}]   ;;  %s1922_s6 = inlined_call_operand.vmem [shape: f32[1,16], index: 6, kind: input, shape index: {}]   ;;  %s1923_s7 = inlined_call_operand.vmem [shape: f32[1,16], index: 7, kind: input, shape index: {}]   ;;  %s1924_s9 = inlined_call_operand.vmem [shape: f32[8,8], index: 9, kind: input, shape index: {}]   ;;  %s1925_s10 = inlined_call_operand.vmem [shape: f32[8,8], index: 10, kind: input, shape index: {}]   ;;  %s1926_s12 = inlined_call_operand.vmem [shape: f32[16,16], index: 12, kind: input, shape index: {}]   ;;  %s1927_s11 = inlined_call_operand.vmem [shape: f32[16,16], index: 11, kind: input, shape index: {}]   ;;  %s1928_s13 = inlined_call_operand.vmem [shape: f32[16,16], index: 13, kind: input, shape index: {}]   ;;  %s1929_s14 = inlined_call_operand.vmem [shape: f32[1,16], index: 14, kind: input, shape index: {}]   ;;  %s1930_s17 = inlined_call_operand.vmem [shape: f32[16,32], index: 17, kind: input, shape index: {}]   ;;  %s1931_s15 = inlined_call_operand.vmem [shape: f32[1,16], index: 15, kind: input, shape index: {}]   ;;  %s1932_s16 = inlined_call_operand.vmem [shape: f32[1,16], index: 16, kind: input, shape index: {}]   ;;  %s1933_s19 = inlined_call_operand.vmem [shape: f32[16,8], index: 19, kind: input, shape index: {}]   ;;  %s1934_s20 = inlined_call_operand.vmem [shape: f32[32,64], index: 20, kind: input, shape index: {}]   ;;  %s1935_s18 = inlined_call_operand.vmem [shape: f32[1,32], index: 18, kind: input, shape index: {}]   ;;  %s1936_s21 = inlined_call_operand.vmem [shape: f32[16,64], index: 21, kind: input, shape index: {}]   ;;  %s1937_s22 = inlined_call_operand.vmem [shape: f32[16,64], index: 22, kind: output, shape index: {}]  }
   0x1   :  { %1941 = sst [smem:[#allocation2_spill]] %s1915_s3  ;;  %1451 = vmatprep.subr.mxu0 %v1574_v0  ;;  %1459 = vmatprep.mubr.msk.f32.mxu0 %vm1575_vm1, %v1574_v0  ;;  %vm351_vm2 = vcmask 130048   ;;  %vm541_vm3 = vcmask 64512   ;;  %vm1366_vm4 = vcmask 523264  }
   0x2   :  { %1942 = sst [smem:[#allocation3_spill]] %s1916_s0  ;;  %1462 = vmatprep.subr.mxu1 %v1574_v0  ;;  %1470 = vmatprep.mubr.msk.f32.mxu1 %vm1575_vm1, %v1574_v0  ;;  %v158_v14 = vshrl.u32 %v157_v13, 7 }
   0x3   :  { %1943 = sst [smem:[#allocation4_spill]] %s1917_s4 }
   0x4   :  { %1944 = sst [smem:[#allocation5_spill]] %s1918_s1  ;;  %v1727_v15 = vsub.s32 0, %v158_v14 }
   0x5   :  { %1945 = sst [smem:[#allocation6_spill]] %s1919_s2 }
   0x6   :  { %1946 = sst [smem:[#allocation7_spill]] %s1920_s8 }
   0x7   :  { %1947 = sst [smem:[#allocation8_spill]] %s1921_s5 }
   0x8   :  { %s1948_s29 = sld [smem:[#allocation2_spill]] }
   0x9   :  { %s1949_s0 = sld [smem:[#allocation3_spill]] }
   0xa   :  { %s1950_s27 = sld [smem:[#allocation4_spill]] }
   0xb   :  { %s1951_s8 = sld [smem:[#allocation5_spill]] }
   0xc   :  { %s1952_s25 = sld [smem:[#allocation6_spill]] }
   0xd   :  { %s1954_s2 = sld [smem:[#allocation8_spill]] }
   0xe   :  { %v75_v1 = vld [vmem:[%s1948_s29 + $0x18] sm:$0xff]  ;;  %v74_v2 = vld [vmem:[%s1948_s29 + $0x10] sm:$0xff]  ;;  %v73_v4 = vld [vmem:[%s1948_s29 + $0x8] sm:$0xff] }
   0xf   :  { %1452 = vmatpush3.msra.mxu0 %v75_v1  ;;  %v1703_v3 = vld [vmem:[%s1949_s0] sm:$0xff]  ;;  %1463 = vmatpush3.msra.mxu1 %v75_v1 }
  0x10   :  { %1453 = vmatprep.subr.mxu0 %v1574_v0  ;;  %v77_v5 = vsel %vm76_vm0, %v1703_v3, 0.0  ;;  %1464 = vmatprep.subr.mxu1 %v1574_v0  ;;  %v72_v7 = vld [vmem:[%s1948_s29] sm:$0xff]  ;;  %v268_v28 = vld [vmem:[%s1950_s27 + $0x18] sm:$0xff]  ;;  %v267_v29 = vld [vmem:[%s1950_s27 + $0x10] sm:$0xff] }
  0x11   :  { %1454 = vmatpush3.msra.mxu0 %v74_v2  ;;  %v78_v6 = vrot.slane %v77_v5, 4  ;;  %1465 = vmatpush3.msra.mxu1 %v74_v2  ;;  %v266_v30 = vld [vmem:[%s1950_s27 + $0x8] sm:$0xff]  ;;  %v265_v31 = vld [vmem:[%s1950_s27] sm:$0xff]  ;;  %s1953_s27 = sld [smem:[#allocation7_spill]] }
  0x12   :  { %1455 = vmatprep.subr.mxu0 %v1574_v0  ;;  %1466 = vmatprep.subr.mxu1 %v1574_v0  ;;  %v1375_v37 = vld [vmem:[%s1951_s8] ss:$0 sm:$0xff] }
  0x13   :  { %1456 = vmatpush3.msra.mxu0 %v73_v4  ;;  %v79_v8 = vadd.f32 %v78_v6, %v77_v5  ;;  %1467 = vmatpush3.msra.mxu1 %v73_v4  ;;  %v1376_v39 = vld [vmem:[%s1952_s25] ss:$0 sm:$0xff] }
  0x14   :  { %1457 = vmatprep.subr.mxu0 %v1574_v0  ;;  %1468 = vmatprep.subr.mxu1 %v1574_v0  ;;  %v1377_v44 = vld [vmem:[%s1954_s2] ss:$0 sm:$0xff] }
  0x15   :  { %1458 = vmatpush3.msra.mxu0 %v72_v7  ;;  %v80_v9 = vrot.slane %v79_v8, 2  ;;  %1469 = vmatpush3.msra.mxu1 %v72_v7 }
  0x16   :  { %1473 = vmatprep.subr.mxu0 %v1574_v0  ;;  %1484 = vmatprep.subr.mxu1 %v1574_v0 }
  0x17   :  { %v81_v10 = vadd.f32 %v80_v9, %v79_v8  ;;  %v1764_v42 = vld [vmem:[%s1953_s27 + $0x8] sm:$0xff]  ;;  %v1771_v43 = vld [vmem:[%s1953_s27] sm:$0xff] }
  0x19   :  { %v82_v11 = vrot.slane %v81_v10, 1 }
  0x1b   :  { %v83_v12 = vadd.f32 %v82_v11, %v81_v10  ;;  %v1381_v10 = vld [vmem:[%s1922_s6] ss:$0 sm:$0xff] }
  0x1d   :  { %1460 = vmatmul.mubr.msk.f32.vlgmr.msra.gmra.mxu0 %vm76_vm0, %v83_v12  ;;  %v1382_v12 = vld [vmem:[%s1923_s7] ss:$0 sm:$0xff] }
  0x1e   :  { %1481 = vmatprep.mubr.msk.f32.mxu0 %vm1575_vm1, %v1574_v0  ;;  %1474 = vmatpush3.msra.mxu0 %v268_v28 }
  0x1f   :  { %1475 = vmatprep.subr.mxu0 %v1574_v0 }
  0x20   :  { %1476 = vmatpush3.msra.mxu0 %v267_v29 }
  0x21   :  { %1477 = vmatprep.subr.mxu0 %v1574_v0 }
  0x22   :  { %1478 = vmatpush3.msra.mxu0 %v266_v30 }
  0x23   :  { %1479 = vmatprep.subr.mxu0 %v1574_v0 }
  0x24   :  { %1480 = vmatpush3.msra.mxu0 %v265_v31 }
  0x25   :  { %1498 = vmatprep.subr.mxu0 %v1574_v0 }
  0xdd   :  { %v153_v16 = vpop.f32.mrf.mxu0 }
  0xde   :  { %v160_v17 = vrot.slane %v153_v16, %v1727_v15  ;;  %v540_v16 = vld [vmem:[%s1924_s9] sm:$0xff] }
  0xdf   :  { %v1461_v18 = vpop.f32.mrf.mxu0 }
  0xe0   :  { %v161_v19 = vsub.f32 %v1703_v3, %v160_v17  ;;  %v615_v17 = vld [vmem:[%s1925_s10] sm:$0xff]  ;;  %v692_v18 = vld [vmem:[%s1926_s12 + $0x8] sm:$0xff] }
  0xe2   :  { %v162_v20 = vmul.f32 %v161_v19, %v161_v19 }
  0xe4   :  { %v163_v21 = vsel %vm76_vm0, %v162_v20, 0.0  ;;  %v691_v20 = vld [vmem:[%s1926_s12] sm:$0xff] }
  0xe5   :  { %v164_v22 = vrot.slane %v163_v21, 4 }
  0xe7   :  { %v165_v23 = vadd.f32 %v164_v22, %v163_v21  ;;  %v840_v21 = vld [vmem:[%s1928_s13 + $0x8] sm:$0xff]  ;;  %v689_v22 = vld [vmem:[%s1927_s11] sm:$0xff] }
  0xe9   :  { %v166_v24 = vrot.slane %v165_v23, 2 }
  0xeb   :  { %v167_v25 = vadd.f32 %v166_v24, %v165_v23  ;;  %v839_v23 = vld [vmem:[%s1928_s13] sm:$0xff] }
  0xed   :  { %v168_v26 = vrot.slane %v167_v25, 1 }
  0xef   :  { %v169_v27 = vadd.f32 %v168_v26, %v167_v25 }
  0xf1   :  { %1471 = vmatmul.mubr.msk.f32.vlgmr.msra.gmra.mxu1 %vm76_vm0, %v169_v27 }
  0xf2   :  { %1488 = vmatprep.mubr.msk.f32.mxu1 %vm1575_vm1, %v1574_v0  ;;  %1485 = vmatpush3.msra.mxu1 %v1764_v42 }
  0xf3   :  { %1486 = vmatprep.subr.mxu1 %v1574_v0 }
  0xf4   :  { %1487 = vmatpush3.msra.mxu1 %v1771_v43 }
  0xf5   :  { %1491 = vmatprep.subr.mxu1 %v1574_v0 }
 0x1b1   :  { %v239_v32 = vpop.f32.mrf.mxu1 }
 0x1b2   :  { %v240_v33 = vadd.f32 1e-05, %v239_v32 }
 0x1b3   :  { %v1472_v34 = vpop.f32.mrf.mxu1 }
 0x1b4   :  { %1568 = vrsqrt.f32 %v240_v33  ;;  %v1388_v33 = vld [vmem:[%s1929_s14] ss:$0 sm:$0xff] }
 0x1c1   :  { %v1569_v35 = vpop.eup %1568 }
 0x1c2   :  { %v247_v36 = vrot.slane %v1569_v35, %v1727_v15 }
 0x1c4   :  { %v248_v38 = vmul.f32 %v247_v36, %v161_v19  ;;  %v690_v19 = vld [vmem:[%s1927_s11 + $0x8] sm:$0xff] }
 0x1c6   :  { %v256_v40 = vmul.f32 %v1375_v37, %v248_v38 }
 0x1c8   :  { %v264_v41 = vadd.f32 %v1376_v39, %v256_v40 }
 0x1ca   :  { %1482 = vmatmul.mubr.msk.f32.vlgmr.msra.gmra.mxu0 %vm76_vm0, %v264_v41 }
 0x1cb   :  { %1500 = vmatprep.mubr.msk.f32.mxu0 %vm1575_vm1, %v1574_v0 }
 0x28a   :  { %v345_v45 = vpop.f32.mrf.mxu0 }
 0x28b   :  { %v346_v46 = vadd.f32 %v1377_v44, %v345_v45 }
 0x28c   :  { %v1483_v47 = vpop.f32.mrf.mxu0 }
 0x28d   :  { %v352_v48 = vsel %vm351_vm2, %v346_v46, 0.0 }
 0x28e   :  { %v353_v49 = vrot.slane %v352_v48, 4 }
 0x290   :  { %v354_v50 = vadd.f32 %v353_v49, %v352_v48 }
 0x292   :  { %v355_v51 = vrot.slane %v354_v50, 2 }
 0x294   :  { %v356_v52 = vadd.f32 %v355_v51, %v354_v50 }
 0x296   :  { %v357_v53 = vrot.slane %v356_v52, 1 }
 0x298   :  { %v358_v54 = vadd.f32 %v357_v53, %v356_v52 }
 0x29a   :  { %1489 = vmatmul.mubr.msk.f32.vlgmr.msra.gmra.mxu1 %vm351_vm2, %v358_v54 }
 0x29b   :  { %1492 = vmatpush3.msra.mxu1 %v1764_v42  ;;  %1495 = vmatprep.mubr.msk.f32.mxu1 %vm1575_vm1, %v1574_v0 }
 0x29c   :  { %1493 = vmatprep.subr.mxu1 %v1574_v0 }
 0x29d   :  { %1494 = vmatpush3.msra.mxu1 %v1771_v43 }
 0x29e   :  { %1503 = vmatprep.subr.mxu1 %v1574_v0 }
 0x35a   :  { %v428_v55 = vpop.f32.mrf.mxu1 }
 0x35b   :  { %v435_v56 = vrot.slane %v428_v55, %v1727_v15 }
 0x35c   :  { %v1490_v57 = vpop.f32.mrf.mxu1 }
 0x35d   :  { %v436_v58 = vsub.f32 %v346_v46, %v435_v56  ;;  %v1112_v57 = vld [vmem:[%s1930_s17 + $0x8] sm:$0xff] }
 0x35f   :  { %v437_v59 = vmul.f32 %v436_v58, %v436_v58 }
 0x361   :  { %v438_v60 = vsel %vm351_vm2, %v437_v59, 0.0 }
 0x362   :  { %v439_v61 = vrot.slane %v438_v60, 4 }
 0x364   :  { %v440_v62 = vadd.f32 %v439_v61, %v438_v60 }
 0x366   :  { %v441_v63 = vrot.slane %v440_v62, 2 }
 0x368   :  { %v442_v1 = vadd.f32 %v441_v63, %v440_v62 }
 0x36a   :  { %v443_v2 = vrot.slane %v442_v1, 1 }
 0x36c   :  { %v444_v4 = vadd.f32 %v443_v2, %v442_v1  ;;  %v1391_v1 = vld [vmem:[%s1931_s15] ss:$0 sm:$0xff] }
 0x36e   :  { %1496 = vmatmul.mubr.msk.f32.vlgmr.msra.gmra.mxu1 %vm351_vm2, %v444_v4  ;;  %v1392_v4 = vld [vmem:[%s1932_s16] ss:$0 sm:$0xff] }
 0x36f   :  { %1505 = vmatprep.mubr.msk.f32.mxu1 %vm1575_vm1, %v1574_v0 }
 0x42e   :  { %v514_v5 = vpop.f32.mrf.mxu1 }
 0x42f   :  { %v515_v6 = vadd.f32 1e-05, %v514_v5 }
 0x430   :  { %v1497_v7 = vpop.f32.mrf.mxu1 }
 0x431   :  { %1570 = vrsqrt.f32 %v515_v6  ;;  %v1281_v7 = vld [vmem:[%s1934_s20 + $0x10] sm:$0xff] }
 0x43e   :  { %v1571_v8 = vpop.eup %1570 }
 0x43f   :  { %v522_v9 = vrot.slane %v1571_v8, %v1727_v15  ;;  %v1393_v8 = vld [vmem:[%s1935_s18] ss:$0 sm:$0xff] }
 0x441   :  { %v523_v11 = vmul.f32 %v522_v9, %v436_v58  ;;  %v1111_v58 = vld [vmem:[%s1930_s17] sm:$0xff] }
 0x443   :  { %v531_v13 = vmul.f32 %v1381_v10, %v523_v11 }
 0x445   :  { %v539_v14 = vadd.f32 %v1382_v12, %v531_v13  ;;  %v1197_v13 = vld [vmem:[%s1933_s19 + $0x8] sm:$0xff] }
 0x447   :  { %1499 = vmatpush3.msra.mxu0 %v539_v14  ;;  %1504 = vmatpush3.msra.mxu1 %v539_v14 }
 0x448   :  { %1501 = vmatmul.mubr.msk.f32.vlgmr.msra.gmra.mxu0 %vm541_vm3, %v540_v16  ;;  %1506 = vmatmul.mubr.msk.f32.vlgmr.msra.gmra.mxu1 %vm541_vm3, %v615_v17  ;;  %v1279_v16 = vld [vmem:[%s1934_s20] sm:$0xff] }
 0x449   :  { %1508 = vmatprep.subr.mxu0 %v1574_v0  ;;  %1512 = vmatprep.mubr.msk.f32.mxu0 %vm1575_vm1, %v1574_v0 }
 0x44a   :  { %1509 = vmatpush3.msra.mxu0 %v692_v18  ;;  %1515 = vmatprep.subr.mxu1 %v1574_v0  ;;  %v1195_v18 = vld [vmem:[%s1936_s21 + $0x8] sm:$0xff] }
 0x44b   :  { %1510 = vmatprep.subr.mxu0 %v1574_v0  ;;  %1516 = vmatpush3.msra.mxu1 %v690_v19 }
 0x44c   :  { %1511 = vmatpush3.msra.mxu0 %v691_v20  ;;  %1517 = vmatprep.subr.mxu1 %v1574_v0  ;;  %v1194_v20 = vld [vmem:[%s1936_s21] sm:$0xff] }
 0x44d   :  { %1513 = vmatmul.mubr.msk.f32.vlgmr.msra.gmra.mxu0 %vm351_vm2, %v539_v14  ;;  %1522 = vmatprep.subr.mxu0 %v1574_v0  ;;  %v1280_v14 = vld [vmem:[%s1934_s20 + $0x8] sm:$0xff] }
 0x44e   :  { %1523 = vmatpush3.msra.mxu0 %v840_v21  ;;  %1519 = vmatprep.mubr.msk.f32.mxu1 %vm1575_vm1, %v1574_v0 }
 0x44f   :  { %1524 = vmatprep.subr.mxu0 %v1574_v0  ;;  %1526 = vmatprep.mubr.msk.f32.mxu0 %vm1575_vm1, %v1574_v0 }
 0x450   :  { %1518 = vmatpush3.msra.mxu1 %v689_v22  ;;  %1525 = vmatpush3.msra.mxu0 %v839_v23 }
 0x451   :  { %1529 = vmatprep.subr.mxu1 %v1574_v0  ;;  %1536 = vmatprep.subr.mxu0 %v1574_v0 }
 0x508   :  { %v611_v24 = vpop.f32.mrf.mxu0  ;;  %v685_v25 = vpop.f32.mrf.mxu1 }
 0x509   :  { %1520 = vmatmul.mubr.msk.f32.vlgmr.msra.gmra.mxu1 %vm351_vm2, %v611_v24  ;;  %1527 = vmatmul.mubr.msk.f32.vlgmr.msra.gmra.mxu0 %vm351_vm2, %v685_v25 }
 0x50a   :  { %v1502_v26 = vpop.f32.mrf.mxu0  ;;  %v1507_v27 = vpop.f32.mrf.mxu1  ;;  %1530 = vmatpush3.msra.mxu1 %v1764_v42  ;;  %1533 = vmatprep.mubr.msk.f32.mxu1 %vm1575_vm1, %v1574_v0 }
 0x50b   :  { %1531 = vmatprep.subr.mxu1 %v1574_v0  ;;  %1537 = vmatpush3.msra.mxu0 %v1764_v42 }
 0x50c   :  { %1532 = vmatpush3.msra.mxu1 %v1771_v43  ;;  %1538 = vmatprep.subr.mxu0 %v1574_v0 }
 0x50d   :  { %v762_v28 = vpop.f32.mrf.mxu0  ;;  %1539 = vmatpush3.msra.mxu0 %v1771_v43  ;;  %1540 = vmatprep.mubr.msk.f32.mxu0 %vm1575_vm1, %v1574_v0 }
 0x50e   :  { %1543 = vmatprep.subr.mxu1 %v1574_v0 }
 0x50f   :  { %v1514_v29 = vpop.f32.mrf.mxu0 }
 0x5c9   :  { %v835_v30 = vpop.f32.mrf.mxu1  ;;  %v910_v31 = vpop.f32.mrf.mxu0 }
 0x5ca   :  { %v836_v32 = vadd.f32 %v835_v30, %v762_v28 }
 0x5cb   :  { %v1521_v34 = vpop.f32.mrf.mxu1  ;;  %v1528_v35 = vpop.f32.mrf.mxu0 }
 0x5cc   :  { %v914_v36 = vadd.f32 %v910_v31, %v836_v32 }
 0x5ce   :  { %v922_v37 = vadd.f32 %v1388_v33, %v914_v36 }
 0x5d0   :  { %v923_v38 = vsel %vm351_vm2, %v922_v37, 0.0 }
 0x5d1   :  { %v924_v39 = vrot.slane %v923_v38, 4 }
 0x5d3   :  { %v925_v40 = vadd.f32 %v924_v39, %v923_v38 }
 0x5d5   :  { %v926_v41 = vrot.slane %v925_v40, 2 }
 0x5d7   :  { %v927_v42 = vadd.f32 %v926_v41, %v925_v40 }
 0x5d9   :  { %v928_v43 = vrot.slane %v927_v42, 1 }
 0x5db   :  { %v929_v44 = vadd.f32 %v928_v43, %v927_v42 }
 0x5dd   :  { %1534 = vmatmul.mubr.msk.f32.vlgmr.msra.gmra.mxu1 %vm351_vm2, %v929_v44 }
 0x5de   :  { %1547 = vmatprep.mubr.msk.f32.mxu1 %vm1575_vm1, %v1574_v0  ;;  %1544 = vmatpush3.msra.mxu1 %v1112_v57 }
 0x5df   :  { %1545 = vmatprep.subr.mxu1 %v1574_v0  ;;  %v1196_v0 = vld [vmem:[%s1933_s19] sm:$0xff] }
 0x5e0   :  { %1546 = vmatpush3.msra.mxu1 %v1111_v58 }
 0x69d   :  { %v999_v45 = vpop.f32.mrf.mxu1 }
 0x69e   :  { %v1006_v46 = vrot.slane %v999_v45, %v1727_v15 }
 0x69f   :  { %v1535_v47 = vpop.f32.mrf.mxu1 }
 0x6a0   :  { %v1007_v48 = vsub.f32 %v922_v37, %v1006_v46 }
 0x6a2   :  { %v1008_v49 = vmul.f32 %v1007_v48, %v1007_v48 }
 0x6a4   :  { %v1009_v50 = vsel %vm351_vm2, %v1008_v49, 0.0 }
 0x6a5   :  { %v1010_v51 = vrot.slane %v1009_v50, 4 }
 0x6a7   :  { %v1011_v52 = vadd.f32 %v1010_v51, %v1009_v50 }
 0x6a9   :  { %v1012_v53 = vrot.slane %v1011_v52, 2 }
 0x6ab   :  { %v1013_v54 = vadd.f32 %v1012_v53, %v1011_v52 }
 0x6ad   :  { %v1014_v55 = vrot.slane %v1013_v54, 1 }
 0x6af   :  { %v1015_v56 = vadd.f32 %v1014_v55, %v1013_v54 }
 0x6b1   :  { %1541 = vmatmul.mubr.msk.f32.vlgmr.msra.gmra.mxu0 %vm351_vm2, %v1015_v56 }
 0x6b2   :  { %1552 = vmatprep.mubr.msk.f32.mxu0 %vm541_vm3, %v1196_v0 }
 0x771   :  { %v1085_v59 = vpop.f32.mrf.mxu0 }
 0x772   :  { %v1086_v60 = vadd.f32 1e-05, %v1085_v59 }
 0x773   :  { %v1542_v61 = vpop.f32.mrf.mxu0 }
 0x774   :  { %1572 = vrsqrt.f32 %v1086_v60 }
 0x781   :  { %v1573_v62 = vpop.eup %1572 }
 0x782   :  { %v1093_v63 = vrot.slane %v1573_v62, %v1727_v15  ;;  %v1282_v15 = vld [vmem:[%s1934_s20 + $0x18] sm:$0xff] }
 0x783   :  { %1555 = vmatprep.subr.mxu1 %v1282_v15 }
 0x784   :  { %v1094_v2 = vmul.f32 %v1093_v63, %v1007_v48 }
 0x786   :  { %v1102_v5 = vmul.f32 %v1391_v1, %v1094_v2 }
 0x788   :  { %v1110_v6 = vadd.f32 %v1392_v4, %v1102_v5 }
 0x78a   :  { %1548 = vmatmul.mubr.msk.f32.vlgmr.msra.gmra.mxu1 %vm351_vm2, %v1110_v6 }
 0x78b   :  { %1556 = vmatpush3.msra.mxu1 %v1282_v15 }
 0x78c   :  { %1557 = vmatprep.subr.mxu1 %v1281_v7 }
 0x78d   :  { %1558 = vmatpush3.msra.mxu1 %v1281_v7 }
 0x78e   :  { %1559 = vmatprep.subr.mxu1 %v1280_v14 }
 0x78f   :  { %1560 = vmatpush3.msra.mxu1 %v1280_v14 }
 0x790   :  { %1561 = vmatprep.subr.mxu1 %v1279_v16 }
 0x791   :  { %1562 = vmatpush3.msra.mxu1 %v1279_v16 }
 0x84a   :  { %v1189_v9 = vpop.f32.mrf.mxu1 }
 0x84b   :  { %v1190_v10 = vadd.f32 %v1393_v8, %v1189_v9 }
 0x84c   :  { %v1549_v11 = vpop.f32.mrf.mxu1 }
 0x84d   :  { %v1193_v12 = vadd.f32 %v1190_v10, %v1703_v3 }
 0x84f   :  { %1550 = vmatprep.subr.mxu0 %v1193_v12 }
 0x850   :  { %1551 = vmatpush3.msra.mxu0 %v1193_v12 }
 0x851   :  { %1553 = vmatmul.mubr.msk.f32.vlgmr.msra.gmra.mxu0 %vm541_vm3, %v1197_v13 }
 0x911   :  { %v1554_v3 = vpop.f32.mrf.mxu0 }
 0x913   :  { %v1270_v17 = vpop.f32.mrf.mxu0 }
 0x914   :  { %1563 = vmatprep.mubr.msk.f32.mxu1 %vm76_vm0, %v1270_v17 }
 0x915   :  { %1564 = vmatmul.mubr.msk.f32.vlgmr.msra.gmra.mxu1 %vm76_vm0, %v1554_v3 }
 0x9d5   :  { %v1565_v19 = vpop.f32.mrf.mxu1 }
 0x9d6   :  { %v1365_v21 = vadd.f32 %v1565_v19, %v1195_v18 }
 0x9d7   :  { %v1355_v22 = vpop.f32.mrf.mxu1 }
 0x9d8   :  { %1368 = vst.msk [vmem:[%s1937_s22 + $0x8] sm:$0xff] %vm1366_vm4, %v1365_v21  ;;  %v1364_v23 = vadd.f32 %v1355_v22, %v1194_v20 }
 0x9da   :  { %1367 = vst.msk [vmem:[%s1937_s22] sm:$0xff] %vm1366_vm4, %v1364_v23 }

// kernel: wrapped_hourglass_fwd.11
= control target key start
LH: loop header
LB: loop body
LE: loop exit
PB: predicated region body
PF: predicated region fallthrough
CT: control target
= control target key end

     0   :  { %v1990_v0 = vmov 0.0   ;;  %vm1991_vm0 = vmmov 0   ;;  %v161_v33 = vlaneseq  ;;  %vm399_vm1 = vcmask 523264   ;;  %s2628_s3 = inlined_call_operand.vmem [shape: f32[128,128], index: 3, kind: input, shape index: {}]   ;;  %s2629_s0 = inlined_call_operand.vmem [shape: f32[32,128], index: 0, kind: input, shape index: {}]   ;;  %s2630_s4 = inlined_call_operand.vmem [shape: f32[128,64], index: 4, kind: input, shape index: {}]   ;;  %s2631_s1 = inlined_call_operand.vmem [shape: f32[1,128], index: 1, kind: input, shape index: {}]   ;;  %s2632_s2 = inlined_call_operand.vmem [shape: f32[1,128], index: 2, kind: input, shape index: {}]   ;;  %s2633_s8 = inlined_call_operand.vmem [shape: f32[64,64], index: 8, kind: input, shape index: {}]   ;;  %s2634_s5 = inlined_call_operand.vmem [shape: f32[1,64], index: 5, kind: input, shape index: {}]   ;;  %s2635_s9 = inlined_call_operand.vmem [shape: f32[32,32], index: 9, kind: input, shape index: {}]   ;;  %s2636_s10 = inlined_call_operand.vmem [shape: f32[32,32], index: 10, kind: input, shape index: {}]   ;;  %s2637_s6 = inlined_call_operand.vmem [shape: f32[1,64], index: 6, kind: input, shape index: {}]   ;;  %s2638_s7 = inlined_call_operand.vmem [shape: f32[1,64], index: 7, kind: input, shape index: {}]   ;;  %s2639_s12 = inlined_call_operand.vmem [shape: f32[64,64], index: 12, kind: input, shape index: {}]   ;;  %s2640_s11 = inlined_call_operand.vmem [shape: f32[64,64], index: 11, kind: input, shape index: {}]   ;;  %s2641_s13 = inlined_call_operand.vmem [shape: f32[64,64], index: 13, kind: input, shape index: {}]   ;;  %s2642_s14 = inlined_call_operand.vmem [shape: f32[1,64], index: 14, kind: input, shape index: {}]   ;;  %s2643_s17 = inlined_call_operand.vmem [shape: f32[64,128], index: 17, kind: input, shape index: {}]   ;;  %s2644_s15 = inlined_call_operand.vmem [shape: f32[1,64], index: 15, kind: input, shape index: {}]   ;;  %s2645_s16 = inlined_call_operand.vmem [shape: f32[1,64], index: 16, kind: input, shape index: {}]   ;;  %s2646_s18 = inlined_call_operand.vmem [shape: f32[1,128], index: 18, kind: input, shape index: {}]   ;;  %s2647_s19 = inlined_call_operand.vmem [shape: f32[32,128], index: 19, kind: output, shape index: {}]  }
   0x1   :  { %2651 = sst [smem:[#allocation2_spill]] %s2628_s3  ;;  %1678 = vmatprep.subr.mxu0 %v1990_v0  ;;  %1710 = vmatprep.mubr.msk.f32.mxu0 %vm1991_vm0, %v1990_v0  ;;  %vm619_vm2 = vcmask 261120  }
   0x2   :  { %2652 = sst [smem:[#allocation3_spill]] %s2629_s0  ;;  %1713 = vmatprep.subr.mxu1 %v1990_v0  ;;  %1745 = vmatprep.mubr.msk.f32.mxu1 %vm1991_vm0, %v1990_v0  ;;  %v162_v34 = vshrl.u32 %v161_v33, 7 }
   0x3   :  { %2653 = sst [smem:[#allocation4_spill]] %s2630_s4 }
   0x4   :  { %2654 = sst [smem:[#allocation5_spill]] %s2631_s1  ;;  %v2210_v35 = vsub.s32 0, %v162_v34  ;;  %v1489_v34 = vld [vmem:[%s2634_s5] ss:$0 sm:$0xff] }
   0x5   :  { %s2655_s20 = sld [smem:[#allocation2_spill]] }
   0x6   :  { %s2656_s26 = sld [smem:[#allocation3_spill]] }
   0x7   :  { %s2657_s21 = sld [smem:[#allocation4_spill]] }
   0x8   :  { %s2658_s1 = sld [smem:[#allocation5_spill]] }
   0xb   :  { %v81_v1 = vld [vmem:[%s2655_s20 + $0x78] sm:$0xff]  ;;  %v80_v2 = vld [vmem:[%s2655_s20 + $0x70] sm:$0xff]  ;;  %v79_v3 = vld [vmem:[%s2655_s20 + $0x68] sm:$0xff] }
   0xc   :  { %1679 = vmatpush3.msra.mxu0 %v81_v1  ;;  %1714 = vmatpush3.msra.mxu1 %v81_v1  ;;  %v78_v4 = vld [vmem:[%s2655_s20 + $0x60] sm:$0xff]  ;;  %v2119_v6 = vld [vmem:[%s2656_s26 + $0x8] sm:$0xff]  ;;  %v77_v7 = vld [vmem:[%s2655_s20 + $0x58] sm:$0xff] }
   0xd   :  { %1680 = vmatprep.subr.mxu0 %v1990_v0  ;;  %1715 = vmatprep.subr.mxu1 %v1990_v0  ;;  %v2114_v5 = vld [vmem:[%s2656_s26] sm:$0xff]  ;;  %v2129_v8 = vld [vmem:[%s2656_s26 + $0x10] sm:$0xff]  ;;  %v2136_v10 = vld [vmem:[%s2656_s26 + $0x18] sm:$0xff] }
   0xe   :  { %1681 = vmatpush3.msra.mxu0 %v80_v2  ;;  %1716 = vmatpush3.msra.mxu1 %v80_v2  ;;  %v82_v9 = vadd.f32 %v2119_v6, %v2114_v5  ;;  %v76_v11 = vld [vmem:[%s2655_s20 + $0x50] sm:$0xff]  ;;  %v75_v13 = vld [vmem:[%s2655_s20 + $0x48] sm:$0xff]  ;;  %v74_v15 = vld [vmem:[%s2655_s20 + $0x40] sm:$0xff] }
   0xf   :  { %1682 = vmatprep.subr.mxu0 %v1990_v0  ;;  %1717 = vmatprep.subr.mxu1 %v1990_v0  ;;  %v73_v17 = vld [vmem:[%s2655_s20 + $0x38] sm:$0xff]  ;;  %v72_v19 = vld [vmem:[%s2655_s20 + $0x30] sm:$0xff]  ;;  %v71_v21 = vld [vmem:[%s2655_s20 + $0x28] sm:$0xff] }
  0x10   :  { %1683 = vmatpush3.msra.mxu0 %v79_v3  ;;  %1718 = vmatpush3.msra.mxu1 %v79_v3  ;;  %v83_v12 = vadd.f32 %v82_v9, %v2129_v8  ;;  %v70_v22 = vld [vmem:[%s2655_s20 + $0x20] sm:$0xff]  ;;  %v69_v24 = vld [vmem:[%s2655_s20 + $0x18] sm:$0xff]  ;;  %v68_v25 = vld [vmem:[%s2655_s20 + $0x10] sm:$0xff] }
  0x11   :  { %1684 = vmatprep.subr.mxu0 %v1990_v0  ;;  %1719 = vmatprep.subr.mxu1 %v1990_v0  ;;  %v67_v27 = vld [vmem:[%s2655_s20 + $0x8] sm:$0xff]  ;;  %v66_v28 = vld [vmem:[%s2655_s20] sm:$0xff]  ;;  %v298_v30 = vld [vmem:[%s2657_s21 + $0x78] sm:$0xff] }
  0x12   :  { %1685 = vmatpush3.msra.mxu0 %v78_v4  ;;  %1720 = vmatpush3.msra.mxu1 %v78_v4  ;;  %v84_v14 = vadd.f32 %v83_v12, %v2136_v10  ;;  %v297_v31 = vld [vmem:[%s2657_s21 + $0x70] sm:$0xff]  ;;  %v296_v32 = vld [vmem:[%s2657_s21 + $0x68] sm:$0xff]  ;;  %v295_v56 = vld [vmem:[%s2657_s21 + $0x60] sm:$0xff] }
  0x13   :  { %1686 = vmatprep.subr.mxu0 %v1990_v0  ;;  %1721 = vmatprep.subr.mxu1 %v1990_v0  ;;  %v294_v57 = vld [vmem:[%s2657_s21 + $0x58] sm:$0xff]  ;;  %v293_v58 = vld [vmem:[%s2657_s21 + $0x50] sm:$0xff]  ;;  %v292_v59 = vld [vmem:[%s2657_s21 + $0x48] sm:$0xff] }
  0x14   :  { %1687 = vmatpush3.msra.mxu0 %v77_v7  ;;  %1722 = vmatpush3.msra.mxu1 %v77_v7  ;;  %v85_v16 = vrot.slane %v84_v14, 4  ;;  %v291_v60 = vld [vmem:[%s2657_s21 + $0x40] sm:$0xff]  ;;  %v290_v61 = vld [vmem:[%s2657_s21 + $0x38] sm:$0xff]  ;;  %v289_v62 = vld [vmem:[%s2657_s21 + $0x30] sm:$0xff] }
  0x15   :  { %1688 = vmatprep.subr.mxu0 %v1990_v0  ;;  %1723 = vmatprep.subr.mxu1 %v1990_v0  ;;  %v288_v63 = vld [vmem:[%s2657_s21 + $0x28] sm:$0xff]  ;;  %v287_v1 = vld [vmem:[%s2657_s21 + $0x20] sm:$0xff]  ;;  %v286_v2 = vld [vmem:[%s2657_s21 + $0x18] sm:$0xff] }
  0x16   :  { %1689 = vmatpush3.msra.mxu0 %v76_v11  ;;  %1724 = vmatpush3.msra.mxu1 %v76_v11  ;;  %v86_v18 = vadd.f32 %v85_v16, %v84_v14  ;;  %v285_v3 = vld [vmem:[%s2657_s21 + $0x10] sm:$0xff]  ;;  %v284_v4 = vld [vmem:[%s2657_s21 + $0x8] sm:$0xff]  ;;  %v1487_v11 = vld [vmem:[%s2658_s1] ss:$0 sm:$0xff] }
  0x17   :  { %1690 = vmatprep.subr.mxu0 %v1990_v0  ;;  %1725 = vmatprep.subr.mxu1 %v1990_v0 }
  0x18   :  { %1691 = vmatpush3.msra.mxu0 %v75_v13  ;;  %1726 = vmatpush3.msra.mxu1 %v75_v13  ;;  %v87_v20 = vrot.slane %v86_v18, 2 }
  0x19   :  { %1692 = vmatprep.subr.mxu0 %v1990_v0  ;;  %1727 = vmatprep.subr.mxu1 %v1990_v0 }
  0x1a   :  { %1693 = vmatpush3.msra.mxu0 %v74_v15  ;;  %1728 = vmatpush3.msra.mxu1 %v74_v15  ;;  %v88_v23 = vadd.f32 %v87_v20, %v86_v18  ;;  %v1488_v15 = vld [vmem:[%s2632_s2] ss:$0 sm:$0xff] }
  0x1b   :  { %1694 = vmatprep.subr.mxu0 %v1990_v0  ;;  %1729 = vmatprep.subr.mxu1 %v1990_v0 }
  0x1c   :  { %1695 = vmatpush3.msra.mxu0 %v73_v17  ;;  %1730 = vmatpush3.msra.mxu1 %v73_v17  ;;  %v89_v26 = vrot.slane %v88_v23, 1 }
  0x1d   :  { %1696 = vmatprep.subr.mxu0 %v1990_v0  ;;  %1731 = vmatprep.subr.mxu1 %v1990_v0 }
  0x1e   :  { %1697 = vmatpush3.msra.mxu0 %v72_v19  ;;  %1732 = vmatpush3.msra.mxu1 %v72_v19  ;;  %v90_v29 = vadd.f32 %v89_v26, %v88_v23  ;;  %v2295_v26 = vld [vmem:[%s2633_s8 + $0x30] sm:$0xff] }
  0x1f   :  { %1698 = vmatprep.subr.mxu0 %v1990_v0  ;;  %1733 = vmatprep.subr.mxu1 %v1990_v0 }
  0x20   :  { %1699 = vmatpush3.msra.mxu0 %v71_v21  ;;  %1734 = vmatpush3.msra.mxu1 %v71_v21 }
  0x21   :  { %1700 = vmatprep.subr.mxu0 %v1990_v0  ;;  %1735 = vmatprep.subr.mxu1 %v1990_v0 }
  0x22   :  { %1701 = vmatpush3.msra.mxu0 %v70_v22  ;;  %1736 = vmatpush3.msra.mxu1 %v70_v22 }
  0x23   :  { %1702 = vmatprep.subr.mxu0 %v1990_v0  ;;  %1737 = vmatprep.subr.mxu1 %v1990_v0 }
  0x24   :  { %1703 = vmatpush3.msra.mxu0 %v69_v24  ;;  %1738 = vmatpush3.msra.mxu1 %v69_v24 }
  0x25   :  { %1704 = vmatprep.subr.mxu0 %v1990_v0  ;;  %1739 = vmatprep.subr.mxu1 %v1990_v0 }
  0x26   :  { %1705 = vmatpush3.msra.mxu0 %v68_v25  ;;  %1740 = vmatpush3.msra.mxu1 %v68_v25  ;;  %v2288_v25 = vld [vmem:[%s2633_s8 + $0x38] sm:$0xff] }
  0x27   :  { %1706 = vmatprep.subr.mxu0 %v1990_v0  ;;  %1741 = vmatprep.subr.mxu1 %v1990_v0 }
  0x28   :  { %1707 = vmatpush3.msra.mxu0 %v67_v27  ;;  %1742 = vmatpush3.msra.mxu1 %v67_v27  ;;  %v2302_v27 = vld [vmem:[%s2633_s8 + $0x28] sm:$0xff] }
  0x29   :  { %1708 = vmatprep.subr.mxu0 %v1990_v0  ;;  %1743 = vmatprep.subr.mxu1 %v1990_v0 }
  0x2a   :  { %1709 = vmatpush3.msra.mxu0 %v66_v28  ;;  %1744 = vmatpush3.msra.mxu1 %v66_v28  ;;  %v2309_v28 = vld [vmem:[%s2633_s8 + $0x20] sm:$0xff] }
  0x2b   :  { %1711 = vmatmul.mubr.f32.vlgmr.msra.gmra.mxu0 %v90_v29  ;;  %1786 = vmatprep.subr.mxu1 %v1990_v0  ;;  %v2316_v29 = vld [vmem:[%s2633_s8 + $0x18] sm:$0xff] }
  0x2c   :  { %1748 = vmatprep.subr.mxu0 %v298_v30 }
  0x2d   :  { %1749 = vmatpush3.msra.mxu0 %v298_v30  ;;  %v2323_v30 = vld [vmem:[%s2633_s8 + $0x10] sm:$0xff] }
  0x2e   :  { %1750 = vmatprep.subr.mxu0 %v297_v31 }
  0x2f   :  { %1751 = vmatpush3.msra.mxu0 %v297_v31  ;;  %v2330_v31 = vld [vmem:[%s2633_s8 + $0x8] sm:$0xff] }
  0x30   :  { %1752 = vmatprep.subr.mxu0 %v296_v32 }
  0x31   :  { %1753 = vmatpush3.msra.mxu0 %v296_v32  ;;  %v2337_v32 = vld [vmem:[%s2633_s8] sm:$0xff] }
  0x32   :  { %1754 = vmatprep.subr.mxu0 %v295_v56 }
  0x33   :  { %1755 = vmatpush3.msra.mxu0 %v295_v56 }
  0x34   :  { %1756 = vmatprep.subr.mxu0 %v294_v57 }
  0x35   :  { %1757 = vmatpush3.msra.mxu0 %v294_v57 }
  0x36   :  { %1758 = vmatprep.subr.mxu0 %v293_v58 }
  0x37   :  { %1759 = vmatpush3.msra.mxu0 %v293_v58 }
  0x38   :  { %1760 = vmatprep.subr.mxu0 %v292_v59 }
  0x39   :  { %1761 = vmatpush3.msra.mxu0 %v292_v59 }
  0x3a   :  { %1762 = vmatprep.subr.mxu0 %v291_v60 }
  0x3b   :  { %1763 = vmatpush3.msra.mxu0 %v291_v60 }
  0x3c   :  { %1764 = vmatprep.subr.mxu0 %v290_v61 }
  0x3d   :  { %1765 = vmatpush3.msra.mxu0 %v290_v61 }
  0x3e   :  { %1766 = vmatprep.subr.mxu0 %v289_v62 }
  0x3f   :  { %1767 = vmatpush3.msra.mxu0 %v289_v62 }
  0x40   :  { %1768 = vmatprep.subr.mxu0 %v288_v63 }
  0x41   :  { %1769 = vmatpush3.msra.mxu0 %v288_v63 }
  0x42   :  { %1770 = vmatprep.subr.mxu0 %v287_v1 }
  0x43   :  { %1771 = vmatpush3.msra.mxu0 %v287_v1 }
  0x44   :  { %1772 = vmatprep.subr.mxu0 %v286_v2 }
  0x45   :  { %1773 = vmatpush3.msra.mxu0 %v286_v2 }
  0x46   :  { %1774 = vmatprep.subr.mxu0 %v285_v3 }
  0x47   :  { %1775 = vmatpush3.msra.mxu0 %v285_v3 }
  0x48   :  { %1776 = vmatprep.subr.mxu0 %v284_v4 }
  0x49   :  { %1777 = vmatpush3.msra.mxu0 %v284_v4 }
  0xeb   :  { %v157_v36 = vpop.f32.mrf.mxu0 }
  0xec   :  { %v164_v37 = vrot.slane %v157_v36, %v2210_v35 }
  0xed   :  { %v1712_v38 = vpop.f32.mrf.mxu0 }
  0xee   :  { %v2214_v39 = vsub.f32 %v2114_v5, %v164_v37  ;;  %v2217_v40 = vsub.f32 %v2119_v6, %v164_v37  ;;  %v2220_v41 = vsub.f32 %v2129_v8, %v164_v37  ;;  %v2223_v42 = vsub.f32 %v2136_v10, %v164_v37  ;;  %v283_v5 = vld [vmem:[%s2657_s21] sm:$0xff] }
  0xef   :  { %1778 = vmatprep.subr.mxu0 %v283_v5 }
  0xf0   :  { %v169_v43 = vmul.f32 %v2214_v39, %v2214_v39  ;;  %v170_v44 = vmul.f32 %v2217_v40, %v2217_v40  ;;  %v171_v45 = vmul.f32 %v2220_v41, %v2220_v41  ;;  %v172_v47 = vmul.f32 %v2223_v42, %v2223_v42  ;;  %1779 = vmatpush3.msra.mxu0 %v283_v5 }
  0xf2   :  { %v173_v46 = vadd.f32 %v170_v44, %v169_v43 }
  0xf4   :  { %v174_v48 = vadd.f32 %v173_v46, %v171_v45 }
  0xf6   :  { %v175_v49 = vadd.f32 %v174_v48, %v172_v47 }
  0xf8   :  { %v176_v50 = vrot.slane %v175_v49, 4 }
  0xfa   :  { %v177_v51 = vadd.f32 %v176_v50, %v175_v49 }
  0xfc   :  { %v178_v52 = vrot.slane %v177_v51, 2 }
  0xfe   :  { %v179_v53 = vadd.f32 %v178_v52, %v177_v51 }
 0x100   :  { %v180_v54 = vrot.slane %v179_v53, 1 }
 0x102   :  { %v181_v55 = vadd.f32 %v180_v54, %v179_v53 }
 0x104   :  { %1746 = vmatmul.mubr.f32.vlgmr.msra.gmra.mxu1 %v181_v55 }
 0x105   :  { %1802 = vmatprep.mubr.msk.f32.mxu1 %vm1991_vm0, %v1990_v0  ;;  %1787 = vmatpush3.msra.mxu1 %v2288_v25 }
 0x106   :  { %1788 = vmatprep.subr.mxu1 %v1990_v0 }
 0x107   :  { %1789 = vmatpush3.msra.mxu1 %v2295_v26 }
 0x108   :  { %1790 = vmatprep.subr.mxu1 %v1990_v0 }
 0x109   :  { %1791 = vmatpush3.msra.mxu1 %v2302_v27 }
 0x10a   :  { %1792 = vmatprep.subr.mxu1 %v1990_v0 }
 0x10b   :  { %1793 = vmatpush3.msra.mxu1 %v2309_v28 }
 0x10c   :  { %1794 = vmatprep.subr.mxu1 %v1990_v0 }
 0x10d   :  { %1795 = vmatpush3.msra.mxu1 %v2316_v29 }
 0x10e   :  { %1796 = vmatprep.subr.mxu1 %v1990_v0 }
 0x10f   :  { %1797 = vmatpush3.msra.mxu1 %v2323_v30 }
 0x110   :  { %1798 = vmatprep.subr.mxu1 %v1990_v0 }
 0x111   :  { %1799 = vmatpush3.msra.mxu1 %v2330_v31 }
 0x112   :  { %1800 = vmatprep.subr.mxu1 %v1990_v0 }
 0x113   :  { %1801 = vmatpush3.msra.mxu1 %v2337_v32 }
 0x114   :  { %1805 = vmatprep.subr.mxu1 %v1990_v0 }
 0x1c4   :  { %v248_v6 = vpop.f32.mrf.mxu1 }
 0x1c5   :  { %v249_v7 = vadd.f32 1e-05, %v248_v6 }
 0x1c6   :  { %v1747_v8 = vpop.f32.mrf.mxu1 }
 0x1c7   :  { %1980 = vrsqrt.f32 %v249_v7 }
 0x1d4   :  { %v1981_v9 = vpop.eup %1980 }
 0x1d5   :  { %v256_v10 = vrot.slane %v1981_v9, %v2210_v35 }
 0x1d7   :  { %v257_v12 = vmul.f32 %v256_v10, %v2214_v39  ;;  %v258_v13 = vmul.f32 %v256_v10, %v2217_v40  ;;  %v259_v14 = vmul.f32 %v256_v10, %v2220_v41  ;;  %v260_v16 = vmul.f32 %v256_v10, %v2223_v42 }
 0x1d9   :  { %v268_v17 = vmul.f32 %v1487_v11, %v257_v12  ;;  %v269_v18 = vmul.f32 %v1487_v11, %v258_v13  ;;  %v270_v19 = vmul.f32 %v1487_v11, %v259_v14  ;;  %v271_v22 = vmul.f32 %v1487_v11, %v260_v16 }
 0x1db   :  { %v279_v20 = vadd.f32 %v1488_v15, %v268_v17  ;;  %v280_v21 = vadd.f32 %v1488_v15, %v269_v18  ;;  %v281_v23 = vadd.f32 %v1488_v15, %v270_v19  ;;  %v282_v24 = vadd.f32 %v1488_v15, %v271_v22  ;;  %v615_v17 = vld [vmem:[%s2635_s9] sm:$0xff] }
 0x1dc   :  { %v717_v18 = vld [vmem:[%s2636_s10] sm:$0xff] }
 0x1dd   :  { %1780 = vmatprep.mubr.f32.mxu0 %v279_v20 }
 0x1de   :  { %1781 = vmatmul.mubr.f32.vlgmr.msra.gmra.mxu0 %v280_v21 }
 0x1df   :  { %1783 = vmatprep.mubr.f32.mxu0 %v281_v23 }
 0x1e2   :  { %1784 = vmatmul.mubr.f32.gmra.mxu0 %v282_v24  ;;  %v1492_v24 = vld [vmem:[%s2637_s6] ss:$0 sm:$0xff] }
 0x1e3   :  { %1832 = vmatprep.mubr.msk.f32.mxu0 %vm619_vm2, %v615_v17 }
 0x29e   :  { %v1782_v33 = vpop.f32.mrf.mxu0 }
 0x29f   :  { %v378_v37 = vadd.f32 %v1782_v33, %v1489_v34 }
 0x2a0   :  { %v372_v36 = vpop.f32.mrf.mxu0 }
 0x2a1   :  { %v373_v38 = vadd.f32 %v1489_v34, %v372_v36  ;;  %v401_v42 = vsel %vm399_vm1, %v378_v37, 0.0 }
 0x2a2   :  { %v1785_v39 = vpop.f32.mrf.mxu0 }
 0x2a3   :  { %v400_v40 = vsel %vm399_vm1, %v373_v38, 0.0  ;;  %v388_v43 = vadd.f32 %v1785_v39, %v1489_v34 }
 0x2a4   :  { %v382_v41 = vpop.f32.mrf.mxu0  ;;  %v402_v45 = vadd.f32 %v401_v42, %v400_v40 }
 0x2a5   :  { %v383_v44 = vadd.f32 %v1489_v34, %v382_v41  ;;  %v405_v48 = vsel %vm399_vm1, %v388_v43, 0.0 }
 0x2a7   :  { %v403_v46 = vsel %vm399_vm1, %v383_v44, 0.0 }
 0x2a8   :  { %v404_v47 = vadd.f32 %v403_v46, %v402_v45 }
 0x2aa   :  { %v406_v49 = vadd.f32 %v405_v48, %v404_v47  ;;  %v616_v47 = vld [vmem:[%s2635_s9 + $0x8] sm:$0xff] }
 0x2ab   :  { %v718_v48 = vld [vmem:[%s2636_s10 + $0x8] sm:$0xff] }
 0x2ac   :  { %v407_v50 = vrot.slane %v406_v49, 4 }
 0x2ae   :  { %v408_v51 = vadd.f32 %v407_v50, %v406_v49  ;;  %v833_v49 = vld [vmem:[%s2639_s12 + $0x38] sm:$0xff]  ;;  %v617_v50 = vld [vmem:[%s2635_s9 + $0x10] sm:$0xff] }
 0x2b0   :  { %v409_v52 = vrot.slane %v408_v51, 2 }
 0x2b2   :  { %v410_v53 = vadd.f32 %v409_v52, %v408_v51  ;;  %v719_v51 = vld [vmem:[%s2636_s10 + $0x10] sm:$0xff] }
 0x2b3   :  { %v832_v52 = vld [vmem:[%s2639_s12 + $0x30] sm:$0xff] }
 0x2b4   :  { %v411_v54 = vrot.slane %v410_v53, 1 }
 0x2b6   :  { %v412_v55 = vadd.f32 %v411_v54, %v410_v53  ;;  %v825_v53 = vld [vmem:[%s2640_s11 + $0x38] sm:$0xff] }
 0x2b7   :  { %v720_v54 = vld [vmem:[%s2636_s10 + $0x18] sm:$0xff] }
 0x2b8   :  { %1803 = vmatmul.mubr.msk.f32.vlgmr.msra.gmra.mxu1 %vm399_vm1, %v412_v55  ;;  %v618_v55 = vld [vmem:[%s2635_s9 + $0x18] sm:$0xff] }
 0x2b9   :  { %1806 = vmatpush3.msra.mxu1 %v2288_v25  ;;  %1821 = vmatprep.mubr.msk.f32.mxu1 %vm1991_vm0, %v1990_v0 }
 0x2ba   :  { %1807 = vmatprep.subr.mxu1 %v1990_v0 }
 0x2bb   :  { %1808 = vmatpush3.msra.mxu1 %v2295_v26 }
 0x2bc   :  { %1809 = vmatprep.subr.mxu1 %v1990_v0 }
 0x2bd   :  { %1810 = vmatpush3.msra.mxu1 %v2302_v27 }
 0x2be   :  { %1811 = vmatprep.subr.mxu1 %v1990_v0 }
 0x2bf   :  { %1812 = vmatpush3.msra.mxu1 %v2309_v28 }
 0x2c0   :  { %1813 = vmatprep.subr.mxu1 %v1990_v0 }
 0x2c1   :  { %1814 = vmatpush3.msra.mxu1 %v2316_v29 }
 0x2c2   :  { %1815 = vmatprep.subr.mxu1 %v1990_v0 }
 0x2c3   :  { %1816 = vmatpush3.msra.mxu1 %v2323_v30 }
 0x2c4   :  { %1817 = vmatprep.subr.mxu1 %v1990_v0 }
 0x2c5   :  { %1818 = vmatpush3.msra.mxu1 %v2330_v31 }
 0x2c6   :  { %1819 = vmatprep.subr.mxu1 %v1990_v0 }
 0x2c7   :  { %1820 = vmatpush3.msra.mxu1 %v2337_v32 }
 0x378   :  { %v482_v56 = vpop.f32.mrf.mxu1 }
 0x379   :  { %v489_v57 = vrot.slane %v482_v56, %v2210_v35  ;;  %v831_v56 = vld [vmem:[%s2639_s12 + $0x28] sm:$0xff] }
 0x37a   :  { %v1804_v58 = vpop.f32.mrf.mxu1 }
 0x37b   :  { %v490_v59 = vsub.f32 %v373_v38, %v489_v57  ;;  %v491_v60 = vsub.f32 %v378_v37, %v489_v57  ;;  %v492_v61 = vsub.f32 %v383_v44, %v489_v57  ;;  %v493_v62 = vsub.f32 %v388_v43, %v489_v57  ;;  %v1493_v37 = vld [vmem:[%s2638_s7] ss:$0 sm:$0xff]  ;;  %v824_v58 = vld [vmem:[%s2640_s11 + $0x30] sm:$0xff] }
 0x37c   :  { %v830_v57 = vld [vmem:[%s2639_s12 + $0x20] sm:$0xff] }
 0x37d   :  { %v494_v63 = vmul.f32 %v490_v59, %v490_v59  ;;  %v495_v1 = vmul.f32 %v491_v60, %v491_v60  ;;  %v496_v2 = vmul.f32 %v492_v61, %v492_v61  ;;  %v497_v3 = vmul.f32 %v493_v62, %v493_v62 }
 0x37f   :  { %v498_v4 = vsel %vm399_vm1, %v494_v63, 0.0  ;;  %v499_v5 = vsel %vm399_vm1, %v495_v1, 0.0  ;;  %v501_v7 = vsel %vm399_vm1, %v496_v2, 0.0  ;;  %v503_v9 = vsel %vm399_vm1, %v497_v3, 0.0  ;;  %v827_v63 = vld [vmem:[%s2639_s12 + $0x8] sm:$0xff]  ;;  %v821_v1 = vld [vmem:[%s2640_s11 + $0x18] sm:$0xff] }
 0x380   :  { %v500_v6 = vadd.f32 %v499_v5, %v498_v4  ;;  %v826_v2 = vld [vmem:[%s2639_s12] sm:$0xff]  ;;  %v820_v3 = vld [vmem:[%s2640_s11 + $0x10] sm:$0xff]  ;;  %v1035_v4 = vld [vmem:[%s2641_s13 + $0x38] sm:$0xff] }
 0x381   :  { %v1034_v5 = vld [vmem:[%s2641_s13 + $0x30] sm:$0xff] }
 0x382   :  { %v502_v8 = vadd.f32 %v501_v7, %v500_v6  ;;  %v1033_v6 = vld [vmem:[%s2641_s13 + $0x28] sm:$0xff]  ;;  %v1032_v7 = vld [vmem:[%s2641_s13 + $0x20] sm:$0xff] }
 0x384   :  { %v504_v10 = vadd.f32 %v503_v9, %v502_v8  ;;  %v1031_v8 = vld [vmem:[%s2641_s13 + $0x18] sm:$0xff]  ;;  %v1030_v9 = vld [vmem:[%s2641_s13 + $0x10] sm:$0xff] }
 0x386   :  { %v505_v11 = vrot.slane %v504_v10, 4 }
 0x388   :  { %v506_v12 = vadd.f32 %v505_v11, %v504_v10  ;;  %v819_v10 = vld [vmem:[%s2640_s11 + $0x8] sm:$0xff] }
 0x389   :  { %v1029_v11 = vld [vmem:[%s2641_s13 + $0x8] sm:$0xff] }
 0x38a   :  { %v507_v13 = vrot.slane %v506_v12, 2 }
 0x38c   :  { %v508_v14 = vadd.f32 %v507_v13, %v506_v12  ;;  %v818_v12 = vld [vmem:[%s2640_s11] sm:$0xff] }
 0x38d   :  { %v1028_v13 = vld [vmem:[%s2641_s13] sm:$0xff] }
 0x38e   :  { %v509_v15 = vrot.slane %v508_v14, 1 }
 0x390   :  { %v510_v16 = vadd.f32 %v509_v15, %v508_v14 }
 0x392   :  { %1822 = vmatmul.mubr.msk.f32.vlgmr.msra.gmra.mxu1 %vm399_vm1, %v510_v16 }
 0x393   :  { %1846 = vmatprep.mubr.msk.f32.mxu1 %vm619_vm2, %v717_v18 }
 0x452   :  { %v580_v19 = vpop.f32.mrf.mxu1 }
 0x453   :  { %v581_v20 = vadd.f32 1e-05, %v580_v19 }
 0x454   :  { %v1823_v21 = vpop.f32.mrf.mxu1 }
 0x455   :  { %1982 = vrsqrt.f32 %v581_v20 }
 0x462   :  { %v1983_v22 = vpop.eup %1982 }
 0x463   :  { %v588_v23 = vrot.slane %v1983_v22, %v2210_v35 }
 0x465   :  { %v592_v33 = vmul.f32 %v588_v23, %v493_v62  ;;  %v591_v34 = vmul.f32 %v588_v23, %v492_v61  ;;  %v590_v36 = vmul.f32 %v588_v23, %v491_v60  ;;  %v589_v40 = vmul.f32 %v588_v23, %v490_v59  ;;  %v829_v59 = vld [vmem:[%s2639_s12 + $0x18] sm:$0xff]  ;;  %v823_v60 = vld [vmem:[%s2640_s11 + $0x28] sm:$0xff]  ;;  %v828_v61 = vld [vmem:[%s2639_s12 + $0x10] sm:$0xff] }
 0x466   :  { %v822_v62 = vld [vmem:[%s2640_s11 + $0x20] sm:$0xff] }
 0x467   :  { %v603_v38 = vmul.f32 %v1492_v24, %v592_v33  ;;  %v602_v39 = vmul.f32 %v1492_v24, %v591_v34  ;;  %v601_v42 = vmul.f32 %v1492_v24, %v590_v36  ;;  %v600_v44 = vmul.f32 %v1492_v24, %v589_v40 }
 0x469   :  { %v2387_v41 = vadd.f32 %v1493_v37, %v603_v38  ;;  %v2391_v43 = vadd.f32 %v1493_v37, %v602_v39  ;;  %v2397_v45 = vadd.f32 %v1493_v37, %v601_v42  ;;  %v611_v46 = vadd.f32 %v1493_v37, %v600_v44 }
 0x46b   :  { %1824 = vmatprep.subr.mxu0 %v2387_v41  ;;  %1838 = vmatprep.subr.mxu1 %v2387_v41 }
 0x46c   :  { %1825 = vmatpush3.msra.mxu0 %v2387_v41  ;;  %1839 = vmatpush3.msra.mxu1 %v2387_v41 }
 0x46d   :  { %1826 = vmatprep.subr.mxu0 %v2391_v43  ;;  %1840 = vmatprep.subr.mxu1 %v2391_v43 }
 0x46e   :  { %1827 = vmatpush3.msra.mxu0 %v2391_v43  ;;  %1841 = vmatpush3.msra.mxu1 %v2391_v43 }
 0x46f   :  { %1828 = vmatprep.subr.mxu0 %v2397_v45  ;;  %1842 = vmatprep.subr.mxu1 %v2397_v45 }
 0x470   :  { %1829 = vmatpush3.msra.mxu0 %v2397_v45  ;;  %1843 = vmatpush3.msra.mxu1 %v2397_v45 }
 0x471   :  { %1830 = vmatprep.subr.mxu0 %v611_v46  ;;  %1844 = vmatprep.subr.mxu1 %v611_v46 }
 0x472   :  { %1831 = vmatpush3.msra.mxu0 %v611_v46  ;;  %1845 = vmatpush3.msra.mxu1 %v611_v46 }
 0x473   :  { %1833 = vmatmul.mubr.msk.f32.vlgmr.msra.gmra.mxu0 %vm619_vm2, %v616_v47  ;;  %1847 = vmatmul.mubr.msk.f32.vlgmr.msra.gmra.mxu1 %vm619_vm2, %v718_v48 }
 0x474   :  { %1852 = vmatprep.subr.mxu0 %v833_v49  ;;  %1835 = vmatprep.mubr.msk.f32.mxu0 %vm619_vm2, %v617_v50 }
 0x475   :  { %1853 = vmatpush3.msra.mxu0 %v833_v49  ;;  %1849 = vmatprep.mubr.msk.f32.mxu1 %vm619_vm2, %v719_v51 }
 0x476   :  { %1854 = vmatprep.subr.mxu0 %v832_v52  ;;  %1874 = vmatprep.subr.mxu1 %v825_v53 }
 0x477   :  { %1855 = vmatpush3.msra.mxu0 %v832_v52  ;;  %1850 = vmatmul.mubr.msk.f32.gmra.mxu1 %vm619_vm2, %v720_v54 }
 0x478   :  { %1836 = vmatmul.mubr.msk.f32.gmra.mxu0 %vm619_vm2, %v618_v55  ;;  %1856 = vmatprep.subr.mxu0 %v831_v56 }
 0x479   :  { %1857 = vmatpush3.msra.mxu0 %v831_v56  ;;  %1868 = vmatprep.mubr.msk.f32.mxu0 %vm399_vm1, %v611_v46 }
 0x47a   :  { %1858 = vmatprep.subr.mxu0 %v830_v57  ;;  %1875 = vmatpush3.msra.mxu1 %v825_v53 }
 0x47b   :  { %1859 = vmatpush3.msra.mxu0 %v830_v57  ;;  %1876 = vmatprep.subr.mxu1 %v824_v58 }
 0x47c   :  { %1860 = vmatprep.subr.mxu0 %v829_v59  ;;  %1877 = vmatpush3.msra.mxu1 %v824_v58 }
 0x47d   :  { %1861 = vmatpush3.msra.mxu0 %v829_v59  ;;  %1878 = vmatprep.subr.mxu1 %v823_v60 }
 0x47e   :  { %1862 = vmatprep.subr.mxu0 %v828_v61  ;;  %1879 = vmatpush3.msra.mxu1 %v823_v60 }
 0x47f   :  { %1863 = vmatpush3.msra.mxu0 %v828_v61  ;;  %1880 = vmatprep.subr.mxu1 %v822_v62 }
 0x480   :  { %1864 = vmatprep.subr.mxu0 %v827_v63  ;;  %1881 = vmatpush3.msra.mxu1 %v822_v62 }
 0x481   :  { %1865 = vmatpush3.msra.mxu0 %v827_v63  ;;  %1882 = vmatprep.subr.mxu1 %v821_v1 }
 0x482   :  { %1866 = vmatprep.subr.mxu0 %v826_v2  ;;  %1883 = vmatpush3.msra.mxu1 %v821_v1 }
 0x483   :  { %1867 = vmatpush3.msra.mxu0 %v826_v2  ;;  %1884 = vmatprep.subr.mxu1 %v820_v3 }
 0x484   :  { %1869 = vmatmul.mubr.msk.f32.vlgmr.msra.gmra.mxu0 %vm399_vm1, %v2397_v45  ;;  %1896 = vmatprep.subr.mxu0 %v1035_v4 }
 0x485   :  { %1871 = vmatprep.mubr.msk.f32.mxu0 %vm399_vm1, %v2391_v43  ;;  %1897 = vmatpush3.msra.mxu0 %v1035_v4 }
 0x486   :  { %1898 = vmatprep.subr.mxu0 %v1034_v5  ;;  %1885 = vmatpush3.msra.mxu1 %v820_v3 }
 0x487   :  { %1899 = vmatpush3.msra.mxu0 %v1034_v5  ;;  %1886 = vmatprep.subr.mxu1 %v819_v10 }
 0x488   :  { %1872 = vmatmul.mubr.msk.f32.gmra.mxu0 %vm399_vm1, %v2387_v41  ;;  %1900 = vmatprep.subr.mxu0 %v1033_v6 }
 0x489   :  { %1901 = vmatpush3.msra.mxu0 %v1033_v6  ;;  %1887 = vmatpush3.msra.mxu1 %v819_v10 }
 0x48a   :  { %1902 = vmatprep.subr.mxu0 %v1032_v7  ;;  %1888 = vmatprep.subr.mxu1 %v818_v12 }
 0x48b   :  { %1903 = vmatpush3.msra.mxu0 %v1032_v7  ;;  %1889 = vmatpush3.msra.mxu1 %v818_v12 }
 0x48c   :  { %1904 = vmatprep.subr.mxu0 %v1031_v8  ;;  %1918 = vmatprep.subr.mxu1 %v1990_v0 }
 0x48d   :  { %1905 = vmatpush3.msra.mxu0 %v1031_v8 }
 0x48e   :  { %1906 = vmatprep.subr.mxu0 %v1030_v9 }
 0x48f   :  { %1907 = vmatpush3.msra.mxu0 %v1030_v9 }
 0x490   :  { %1908 = vmatprep.subr.mxu0 %v1029_v11 }
 0x491   :  { %1909 = vmatpush3.msra.mxu0 %v1029_v11 }
 0x492   :  { %1910 = vmatprep.subr.mxu0 %v1028_v13 }
 0x493   :  { %1911 = vmatpush3.msra.mxu0 %v1028_v13 }
 0x494   :  { %1937 = vmatprep.subr.mxu0 %v1990_v0 }
 0x533   :  { %v1834_v14 = vpop.f32.mrf.mxu0  ;;  %v1848_v15 = vpop.f32.mrf.mxu1 }
 0x535   :  { %v698_v16 = vpop.f32.mrf.mxu0  ;;  %v799_v17 = vpop.f32.mrf.mxu1 }
 0x536   :  { %1890 = vmatprep.mubr.msk.f32.mxu1 %vm399_vm1, %v698_v16  ;;  %1912 = vmatprep.mubr.msk.f32.mxu0 %vm399_vm1, %v799_v17 }
 0x537   :  { %v1851_v18 = vpop.f32.mrf.mxu1  ;;  %1891 = vmatmul.mubr.msk.f32.vlgmr.msra.gmra.mxu1 %vm399_vm1, %v1834_v14  ;;  %1913 = vmatmul.mubr.msk.f32.vlgmr.msra.gmra.mxu0 %vm399_vm1, %v1848_v15 }
 0x538   :  { %v1837_v19 = vpop.f32.mrf.mxu0  ;;  %1919 = vmatpush3.msra.mxu1 %v2288_v25  ;;  %1938 = vmatpush3.msra.mxu0 %v2288_v25 }
 0x539   :  { %v809_v20 = vpop.f32.mrf.mxu1  ;;  %1920 = vmatprep.subr.mxu1 %v1990_v0  ;;  %1939 = vmatprep.subr.mxu0 %v1990_v0 }
 0x53a   :  { %v708_v21 = vpop.f32.mrf.mxu0  ;;  %1915 = vmatprep.mubr.msk.f32.mxu0 %vm399_vm1, %v809_v20  ;;  %1921 = vmatpush3.msra.mxu1 %v2295_v26 }
 0x53b   :  { %1893 = vmatprep.mubr.msk.f32.mxu1 %vm399_vm1, %v708_v21  ;;  %1916 = vmatmul.mubr.msk.f32.gmra.mxu0 %vm399_vm1, %v1851_v18  ;;  %v1370_v21 = vld [vmem:[%s2643_s17 + $0x38] sm:$0xff] }
 0x53c   :  { %1894 = vmatmul.mubr.msk.f32.gmra.mxu1 %vm399_vm1, %v1837_v19  ;;  %1922 = vmatprep.subr.mxu1 %v1990_v0 }
 0x53d   :  { %1923 = vmatpush3.msra.mxu1 %v2302_v27  ;;  %1934 = vmatprep.mubr.msk.f32.mxu1 %vm1991_vm0, %v1990_v0 }
 0x53e   :  { %1924 = vmatprep.subr.mxu1 %v1990_v0  ;;  %1940 = vmatpush3.msra.mxu0 %v2295_v26 }
 0x53f   :  { %1925 = vmatpush3.msra.mxu1 %v2309_v28  ;;  %1941 = vmatprep.subr.mxu0 %v1990_v0 }
 0x540   :  { %1926 = vmatprep.subr.mxu1 %v1990_v0  ;;  %1942 = vmatpush3.msra.mxu0 %v2302_v27 }
 0x541   :  { %1927 = vmatpush3.msra.mxu1 %v2316_v29  ;;  %1943 = vmatprep.subr.mxu0 %v1990_v0 }
 0x542   :  { %1928 = vmatprep.subr.mxu1 %v1990_v0  ;;  %1944 = vmatpush3.msra.mxu0 %v2309_v28 }
 0x543   :  { %1929 = vmatpush3.msra.mxu1 %v2323_v30  ;;  %1945 = vmatprep.subr.mxu0 %v1990_v0 }
 0x544   :  { %1930 = vmatprep.subr.mxu1 %v1990_v0  ;;  %1946 = vmatpush3.msra.mxu0 %v2316_v29  ;;  %v1870_v25 = vpop.f32.mrf.mxu0 }
 0x545   :  { %1931 = vmatpush3.msra.mxu1 %v2330_v31  ;;  %1947 = vmatprep.subr.mxu0 %v1990_v0 }
 0x546   :  { %1932 = vmatprep.subr.mxu1 %v1990_v0  ;;  %1948 = vmatpush3.msra.mxu0 %v2323_v30  ;;  %v912_v26 = vpop.f32.mrf.mxu0 }
 0x547   :  { %1933 = vmatpush3.msra.mxu1 %v2337_v32  ;;  %1949 = vmatprep.subr.mxu0 %v1990_v0 }
 0x548   :  { %1950 = vmatpush3.msra.mxu0 %v2330_v31  ;;  %1953 = vmatprep.mubr.msk.f32.mxu0 %vm1991_vm0, %v1990_v0  ;;  %v1873_v27 = vpop.f32.mrf.mxu0  ;;  %v1514_v31 = vld [vmem:[%s2642_s14] ss:$0 sm:$0xff] }
 0x549   :  { %1951 = vmatprep.subr.mxu0 %v1990_v0  ;;  %1956 = vmatprep.subr.mxu1 %v1370_v21 }
 0x54a   :  { %1952 = vmatpush3.msra.mxu0 %v2337_v32  ;;  %v922_v28 = vpop.f32.mrf.mxu0 }
 0x5f7   :  { %v1892_v29 = vpop.f32.mrf.mxu1  ;;  %v1914_v22 = vpop.f32.mrf.mxu0 }
 0x5f8   :  { %v1015_v30 = vadd.f32 %v1892_v29, %v1870_v25  ;;  %v1369_v25 = vld [vmem:[%s2643_s17 + $0x30] sm:$0xff] }
 0x5f9   :  { %v1009_v23 = vpop.f32.mrf.mxu1  ;;  %v1114_v24 = vpop.f32.mrf.mxu0  ;;  %v1365_v29 = vld [vmem:[%s2643_s17 + $0x10] sm:$0xff] }
 0x5fa   :  { %v1010_v33 = vadd.f32 %v1009_v23, %v912_v26  ;;  %v1134_v34 = vadd.f32 %v1914_v22, %v1015_v30  ;;  %v1368_v26 = vld [vmem:[%s2643_s17 + $0x28] sm:$0xff]  ;;  %v1363_v30 = vld [vmem:[%s2643_s17] sm:$0xff] }
 0x5fb   :  { %v1917_v0 = vpop.f32.mrf.mxu0  ;;  %v1364_v22 = vld [vmem:[%s2643_s17 + $0x8] sm:$0xff] }
 0x5fc   :  { %v1133_v36 = vadd.f32 %v1114_v24, %v1010_v33  ;;  %v1895_v37 = vpop.f32.mrf.mxu1  ;;  %v1145_v40 = vadd.f32 %v1514_v31, %v1134_v34 }
 0x5fd   :  { %v1025_v38 = vadd.f32 %v1895_v37, %v1873_v27  ;;  %v1124_v43 = vpop.f32.mrf.mxu0  ;;  %v1367_v27 = vld [vmem:[%s2643_s17 + $0x20] sm:$0xff] }
 0x5fe   :  { %v1144_v32 = vadd.f32 %v1514_v31, %v1133_v36  ;;  %v1019_v39 = vpop.f32.mrf.mxu1  ;;  %v1149_v46 = vsel %vm399_vm1, %v1145_v40, 0.0  ;;  %v1517_v36 = vld [vmem:[%s2644_s15] ss:$0 sm:$0xff] }
 0x5ff   :  { %v1136_v41 = vadd.f32 %v1917_v0, %v1025_v38  ;;  %v1020_v42 = vadd.f32 %v1019_v39, %v922_v28  ;;  %v1366_v28 = vld [vmem:[%s2643_s17 + $0x18] sm:$0xff] }
 0x600   :  { %v1148_v44 = vsel %vm399_vm1, %v1144_v32, 0.0 }
 0x601   :  { %v1135_v45 = vadd.f32 %v1124_v43, %v1020_v42  ;;  %v1147_v47 = vadd.f32 %v1514_v31, %v1136_v41  ;;  %v1150_v49 = vadd.f32 %v1149_v46, %v1148_v44 }
 0x603   :  { %v1146_v48 = vadd.f32 %v1514_v31, %v1135_v45  ;;  %v1153_v52 = vsel %vm399_vm1, %v1147_v47, 0.0 }
 0x605   :  { %v1151_v50 = vsel %vm399_vm1, %v1146_v48, 0.0 }
 0x606   :  { %v1152_v51 = vadd.f32 %v1151_v50, %v1150_v49 }
 0x608   :  { %v1154_v53 = vadd.f32 %v1153_v52, %v1152_v51  ;;  %v1986_v51 = vld [vmem:[%s2656_s26 + $0x8] sm:$0xff] }
 0x60a   :  { %v1155_v54 = vrot.slane %v1154_v53, 4 }
 0x60c   :  { %v1156_v55 = vadd.f32 %v1155_v54, %v1154_v53 }
 0x60e   :  { %v1157_v56 = vrot.slane %v1156_v55, 2 }
 0x610   :  { %v1158_v57 = vadd.f32 %v1157_v56, %v1156_v55  ;;  %v1987_v55 = vld [vmem:[%s2656_s26] sm:$0xff] }
 0x612   :  { %v1159_v58 = vrot.slane %v1158_v57, 1 }
 0x614   :  { %v1160_v59 = vadd.f32 %v1159_v58, %v1158_v57 }
 0x616   :  { %1935 = vmatmul.mubr.msk.f32.vlgmr.msra.gmra.mxu1 %vm399_vm1, %v1160_v59  ;;  %v1988_v59 = vld [vmem:[%s2656_s26 + $0x18] sm:$0xff] }
 0x617   :  { %1957 = vmatpush3.msra.mxu1 %v1370_v21 }
 0x618   :  { %1958 = vmatprep.subr.mxu1 %v1369_v25 }
 0x619   :  { %1959 = vmatpush3.msra.mxu1 %v1369_v25 }
 0x61a   :  { %1960 = vmatprep.subr.mxu1 %v1368_v26 }
 0x61b   :  { %1961 = vmatpush3.msra.mxu1 %v1368_v26 }
 0x61c   :  { %1962 = vmatprep.subr.mxu1 %v1367_v27 }
 0x61d   :  { %1963 = vmatpush3.msra.mxu1 %v1367_v27 }
 0x61e   :  { %1964 = vmatprep.subr.mxu1 %v1366_v28 }
 0x61f   :  { %1965 = vmatpush3.msra.mxu1 %v1366_v28 }
 0x620   :  { %1966 = vmatprep.subr.mxu1 %v1365_v29 }
 0x621   :  { %1967 = vmatpush3.msra.mxu1 %v1365_v29 }
 0x622   :  { %1968 = vmatprep.subr.mxu1 %v1364_v22 }
 0x623   :  { %1969 = vmatpush3.msra.mxu1 %v1364_v22 }
 0x624   :  { %1970 = vmatprep.subr.mxu1 %v1363_v30 }
 0x625   :  { %1971 = vmatpush3.msra.mxu1 %v1363_v30 }
 0x6d6   :  { %v1230_v60 = vpop.f32.mrf.mxu1 }
 0x6d7   :  { %v1237_v61 = vrot.slane %v1230_v60, %v2210_v35 }
 0x6d8   :  { %v1936_v62 = vpop.f32.mrf.mxu1 }
 0x6d9   :  { %v1238_v63 = vsub.f32 %v1144_v32, %v1237_v61  ;;  %v1239_v1 = vsub.f32 %v1145_v40, %v1237_v61  ;;  %v1240_v2 = vsub.f32 %v1146_v48, %v1237_v61  ;;  %v1241_v3 = vsub.f32 %v1147_v47, %v1237_v61  ;;  %v1518_v32 = vld [vmem:[%s2645_s16] ss:$0 sm:$0xff]  ;;  %v1989_v62 = vld [vmem:[%s2656_s26 + $0x10] sm:$0xff] }
 0x6da   :  { %v1519_v47 = vld [vmem:[%s2646_s18] ss:$0 sm:$0xff] }
 0x6db   :  { %v1242_v4 = vmul.f32 %v1238_v63, %v1238_v63  ;;  %v1243_v5 = vmul.f32 %v1239_v1, %v1239_v1  ;;  %v1244_v6 = vmul.f32 %v1240_v2, %v1240_v2  ;;  %v1245_v7 = vmul.f32 %v1241_v3, %v1241_v3 }
 0x6dd   :  { %v1246_v8 = vsel %vm399_vm1, %v1242_v4, 0.0  ;;  %v1247_v9 = vsel %vm399_vm1, %v1243_v5, 0.0  ;;  %v1249_v11 = vsel %vm399_vm1, %v1244_v6, 0.0  ;;  %v1251_v13 = vsel %vm399_vm1, %v1245_v7, 0.0 }
 0x6de   :  { %v1248_v10 = vadd.f32 %v1247_v9, %v1246_v8 }
 0x6e0   :  { %v1250_v12 = vadd.f32 %v1249_v11, %v1248_v10 }
 0x6e2   :  { %v1252_v14 = vadd.f32 %v1251_v13, %v1250_v12 }
 0x6e4   :  { %v1253_v15 = vrot.slane %v1252_v14, 4 }
 0x6e6   :  { %v1254_v16 = vadd.f32 %v1253_v15, %v1252_v14 }
 0x6e8   :  { %v1255_v17 = vrot.slane %v1254_v16, 2 }
 0x6ea   :  { %v1256_v18 = vadd.f32 %v1255_v17, %v1254_v16 }
 0x6ec   :  { %v1257_v19 = vrot.slane %v1256_v18, 1 }
 0x6ee   :  { %v1258_v20 = vadd.f32 %v1257_v19, %v1256_v18 }
 0x6f0   :  { %1954 = vmatmul.mubr.msk.f32.vlgmr.msra.gmra.mxu0 %vm399_vm1, %v1258_v20 }
 0x7b0   :  { %v1328_v23 = vpop.f32.mrf.mxu0 }
 0x7b1   :  { %v1329_v24 = vadd.f32 1e-05, %v1328_v23 }
 0x7b2   :  { %v1955_v33 = vpop.f32.mrf.mxu0 }
 0x7b3   :  { %1984 = vrsqrt.f32 %v1329_v24 }
 0x7c0   :  { %v1985_v34 = vpop.eup %1984 }
 0x7c1   :  { %v1336_v31 = vrot.slane %v1985_v34, %v2210_v35 }
 0x7c3   :  { %v1337_v37 = vmul.f32 %v1336_v31, %v1238_v63  ;;  %v1338_v0 = vmul.f32 %v1336_v31, %v1239_v1  ;;  %v1339_v38 = vmul.f32 %v1336_v31, %v1240_v2  ;;  %v1340_v39 = vmul.f32 %v1336_v31, %v1241_v3 }
 0x7c5   :  { %v1348_v40 = vmul.f32 %v1517_v36, %v1337_v37  ;;  %v1349_v41 = vmul.f32 %v1517_v36, %v1338_v0  ;;  %v1350_v42 = vmul.f32 %v1517_v36, %v1339_v38  ;;  %v1351_v45 = vmul.f32 %v1517_v36, %v1340_v39 }
 0x7c7   :  { %v1359_v43 = vadd.f32 %v1518_v32, %v1348_v40  ;;  %v1360_v44 = vadd.f32 %v1518_v32, %v1349_v41  ;;  %v1361_v35 = vadd.f32 %v1518_v32, %v1350_v42  ;;  %v1362_v46 = vadd.f32 %v1518_v32, %v1351_v45 }
 0x7c9   :  { %1972 = vmatprep.mubr.msk.f32.mxu1 %vm399_vm1, %v1359_v43 }
 0x7ca   :  { %1973 = vmatmul.mubr.msk.f32.vlgmr.msra.gmra.mxu1 %vm399_vm1, %v1360_v44 }
 0x7cb   :  { %1975 = vmatprep.mubr.msk.f32.mxu1 %vm399_vm1, %v1361_v35 }
 0x7ce   :  { %1976 = vmatmul.mubr.msk.f32.gmra.mxu1 %vm399_vm1, %v1362_v46 }
 0x88a   :  { %v1974_v48 = vpop.f32.mrf.mxu1 }
 0x88b   :  { %v1462_v49 = vadd.f32 %v1974_v48, %v1519_v47 }
 0x88c   :  { %v1456_v50 = vpop.f32.mrf.mxu1 }
 0x88d   :  { %v1476_v52 = vadd.f32 %v1986_v51, %v1462_v49  ;;  %v1457_v53 = vadd.f32 %v1519_v47, %v1456_v50 }
 0x88e   :  { %v1977_v54 = vpop.f32.mrf.mxu1 }
 0x88f   :  { %1480 = vst [vmem:[%s2647_s19 + $0x8] sm:$0xff] %v1476_v52  ;;  %v1475_v56 = vadd.f32 %v1987_v55, %v1457_v53  ;;  %v1472_v57 = vadd.f32 %v1977_v54, %v1519_v47 }
 0x890   :  { %v1466_v58 = vpop.f32.mrf.mxu1 }
 0x891   :  { %1479 = vst [vmem:[%s2647_s19] sm:$0xff] %v1475_v56  ;;  %v1478_v60 = vadd.f32 %v1988_v59, %v1472_v57  ;;  %v1467_v61 = vadd.f32 %v1519_v47, %v1466_v58 }
 0x893   :  { %1482 = vst [vmem:[%s2647_s19 + $0x18] sm:$0xff] %v1478_v60  ;;  %v1477_v63 = vadd.f32 %v1989_v62, %v1467_v61 }
 0x895   :  { %1481 = vst [vmem:[%s2647_s19 + $0x10] sm:$0xff] %v1477_v63 }

// kernel: wrapped_hourglass_fwd.20
= control target key start
LH: loop header
LB: loop body
LE: loop exit
PB: predicated region body
PF: predicated region fallthrough
CT: control target
= control target key end

     0   :  { %v1857_v0 = vmov 0.0   ;;  %vm1858_vm0 = vmmov 0   ;;  %vm81_vm1 = vcmask 523264   ;;  %v164_v20 = vlaneseq  ;;  %s2313_s3 = inlined_call_operand.vmem [shape: f32[64,64], index: 3, kind: input, shape index: {}]   ;;  %s2314_s0 = inlined_call_operand.vmem [shape: f32[16,64], index: 0, kind: input, shape index: {}]   ;;  %s2315_s4 = inlined_call_operand.vmem [shape: f32[64,32], index: 4, kind: input, shape index: {}]   ;;  %s2316_s1 = inlined_call_operand.vmem [shape: f32[1,64], index: 1, kind: input, shape index: {}]   ;;  %s2317_s2 = inlined_call_operand.vmem [shape: f32[1,64], index: 2, kind: input, shape index: {}]   ;;  %s2318_s8 = inlined_call_operand.vmem [shape: f32[32,32], index: 8, kind: input, shape index: {}]   ;;  %s2319_s5 = inlined_call_operand.vmem [shape: f32[1,32], index: 5, kind: input, shape index: {}]   ;;  %s2320_s9 = inlined_call_operand.vmem [shape: f32[16,16], index: 9, kind: input, shape index: {}]   ;;  %s2321_s10 = inlined_call_operand.vmem [shape: f32[16,16], index: 10, kind: input, shape index: {}]   ;;  %s2322_s6 = inlined_call_operand.vmem [shape: f32[1,32], index: 6, kind: input, shape index: {}]   ;;  %s2323_s7 = inlined_call_operand.vmem [shape: f32[1,32], index: 7, kind: input, shape index: {}]   ;;  %s2324_s12 = inlined_call_operand.vmem [shape: f32[32,32], index: 12, kind: input, shape index: {}]   ;;  %s2325_s11 = inlined_call_operand.vmem [shape: f32[32,32], index: 11, kind: input, shape index: {}]   ;;  %s2326_s13 = inlined_call_operand.vmem [shape: f32[32,32], index: 13, kind: input, shape index: {}]   ;;  %s2327_s14 = inlined_call_operand.vmem [shape: f32[1,32], index: 14, kind: input, shape index: {}]   ;;  %s2328_s17 = inlined_call_operand.vmem [shape: f32[32,64], index: 17, kind: input, shape index: {}]   ;;  %s2329_s15 = inlined_call_operand.vmem [shape: f32[1,32], index: 15, kind: input, shape index: {}]   ;;  %s2330_s16 = inlined_call_operand.vmem [shape: f32[1,32], index: 16, kind: input, shape index: {}]   ;;  %s2331_s19 = inlined_call_operand.vmem [shape: f32[32,16], index: 19, kind: input, shape index: {}]   ;;  %s2332_s20 = inlined_call_operand.vmem [shape: f32[64,128], index: 20, kind: input, shape index: {}]   ;;  %s2333_s18 = inlined_call_operand.vmem [shape: f32[1,64], index: 18, kind: input, shape index: {}]   ;;  %s2334_s21 = inlined_call_operand.vmem [shape: f32[32,128], index: 21, kind: input, shape index: {}]   ;;  %s2335_s22 = inlined_call_operand.vmem [shape: f32[32,128], index: 22, kind: output, shape index: {}]  }
   0x1   :  { %2340 = sst [smem:[#allocation2_spill]] %s2313_s3  ;;  %1658 = vmatprep.subr.mxu0 %v1857_v0  ;;  %1674 = vmatprep.mubr.msk.f32.mxu0 %vm1858_vm0, %v1857_v0  ;;  %vm379_vm2 = vcmask 261120   ;;  %vm579_vm3 = vcmask 130048  }
   0x2   :  { %2341 = sst [smem:[#allocation3_spill]] %s2314_s0  ;;  %1677 = vmatprep.subr.mxu1 %v1857_v0  ;;  %1693 = vmatprep.mubr.msk.f32.mxu1 %vm1858_vm0, %v1857_v0  ;;  %v165_v21 = vshrl.u32 %v164_v20, 7 }
   0x3   :  { %2342 = sst [smem:[#allocation4_spill]] %s2315_s4 }
   0x4   :  { %2343 = sst [smem:[#allocation5_spill]] %s2316_s1  ;;  %v2034_v22 = vsub.s32 0, %v165_v21 }
   0x5   :  { %2344 = sst [smem:[#allocation6_spill]] %s2317_s2 }
   0x6   :  { %2345 = sst [smem:[#allocation7_spill]] %s2318_s8 }
   0x7   :  { %2346 = sst [smem:[#allocation8_spill]] %s2319_s5 }
   0x8   :  { %s2347_s29 = sld [smem:[#allocation2_spill]] }
   0x9   :  { %s2348_s24 = sld [smem:[#allocation3_spill]] }
   0xa   :  { %s2350_s26 = sld [smem:[#allocation5_spill]] }
   0xb   :  { %s2351_s27 = sld [smem:[#allocation6_spill]] }
   0xc   :  { %s2352_s30 = sld [smem:[#allocation7_spill]] }
   0xe   :  { %v80_v1 = vld [vmem:[%s2347_s29 + $0x38] sm:$0xff]  ;;  %v79_v2 = vld [vmem:[%s2347_s29 + $0x30] sm:$0xff]  ;;  %v78_v3 = vld [vmem:[%s2347_s29 + $0x28] sm:$0xff] }
   0xf   :  { %1659 = vmatpush3.msra.mxu0 %v80_v1  ;;  %v1991_v4 = vld [vmem:[%s2348_s24] sm:$0xff]  ;;  %1678 = vmatpush3.msra.mxu1 %v80_v1  ;;  %v1996_v5 = vld [vmem:[%s2348_s24 + $0x8] sm:$0xff]  ;;  %v76_v10 = vld [vmem:[%s2347_s29 + $0x18] sm:$0xff]  ;;  %s2349_s24 = sld [smem:[#allocation4_spill]] }
  0x10   :  { %1660 = vmatprep.subr.mxu0 %v1857_v0  ;;  %v82_v6 = vsel %vm81_vm1, %v1991_v4, 0.0  ;;  %1679 = vmatprep.subr.mxu1 %v1857_v0  ;;  %v77_v7 = vld [vmem:[%s2347_s29 + $0x20] sm:$0xff]  ;;  %v83_v8 = vsel %vm81_vm1, %v1996_v5, 0.0  ;;  %v75_v12 = vld [vmem:[%s2347_s29 + $0x10] sm:$0xff]  ;;  %v74_v14 = vld [vmem:[%s2347_s29 + $0x8] sm:$0xff] }
  0x11   :  { %1661 = vmatpush3.msra.mxu0 %v79_v2  ;;  %1680 = vmatpush3.msra.mxu1 %v79_v2  ;;  %v84_v9 = vadd.f32 %v83_v8, %v82_v6  ;;  %v73_v16 = vld [vmem:[%s2347_s29] sm:$0xff] }
  0x12   :  { %1662 = vmatprep.subr.mxu0 %v1857_v0  ;;  %1681 = vmatprep.subr.mxu1 %v1857_v0  ;;  %v1525_v52 = vld [vmem:[%s2350_s26] ss:$0 sm:$0xff]  ;;  %v2083_v60 = vld [vmem:[%s2352_s30 + $0x18] sm:$0xff]  ;;  %v2091_v61 = vld [vmem:[%s2352_s30 + $0x10] sm:$0xff]  ;;  %s2353_s26 = sld [smem:[#allocation8_spill]] }
  0x13   :  { %1663 = vmatpush3.msra.mxu0 %v78_v3  ;;  %1682 = vmatpush3.msra.mxu1 %v78_v3  ;;  %v85_v11 = vrot.slane %v84_v9, 4  ;;  %v1526_v55 = vld [vmem:[%s2351_s27] ss:$0 sm:$0xff]  ;;  %v2100_v62 = vld [vmem:[%s2352_s30 + $0x8] sm:$0xff] }
  0x14   :  { %1664 = vmatprep.subr.mxu0 %v1857_v0  ;;  %1683 = vmatprep.subr.mxu1 %v1857_v0  ;;  %v2109_v63 = vld [vmem:[%s2352_s30] sm:$0xff] }
  0x15   :  { %1665 = vmatpush3.msra.mxu0 %v77_v7  ;;  %1684 = vmatpush3.msra.mxu1 %v77_v7  ;;  %v86_v13 = vadd.f32 %v85_v11, %v84_v9  ;;  %v286_v39 = vld [vmem:[%s2349_s24 + $0x38] sm:$0xff]  ;;  %v285_v40 = vld [vmem:[%s2349_s24 + $0x30] sm:$0xff]  ;;  %v284_v41 = vld [vmem:[%s2349_s24 + $0x28] sm:$0xff] }
  0x16   :  { %1666 = vmatprep.subr.mxu0 %v1857_v0  ;;  %1685 = vmatprep.subr.mxu1 %v1857_v0  ;;  %v283_v42 = vld [vmem:[%s2349_s24 + $0x20] sm:$0xff]  ;;  %v282_v43 = vld [vmem:[%s2349_s24 + $0x18] sm:$0xff]  ;;  %v281_v44 = vld [vmem:[%s2349_s24 + $0x10] sm:$0xff] }
  0x17   :  { %1667 = vmatpush3.msra.mxu0 %v76_v10  ;;  %1686 = vmatpush3.msra.mxu1 %v76_v10  ;;  %v87_v15 = vrot.slane %v86_v13, 2  ;;  %v280_v45 = vld [vmem:[%s2349_s24 + $0x8] sm:$0xff]  ;;  %v279_v46 = vld [vmem:[%s2349_s24] sm:$0xff] }
  0x18   :  { %1668 = vmatprep.subr.mxu0 %v1857_v0  ;;  %1687 = vmatprep.subr.mxu1 %v1857_v0  ;;  %v1527_v1 = vld [vmem:[%s2353_s26] ss:$0 sm:$0xff] }
  0x19   :  { %1669 = vmatpush3.msra.mxu0 %v75_v12  ;;  %1688 = vmatpush3.msra.mxu1 %v75_v12  ;;  %v88_v17 = vadd.f32 %v87_v15, %v86_v13 }
  0x1a   :  { %1670 = vmatprep.subr.mxu0 %v1857_v0  ;;  %1689 = vmatprep.subr.mxu1 %v1857_v0 }
  0x1b   :  { %1671 = vmatpush3.msra.mxu0 %v74_v14  ;;  %1690 = vmatpush3.msra.mxu1 %v74_v14  ;;  %v89_v18 = vrot.slane %v88_v17, 1 }
  0x1c   :  { %1672 = vmatprep.subr.mxu0 %v1857_v0  ;;  %1691 = vmatprep.subr.mxu1 %v1857_v0 }
  0x1d   :  { %1673 = vmatpush3.msra.mxu0 %v73_v16  ;;  %1692 = vmatpush3.msra.mxu1 %v73_v16  ;;  %v90_v19 = vadd.f32 %v89_v18, %v88_v17 }
  0x1e   :  { %1726 = vmatprep.subr.mxu1 %v1857_v0  ;;  %1696 = vmatprep.subr.mxu0 %v286_v39 }
  0x1f   :  { %1675 = vmatmul.mubr.msk.f32.vlgmr.msra.gmra.mxu0 %vm81_vm1, %v90_v19 }
  0x20   :  { %1697 = vmatpush3.msra.mxu0 %v286_v39 }
  0x21   :  { %1698 = vmatprep.subr.mxu0 %v285_v40 }
  0x22   :  { %1699 = vmatpush3.msra.mxu0 %v285_v40 }
  0x23   :  { %1700 = vmatprep.subr.mxu0 %v284_v41 }
  0x24   :  { %1701 = vmatpush3.msra.mxu0 %v284_v41  ;;  %v1532_v41 = vld [vmem:[%s2322_s6] ss:$0 sm:$0xff] }
  0x25   :  { %1702 = vmatprep.subr.mxu0 %v283_v42 }
  0x26   :  { %1703 = vmatpush3.msra.mxu0 %v283_v42 }
  0x27   :  { %1704 = vmatprep.subr.mxu0 %v282_v43 }
  0x28   :  { %1705 = vmatpush3.msra.mxu0 %v282_v43 }
  0x29   :  { %1706 = vmatprep.subr.mxu0 %v281_v44 }
  0x2a   :  { %1707 = vmatpush3.msra.mxu0 %v281_v44  ;;  %v1533_v44 = vld [vmem:[%s2323_s7] ss:$0 sm:$0xff] }
  0x2b   :  { %1708 = vmatprep.subr.mxu0 %v280_v45 }
  0x2c   :  { %1709 = vmatpush3.msra.mxu0 %v280_v45 }
  0x2d   :  { %1710 = vmatprep.subr.mxu0 %v279_v46 }
  0x2e   :  { %1711 = vmatpush3.msra.mxu0 %v279_v46 }
  0x2f   :  { %1715 = vmatprep.subr.mxu0 %v1857_v0 }
  0xdf   :  { %v160_v23 = vpop.f32.mrf.mxu0 }
  0xe0   :  { %v167_v24 = vrot.slane %v160_v23, %v2034_v22 }
  0xe1   :  { %v1676_v25 = vpop.f32.mrf.mxu0 }
  0xe2   :  { %v168_v26 = vsub.f32 %v1991_v4, %v167_v24  ;;  %v169_v27 = vsub.f32 %v1996_v5, %v167_v24 }
  0xe4   :  { %v170_v28 = vmul.f32 %v168_v26, %v168_v26  ;;  %v171_v29 = vmul.f32 %v169_v27, %v169_v27 }
  0xe6   :  { %v172_v30 = vsel %vm81_vm1, %v170_v28, 0.0  ;;  %v173_v31 = vsel %vm81_vm1, %v171_v29, 0.0 }
  0xe7   :  { %v174_v32 = vadd.f32 %v173_v31, %v172_v30 }
  0xe9   :  { %v175_v33 = vrot.slane %v174_v32, 4 }
  0xeb   :  { %v176_v34 = vadd.f32 %v175_v33, %v174_v32 }
  0xed   :  { %v177_v35 = vrot.slane %v176_v34, 2 }
  0xef   :  { %v178_v36 = vadd.f32 %v177_v35, %v176_v34  ;;  %v577_v34 = vld [vmem:[%s2320_s9] sm:$0xff] }
  0xf0   :  { %v661_v35 = vld [vmem:[%s2321_s10] sm:$0xff] }
  0xf1   :  { %v179_v37 = vrot.slane %v178_v36, 1 }
  0xf3   :  { %v180_v38 = vadd.f32 %v179_v37, %v178_v36 }
  0xf5   :  { %1694 = vmatmul.mubr.msk.f32.vlgmr.msra.gmra.mxu1 %vm81_vm1, %v180_v38 }
  0xf6   :  { %1734 = vmatprep.mubr.msk.f32.mxu1 %vm1858_vm0, %v1857_v0  ;;  %1727 = vmatpush3.msra.mxu1 %v2083_v60 }
  0xf7   :  { %1728 = vmatprep.subr.mxu1 %v1857_v0 }
  0xf8   :  { %1729 = vmatpush3.msra.mxu1 %v2091_v61 }
  0xf9   :  { %1730 = vmatprep.subr.mxu1 %v1857_v0 }
  0xfa   :  { %1731 = vmatpush3.msra.mxu1 %v2100_v62 }
  0xfb   :  { %1732 = vmatprep.subr.mxu1 %v1857_v0 }
  0xfc   :  { %1733 = vmatpush3.msra.mxu1 %v2109_v63 }
 0x1b5   :  { %v250_v47 = vpop.f32.mrf.mxu1 }
 0x1b6   :  { %v251_v48 = vadd.f32 1e-05, %v250_v47 }
 0x1b7   :  { %v1695_v49 = vpop.f32.mrf.mxu1 }
 0x1b8   :  { %1851 = vrsqrt.f32 %v251_v48  ;;  %v578_v49 = vld [vmem:[%s2320_s9 + $0x8] sm:$0xff] }
 0x1c5   :  { %v1852_v50 = vpop.eup %1851 }
 0x1c6   :  { %v258_v51 = vrot.slane %v1852_v50, %v2034_v22  ;;  %v662_v50 = vld [vmem:[%s2321_s10 + $0x8] sm:$0xff] }
 0x1c8   :  { %v259_v53 = vmul.f32 %v258_v51, %v168_v26  ;;  %v260_v54 = vmul.f32 %v258_v51, %v169_v27  ;;  %v751_v51 = vld [vmem:[%s2324_s12 + $0x18] sm:$0xff] }
 0x1ca   :  { %v268_v56 = vmul.f32 %v1525_v52, %v259_v53  ;;  %v269_v57 = vmul.f32 %v1525_v52, %v260_v54  ;;  %v747_v52 = vld [vmem:[%s2325_s11 + $0x18] sm:$0xff]  ;;  %v750_v53 = vld [vmem:[%s2324_s12 + $0x10] sm:$0xff] }
 0x1cb   :  { %v746_v54 = vld [vmem:[%s2325_s11 + $0x10] sm:$0xff] }
 0x1cc   :  { %v277_v58 = vadd.f32 %v1526_v55, %v268_v56  ;;  %v278_v59 = vadd.f32 %v1526_v55, %v269_v57  ;;  %v749_v55 = vld [vmem:[%s2324_s12 + $0x8] sm:$0xff]  ;;  %v748_v56 = vld [vmem:[%s2324_s12] sm:$0xff]  ;;  %v917_v57 = vld [vmem:[%s2326_s13 + $0x18] sm:$0xff] }
 0x1ce   :  { %1712 = vmatprep.mubr.msk.f32.mxu0 %vm81_vm1, %v277_v58  ;;  %v916_v58 = vld [vmem:[%s2326_s13 + $0x10] sm:$0xff] }
 0x1cf   :  { %1713 = vmatmul.mubr.msk.f32.vlgmr.msra.gmra.mxu0 %vm81_vm1, %v278_v59  ;;  %v745_v59 = vld [vmem:[%s2325_s11 + $0x8] sm:$0xff] }
 0x1d0   :  { %1723 = vmatprep.mubr.msk.f32.mxu0 %vm1858_vm0, %v1857_v0  ;;  %1716 = vmatpush3.msra.mxu0 %v2083_v60 }
 0x1d1   :  { %1717 = vmatprep.subr.mxu0 %v1857_v0 }
 0x1d2   :  { %1718 = vmatpush3.msra.mxu0 %v2091_v61 }
 0x1d3   :  { %1719 = vmatprep.subr.mxu0 %v1857_v0 }
 0x1d4   :  { %1720 = vmatpush3.msra.mxu0 %v2100_v62 }
 0x1d5   :  { %1721 = vmatprep.subr.mxu0 %v1857_v0 }
 0x1d6   :  { %1722 = vmatpush3.msra.mxu0 %v2109_v63 }
 0x28f   :  { %v1714_v2 = vpop.f32.mrf.mxu0 }
 0x290   :  { %v372_v3 = vadd.f32 %v1714_v2, %v1527_v1  ;;  %v744_v2 = vld [vmem:[%s2325_s11] sm:$0xff] }
 0x291   :  { %v366_v6 = vpop.f32.mrf.mxu0 }
 0x292   :  { %v367_v7 = vadd.f32 %v1527_v1, %v366_v6  ;;  %v381_v8 = vsel %vm379_vm2, %v372_v3, 0.0  ;;  %v915_v1 = vld [vmem:[%s2326_s13 + $0x8] sm:$0xff] }
 0x294   :  { %v380_v9 = vsel %vm379_vm2, %v367_v7, 0.0 }
 0x295   :  { %v382_v10 = vadd.f32 %v381_v8, %v380_v9 }
 0x297   :  { %v383_v11 = vrot.slane %v382_v10, 4 }
 0x299   :  { %v384_v12 = vadd.f32 %v383_v11, %v382_v10 }
 0x29b   :  { %v385_v13 = vrot.slane %v384_v12, 2 }
 0x29d   :  { %v386_v14 = vadd.f32 %v385_v13, %v384_v12  ;;  %v1544_v13 = vld [vmem:[%s2327_s14] ss:$0 sm:$0xff] }
 0x29f   :  { %v387_v15 = vrot.slane %v386_v14, 1 }
 0x2a1   :  { %v388_v16 = vadd.f32 %v387_v15, %v386_v14 }
 0x2a3   :  { %1724 = vmatmul.mubr.msk.f32.vlgmr.msra.gmra.mxu0 %vm379_vm2, %v388_v16 }
 0x2a4   :  { %1741 = vmatprep.mubr.msk.f32.mxu0 %vm579_vm3, %v577_v34 }
 0x363   :  { %v458_v17 = vpop.f32.mrf.mxu0 }
 0x364   :  { %v465_v18 = vrot.slane %v458_v17, %v2034_v22 }
 0x365   :  { %v1725_v19 = vpop.f32.mrf.mxu0 }
 0x366   :  { %v466_v20 = vsub.f32 %v367_v7, %v465_v18  ;;  %v467_v21 = vsub.f32 %v372_v3, %v465_v18  ;;  %v914_v3 = vld [vmem:[%s2326_s13] sm:$0xff] }
 0x368   :  { %v468_v23 = vmul.f32 %v466_v20, %v466_v20  ;;  %v469_v24 = vmul.f32 %v467_v21, %v467_v21 }
 0x36a   :  { %v470_v25 = vsel %vm379_vm2, %v468_v23, 0.0  ;;  %v471_v26 = vsel %vm379_vm2, %v469_v24, 0.0 }
 0x36b   :  { %v472_v27 = vadd.f32 %v471_v26, %v470_v25 }
 0x36d   :  { %v473_v28 = vrot.slane %v472_v27, 4 }
 0x36f   :  { %v474_v29 = vadd.f32 %v473_v28, %v472_v27 }
 0x371   :  { %v475_v30 = vrot.slane %v474_v29, 2 }
 0x373   :  { %v476_v31 = vadd.f32 %v475_v30, %v474_v29 }
 0x375   :  { %v477_v32 = vrot.slane %v476_v31, 1 }
 0x377   :  { %v478_v33 = vadd.f32 %v477_v32, %v476_v31 }
 0x379   :  { %1735 = vmatmul.mubr.msk.f32.vlgmr.msra.gmra.mxu1 %vm379_vm2, %v478_v33 }
 0x37a   :  { %1748 = vmatprep.mubr.msk.f32.mxu1 %vm579_vm3, %v661_v35 }
 0x439   :  { %v548_v36 = vpop.f32.mrf.mxu1 }
 0x43a   :  { %v549_v37 = vadd.f32 1e-05, %v548_v36 }
 0x43b   :  { %v1736_v38 = vpop.f32.mrf.mxu1 }
 0x43c   :  { %1853 = vrsqrt.f32 %v549_v37 }
 0x449   :  { %v1854_v39 = vpop.eup %1853 }
 0x44a   :  { %v556_v40 = vrot.slane %v1854_v39, %v2034_v22 }
 0x44c   :  { %v558_v42 = vmul.f32 %v556_v40, %v467_v21  ;;  %v557_v43 = vmul.f32 %v556_v40, %v466_v20 }
 0x44e   :  { %v567_v45 = vmul.f32 %v1532_v41, %v558_v42  ;;  %v566_v46 = vmul.f32 %v1532_v41, %v557_v43 }
 0x450   :  { %v576_v47 = vadd.f32 %v1533_v44, %v567_v45  ;;  %v575_v48 = vadd.f32 %v1533_v44, %v566_v46  ;;  %v1210_v44 = vld [vmem:[%s2328_s17 + $0x18] sm:$0xff]  ;;  %v1209_v45 = vld [vmem:[%s2328_s17 + $0x10] sm:$0xff]  ;;  %v1208_v46 = vld [vmem:[%s2328_s17 + $0x8] sm:$0xff] }
 0x452   :  { %1737 = vmatprep.subr.mxu0 %v576_v47  ;;  %1744 = vmatprep.subr.mxu1 %v576_v47 }
 0x453   :  { %1738 = vmatpush3.msra.mxu0 %v576_v47  ;;  %1745 = vmatpush3.msra.mxu1 %v576_v47 }
 0x454   :  { %1739 = vmatprep.subr.mxu0 %v575_v48  ;;  %1746 = vmatprep.subr.mxu1 %v575_v48 }
 0x455   :  { %1740 = vmatpush3.msra.mxu0 %v575_v48  ;;  %1747 = vmatpush3.msra.mxu1 %v575_v48 }
 0x456   :  { %1742 = vmatmul.mubr.msk.f32.vlgmr.msra.gmra.mxu0 %vm579_vm3, %v578_v49  ;;  %1749 = vmatmul.mubr.msk.f32.vlgmr.msra.gmra.mxu1 %vm579_vm3, %v662_v50 }
 0x457   :  { %1751 = vmatprep.subr.mxu0 %v751_v51  ;;  %1759 = vmatprep.mubr.msk.f32.mxu0 %vm379_vm2, %v575_v48 }
 0x458   :  { %1752 = vmatpush3.msra.mxu0 %v751_v51  ;;  %1762 = vmatprep.subr.mxu1 %v747_v52 }
 0x459   :  { %1753 = vmatprep.subr.mxu0 %v750_v53  ;;  %1763 = vmatpush3.msra.mxu1 %v747_v52 }
 0x45a   :  { %1754 = vmatpush3.msra.mxu0 %v750_v53  ;;  %1764 = vmatprep.subr.mxu1 %v746_v54  ;;  %v1547_v53 = vld [vmem:[%s2329_s15] ss:$0 sm:$0xff] }
 0x45b   :  { %1755 = vmatprep.subr.mxu0 %v749_v55  ;;  %1765 = vmatpush3.msra.mxu1 %v746_v54 }
 0x45c   :  { %1756 = vmatpush3.msra.mxu0 %v749_v55  ;;  %1766 = vmatprep.subr.mxu1 %v745_v59 }
 0x45d   :  { %1757 = vmatprep.subr.mxu0 %v748_v56  ;;  %1767 = vmatpush3.msra.mxu1 %v745_v59 }
 0x45e   :  { %1758 = vmatpush3.msra.mxu0 %v748_v56  ;;  %1768 = vmatprep.subr.mxu1 %v744_v2  ;;  %v1548_v56 = vld [vmem:[%s2330_s16] ss:$0 sm:$0xff] }
 0x45f   :  { %1760 = vmatmul.mubr.msk.f32.vlgmr.msra.gmra.mxu0 %vm379_vm2, %v576_v47  ;;  %1773 = vmatprep.subr.mxu0 %v917_v57  ;;  %v1207_v47 = vld [vmem:[%s2328_s17] sm:$0xff] }
 0x460   :  { %1774 = vmatpush3.msra.mxu0 %v917_v57  ;;  %1769 = vmatpush3.msra.mxu1 %v744_v2  ;;  %v1413_v2 = vld [vmem:[%s2332_s20 + $0x38] sm:$0xff] }
 0x461   :  { %1775 = vmatprep.subr.mxu0 %v916_v58  ;;  %1784 = vmatprep.subr.mxu1 %v1857_v0 }
 0x462   :  { %1776 = vmatpush3.msra.mxu0 %v916_v58 }
 0x463   :  { %1777 = vmatprep.subr.mxu0 %v915_v1 }
 0x464   :  { %1778 = vmatpush3.msra.mxu0 %v915_v1 }
 0x465   :  { %1779 = vmatprep.subr.mxu0 %v914_v3 }
 0x466   :  { %1780 = vmatpush3.msra.mxu0 %v914_v3  ;;  %v1412_v3 = vld [vmem:[%s2332_s20 + $0x30] sm:$0xff] }
 0x467   :  { %1795 = vmatprep.subr.mxu0 %v1857_v0 }
 0x516   :  { %v1743_v6 = vpop.f32.mrf.mxu0  ;;  %v1750_v7 = vpop.f32.mrf.mxu1 }
 0x518   :  { %v652_v8 = vpop.f32.mrf.mxu0  ;;  %v735_v9 = vpop.f32.mrf.mxu1 }
 0x519   :  { %1770 = vmatprep.mubr.msk.f32.mxu1 %vm379_vm2, %v652_v8  ;;  %1781 = vmatprep.mubr.msk.f32.mxu0 %vm379_vm2, %v735_v9  ;;  %v1409_v8 = vld [vmem:[%s2332_s20 + $0x18] sm:$0xff]  ;;  %v1408_v9 = vld [vmem:[%s2332_s20 + $0x10] sm:$0xff] }
 0x51a   :  { %1771 = vmatmul.mubr.msk.f32.vlgmr.msra.gmra.mxu1 %vm379_vm2, %v1743_v6  ;;  %1782 = vmatmul.mubr.msk.f32.vlgmr.msra.gmra.mxu0 %vm379_vm2, %v1750_v7  ;;  %v1411_v6 = vld [vmem:[%s2332_s20 + $0x28] sm:$0xff]  ;;  %v1410_v7 = vld [vmem:[%s2332_s20 + $0x20] sm:$0xff] }
 0x51b   :  { %1785 = vmatpush3.msra.mxu1 %v2083_v60  ;;  %1792 = vmatprep.mubr.msk.f32.mxu1 %vm1858_vm0, %v1857_v0 }
 0x51c   :  { %1786 = vmatprep.subr.mxu1 %v1857_v0  ;;  %1796 = vmatpush3.msra.mxu0 %v2083_v60 }
 0x51d   :  { %1787 = vmatpush3.msra.mxu1 %v2091_v61  ;;  %1797 = vmatprep.subr.mxu0 %v1857_v0 }
 0x51e   :  { %1788 = vmatprep.subr.mxu1 %v1857_v0  ;;  %1798 = vmatpush3.msra.mxu0 %v2091_v61 }
 0x51f   :  { %1789 = vmatpush3.msra.mxu1 %v2100_v62  ;;  %1799 = vmatprep.subr.mxu0 %v1857_v0  ;;  %v1761_v60 = vpop.f32.mrf.mxu0 }
 0x520   :  { %1790 = vmatprep.subr.mxu1 %v1857_v0  ;;  %1800 = vmatpush3.msra.mxu0 %v2100_v62 }
 0x521   :  { %1791 = vmatpush3.msra.mxu1 %v2109_v63  ;;  %1801 = vmatprep.subr.mxu0 %v1857_v0  ;;  %v824_v10 = vpop.f32.mrf.mxu0 }
 0x522   :  { %1802 = vmatpush3.msra.mxu0 %v2109_v63  ;;  %1803 = vmatprep.mubr.msk.f32.mxu0 %vm1858_vm0, %v1857_v0 }
 0x523   :  { %1806 = vmatprep.subr.mxu1 %v1210_v44 }
 0x5da   :  { %v1772_v61 = vpop.f32.mrf.mxu1  ;;  %v1783_v11 = vpop.f32.mrf.mxu0 }
 0x5db   :  { %v911_v12 = vadd.f32 %v1772_v61, %v1761_v60  ;;  %v1549_v60 = vld [vmem:[%s2333_s18] ss:$0 sm:$0xff] }
 0x5dc   :  { %v905_v14 = vpop.f32.mrf.mxu1  ;;  %v990_v16 = vpop.f32.mrf.mxu0 }
 0x5dd   :  { %v1000_v62 = vadd.f32 %v1783_v11, %v911_v12  ;;  %v906_v15 = vadd.f32 %v905_v14, %v824_v10 }
 0x5df   :  { %v1009_v17 = vadd.f32 %v1544_v13, %v1000_v62  ;;  %v999_v18 = vadd.f32 %v990_v16, %v906_v15  ;;  %v1306_v62 = vld [vmem:[%s2331_s19 + $0x8] sm:$0xff]  ;;  %v1307_v15 = vld [vmem:[%s2331_s19 + $0x10] sm:$0xff]  ;;  %v1406_v16 = vld [vmem:[%s2332_s20] sm:$0xff] }
 0x5e1   :  { %v1008_v19 = vadd.f32 %v1544_v13, %v999_v18  ;;  %v1011_v63 = vsel %vm379_vm2, %v1009_v17, 0.0 }
 0x5e3   :  { %v1010_v0 = vsel %vm379_vm2, %v1008_v19, 0.0 }
 0x5e4   :  { %v1012_v20 = vadd.f32 %v1011_v63, %v1010_v0  ;;  %v1302_v0 = vld [vmem:[%s2334_s21 + $0x8] sm:$0xff] }
 0x5e6   :  { %v1013_v21 = vrot.slane %v1012_v20, 4 }
 0x5e8   :  { %v1014_v23 = vadd.f32 %v1013_v21, %v1012_v20  ;;  %v1301_v21 = vld [vmem:[%s2334_s21] sm:$0xff] }
 0x5ea   :  { %v1015_v24 = vrot.slane %v1014_v23, 2 }
 0x5ec   :  { %v1016_v25 = vadd.f32 %v1015_v24, %v1014_v23 }
 0x5ee   :  { %v1017_v26 = vrot.slane %v1016_v25, 1 }
 0x5f0   :  { %v1018_v27 = vadd.f32 %v1017_v26, %v1016_v25  ;;  %v1304_v25 = vld [vmem:[%s2334_s21 + $0x18] sm:$0xff] }
 0x5f2   :  { %1793 = vmatmul.mubr.msk.f32.vlgmr.msra.gmra.mxu1 %vm379_vm2, %v1018_v27 }
 0x5f3   :  { %1807 = vmatpush3.msra.mxu1 %v1210_v44 }
 0x5f4   :  { %1808 = vmatprep.subr.mxu1 %v1209_v45 }
 0x5f5   :  { %1809 = vmatpush3.msra.mxu1 %v1209_v45 }
 0x5f6   :  { %1810 = vmatprep.subr.mxu1 %v1208_v46 }
 0x5f7   :  { %1811 = vmatpush3.msra.mxu1 %v1208_v46 }
 0x5f8   :  { %1812 = vmatprep.subr.mxu1 %v1207_v47 }
 0x5f9   :  { %1813 = vmatpush3.msra.mxu1 %v1207_v47 }
 0x5fa   :  { %1827 = vmatprep.subr.mxu1 %v1413_v2 }
 0x6b2   :  { %v1088_v28 = vpop.f32.mrf.mxu1 }
 0x6b3   :  { %v1095_v29 = vrot.slane %v1088_v28, %v2034_v22  ;;  %v1303_v28 = vld [vmem:[%s2334_s21 + $0x10] sm:$0xff] }
 0x6b4   :  { %v1794_v30 = vpop.f32.mrf.mxu1 }
 0x6b5   :  { %v1096_v31 = vsub.f32 %v1008_v19, %v1095_v29  ;;  %v1097_v32 = vsub.f32 %v1009_v17, %v1095_v29 }
 0x6b7   :  { %v1098_v33 = vmul.f32 %v1096_v31, %v1096_v31  ;;  %v1099_v34 = vmul.f32 %v1097_v32, %v1097_v32 }
 0x6b9   :  { %v1100_v35 = vsel %vm379_vm2, %v1098_v33, 0.0  ;;  %v1101_v36 = vsel %vm379_vm2, %v1099_v34, 0.0 }
 0x6ba   :  { %v1102_v37 = vadd.f32 %v1101_v36, %v1100_v35 }
 0x6bc   :  { %v1103_v38 = vrot.slane %v1102_v37, 4 }
 0x6be   :  { %v1104_v39 = vadd.f32 %v1103_v38, %v1102_v37 }
 0x6c0   :  { %v1105_v40 = vrot.slane %v1104_v39, 2 }
 0x6c2   :  { %v1106_v41 = vadd.f32 %v1105_v40, %v1104_v39 }
 0x6c4   :  { %v1107_v42 = vrot.slane %v1106_v41, 1 }
 0x6c6   :  { %v1108_v43 = vadd.f32 %v1107_v42, %v1106_v41 }
 0x6c8   :  { %1804 = vmatmul.mubr.msk.f32.vlgmr.msra.gmra.mxu0 %vm379_vm2, %v1108_v43 }
 0x788   :  { %v1178_v48 = vpop.f32.mrf.mxu0 }
 0x789   :  { %v1179_v49 = vadd.f32 1e-05, %v1178_v48 }
 0x78a   :  { %v1805_v50 = vpop.f32.mrf.mxu0 }
 0x78b   :  { %1855 = vrsqrt.f32 %v1179_v49 }
 0x798   :  { %v1856_v51 = vpop.eup %1855 }
 0x799   :  { %v1186_v52 = vrot.slane %v1856_v51, %v2034_v22  ;;  %v1305_v22 = vld [vmem:[%s2331_s19] sm:$0xff] }
 0x79a   :  { %1821 = vmatprep.mubr.msk.f32.mxu0 %vm579_vm3, %v1305_v22 }
 0x79b   :  { %v1187_v54 = vmul.f32 %v1186_v52, %v1096_v31  ;;  %v1188_v55 = vmul.f32 %v1186_v52, %v1097_v32 }
 0x79d   :  { %v1196_v57 = vmul.f32 %v1547_v53, %v1187_v54  ;;  %v1197_v58 = vmul.f32 %v1547_v53, %v1188_v55 }
 0x79f   :  { %v1205_v59 = vadd.f32 %v1548_v56, %v1196_v57  ;;  %v1206_v1 = vadd.f32 %v1548_v56, %v1197_v58 }
 0x7a1   :  { %1814 = vmatprep.mubr.msk.f32.mxu1 %vm379_vm2, %v1205_v59 }
 0x7a2   :  { %1815 = vmatmul.mubr.msk.f32.vlgmr.msra.gmra.mxu1 %vm379_vm2, %v1206_v1 }
 0x7a3   :  { %1828 = vmatpush3.msra.mxu1 %v1413_v2 }
 0x7a4   :  { %1829 = vmatprep.subr.mxu1 %v1412_v3 }
 0x7a5   :  { %1830 = vmatpush3.msra.mxu1 %v1412_v3 }
 0x7a6   :  { %1831 = vmatprep.subr.mxu1 %v1411_v6 }
 0x7a7   :  { %1832 = vmatpush3.msra.mxu1 %v1411_v6 }
 0x7a8   :  { %1833 = vmatprep.subr.mxu1 %v1410_v7 }
 0x7a9   :  { %1834 = vmatpush3.msra.mxu1 %v1410_v7 }
 0x7aa   :  { %1835 = vmatprep.subr.mxu1 %v1409_v8 }
 0x7ab   :  { %1836 = vmatpush3.msra.mxu1 %v1409_v8 }
 0x7ac   :  { %1837 = vmatprep.subr.mxu1 %v1408_v9 }
 0x7ad   :  { %1838 = vmatpush3.msra.mxu1 %v1408_v9 }
 0x862   :  { %v1816_v10 = vpop.f32.mrf.mxu1 }
 0x863   :  { %v1296_v61 = vadd.f32 %v1816_v10, %v1549_v60 }
 0x864   :  { %v1290_v11 = vpop.f32.mrf.mxu1 }
 0x865   :  { %v1300_v12 = vadd.f32 %v1296_v61, %v1996_v5  ;;  %v1291_v13 = vadd.f32 %v1549_v60, %v1290_v11  ;;  %v1407_v5 = vld [vmem:[%s2332_s20 + $0x8] sm:$0xff] }
 0x866   :  { %1839 = vmatprep.subr.mxu1 %v1407_v5 }
 0x867   :  { %v1299_v14 = vadd.f32 %v1291_v13, %v1991_v4  ;;  %1817 = vmatprep.subr.mxu0 %v1300_v12  ;;  %v1308_v4 = vld [vmem:[%s2331_s19 + $0x18] sm:$0xff]  ;;  %1840 = vmatpush3.msra.mxu1 %v1407_v5 }
 0x868   :  { %1818 = vmatpush3.msra.mxu0 %v1300_v12  ;;  %1841 = vmatprep.subr.mxu1 %v1406_v16 }
 0x869   :  { %1819 = vmatprep.subr.mxu0 %v1299_v14  ;;  %1842 = vmatpush3.msra.mxu1 %v1406_v16 }
 0x86a   :  { %1820 = vmatpush3.msra.mxu0 %v1299_v14 }
 0x86b   :  { %1822 = vmatmul.mubr.msk.f32.vlgmr.msra.gmra.mxu0 %vm579_vm3, %v1306_v62 }
 0x86c   :  { %1824 = vmatprep.mubr.msk.f32.mxu0 %vm579_vm3, %v1307_v15 }
 0x86f   :  { %1825 = vmatmul.mubr.msk.f32.gmra.mxu0 %vm579_vm3, %v1308_v4 }
 0x92b   :  { %v1823_v17 = vpop.f32.mrf.mxu0 }
 0x92d   :  { %v1387_v18 = vpop.f32.mrf.mxu0 }
 0x92e   :  { %1843 = vmatprep.mubr.msk.f32.mxu1 %vm81_vm1, %v1387_v18 }
 0x92f   :  { %v1826_v19 = vpop.f32.mrf.mxu0  ;;  %1844 = vmatmul.mubr.msk.f32.vlgmr.msra.gmra.mxu1 %vm81_vm1, %v1823_v17 }
 0x931   :  { %v1397_v63 = vpop.f32.mrf.mxu0 }
 0x932   :  { %1846 = vmatprep.mubr.msk.f32.mxu1 %vm81_vm1, %v1397_v63 }
 0x933   :  { %1847 = vmatmul.mubr.msk.f32.gmra.mxu1 %vm81_vm1, %v1826_v19 }
 0x9ef   :  { %v1845_v20 = vpop.f32.mrf.mxu1 }
 0x9f0   :  { %v1512_v23 = vadd.f32 %v1845_v20, %v1302_v0 }
 0x9f1   :  { %v1492_v24 = vpop.f32.mrf.mxu1 }
 0x9f2   :  { %1516 = vst [vmem:[%s2335_s22 + $0x8] sm:$0xff] %v1512_v23  ;;  %v1511_v26 = vadd.f32 %v1492_v24, %v1301_v21 }
 0x9f3   :  { %v1848_v27 = vpop.f32.mrf.mxu1 }
 0x9f4   :  { %1515 = vst [vmem:[%s2335_s22] sm:$0xff] %v1511_v26  ;;  %v1514_v29 = vadd.f32 %v1848_v27, %v1304_v25 }
 0x9f5   :  { %v1502_v30 = vpop.f32.mrf.mxu1 }
 0x9f6   :  { %1518 = vst [vmem:[%s2335_s22 + $0x18] sm:$0xff] %v1514_v29  ;;  %v1513_v31 = vadd.f32 %v1502_v30, %v1303_v28 }
 0x9f8   :  { %1517 = vst [vmem:[%s2335_s22 + $0x10] sm:$0xff] %v1513_v31 }

// kernel: wrapped_hourglass_fwd.21
= control target key start
LH: loop header
LB: loop body
LE: loop exit
PB: predicated region body
PF: predicated region fallthrough
CT: control target
= control target key end

     0   :  { %v1232_v2 = vmov 0.0   ;;  %vm1233_vm0 = vmmov 0   ;;  %v256_v57 = vlaneseq  ;;  %vm610_vm1 = vcmask 523264   ;;  %s1735_s5 = inlined_call_operand.vmem [shape: f32[128,128], index: 5, kind: input, shape index: {}]   ;;  %s1736_s0 = inlined_call_operand.vmem [shape: f32[32,128], index: 0, kind: input, shape index: {}]   ;;  %s1737_s4 = inlined_call_operand.vmem [shape: f32[128,128], index: 4, kind: input, shape index: {}]   ;;  %s1738_s6 = inlined_call_operand.vmem [shape: f32[1,128], index: 6, kind: input, shape index: {}]   ;;  %s1739_s7 = inlined_call_operand.vmem [shape: f32[128,128], index: 7, kind: input, shape index: {}]   ;;  %s1740_s9 = inlined_call_operand.vmem [shape: f32[128,64], index: 9, kind: input, shape index: {}]   ;;  %s1741_s2 = inlined_call_operand.vmem [shape: f32[1,128], index: 2, kind: input, shape index: {}]   ;;  %s1742_s3 = inlined_call_operand.vmem [shape: f32[1,128], index: 3, kind: input, shape index: {}]   ;;  %s1743_s11 = inlined_call_operand.vmem [shape: f32[64,64], index: 11, kind: input, shape index: {}]   ;;  %s1744_s8 = inlined_call_operand.vmem [shape: f32[1,128], index: 8, kind: input, shape index: {}]   ;;  %s1745_s12 = inlined_call_operand.vmem [shape: f32[64,128], index: 12, kind: input, shape index: {}]   ;;  %s1746_s10 = inlined_call_operand.vmem [shape: f32[1,64], index: 10, kind: input, shape index: {}]   ;;  %s1747_s1 = inlined_call_operand.vmem [shape: f32[32,128], index: 1, kind: input, shape index: {}]   ;;  %s1748_s13 = inlined_call_operand.vmem [shape: f32[1,128], index: 13, kind: input, shape index: {}]   ;;  %s1749_s14 = inlined_call_operand.vmem [shape: f32[32,64], index: 14, kind: output, shape index: {0}]   ;;  %s1750_s15 = inlined_call_operand.vmem [shape: f32[32,128], index: 15, kind: output, shape index: {1}]  }
   0x1   :  { %v68_v0 = vld [vmem:[%s1735_s5 + $0x78] sm:$0xff]  ;;  %v67_v1 = vld [vmem:[%s1735_s5 + $0x70] sm:$0xff]  ;;  %1030 = vmatprep.subr.mxu1 %v1232_v2  ;;  %v66_v3 = vld [vmem:[%s1735_s5 + $0x68] sm:$0xff]  ;;  %1062 = vmatprep.mubr.msk.f32.mxu1 %vm1233_vm0, %v1232_v2 }
   0x2   :  { %992 = vmatprep.subr.mxu0 %v68_v0  ;;  %v65_v4 = vld [vmem:[%s1735_s5 + $0x60] sm:$0xff]  ;;  %v64_v6 = vld [vmem:[%s1735_s5 + $0x58] sm:$0xff]  ;;  %v175_v8 = vld [vmem:[%s1737_s4 + $0x70] sm:$0xff]  ;;  %v1467_v58 = vshrl.u32 %v256_v57, 7 }
   0x3   :  { %993 = vmatpush3.msra.mxu0 %v68_v0  ;;  %v49_v5 = vld [vmem:[%s1736_s0] sm:$0xff]  ;;  %v176_v7 = vld [vmem:[%s1737_s4 + $0x78] sm:$0xff]  ;;  %v63_v9 = vld [vmem:[%s1735_s5 + $0x50] sm:$0xff] }
   0x4   :  { %994 = vmatprep.subr.mxu0 %v67_v1  ;;  %1024 = vmatprep.mubr.f32.mxu0 %v49_v5  ;;  %v174_v10 = vld [vmem:[%s1737_s4 + $0x68] sm:$0xff]  ;;  %v61_v12 = vld [vmem:[%s1735_s5 + $0x40] sm:$0xff]  ;;  %v60_v13 = vld [vmem:[%s1735_s5 + $0x38] sm:$0xff]  ;;  %v258_v59 = vsub.s32 0, %v1467_v58 }
   0x5   :  { %995 = vmatpush3.msra.mxu0 %v67_v1  ;;  %1031 = vmatpush3.msra.mxu1 %v176_v7  ;;  %v62_v11 = vld [vmem:[%s1735_s5 + $0x48] sm:$0xff]  ;;  %v59_v14 = vld [vmem:[%s1735_s5 + $0x30] sm:$0xff]  ;;  %v57_v16 = vld [vmem:[%s1735_s5 + $0x20] sm:$0xff] }
   0x6   :  { %996 = vmatprep.subr.mxu0 %v66_v3  ;;  %1032 = vmatprep.subr.mxu1 %v1232_v2  ;;  %v58_v15 = vld [vmem:[%s1735_s5 + $0x28] sm:$0xff]  ;;  %v56_v17 = vld [vmem:[%s1735_s5 + $0x18] sm:$0xff]  ;;  %v55_v18 = vld [vmem:[%s1735_s5 + $0x10] sm:$0xff] }
   0x7   :  { %997 = vmatpush3.msra.mxu0 %v66_v3  ;;  %1033 = vmatpush3.msra.mxu1 %v175_v8  ;;  %v54_v19 = vld [vmem:[%s1735_s5 + $0x8] sm:$0xff]  ;;  %v53_v20 = vld [vmem:[%s1735_s5] sm:$0xff]  ;;  %v51_v22 = vld [vmem:[%s1736_s0 + $0x10] sm:$0xff] }
   0x8   :  { %998 = vmatprep.subr.mxu0 %v65_v4  ;;  %1034 = vmatprep.subr.mxu1 %v1232_v2  ;;  %v50_v21 = vld [vmem:[%s1736_s0 + $0x8] sm:$0xff]  ;;  %v52_v23 = vld [vmem:[%s1736_s0 + $0x18] sm:$0xff]  ;;  %v173_v24 = vld [vmem:[%s1737_s4 + $0x60] sm:$0xff] }
   0x9   :  { %999 = vmatpush3.msra.mxu0 %v65_v4  ;;  %1035 = vmatpush3.msra.mxu1 %v174_v10  ;;  %v172_v25 = vld [vmem:[%s1737_s4 + $0x58] sm:$0xff]  ;;  %v171_v26 = vld [vmem:[%s1737_s4 + $0x50] sm:$0xff]  ;;  %v170_v27 = vld [vmem:[%s1737_s4 + $0x48] sm:$0xff] }
   0xa   :  { %1000 = vmatprep.subr.mxu0 %v64_v6  ;;  %1036 = vmatprep.subr.mxu1 %v1232_v2  ;;  %v169_v28 = vld [vmem:[%s1737_s4 + $0x40] sm:$0xff]  ;;  %v168_v29 = vld [vmem:[%s1737_s4 + $0x38] sm:$0xff]  ;;  %v167_v30 = vld [vmem:[%s1737_s4 + $0x30] sm:$0xff] }
   0xb   :  { %1001 = vmatpush3.msra.mxu0 %v64_v6  ;;  %1037 = vmatpush3.msra.mxu1 %v173_v24  ;;  %v166_v31 = vld [vmem:[%s1737_s4 + $0x28] sm:$0xff]  ;;  %v165_v32 = vld [vmem:[%s1737_s4 + $0x20] sm:$0xff]  ;;  %v164_v33 = vld [vmem:[%s1737_s4 + $0x18] sm:$0xff] }
   0xc   :  { %1002 = vmatprep.subr.mxu0 %v63_v9  ;;  %1038 = vmatprep.subr.mxu1 %v1232_v2  ;;  %v163_v34 = vld [vmem:[%s1737_s4 + $0x10] sm:$0xff]  ;;  %v162_v35 = vld [vmem:[%s1737_s4 + $0x8] sm:$0xff]  ;;  %v161_v36 = vld [vmem:[%s1737_s4] sm:$0xff] }
   0xd   :  { %1003 = vmatpush3.msra.mxu0 %v63_v9  ;;  %1039 = vmatpush3.msra.mxu1 %v172_v25  ;;  %v860_v38 = vld [vmem:[%s1738_s6] ss:$0 sm:$0xff]  ;;  %v397_v55 = vld [vmem:[%s1739_s7 + $0x78] sm:$0xff]  ;;  %v396_v56 = vld [vmem:[%s1739_s7 + $0x70] sm:$0xff] }
   0xe   :  { %1004 = vmatprep.subr.mxu0 %v62_v11  ;;  %1040 = vmatprep.subr.mxu1 %v1232_v2 }
   0xf   :  { %1005 = vmatpush3.msra.mxu0 %v62_v11  ;;  %1041 = vmatpush3.msra.mxu1 %v171_v26 }
  0x10   :  { %1006 = vmatprep.subr.mxu0 %v61_v12  ;;  %1042 = vmatprep.subr.mxu1 %v1232_v2 }
  0x11   :  { %1007 = vmatpush3.msra.mxu0 %v61_v12  ;;  %1043 = vmatpush3.msra.mxu1 %v170_v27 }
  0x12   :  { %1008 = vmatprep.subr.mxu0 %v60_v13  ;;  %1044 = vmatprep.subr.mxu1 %v1232_v2 }
  0x13   :  { %1009 = vmatpush3.msra.mxu0 %v60_v13  ;;  %1045 = vmatpush3.msra.mxu1 %v169_v28 }
  0x14   :  { %1010 = vmatprep.subr.mxu0 %v59_v14  ;;  %1046 = vmatprep.subr.mxu1 %v1232_v2 }
  0x15   :  { %1011 = vmatpush3.msra.mxu0 %v59_v14  ;;  %1047 = vmatpush3.msra.mxu1 %v168_v29 }
  0x16   :  { %1012 = vmatprep.subr.mxu0 %v58_v15  ;;  %1048 = vmatprep.subr.mxu1 %v1232_v2 }
  0x17   :  { %1013 = vmatpush3.msra.mxu0 %v58_v15  ;;  %1049 = vmatpush3.msra.mxu1 %v167_v30 }
  0x18   :  { %1014 = vmatprep.subr.mxu0 %v57_v16  ;;  %1050 = vmatprep.subr.mxu1 %v1232_v2 }
  0x19   :  { %1015 = vmatpush3.msra.mxu0 %v57_v16  ;;  %1051 = vmatpush3.msra.mxu1 %v166_v31  ;;  %v395_v16 = vld [vmem:[%s1739_s7 + $0x68] sm:$0xff] }
  0x1a   :  { %1016 = vmatprep.subr.mxu0 %v56_v17  ;;  %1052 = vmatprep.subr.mxu1 %v1232_v2 }
  0x1b   :  { %1017 = vmatpush3.msra.mxu0 %v56_v17  ;;  %1053 = vmatpush3.msra.mxu1 %v165_v32  ;;  %v394_v17 = vld [vmem:[%s1739_s7 + $0x60] sm:$0xff] }
  0x1c   :  { %1018 = vmatprep.subr.mxu0 %v55_v18  ;;  %1054 = vmatprep.subr.mxu1 %v1232_v2 }
  0x1d   :  { %1019 = vmatpush3.msra.mxu0 %v55_v18  ;;  %1055 = vmatpush3.msra.mxu1 %v164_v33  ;;  %v393_v18 = vld [vmem:[%s1739_s7 + $0x58] sm:$0xff] }
  0x1e   :  { %1020 = vmatprep.subr.mxu0 %v54_v19  ;;  %1056 = vmatprep.subr.mxu1 %v1232_v2 }
  0x1f   :  { %1021 = vmatpush3.msra.mxu0 %v54_v19  ;;  %1057 = vmatpush3.msra.mxu1 %v163_v34  ;;  %v392_v19 = vld [vmem:[%s1739_s7 + $0x50] sm:$0xff] }
  0x20   :  { %1022 = vmatprep.subr.mxu0 %v53_v20  ;;  %1058 = vmatprep.subr.mxu1 %v1232_v2 }
  0x21   :  { %1023 = vmatpush3.msra.mxu0 %v53_v20  ;;  %1059 = vmatpush3.msra.mxu1 %v162_v35  ;;  %v391_v20 = vld [vmem:[%s1739_s7 + $0x48] sm:$0xff] }
  0x22   :  { %1025 = vmatmul.mubr.f32.vlgmr.msra.gmra.mxu0 %v50_v21  ;;  %1065 = vmatprep.subr.mxu0 %v1232_v2  ;;  %v390_v21 = vld [vmem:[%s1739_s7 + $0x40] sm:$0xff] }
  0x23   :  { %1027 = vmatprep.mubr.f32.mxu0 %v51_v22  ;;  %1066 = vmatpush3.msra.mxu0 %v176_v7  ;;  %v389_v22 = vld [vmem:[%s1739_s7 + $0x38] sm:$0xff] }
  0x24   :  { %1067 = vmatprep.subr.mxu0 %v1232_v2  ;;  %1060 = vmatprep.subr.mxu1 %v1232_v2 }
  0x25   :  { %1068 = vmatpush3.msra.mxu0 %v175_v8  ;;  %1061 = vmatpush3.msra.mxu1 %v161_v36 }
  0x26   :  { %1028 = vmatmul.mubr.f32.gmra.mxu0 %v52_v23  ;;  %1069 = vmatprep.subr.mxu0 %v1232_v2  ;;  %v388_v23 = vld [vmem:[%s1739_s7 + $0x30] sm:$0xff] }
  0x27   :  { %1070 = vmatpush3.msra.mxu0 %v174_v10  ;;  %1097 = vmatprep.mubr.msk.f32.mxu0 %vm1233_vm0, %v1232_v2 }
  0x28   :  { %1071 = vmatprep.subr.mxu0 %v1232_v2  ;;  %1100 = vmatprep.subr.mxu1 %v397_v55 }
  0x29   :  { %1072 = vmatpush3.msra.mxu0 %v173_v24  ;;  %v387_v24 = vld [vmem:[%s1739_s7 + $0x28] sm:$0xff] }
  0x2a   :  { %1073 = vmatprep.subr.mxu0 %v1232_v2 }
  0x2b   :  { %1074 = vmatpush3.msra.mxu0 %v172_v25  ;;  %v386_v25 = vld [vmem:[%s1739_s7 + $0x20] sm:$0xff] }
  0x2c   :  { %1075 = vmatprep.subr.mxu0 %v1232_v2 }
  0x2d   :  { %1076 = vmatpush3.msra.mxu0 %v171_v26  ;;  %v385_v26 = vld [vmem:[%s1739_s7 + $0x18] sm:$0xff] }
  0x2e   :  { %1077 = vmatprep.subr.mxu0 %v1232_v2 }
  0x2f   :  { %1078 = vmatpush3.msra.mxu0 %v170_v27  ;;  %v384_v27 = vld [vmem:[%s1739_s7 + $0x10] sm:$0xff] }
  0x30   :  { %1079 = vmatprep.subr.mxu0 %v1232_v2 }
  0x31   :  { %1080 = vmatpush3.msra.mxu0 %v169_v28  ;;  %v383_v28 = vld [vmem:[%s1739_s7 + $0x8] sm:$0xff] }
  0x32   :  { %1081 = vmatprep.subr.mxu0 %v1232_v2 }
  0x33   :  { %1082 = vmatpush3.msra.mxu0 %v168_v29  ;;  %v382_v29 = vld [vmem:[%s1739_s7] sm:$0xff] }
  0x34   :  { %1083 = vmatprep.subr.mxu0 %v1232_v2 }
  0x35   :  { %1084 = vmatpush3.msra.mxu0 %v167_v30  ;;  %v505_v30 = vld [vmem:[%s1740_s9 + $0x78] sm:$0xff] }
  0x36   :  { %1085 = vmatprep.subr.mxu0 %v1232_v2 }
  0x37   :  { %1086 = vmatpush3.msra.mxu0 %v166_v31  ;;  %v504_v31 = vld [vmem:[%s1740_s9 + $0x70] sm:$0xff] }
  0x38   :  { %1087 = vmatprep.subr.mxu0 %v1232_v2 }
  0x39   :  { %1088 = vmatpush3.msra.mxu0 %v165_v32  ;;  %v503_v32 = vld [vmem:[%s1740_s9 + $0x68] sm:$0xff] }
  0x3a   :  { %1089 = vmatprep.subr.mxu0 %v1232_v2 }
  0x3b   :  { %1090 = vmatpush3.msra.mxu0 %v164_v33  ;;  %v502_v33 = vld [vmem:[%s1740_s9 + $0x60] sm:$0xff] }
  0x3c   :  { %1091 = vmatprep.subr.mxu0 %v1232_v2 }
  0x3d   :  { %1092 = vmatpush3.msra.mxu0 %v163_v34  ;;  %v501_v34 = vld [vmem:[%s1740_s9 + $0x58] sm:$0xff] }
  0x3e   :  { %1093 = vmatprep.subr.mxu0 %v1232_v2 }
  0x3f   :  { %1094 = vmatpush3.msra.mxu0 %v162_v35  ;;  %v500_v35 = vld [vmem:[%s1740_s9 + $0x50] sm:$0xff] }
  0x40   :  { %1095 = vmatprep.subr.mxu0 %v1232_v2 }
  0x41   :  { %1096 = vmatpush3.msra.mxu0 %v161_v36  ;;  %v499_v36 = vld [vmem:[%s1740_s9 + $0x48] sm:$0xff] }
  0x42   :  { %1138 = vmatprep.subr.mxu0 %v505_v30 }
  0xe2   :  { %v1026_v37 = vpop.f32.mrf.mxu0 }
  0xe3   :  { %v148_v42 = vadd.f32 %v1026_v37, %v860_v38  ;;  %v498_v37 = vld [vmem:[%s1740_s9 + $0x40] sm:$0xff] }
  0xe4   :  { %v142_v39 = vpop.f32.mrf.mxu0 }
  0xe5   :  { %v143_v40 = vadd.f32 %v860_v38, %v142_v39  ;;  %v496_v39 = vld [vmem:[%s1740_s9 + $0x30] sm:$0xff] }
  0xe6   :  { %v1029_v41 = vpop.f32.mrf.mxu0 }
  0xe7   :  { %v177_v44 = vadd.f32 %v148_v42, %v143_v40  ;;  %v158_v46 = vadd.f32 %v1029_v41, %v860_v38  ;;  %v494_v41 = vld [vmem:[%s1740_s9 + $0x20] sm:$0xff] }
  0xe8   :  { %v152_v43 = vpop.f32.mrf.mxu0 }
  0xe9   :  { %v153_v45 = vadd.f32 %v860_v38, %v152_v43  ;;  %v497_v38 = vld [vmem:[%s1740_s9 + $0x38] sm:$0xff] }
  0xeb   :  { %v178_v47 = vadd.f32 %v177_v44, %v153_v45 }
  0xed   :  { %v179_v48 = vadd.f32 %v178_v47, %v158_v46 }
  0xef   :  { %v180_v49 = vrot.slane %v179_v48, 4 }
  0xf1   :  { %v181_v50 = vadd.f32 %v180_v49, %v179_v48  ;;  %v861_v48 = vld [vmem:[%s1741_s2] ss:$0 sm:$0xff] }
  0xf3   :  { %v182_v51 = vrot.slane %v181_v50, 2 }
  0xf5   :  { %v183_v52 = vadd.f32 %v182_v51, %v181_v50 }
  0xf7   :  { %v184_v53 = vrot.slane %v183_v52, 1 }
  0xf9   :  { %v185_v54 = vadd.f32 %v184_v53, %v183_v52  ;;  %v862_v53 = vld [vmem:[%s1742_s3] ss:$0 sm:$0xff] }
  0xfb   :  { %1063 = vmatmul.mubr.f32.vlgmr.msra.gmra.mxu1 %v185_v54 }
  0xfc   :  { %1101 = vmatpush3.msra.mxu1 %v397_v55 }
  0xfd   :  { %1102 = vmatprep.subr.mxu1 %v396_v56 }
  0xfe   :  { %1103 = vmatpush3.msra.mxu1 %v396_v56 }
  0xff   :  { %1104 = vmatprep.subr.mxu1 %v395_v16 }
 0x100   :  { %1105 = vmatpush3.msra.mxu1 %v395_v16 }
 0x101   :  { %1106 = vmatprep.subr.mxu1 %v394_v17 }
 0x102   :  { %1107 = vmatpush3.msra.mxu1 %v394_v17 }
 0x103   :  { %1108 = vmatprep.subr.mxu1 %v393_v18 }
 0x104   :  { %1109 = vmatpush3.msra.mxu1 %v393_v18 }
 0x105   :  { %1110 = vmatprep.subr.mxu1 %v392_v19 }
 0x106   :  { %1111 = vmatpush3.msra.mxu1 %v392_v19  ;;  %v604_v19 = vld [vmem:[%s1743_s11 + $0x10] sm:$0xff] }
 0x107   :  { %1112 = vmatprep.subr.mxu1 %v391_v20 }
 0x108   :  { %1113 = vmatpush3.msra.mxu1 %v391_v20  ;;  %v603_v20 = vld [vmem:[%s1743_s11 + $0x8] sm:$0xff] }
 0x109   :  { %1114 = vmatprep.subr.mxu1 %v390_v21 }
 0x10a   :  { %1115 = vmatpush3.msra.mxu1 %v390_v21  ;;  %v602_v21 = vld [vmem:[%s1743_s11] sm:$0xff] }
 0x10b   :  { %1116 = vmatprep.subr.mxu1 %v389_v22 }
 0x10c   :  { %1117 = vmatpush3.msra.mxu1 %v389_v22  ;;  %v731_v22 = vld [vmem:[%s1745_s12 + $0x38] sm:$0xff] }
 0x10d   :  { %1118 = vmatprep.subr.mxu1 %v388_v23 }
 0x10e   :  { %1119 = vmatpush3.msra.mxu1 %v388_v23  ;;  %v864_v23 = vld [vmem:[%s1746_s10] ss:$0 sm:$0xff] }
 0x10f   :  { %1120 = vmatprep.subr.mxu1 %v387_v24 }
 0x110   :  { %1121 = vmatpush3.msra.mxu1 %v387_v24 }
 0x111   :  { %1122 = vmatprep.subr.mxu1 %v386_v25 }
 0x112   :  { %1123 = vmatpush3.msra.mxu1 %v386_v25 }
 0x113   :  { %1124 = vmatprep.subr.mxu1 %v385_v26 }
 0x114   :  { %1125 = vmatpush3.msra.mxu1 %v385_v26 }
 0x115   :  { %1126 = vmatprep.subr.mxu1 %v384_v27 }
 0x116   :  { %1127 = vmatpush3.msra.mxu1 %v384_v27 }
 0x117   :  { %1128 = vmatprep.subr.mxu1 %v383_v28 }
 0x118   :  { %1129 = vmatpush3.msra.mxu1 %v383_v28 }
 0x119   :  { %1130 = vmatprep.subr.mxu1 %v382_v29 }
 0x11a   :  { %1131 = vmatpush3.msra.mxu1 %v382_v29 }
 0x1bb   :  { %v252_v60 = vpop.f32.mrf.mxu1 }
 0x1bc   :  { %v259_v61 = vrot.slane %v252_v60, %v258_v59 }
 0x1bd   :  { %v1064_v62 = vpop.f32.mrf.mxu1 }
 0x1be   :  { %v1472_v63 = vsub.f32 %v143_v40, %v259_v61  ;;  %v1474_v0 = vsub.f32 %v148_v42, %v259_v61  ;;  %v1476_v1 = vsub.f32 %v153_v45, %v259_v61  ;;  %v1478_v2 = vsub.f32 %v158_v46, %v259_v61  ;;  %v495_v40 = vld [vmem:[%s1740_s9 + $0x28] sm:$0xff]  ;;  %v493_v42 = vld [vmem:[%s1740_s9 + $0x18] sm:$0xff] }
 0x1c0   :  { %v264_v3 = vmul.f32 %v1472_v63, %v1472_v63  ;;  %v265_v4 = vmul.f32 %v1474_v0, %v1474_v0  ;;  %v266_v5 = vmul.f32 %v1476_v1, %v1476_v1  ;;  %v267_v7 = vmul.f32 %v1478_v2, %v1478_v2 }
 0x1c2   :  { %v268_v6 = vadd.f32 %v265_v4, %v264_v3  ;;  %v491_v3 = vld [vmem:[%s1740_s9 + $0x8] sm:$0xff]  ;;  %v490_v4 = vld [vmem:[%s1740_s9] sm:$0xff] }
 0x1c4   :  { %v269_v8 = vadd.f32 %v268_v6, %v266_v5  ;;  %v609_v5 = vld [vmem:[%s1743_s11 + $0x38] sm:$0xff]  ;;  %v608_v6 = vld [vmem:[%s1743_s11 + $0x30] sm:$0xff] }
 0x1c5   :  { %1176 = vmatprep.subr.mxu1 %v609_v5 }
 0x1c6   :  { %v270_v9 = vadd.f32 %v269_v8, %v267_v7  ;;  %v607_v7 = vld [vmem:[%s1743_s11 + $0x28] sm:$0xff]  ;;  %v606_v8 = vld [vmem:[%s1743_s11 + $0x20] sm:$0xff] }
 0x1c8   :  { %v271_v10 = vrot.slane %v270_v9, 4 }
 0x1ca   :  { %v272_v11 = vadd.f32 %v271_v10, %v270_v9  ;;  %v605_v9 = vld [vmem:[%s1743_s11 + $0x18] sm:$0xff] }
 0x1cc   :  { %v273_v12 = vrot.slane %v272_v11, 2 }
 0x1ce   :  { %v274_v13 = vadd.f32 %v273_v12, %v272_v11  ;;  %v863_v11 = vld [vmem:[%s1744_s8] ss:$0 sm:$0xff] }
 0x1d0   :  { %v275_v14 = vrot.slane %v274_v13, 1 }
 0x1d2   :  { %v276_v15 = vadd.f32 %v275_v14, %v274_v13 }
 0x1d4   :  { %1098 = vmatmul.mubr.f32.vlgmr.msra.gmra.mxu0 %v276_v15 }
 0x1d5   :  { %1139 = vmatpush3.msra.mxu0 %v505_v30 }
 0x1d6   :  { %1140 = vmatprep.subr.mxu0 %v504_v31 }
 0x1d7   :  { %1141 = vmatpush3.msra.mxu0 %v504_v31 }
 0x1d8   :  { %1142 = vmatprep.subr.mxu0 %v503_v32 }
 0x1d9   :  { %1143 = vmatpush3.msra.mxu0 %v503_v32 }
 0x1da   :  { %1144 = vmatprep.subr.mxu0 %v502_v33 }
 0x1db   :  { %1145 = vmatpush3.msra.mxu0 %v502_v33 }
 0x1dc   :  { %1146 = vmatprep.subr.mxu0 %v501_v34 }
 0x1dd   :  { %1147 = vmatpush3.msra.mxu0 %v501_v34  ;;  %v730_v34 = vld [vmem:[%s1745_s12 + $0x30] sm:$0xff] }
 0x1de   :  { %1148 = vmatprep.subr.mxu0 %v500_v35 }
 0x1df   :  { %1149 = vmatpush3.msra.mxu0 %v500_v35 }
 0x1e0   :  { %1150 = vmatprep.subr.mxu0 %v499_v36 }
 0x1e1   :  { %1151 = vmatpush3.msra.mxu0 %v499_v36  ;;  %v729_v36 = vld [vmem:[%s1745_s12 + $0x28] sm:$0xff] }
 0x1e2   :  { %1152 = vmatprep.subr.mxu0 %v498_v37 }
 0x1e3   :  { %1153 = vmatpush3.msra.mxu0 %v498_v37 }
 0x1e4   :  { %1154 = vmatprep.subr.mxu0 %v497_v38 }
 0x1e5   :  { %1155 = vmatpush3.msra.mxu0 %v497_v38  ;;  %v728_v38 = vld [vmem:[%s1745_s12 + $0x20] sm:$0xff] }
 0x1e6   :  { %1156 = vmatprep.subr.mxu0 %v496_v39 }
 0x1e7   :  { %1157 = vmatpush3.msra.mxu0 %v496_v39  ;;  %v727_v39 = vld [vmem:[%s1745_s12 + $0x18] sm:$0xff] }
 0x1e8   :  { %1158 = vmatprep.subr.mxu0 %v495_v40 }
 0x1e9   :  { %1159 = vmatpush3.msra.mxu0 %v495_v40  ;;  %v726_v40 = vld [vmem:[%s1745_s12 + $0x10] sm:$0xff] }
 0x1ea   :  { %1160 = vmatprep.subr.mxu0 %v494_v41 }
 0x1eb   :  { %1161 = vmatpush3.msra.mxu0 %v494_v41  ;;  %v725_v41 = vld [vmem:[%s1745_s12 + $0x8] sm:$0xff] }
 0x1ec   :  { %1162 = vmatprep.subr.mxu0 %v493_v42 }
 0x1ed   :  { %1163 = vmatpush3.msra.mxu0 %v493_v42  ;;  %v724_v42 = vld [vmem:[%s1745_s12] sm:$0xff] }
 0x294   :  { %v343_v43 = vpop.f32.mrf.mxu0 }
 0x295   :  { %v344_v44 = vadd.f32 1e-05, %v343_v43 }
 0x296   :  { %v1099_v45 = vpop.f32.mrf.mxu0 }
 0x297   :  { %1222 = vrsqrt.f32 %v344_v44 }
 0x2a4   :  { %v1223_v46 = vpop.eup %1222 }
 0x2a5   :  { %v351_v47 = vrot.slane %v1223_v46, %v258_v59 }
 0x2a7   :  { %v352_v49 = vmul.f32 %v351_v47, %v1472_v63  ;;  %v353_v50 = vmul.f32 %v351_v47, %v1474_v0  ;;  %v354_v51 = vmul.f32 %v351_v47, %v1476_v1  ;;  %v355_v52 = vmul.f32 %v351_v47, %v1478_v2  ;;  %v492_v2 = vld [vmem:[%s1740_s9 + $0x10] sm:$0xff] }
 0x2a8   :  { %1164 = vmatprep.subr.mxu0 %v492_v2 }
 0x2a9   :  { %v363_v54 = vmul.f32 %v861_v48, %v352_v49  ;;  %v364_v55 = vmul.f32 %v861_v48, %v353_v50  ;;  %v365_v56 = vmul.f32 %v861_v48, %v354_v51  ;;  %v366_v57 = vmul.f32 %v861_v48, %v355_v52  ;;  %1165 = vmatpush3.msra.mxu0 %v492_v2  ;;  %v837_v51 = vld [vmem:[%s1747_s1 + $0x8] sm:$0xff]  ;;  %v869_v52 = vld [vmem:[%s1748_s13] ss:$0 sm:$0xff] }
 0x2aa   :  { %1166 = vmatprep.subr.mxu0 %v491_v3 }
 0x2ab   :  { %v374_v58 = vadd.f32 %v862_v53, %v363_v54  ;;  %v375_v59 = vadd.f32 %v862_v53, %v364_v55  ;;  %v376_v60 = vadd.f32 %v862_v53, %v365_v56  ;;  %v377_v63 = vadd.f32 %v862_v53, %v366_v57  ;;  %1167 = vmatpush3.msra.mxu0 %v491_v3  ;;  %v836_v54 = vld [vmem:[%s1747_s1] sm:$0xff]  ;;  %v838_v3 = vld [vmem:[%s1747_s1 + $0x10] sm:$0xff] }
 0x2ac   :  { %1168 = vmatprep.subr.mxu0 %v490_v4 }
 0x2ad   :  { %v378_v61 = vmax.f32 %v374_v58, 0.0  ;;  %v379_v62 = vmax.f32 %v375_v59, 0.0  ;;  %v380_v0 = vmax.f32 %v376_v60, 0.0  ;;  %v381_v1 = vmax.f32 %v377_v63, 0.0  ;;  %1169 = vmatpush3.msra.mxu0 %v490_v4  ;;  %v839_v60 = vld [vmem:[%s1747_s1 + $0x18] sm:$0xff] }
 0x2af   :  { %1132 = vmatprep.mubr.f32.mxu1 %v378_v61 }
 0x2b0   :  { %1133 = vmatmul.mubr.f32.vlgmr.msra.gmra.mxu1 %v379_v62 }
 0x2b1   :  { %1135 = vmatprep.mubr.f32.mxu1 %v380_v0  ;;  %1177 = vmatpush3.msra.mxu1 %v609_v5 }
 0x2b2   :  { %1178 = vmatprep.subr.mxu1 %v608_v6 }
 0x2b3   :  { %1179 = vmatpush3.msra.mxu1 %v608_v6 }
 0x2b4   :  { %1136 = vmatmul.mubr.f32.gmra.mxu1 %v381_v1  ;;  %1180 = vmatprep.subr.mxu1 %v607_v7 }
 0x2b5   :  { %1181 = vmatpush3.msra.mxu1 %v607_v7 }
 0x2b6   :  { %1182 = vmatprep.subr.mxu1 %v606_v8 }
 0x2b7   :  { %1183 = vmatpush3.msra.mxu1 %v606_v8 }
 0x2b8   :  { %1184 = vmatprep.subr.mxu1 %v605_v9 }
 0x2b9   :  { %1185 = vmatpush3.msra.mxu1 %v605_v9 }
 0x2ba   :  { %1186 = vmatprep.subr.mxu1 %v604_v19 }
 0x2bb   :  { %1187 = vmatpush3.msra.mxu1 %v604_v19 }
 0x2bc   :  { %1188 = vmatprep.subr.mxu1 %v603_v20 }
 0x2bd   :  { %1189 = vmatpush3.msra.mxu1 %v603_v20 }
 0x2be   :  { %1190 = vmatprep.subr.mxu1 %v602_v21 }
 0x2bf   :  { %1191 = vmatpush3.msra.mxu1 %v602_v21 }
 0x2c0   :  { %1198 = vmatprep.subr.mxu1 %v731_v22 }
 0x370   :  { %v1134_v10 = vpop.f32.mrf.mxu1 }
 0x371   :  { %v1610_v14 = vadd.f32 %v1134_v10, %v863_v11 }
 0x372   :  { %v471_v12 = vpop.f32.mrf.mxu1 }
 0x373   :  { %v1608_v13 = vadd.f32 %v863_v11, %v471_v12  ;;  %v841_v56 = vadd.f32 %v837_v51, %v1610_v14 }
 0x374   :  { %v1137_v15 = vpop.f32.mrf.mxu1 }
 0x375   :  { %1170 = vmatprep.mubr.f32.mxu0 %v1608_v13  ;;  %v1616_v18 = vadd.f32 %v1137_v15, %v863_v11  ;;  %v840_v62 = vadd.f32 %v836_v54, %v1608_v13 }
 0x376   :  { %v481_v16 = vpop.f32.mrf.mxu1  ;;  %1171 = vmatmul.mubr.f32.vlgmr.msra.gmra.mxu0 %v1610_v14 }
 0x377   :  { %v1614_v17 = vadd.f32 %v863_v11, %v481_v16  ;;  %v843_v5 = vadd.f32 %v839_v60, %v1616_v18 }
 0x379   :  { %1173 = vmatprep.mubr.f32.mxu0 %v1614_v17  ;;  %v842_v11 = vadd.f32 %v838_v3, %v1614_v17 }
 0x37a   :  { %1174 = vmatmul.mubr.f32.gmra.mxu0 %v1616_v18 }
 0x436   :  { %v1172_v24 = vpop.f32.mrf.mxu0 }
 0x437   :  { %v1635_v25 = vadd.f32 %v1172_v24, %v864_v23 }
 0x438   :  { %v579_v26 = vpop.f32.mrf.mxu0 }
 0x439   :  { %v1637_v27 = vadd.f32 %v864_v23, %v579_v26  ;;  %v599_v30 = vmul.f32 %v1635_v25, %v1635_v25 }
 0x43a   :  { %v1175_v28 = vpop.f32.mrf.mxu0 }
 0x43b   :  { %v598_v29 = vmul.f32 %v1637_v27, %v1637_v27  ;;  %v1643_v31 = vadd.f32 %v1175_v28, %v864_v23 }
 0x43c   :  { %v589_v32 = vpop.f32.mrf.mxu0 }
 0x43d   :  { %v1645_v33 = vadd.f32 %v864_v23, %v589_v32  ;;  %1192 = vmatprep.mubr.msk.f32.mxu1 %vm610_vm1, %v598_v29  ;;  %v601_v37 = vmul.f32 %v1643_v31, %v1643_v31 }
 0x43e   :  { %1193 = vmatmul.mubr.msk.f32.vlgmr.msra.gmra.mxu1 %vm610_vm1, %v599_v30 }
 0x43f   :  { %v600_v35 = vmul.f32 %v1645_v33, %v1645_v33  ;;  %1199 = vmatpush3.msra.mxu1 %v731_v22 }
 0x440   :  { %1200 = vmatprep.subr.mxu1 %v730_v34 }
 0x441   :  { %1201 = vmatpush3.msra.mxu1 %v730_v34  ;;  %1195 = vmatprep.mubr.msk.f32.mxu1 %vm610_vm1, %v600_v35 }
 0x442   :  { %1202 = vmatprep.subr.mxu1 %v729_v36  ;;  %1196 = vmatmul.mubr.msk.f32.gmra.mxu1 %vm610_vm1, %v601_v37 }
 0x443   :  { %1203 = vmatpush3.msra.mxu1 %v729_v36  ;;  %1214 = vmatprep.mubr.msk.f32.mxu1 %vm610_vm1, %v1637_v27 }
 0x444   :  { %1204 = vmatprep.subr.mxu1 %v728_v38 }
 0x445   :  { %1205 = vmatpush3.msra.mxu1 %v728_v38 }
 0x446   :  { %1206 = vmatprep.subr.mxu1 %v727_v39 }
 0x447   :  { %1207 = vmatpush3.msra.mxu1 %v727_v39 }
 0x448   :  { %1208 = vmatprep.subr.mxu1 %v726_v40 }
 0x449   :  { %1209 = vmatpush3.msra.mxu1 %v726_v40 }
 0x44a   :  { %1210 = vmatprep.subr.mxu1 %v725_v41 }
 0x44b   :  { %1211 = vmatpush3.msra.mxu1 %v725_v41 }
 0x44c   :  { %1212 = vmatprep.subr.mxu1 %v724_v42 }
 0x44d   :  { %1213 = vmatpush3.msra.mxu1 %v724_v42 }
 0x44e   :  { %1215 = vmatmul.mubr.msk.f32.vlgmr.msra.gmra.mxu1 %vm610_vm1, %v1635_v25 }
 0x44f   :  { %1217 = vmatprep.mubr.msk.f32.mxu1 %vm610_vm1, %v1645_v33 }
 0x452   :  { %1218 = vmatmul.mubr.msk.f32.gmra.mxu1 %vm610_vm1, %v1643_v31 }
 0x4fe   :  { %v1194_v43 = vpop.f32.mrf.mxu1 }
 0x4ff   :  { %v709_v44 = vmax.f32 %v1194_v43, 1e-24 }
 0x500   :  { %v689_v45 = vpop.f32.mrf.mxu1 }
 0x501   :  { %1224 = vrsqrt.f32 %v709_v44  ;;  %v708_v46 = vmax.f32 %v689_v45, 1e-24 }
 0x502   :  { %v1197_v47 = vpop.f32.mrf.mxu1 }
 0x503   :  { %1226 = vrsqrt.f32 %v708_v46  ;;  %v711_v48 = vmax.f32 %v1197_v47, 1e-24 }
 0x504   :  { %v699_v49 = vpop.f32.mrf.mxu1 }
 0x505   :  { %1228 = vrsqrt.f32 %v711_v48  ;;  %v710_v50 = vmax.f32 %v699_v49, 1e-24 }
 0x507   :  { %1230 = vrsqrt.f32 %v710_v50 }
 0x50e   :  { %v1225_v53 = vpop.eup %1224  ;;  %v1216_v55 = vpop.f32.mrf.mxu1 }
 0x50f   :  { %v717_v57 = vmul.f32 %v1225_v53, %v1635_v25  ;;  %v823_v58 = vadd.f32 %v1216_v55, %v869_v52 }
 0x510   :  { %v1227_v59 = vpop.eup %1226  ;;  %v817_v61 = vpop.f32.mrf.mxu1 }
 0x511   :  { %721 = vst.msk [vmem:[%s1749_s14 + $0x8] sm:$0xff] %vm610_vm1, %v717_v57  ;;  %v716_v63 = vmul.f32 %v1227_v59, %v1637_v27  ;;  %v845_v0 = vadd.f32 %v841_v56, %v823_v58  ;;  %v818_v1 = vadd.f32 %v869_v52, %v817_v61 }
 0x512   :  { %v1229_v2 = vpop.eup %1228  ;;  %v1219_v4 = vpop.f32.mrf.mxu1 }
 0x513   :  { %720 = vst.msk [vmem:[%s1749_s14] sm:$0xff] %vm610_vm1, %v716_v63  ;;  %v719_v6 = vmul.f32 %v1229_v2, %v1643_v31  ;;  %849 = vst [vmem:[%s1750_s15 + $0x8] sm:$0xff] %v845_v0  ;;  %v844_v7 = vadd.f32 %v840_v62, %v818_v1  ;;  %v833_v8 = vadd.f32 %v1219_v4, %v869_v52 }
 0x514   :  { %v1231_v9 = vpop.eup %1230  ;;  %v827_v10 = vpop.f32.mrf.mxu1 }
 0x515   :  { %723 = vst.msk [vmem:[%s1749_s14 + $0x18] sm:$0xff] %vm610_vm1, %v719_v6  ;;  %v718_v12 = vmul.f32 %v1231_v9, %v1645_v33  ;;  %848 = vst [vmem:[%s1750_s15] sm:$0xff] %v844_v7  ;;  %v847_v13 = vadd.f32 %v843_v5, %v833_v8  ;;  %v828_v14 = vadd.f32 %v869_v52, %v827_v10 }
 0x517   :  { %722 = vst.msk [vmem:[%s1749_s14 + $0x10] sm:$0xff] %vm610_vm1, %v718_v12  ;;  %851 = vst [vmem:[%s1750_s15 + $0x18] sm:$0xff] %v847_v13  ;;  %v846_v15 = vadd.f32 %v842_v11, %v828_v14 }
 0x519   :  { %850 = vst [vmem:[%s1750_s15 + $0x10] sm:$0xff] %v846_v15 }

</bundles_post_ra>
